<compile_context>
chip_gen: v7x
topology: tpu7x:2x2x1
jax: 0.10.0
libtpu: 0.0.40
codegen_flags: <defaults>
</compile_context>

<pallas_src>
import functools

import jax
import jax.numpy as jnp
from jax import lax
from jax.experimental import pallas as pl
from jax.experimental.pallas import tpu as pltpu


def _fused_conv_kernel(x_ref, w1_ref, b1_ref, w2_ref, b2_ref, o_ref,
                       xp_ref, c1p_ref, *, rb):
    """Fused conv1(3x3, pad=1) -> conv2(3x3, pad=1) for one batch element.

    x_ref  : (1, H, W, Cin)   bf16 NHWC input tile
    w1_ref : (9*Cin, C1)      bf16 folded conv1 weight (tap-major contraction)
    b1_ref : (1, C1)          f32
    w2_ref : (9*C1, Cout)     bf16 folded conv2 weight
    b2_ref : (1, Cout)        f32
    o_ref  : (1, H*W, Cout)   f32 lane-dense output
    xp_ref : (H+2, W+2, Cin)  bf16 VMEM scratch: zero-padded input
    c1p_ref: (H+2, W+2, C1)   bf16 VMEM scratch: zero-padded conv1 output
    rb     : static row-block size (divides H)
    """
    H, W, Cin = x_ref.shape[1], x_ref.shape[2], x_ref.shape[3]
    C1 = w1_ref.shape[1]
    n_blocks = H // rb
    unroll = n_blocks <= 8

    # In-kernel halo. Only the 1-px border actually needs the zeros (interiors are overwritten
    # below), but a full VMEM zero-fill is cheap and correct on multi-core parts where each
    # core owns a private scratch (so no once-per-grid init is relied upon).
    xp_ref[...] = jnp.zeros_like(xp_ref)
    c1p_ref[...] = jnp.zeros_like(c1p_ref)
    xp_ref[pl.ds(1, H), pl.ds(1, W), :] = x_ref[0]

    def conv_rows(src_ref, w_ref, b_ref, cin, r0, rows):
        # im2col for `rows` output rows starting at r0 -> (rows*W, 9*cin), then ONE MXU matmul.
        pieces = []
        for k in range(9):
            dh, dw = k // 3, k % 3
            p = src_ref[pl.ds(r0 + dh, rows), pl.ds(dw, W), :]
            pieces.append(p.reshape(rows * W, cin))
        col = jnp.concatenate(pieces, axis=-1)                  # (rows*W, 9*cin) bf16
        return jnp.dot(col, w_ref[...],
                       preferred_element_type=jnp.float32) + b_ref[...]

    # ---- layer 1: xp -> interior of c1p (kept in bf16 in VMEM; never touches HBM) ----
    def l1_body(j, carry):
        r0 = pl.multiple_of(j * rb, rb)
        y = conv_rows(xp_ref, w1_ref, b1_ref, Cin, r0, rb)      # (rb*W, C1) f32
        c1p_ref[pl.ds(r0 + 1, rb), pl.ds(1, W), :] = (
            y.reshape(rb, W, C1).astype(c1p_ref.dtype))
        return carry

    lax.fori_loop(0, n_blocks, l1_body, 0, unroll=unroll)

    # ---- layer 2: c1p -> lane-dense output ----
    def l2_body(j, carry):
        r0 = pl.multiple_of(j * rb, rb)
        y = conv_rows(c1p_ref, w2_ref, b2_ref, C1, r0, rb)      # (rb*W, Cout) f32
        m0 = pl.multiple_of(j * (rb * W), rb * W)
        o_ref[0, pl.ds(m0, rb * W), :] = y.astype(o_ref.dtype)
        return carry

    lax.fori_loop(0, n_blocks, l2_body, 0, unroll=unroll)


def _fold_weight(w_oihw):
    """(Cout, Cin, 3, 3) PyTorch conv weight -> (9*Cin, Cout), tap-major contraction layout.

    Folded so that col[:, (dh*3+dw)*Cin + ci] pairs with W_fold[(dh*3+dw)*Cin + ci, co],
    i.e. standard cross-correlation with padding=1 (matches nn.Conv2d).
    """
    cout, cin = w_oihw.shape[0], w_oihw.shape[1]
    return jnp.transpose(w_oihw, (2, 3, 1, 0)).reshape(9 * cin, cout)


def _pick_row_block(H, W, max_m=128):
    """Largest row block rb dividing H with rb*W <= max_m (bounds live M per matmul)."""
    rb = 1
    for cand in range(1, H + 1):
        if H % cand == 0 and cand * W <= max_m:
            rb = cand
    return rb


def conv_feature_fused(x_nchw, w1f, b1, w2f, b2):
    """Fused two-layer 3x3 conv. x_nchw (N, Cin, H, W); returns (N, Cout, H, W) f32."""
    N, Cin, H, W = x_nchw.shape
    C1 = w1f.shape[1]
    Cout = w2f.shape[1]

    # NCHW -> NHWC (channels on lanes), bf16 for the MXU; f32 accumulate inside the kernel.
    x = jnp.transpose(x_nchw, (0, 2, 3, 1)).astype(jnp.bfloat16)
    b1r = b1.reshape(1, C1).astype(jnp.float32)
    b2r = b2.reshape(1, Cout).astype(jnp.float32)

    rb = _pick_row_block(H, W)
    kernel = functools.partial(_fused_conv_kernel, rb=rb)

    flops = 2 * N * H * W * 9 * (Cin * C1 + C1 * Cout)
    bytes_accessed = (x.size * 2 + w1f.size * 2 + w2f.size * 2
                      + (C1 + Cout) * 4 + N * H * W * Cout * 4)

    out = pl.pallas_call(
        kernel,
        out_shape=jax.ShapeDtypeStruct((N, H * W, Cout), jnp.float32),
        grid=(N,),
        in_specs=[
            pl.BlockSpec((1, H, W, Cin), lambda n: (n, 0, 0, 0)),
            pl.BlockSpec((9 * Cin, C1), lambda n: (0, 0)),
            pl.BlockSpec((1, C1), lambda n: (0, 0)),
            pl.BlockSpec((9 * C1, Cout), lambda n: (0, 0)),
            pl.BlockSpec((1, Cout), lambda n: (0, 0)),
        ],
        out_specs=pl.BlockSpec((1, H * W, Cout), lambda n: (n, 0, 0)),
        scratch_shapes=[
            pltpu.VMEM((H + 2, W + 2, Cin), jnp.bfloat16),   # padded input
            pltpu.VMEM((H + 2, W + 2, C1), jnp.bfloat16),    # padded conv1 output
        ],
        compiler_params=pltpu.CompilerParams(
            dimension_semantics=("parallel",)),
        cost_estimate=pl.CostEstimate(flops=flops, transcendentals=0,
                                      bytes_accessed=bytes_accessed),
    )(x, w1f, b1r, w2f, b2r)

    # Lane-dense (N, H*W, Cout) -> NCHW to match the PyTorch module's output layout.
    return jnp.transpose(out.reshape(N, H, W, Cout), (0, 3, 1, 2))


class ConvolutionFeaturePallas:
    """JAX/Pallas port of PyTorch ConvolutionFeature (conv1 -> conv2, no activation)."""

    def __init__(self, num_features, emb_dim=256, key=None):
        if key is None:
            key = jax.random.PRNGKey(0)
        k1, k2, k3, k4 = jax.random.split(key, 4)
        self.num_features = num_features
        self.emb_dim = emb_dim

        def uinit(k, shape, fan_in):
            bound = 1.0 / jnp.sqrt(jnp.float32(fan_in))
            return jax.random.uniform(k, shape, jnp.float32, -bound, bound)

        fan1 = num_features * 9
        self.w1 = uinit(k1, (64, num_features, 3, 3), fan1)        # conv1.weight
        self.b1 = uinit(k2, (64,), fan1)                           # conv1.bias
        fan2 = 64 * 9
        self.w2 = uinit(k3, (emb_dim, 64, 3, 3), fan2)             # conv2.weight
        self.b2 = uinit(k4, (emb_dim,), fan2)                      # conv2.bias

        # Pre-folded bf16 weights for the fused kernel (K = 9*Cin, tap-major).
        self._w1f = _fold_weight(self.w1).astype(jnp.bfloat16)     # (9*Cin, 64)
        self._w2f = _fold_weight(self.w2).astype(jnp.bfloat16)     # (9*64, emb_dim)

    @functools.partial(jax.jit, static_argnums=0)
    def __call__(self, x_nchw):
        return conv_feature_fused(x_nchw, self._w1f, self.b1, self._w2f, self.b2)


def _reference_forward(mod, x_nchw):
    """Pure-JAX (XLA conv, f32) reference for correctness checking."""
    dn = lax.conv_dimension_numbers(x_nchw.shape, mod.w1.shape, ("NCHW", "OIHW", "NCHW"))
    c1 = lax.conv_general_dilated(x_nchw, mod.w1, (1, 1), "SAME", dimension_numbers=dn)
    c1 = c1 + mod.b1[None, :, None, None]
    dn2 = lax.conv_dimension_numbers(c1.shape, mod.w2.shape, ("NCHW", "OIHW", "NCHW"))
    c2 = lax.conv_general_dilated(c1, mod.w2, (1, 1), "SAME", dimension_numbers=dn2)
    return c2 + mod.b2[None, :, None, None]


if __name__ == "__main__":
    key = jax.random.PRNGKey(0)
    kx, kp = jax.random.split(key)

    # Small shapes consistent with the module: batch=2, num_features=4, 16x16 images.
    # emb_dim=128 keeps the test small while keeping output-channel stores lane-dense.
    N, C, H, W = 2, 4, 16, 16
    EMB = 128
    x = jax.random.normal(kx, (N, C, H, W), jnp.float32)

    module = ConvolutionFeaturePallas(num_features=C, emb_dim=EMB, key=kp)

    out = jax.block_until_ready(module(x))
    assert out.shape == (N, EMB, H, W), out.shape

    ref = jax.block_until_ready(_reference_forward(module, x))
    # bf16 activations/weights on the MXU path (f32 accumulate) -> deliberately loose tolerance.
    if not jnp.allclose(out, ref, rtol=2e-2, atol=2e-2):
        max_err = float(jnp.max(jnp.abs(out - ref)))
        raise AssertionError(
            f"Pallas conv output mismatch vs XLA reference (max abs err {max_err})")

    print("KERNEL_OK")
</pallas_src>

<mosaic_0001>
module attributes {stable_mosaic.version = 11 : i64} {
  func.func @_fused_conv_kernel(%arg0: i32, %arg1: memref<1x16x16x4xbf16, #tpu.memory_space<vmem>>, %arg2: memref<36x64xbf16, #tpu.memory_space<vmem>>, %arg3: memref<1x64xf32, #tpu.memory_space<vmem>>, %arg4: memref<576x128xbf16, #tpu.memory_space<vmem>>, %arg5: memref<1x128xf32, #tpu.memory_space<vmem>>, %arg6: memref<1x256x128xf32, #tpu.memory_space<vmem>>, %arg7: memref<18x18x4xbf16, #tpu.memory_space<vmem>>, %arg8: memref<18x18x64xbf16, #tpu.memory_space<vmem>>) attributes {dimension_semantics = [#tpu.dimension_semantics<parallel>], iteration_bounds = array<i64: 2>, scalar_prefetch = 0 : i64, scratch_operands = 2 : i64, tpu.core_type = #tpu.core_type<tc>, window_params = [{transform_indices = @transform_0, window_bounds = array<i64: 1, 16, 16, 4>}, {pipeline_mode = #tpu.pipeline_mode<synchronous>, transform_indices = @transform_1, window_bounds = array<i64: 36, 64>}, {pipeline_mode = #tpu.pipeline_mode<synchronous>, transform_indices = @transform_2, window_bounds = array<i64: 1, 64>}, {pipeline_mode = #tpu.pipeline_mode<synchronous>, transform_indices = @transform_3, window_bounds = array<i64: 576, 128>}, {pipeline_mode = #tpu.pipeline_mode<synchronous>, transform_indices = @transform_4, window_bounds = array<i64: 1, 128>}, {transform_indices = @transform_5, window_bounds = array<i64: 1, 256, 128>}]} {
    %cst = arith.constant 0.000000e+00 : bf16
    %0 = vector.broadcast %cst : bf16 to vector<18x18x4xbf16>
    %c0 = arith.constant 0 : index
    %c0_0 = arith.constant 0 : index
    %c0_1 = arith.constant 0 : index
    %1 = vector.load %arg7[%c0, %c0_0, %c0_1] : memref<18x18x4xbf16, #tpu.memory_space<vmem>>, vector<18x18x4xbf16>
    tpu.vector_store %arg7[%c0, %c0_0, %c0_1], %0 {strides = array<i32>} : memref<18x18x4xbf16, #tpu.memory_space<vmem>>, vector<18x18x4xbf16>,
    %cst_2 = arith.constant 0.000000e+00 : bf16
    %2 = vector.broadcast %cst_2 : bf16 to vector<18x18x64xbf16>
    %c0_3 = arith.constant 0 : index
    %c0_4 = arith.constant 0 : index
    %c0_5 = arith.constant 0 : index
    %3 = vector.load %arg8[%c0_3, %c0_4, %c0_5] : memref<18x18x64xbf16, #tpu.memory_space<vmem>>, vector<18x18x64xbf16>
    tpu.vector_store %arg8[%c0_3, %c0_4, %c0_5], %2 {strides = array<i32>} : memref<18x18x64xbf16, #tpu.memory_space<vmem>>, vector<18x18x64xbf16>,
    %c0_6 = arith.constant 0 : index
    %c0_7 = arith.constant 0 : index
    %c0_8 = arith.constant 0 : index
    %c0_9 = arith.constant 0 : index
    %4 = vector.load %arg1[%c0_6, %c0_7, %c0_8, %c0_9] : memref<1x16x16x4xbf16, #tpu.memory_space<vmem>>, vector<1x16x16x4xbf16>
    %5 = vector.shape_cast %4 : vector<1x16x16x4xbf16> to vector<16x16x4xbf16>
    %c1 = arith.constant 1 : index
    %c1_10 = arith.constant 1 : index
    %c0_11 = arith.constant 0 : index
    %6 = vector.load %arg7[%c1, %c1_10, %c0_11] : memref<18x18x4xbf16, #tpu.memory_space<vmem>>, vector<16x16x4xbf16>
    tpu.vector_store %arg7[%c1, %c1_10, %c0_11], %5 {strides = array<i32>} : memref<18x18x4xbf16, #tpu.memory_space<vmem>>, vector<16x16x4xbf16>,
    %c0_i32 = arith.constant 0 : i32
    %c8_i32 = arith.constant 8 : i32
    %7 = arith.muli %c0_i32, %c8_i32 : i32
    %8 = tpu.assume_multiple %7, 8 : i32
    %c0_i32_12 = arith.constant 0 : i32
    %9 = arith.addi %8, %c0_i32_12 : i32
    %10 = arith.index_cast %9 : i32 to index
    %c0_13 = arith.constant 0 : index
    %c0_14 = arith.constant 0 : index
    %11 = vector.load %arg7[%10, %c0_13, %c0_14] : memref<18x18x4xbf16, #tpu.memory_space<vmem>>, vector<8x16x4xbf16>
    %12 = vector.shape_cast %11 : vector<8x16x4xbf16> to vector<128x4xbf16>
    %c0_i32_15 = arith.constant 0 : i32
    %13 = arith.addi %8, %c0_i32_15 : i32
    %14 = arith.index_cast %13 : i32 to index
    %c1_16 = arith.constant 1 : index
    %c0_17 = arith.constant 0 : index
    %15 = vector.load %arg7[%14, %c1_16, %c0_17] : memref<18x18x4xbf16, #tpu.memory_space<vmem>>, vector<8x16x4xbf16>
    %16 = vector.shape_cast %15 : vector<8x16x4xbf16> to vector<128x4xbf16>
    %c0_i32_18 = arith.constant 0 : i32
    %17 = arith.addi %8, %c0_i32_18 : i32
    %18 = arith.index_cast %17 : i32 to index
    %c2 = arith.constant 2 : index
    %c0_19 = arith.constant 0 : index
    %19 = vector.load %arg7[%18, %c2, %c0_19] : memref<18x18x4xbf16, #tpu.memory_space<vmem>>, vector<8x16x4xbf16>
    %20 = vector.shape_cast %19 : vector<8x16x4xbf16> to vector<128x4xbf16>
    %c1_i32 = arith.constant 1 : i32
    %21 = arith.addi %8, %c1_i32 : i32
    %22 = arith.index_cast %21 : i32 to index
    %c0_20 = arith.constant 0 : index
    %c0_21 = arith.constant 0 : index
    %23 = vector.load %arg7[%22, %c0_20, %c0_21] : memref<18x18x4xbf16, #tpu.memory_space<vmem>>, vector<8x16x4xbf16>
    %24 = vector.shape_cast %23 : vector<8x16x4xbf16> to vector<128x4xbf16>
    %c1_i32_22 = arith.constant 1 : i32
    %25 = arith.addi %8, %c1_i32_22 : i32
    %26 = arith.index_cast %25 : i32 to index
    %c1_23 = arith.constant 1 : index
    %c0_24 = arith.constant 0 : index
    %27 = vector.load %arg7[%26, %c1_23, %c0_24] : memref<18x18x4xbf16, #tpu.memory_space<vmem>>, vector<8x16x4xbf16>
    %28 = vector.shape_cast %27 : vector<8x16x4xbf16> to vector<128x4xbf16>
    %c1_i32_25 = arith.constant 1 : i32
    %29 = arith.addi %8, %c1_i32_25 : i32
    %30 = arith.index_cast %29 : i32 to index
    %c2_26 = arith.constant 2 : index
    %c0_27 = arith.constant 0 : index
    %31 = vector.load %arg7[%30, %c2_26, %c0_27] : memref<18x18x4xbf16, #tpu.memory_space<vmem>>, vector<8x16x4xbf16>
    %32 = vector.shape_cast %31 : vector<8x16x4xbf16> to vector<128x4xbf16>
    %c2_i32 = arith.constant 2 : i32
    %33 = arith.addi %8, %c2_i32 : i32
    %34 = arith.index_cast %33 : i32 to index
    %c0_28 = arith.constant 0 : index
    %c0_29 = arith.constant 0 : index
    %35 = vector.load %arg7[%34, %c0_28, %c0_29] : memref<18x18x4xbf16, #tpu.memory_space<vmem>>, vector<8x16x4xbf16>
    %36 = vector.shape_cast %35 : vector<8x16x4xbf16> to vector<128x4xbf16>
    %c2_i32_30 = arith.constant 2 : i32
    %37 = arith.addi %8, %c2_i32_30 : i32
    %38 = arith.index_cast %37 : i32 to index
    %c1_31 = arith.constant 1 : index
    %c0_32 = arith.constant 0 : index
    %39 = vector.load %arg7[%38, %c1_31, %c0_32] : memref<18x18x4xbf16, #tpu.memory_space<vmem>>, vector<8x16x4xbf16>
    %40 = vector.shape_cast %39 : vector<8x16x4xbf16> to vector<128x4xbf16>
    %c2_i32_33 = arith.constant 2 : i32
    %41 = arith.addi %8, %c2_i32_33 : i32
    %42 = arith.index_cast %41 : i32 to index
    %c2_34 = arith.constant 2 : index
    %c0_35 = arith.constant 0 : index
    %43 = vector.load %arg7[%42, %c2_34, %c0_35] : memref<18x18x4xbf16, #tpu.memory_space<vmem>>, vector<8x16x4xbf16>
    %44 = vector.shape_cast %43 : vector<8x16x4xbf16> to vector<128x4xbf16>
    %45 = tpu.concatenate %12, %16, %20, %24, %28, %32, %36, %40, %44 in 1 : vector<128x4xbf16>, vector<128x4xbf16>, vector<128x4xbf16>, vector<128x4xbf16>, vector<128x4xbf16>, vector<128x4xbf16>, vector<128x4xbf16>, vector<128x4xbf16>, vector<128x4xbf16> -> vector<128x36xbf16>
    %c0_36 = arith.constant 0 : index
    %c0_37 = arith.constant 0 : index
    %46 = vector.load %arg2[%c0_36, %c0_37] : memref<36x64xbf16, #tpu.memory_space<vmem>>, vector<36x64xbf16>
    %cst_38 = arith.constant dense<0.000000e+00> : vector<128x64xf32>
    %47 = tpu.matmul %45, %46, %cst_38 {dimension_numbers = #tpu.dot_dimension_numbers<[1], [0], [0], [1], [0, 0, 1, 1], [], []>} : vector<128x36xbf16>, vector<36x64xbf16>, vector<128x64xf32> -> vector<128x64xf32>
    %c0_39 = arith.constant 0 : index
    %c0_40 = arith.constant 0 : index
    %48 = vector.load %arg3[%c0_39, %c0_40] : memref<1x64xf32, #tpu.memory_space<vmem>>, vector<1x64xf32>
    %49 = vector.broadcast %48 : vector<1x64xf32> to vector<128x64xf32>
    %50 = arith.addf %47, %49 : vector<128x64xf32>
    %51 = vector.shape_cast %50 : vector<128x64xf32> to vector<8x16x64xf32>
    %52 = arith.truncf %51 : vector<8x16x64xf32> to vector<8x16x64xbf16>
    %c1_i32_41 = arith.constant 1 : i32
    %53 = arith.addi %8, %c1_i32_41 : i32
    %54 = arith.index_cast %53 : i32 to index
    %c1_42 = arith.constant 1 : index
    %c0_43 = arith.constant 0 : index
    %55 = vector.load %arg8[%54, %c1_42, %c0_43] : memref<18x18x64xbf16, #tpu.memory_space<vmem>>, vector<8x16x64xbf16>
    tpu.vector_store %arg8[%54, %c1_42, %c0_43], %52 {strides = array<i32>} : memref<18x18x64xbf16, #tpu.memory_space<vmem>>, vector<8x16x64xbf16>,
    %c1_i32_44 = arith.constant 1 : i32
    %c8_i32_45 = arith.constant 8 : i32
    %56 = arith.muli %c1_i32_44, %c8_i32_45 : i32
    %57 = tpu.assume_multiple %56, 8 : i32
    %c0_i32_46 = arith.constant 0 : i32
    %58 = arith.addi %57, %c0_i32_46 : i32
    %59 = arith.index_cast %58 : i32 to index
    %c0_47 = arith.constant 0 : index
    %c0_48 = arith.constant 0 : index
    %60 = vector.load %arg7[%59, %c0_47, %c0_48] : memref<18x18x4xbf16, #tpu.memory_space<vmem>>, vector<8x16x4xbf16>
    %61 = vector.shape_cast %60 : vector<8x16x4xbf16> to vector<128x4xbf16>
    %c0_i32_49 = arith.constant 0 : i32
    %62 = arith.addi %57, %c0_i32_49 : i32
    %63 = arith.index_cast %62 : i32 to index
    %c1_50 = arith.constant 1 : index
    %c0_51 = arith.constant 0 : index
    %64 = vector.load %arg7[%63, %c1_50, %c0_51] : memref<18x18x4xbf16, #tpu.memory_space<vmem>>, vector<8x16x4xbf16>
    %65 = vector.shape_cast %64 : vector<8x16x4xbf16> to vector<128x4xbf16>
    %c0_i32_52 = arith.constant 0 : i32
    %66 = arith.addi %57, %c0_i32_52 : i32
    %67 = arith.index_cast %66 : i32 to index
    %c2_53 = arith.constant 2 : index
    %c0_54 = arith.constant 0 : index
    %68 = vector.load %arg7[%67, %c2_53, %c0_54] : memref<18x18x4xbf16, #tpu.memory_space<vmem>>, vector<8x16x4xbf16>
    %69 = vector.shape_cast %68 : vector<8x16x4xbf16> to vector<128x4xbf16>
    %c1_i32_55 = arith.constant 1 : i32
    %70 = arith.addi %57, %c1_i32_55 : i32
    %71 = arith.index_cast %70 : i32 to index
    %c0_56 = arith.constant 0 : index
    %c0_57 = arith.constant 0 : index
    %72 = vector.load %arg7[%71, %c0_56, %c0_57] : memref<18x18x4xbf16, #tpu.memory_space<vmem>>, vector<8x16x4xbf16>
    %73 = vector.shape_cast %72 : vector<8x16x4xbf16> to vector<128x4xbf16>
    %c1_i32_58 = arith.constant 1 : i32
    %74 = arith.addi %57, %c1_i32_58 : i32
    %75 = arith.index_cast %74 : i32 to index
    %c1_59 = arith.constant 1 : index
    %c0_60 = arith.constant 0 : index
    %76 = vector.load %arg7[%75, %c1_59, %c0_60] : memref<18x18x4xbf16, #tpu.memory_space<vmem>>, vector<8x16x4xbf16>
    %77 = vector.shape_cast %76 : vector<8x16x4xbf16> to vector<128x4xbf16>
    %c1_i32_61 = arith.constant 1 : i32
    %78 = arith.addi %57, %c1_i32_61 : i32
    %79 = arith.index_cast %78 : i32 to index
    %c2_62 = arith.constant 2 : index
    %c0_63 = arith.constant 0 : index
    %80 = vector.load %arg7[%79, %c2_62, %c0_63] : memref<18x18x4xbf16, #tpu.memory_space<vmem>>, vector<8x16x4xbf16>
    %81 = vector.shape_cast %80 : vector<8x16x4xbf16> to vector<128x4xbf16>
    %c2_i32_64 = arith.constant 2 : i32
    %82 = arith.addi %57, %c2_i32_64 : i32
    %83 = arith.index_cast %82 : i32 to index
    %c0_65 = arith.constant 0 : index
    %c0_66 = arith.constant 0 : index
    %84 = vector.load %arg7[%83, %c0_65, %c0_66] : memref<18x18x4xbf16, #tpu.memory_space<vmem>>, vector<8x16x4xbf16>
    %85 = vector.shape_cast %84 : vector<8x16x4xbf16> to vector<128x4xbf16>
    %c2_i32_67 = arith.constant 2 : i32
    %86 = arith.addi %57, %c2_i32_67 : i32
    %87 = arith.index_cast %86 : i32 to index
    %c1_68 = arith.constant 1 : index
    %c0_69 = arith.constant 0 : index
    %88 = vector.load %arg7[%87, %c1_68, %c0_69] : memref<18x18x4xbf16, #tpu.memory_space<vmem>>, vector<8x16x4xbf16>
    %89 = vector.shape_cast %88 : vector<8x16x4xbf16> to vector<128x4xbf16>
    %c2_i32_70 = arith.constant 2 : i32
    %90 = arith.addi %57, %c2_i32_70 : i32
    %91 = arith.index_cast %90 : i32 to index
    %c2_71 = arith.constant 2 : index
    %c0_72 = arith.constant 0 : index
    %92 = vector.load %arg7[%91, %c2_71, %c0_72] : memref<18x18x4xbf16, #tpu.memory_space<vmem>>, vector<8x16x4xbf16>
    %93 = vector.shape_cast %92 : vector<8x16x4xbf16> to vector<128x4xbf16>
    %94 = tpu.concatenate %61, %65, %69, %73, %77, %81, %85, %89, %93 in 1 : vector<128x4xbf16>, vector<128x4xbf16>, vector<128x4xbf16>, vector<128x4xbf16>, vector<128x4xbf16>, vector<128x4xbf16>, vector<128x4xbf16>, vector<128x4xbf16>, vector<128x4xbf16> -> vector<128x36xbf16>
    %c0_73 = arith.constant 0 : index
    %c0_74 = arith.constant 0 : index
    %95 = vector.load %arg2[%c0_73, %c0_74] : memref<36x64xbf16, #tpu.memory_space<vmem>>, vector<36x64xbf16>
    %cst_75 = arith.constant dense<0.000000e+00> : vector<128x64xf32>
    %96 = tpu.matmul %94, %95, %cst_75 {dimension_numbers = #tpu.dot_dimension_numbers<[1], [0], [0], [1], [0, 0, 1, 1], [], []>} : vector<128x36xbf16>, vector<36x64xbf16>, vector<128x64xf32> -> vector<128x64xf32>
    %c0_76 = arith.constant 0 : index
    %c0_77 = arith.constant 0 : index
    %97 = vector.load %arg3[%c0_76, %c0_77] : memref<1x64xf32, #tpu.memory_space<vmem>>, vector<1x64xf32>
    %98 = vector.broadcast %97 : vector<1x64xf32> to vector<128x64xf32>
    %99 = arith.addf %96, %98 : vector<128x64xf32>
    %100 = vector.shape_cast %99 : vector<128x64xf32> to vector<8x16x64xf32>
    %101 = arith.truncf %100 : vector<8x16x64xf32> to vector<8x16x64xbf16>
    %c1_i32_78 = arith.constant 1 : i32
    %102 = arith.addi %57, %c1_i32_78 : i32
    %103 = arith.index_cast %102 : i32 to index
    %c1_79 = arith.constant 1 : index
    %c0_80 = arith.constant 0 : index
    %104 = vector.load %arg8[%103, %c1_79, %c0_80] : memref<18x18x64xbf16, #tpu.memory_space<vmem>>, vector<8x16x64xbf16>
    tpu.vector_store %arg8[%103, %c1_79, %c0_80], %101 {strides = array<i32>} : memref<18x18x64xbf16, #tpu.memory_space<vmem>>, vector<8x16x64xbf16>,
    %c2_i32_81 = arith.constant 2 : i32
    %c0_i32_82 = arith.constant 0 : i32
    %c8_i32_83 = arith.constant 8 : i32
    %105 = arith.muli %c0_i32_82, %c8_i32_83 : i32
    %106 = tpu.assume_multiple %105, 8 : i32
    %c0_i32_84 = arith.constant 0 : i32
    %107 = arith.addi %106, %c0_i32_84 : i32
    %108 = arith.index_cast %107 : i32 to index
    %c0_85 = arith.constant 0 : index
    %c0_86 = arith.constant 0 : index
    %109 = vector.load %arg8[%108, %c0_85, %c0_86] : memref<18x18x64xbf16, #tpu.memory_space<vmem>>, vector<8x16x64xbf16>
    %110 = vector.shape_cast %109 : vector<8x16x64xbf16> to vector<128x64xbf16>
    %c0_i32_87 = arith.constant 0 : i32
    %111 = arith.addi %106, %c0_i32_87 : i32
    %112 = arith.index_cast %111 : i32 to index
    %c1_88 = arith.constant 1 : index
    %c0_89 = arith.constant 0 : index
    %113 = vector.load %arg8[%112, %c1_88, %c0_89] : memref<18x18x64xbf16, #tpu.memory_space<vmem>>, vector<8x16x64xbf16>
    %114 = vector.shape_cast %113 : vector<8x16x64xbf16> to vector<128x64xbf16>
    %c0_i32_90 = arith.constant 0 : i32
    %115 = arith.addi %106, %c0_i32_90 : i32
    %116 = arith.index_cast %115 : i32 to index
    %c2_91 = arith.constant 2 : index
    %c0_92 = arith.constant 0 : index
    %117 = vector.load %arg8[%116, %c2_91, %c0_92] : memref<18x18x64xbf16, #tpu.memory_space<vmem>>, vector<8x16x64xbf16>
    %118 = vector.shape_cast %117 : vector<8x16x64xbf16> to vector<128x64xbf16>
    %c1_i32_93 = arith.constant 1 : i32
    %119 = arith.addi %106, %c1_i32_93 : i32
    %120 = arith.index_cast %119 : i32 to index
    %c0_94 = arith.constant 0 : index
    %c0_95 = arith.constant 0 : index
    %121 = vector.load %arg8[%120, %c0_94, %c0_95] : memref<18x18x64xbf16, #tpu.memory_space<vmem>>, vector<8x16x64xbf16>
    %122 = vector.shape_cast %121 : vector<8x16x64xbf16> to vector<128x64xbf16>
    %c1_i32_96 = arith.constant 1 : i32
    %123 = arith.addi %106, %c1_i32_96 : i32
    %124 = arith.index_cast %123 : i32 to index
    %c1_97 = arith.constant 1 : index
    %c0_98 = arith.constant 0 : index
    %125 = vector.load %arg8[%124, %c1_97, %c0_98] : memref<18x18x64xbf16, #tpu.memory_space<vmem>>, vector<8x16x64xbf16>
    %126 = vector.shape_cast %125 : vector<8x16x64xbf16> to vector<128x64xbf16>
    %c1_i32_99 = arith.constant 1 : i32
    %127 = arith.addi %106, %c1_i32_99 : i32
    %128 = arith.index_cast %127 : i32 to index
    %c2_100 = arith.constant 2 : index
    %c0_101 = arith.constant 0 : index
    %129 = vector.load %arg8[%128, %c2_100, %c0_101] : memref<18x18x64xbf16, #tpu.memory_space<vmem>>, vector<8x16x64xbf16>
    %130 = vector.shape_cast %129 : vector<8x16x64xbf16> to vector<128x64xbf16>
    %c2_i32_102 = arith.constant 2 : i32
    %131 = arith.addi %106, %c2_i32_102 : i32
    %132 = arith.index_cast %131 : i32 to index
    %c0_103 = arith.constant 0 : index
    %c0_104 = arith.constant 0 : index
    %133 = vector.load %arg8[%132, %c0_103, %c0_104] : memref<18x18x64xbf16, #tpu.memory_space<vmem>>, vector<8x16x64xbf16>
    %134 = vector.shape_cast %133 : vector<8x16x64xbf16> to vector<128x64xbf16>
    %c2_i32_105 = arith.constant 2 : i32
    %135 = arith.addi %106, %c2_i32_105 : i32
    %136 = arith.index_cast %135 : i32 to index
    %c1_106 = arith.constant 1 : index
    %c0_107 = arith.constant 0 : index
    %137 = vector.load %arg8[%136, %c1_106, %c0_107] : memref<18x18x64xbf16, #tpu.memory_space<vmem>>, vector<8x16x64xbf16>
    %138 = vector.shape_cast %137 : vector<8x16x64xbf16> to vector<128x64xbf16>
    %c2_i32_108 = arith.constant 2 : i32
    %139 = arith.addi %106, %c2_i32_108 : i32
    %140 = arith.index_cast %139 : i32 to index
    %c2_109 = arith.constant 2 : index
    %c0_110 = arith.constant 0 : index
    %141 = vector.load %arg8[%140, %c2_109, %c0_110] : memref<18x18x64xbf16, #tpu.memory_space<vmem>>, vector<8x16x64xbf16>
    %142 = vector.shape_cast %141 : vector<8x16x64xbf16> to vector<128x64xbf16>
    %143 = tpu.concatenate %110, %114, %118, %122, %126, %130, %134, %138, %142 in 1 : vector<128x64xbf16>, vector<128x64xbf16>, vector<128x64xbf16>, vector<128x64xbf16>, vector<128x64xbf16>, vector<128x64xbf16>, vector<128x64xbf16>, vector<128x64xbf16>, vector<128x64xbf16> -> vector<128x576xbf16>
    %c0_111 = arith.constant 0 : index
    %c0_112 = arith.constant 0 : index
    %144 = vector.load %arg4[%c0_111, %c0_112] : memref<576x128xbf16, #tpu.memory_space<vmem>>, vector<576x128xbf16>
    %cst_113 = arith.constant dense<0.000000e+00> : vector<128x128xf32>
    %145 = tpu.matmul %143, %144, %cst_113 {dimension_numbers = #tpu.dot_dimension_numbers<[1], [0], [0], [1], [0, 0, 1, 1], [], []>} : vector<128x576xbf16>, vector<576x128xbf16>, vector<128x128xf32> -> vector<128x128xf32>
    %c0_114 = arith.constant 0 : index
    %c0_115 = arith.constant 0 : index
    %146 = vector.load %arg5[%c0_114, %c0_115] : memref<1x128xf32, #tpu.memory_space<vmem>>, vector<1x128xf32>
    %147 = vector.broadcast %146 : vector<1x128xf32> to vector<128x128xf32>
    %148 = arith.addf %145, %147 : vector<128x128xf32>
    %c128_i32 = arith.constant 128 : i32
    %149 = arith.muli %c0_i32_82, %c128_i32 : i32
    %150 = tpu.assume_multiple %149, 128 : i32
    %c0_116 = arith.constant 0 : index
    %151 = arith.index_cast %150 : i32 to index
    %c0_117 = arith.constant 0 : index
    %152 = vector.load %arg6[%c0_116, %151, %c0_117] : memref<1x256x128xf32, #tpu.memory_space<vmem>>, vector<1x128x128xf32>
    %153 = vector.shape_cast %152 : vector<1x128x128xf32> to vector<128x128xf32>
    %154 = vector.shape_cast %148 : vector<128x128xf32> to vector<1x128x128xf32>
    tpu.vector_store %arg6[%c0_116, %151, %c0_117], %154 {strides = array<i32>} : memref<1x256x128xf32, #tpu.memory_space<vmem>>, vector<1x128x128xf32>,
    %c1_i32_118 = arith.constant 1 : i32
    %c8_i32_119 = arith.constant 8 : i32
    %155 = arith.muli %c1_i32_118, %c8_i32_119 : i32
    %156 = tpu.assume_multiple %155, 8 : i32
    %c0_i32_120 = arith.constant 0 : i32
    %157 = arith.addi %156, %c0_i32_120 : i32
    %158 = arith.index_cast %157 : i32 to index
    %c0_121 = arith.constant 0 : index
    %c0_122 = arith.constant 0 : index
    %159 = vector.load %arg8[%158, %c0_121, %c0_122] : memref<18x18x64xbf16, #tpu.memory_space<vmem>>, vector<8x16x64xbf16>
    %160 = vector.shape_cast %159 : vector<8x16x64xbf16> to vector<128x64xbf16>
    %c0_i32_123 = arith.constant 0 : i32
    %161 = arith.addi %156, %c0_i32_123 : i32
    %162 = arith.index_cast %161 : i32 to index
    %c1_124 = arith.constant 1 : index
    %c0_125 = arith.constant 0 : index
    %163 = vector.load %arg8[%162, %c1_124, %c0_125] : memref<18x18x64xbf16, #tpu.memory_space<vmem>>, vector<8x16x64xbf16>
    %164 = vector.shape_cast %163 : vector<8x16x64xbf16> to vector<128x64xbf16>
    %c0_i32_126 = arith.constant 0 : i32
    %165 = arith.addi %156, %c0_i32_126 : i32
    %166 = arith.index_cast %165 : i32 to index
    %c2_127 = arith.constant 2 : index
    %c0_128 = arith.constant 0 : index
    %167 = vector.load %arg8[%166, %c2_127, %c0_128] : memref<18x18x64xbf16, #tpu.memory_space<vmem>>, vector<8x16x64xbf16>
    %168 = vector.shape_cast %167 : vector<8x16x64xbf16> to vector<128x64xbf16>
    %c1_i32_129 = arith.constant 1 : i32
    %169 = arith.addi %156, %c1_i32_129 : i32
    %170 = arith.index_cast %169 : i32 to index
    %c0_130 = arith.constant 0 : index
    %c0_131 = arith.constant 0 : index
    %171 = vector.load %arg8[%170, %c0_130, %c0_131] : memref<18x18x64xbf16, #tpu.memory_space<vmem>>, vector<8x16x64xbf16>
    %172 = vector.shape_cast %171 : vector<8x16x64xbf16> to vector<128x64xbf16>
    %c1_i32_132 = arith.constant 1 : i32
    %173 = arith.addi %156, %c1_i32_132 : i32
    %174 = arith.index_cast %173 : i32 to index
    %c1_133 = arith.constant 1 : index
    %c0_134 = arith.constant 0 : index
    %175 = vector.load %arg8[%174, %c1_133, %c0_134] : memref<18x18x64xbf16, #tpu.memory_space<vmem>>, vector<8x16x64xbf16>
    %176 = vector.shape_cast %175 : vector<8x16x64xbf16> to vector<128x64xbf16>
    %c1_i32_135 = arith.constant 1 : i32
    %177 = arith.addi %156, %c1_i32_135 : i32
    %178 = arith.index_cast %177 : i32 to index
    %c2_136 = arith.constant 2 : index
    %c0_137 = arith.constant 0 : index
    %179 = vector.load %arg8[%178, %c2_136, %c0_137] : memref<18x18x64xbf16, #tpu.memory_space<vmem>>, vector<8x16x64xbf16>
    %180 = vector.shape_cast %179 : vector<8x16x64xbf16> to vector<128x64xbf16>
    %c2_i32_138 = arith.constant 2 : i32
    %181 = arith.addi %156, %c2_i32_138 : i32
    %182 = arith.index_cast %181 : i32 to index
    %c0_139 = arith.constant 0 : index
    %c0_140 = arith.constant 0 : index
    %183 = vector.load %arg8[%182, %c0_139, %c0_140] : memref<18x18x64xbf16, #tpu.memory_space<vmem>>, vector<8x16x64xbf16>
    %184 = vector.shape_cast %183 : vector<8x16x64xbf16> to vector<128x64xbf16>
    %c2_i32_141 = arith.constant 2 : i32
    %185 = arith.addi %156, %c2_i32_141 : i32
    %186 = arith.index_cast %185 : i32 to index
    %c1_142 = arith.constant 1 : index
    %c0_143 = arith.constant 0 : index
    %187 = vector.load %arg8[%186, %c1_142, %c0_143] : memref<18x18x64xbf16, #tpu.memory_space<vmem>>, vector<8x16x64xbf16>
    %188 = vector.shape_cast %187 : vector<8x16x64xbf16> to vector<128x64xbf16>
    %c2_i32_144 = arith.constant 2 : i32
    %189 = arith.addi %156, %c2_i32_144 : i32
    %190 = arith.index_cast %189 : i32 to index
    %c2_145 = arith.constant 2 : index
    %c0_146 = arith.constant 0 : index
    %191 = vector.load %arg8[%190, %c2_145, %c0_146] : memref<18x18x64xbf16, #tpu.memory_space<vmem>>, vector<8x16x64xbf16>
    %192 = vector.shape_cast %191 : vector<8x16x64xbf16> to vector<128x64xbf16>
    %193 = tpu.concatenate %160, %164, %168, %172, %176, %180, %184, %188, %192 in 1 : vector<128x64xbf16>, vector<128x64xbf16>, vector<128x64xbf16>, vector<128x64xbf16>, vector<128x64xbf16>, vector<128x64xbf16>, vector<128x64xbf16>, vector<128x64xbf16>, vector<128x64xbf16> -> vector<128x576xbf16>
    %c0_147 = arith.constant 0 : index
    %c0_148 = arith.constant 0 : index
    %194 = vector.load %arg4[%c0_147, %c0_148] : memref<576x128xbf16, #tpu.memory_space<vmem>>, vector<576x128xbf16>
    %cst_149 = arith.constant dense<0.000000e+00> : vector<128x128xf32>
    %195 = tpu.matmul %193, %194, %cst_149 {dimension_numbers = #tpu.dot_dimension_numbers<[1], [0], [0], [1], [0, 0, 1, 1], [], []>} : vector<128x576xbf16>, vector<576x128xbf16>, vector<128x128xf32> -> vector<128x128xf32>
    %c0_150 = arith.constant 0 : index
    %c0_151 = arith.constant 0 : index
    %196 = vector.load %arg5[%c0_150, %c0_151] : memref<1x128xf32, #tpu.memory_space<vmem>>, vector<1x128xf32>
    %197 = vector.broadcast %196 : vector<1x128xf32> to vector<128x128xf32>
    %198 = arith.addf %195, %197 : vector<128x128xf32>
    %c128_i32_152 = arith.constant 128 : i32
    %199 = arith.muli %c1_i32_118, %c128_i32_152 : i32
    %200 = tpu.assume_multiple %199, 128 : i32
    %c0_153 = arith.constant 0 : index
    %201 = arith.index_cast %200 : i32 to index
    %c0_154 = arith.constant 0 : index
    %202 = vector.load %arg6[%c0_153, %201, %c0_154] : memref<1x256x128xf32, #tpu.memory_space<vmem>>, vector<1x128x128xf32>
    %203 = vector.shape_cast %202 : vector<1x128x128xf32> to vector<128x128xf32>
    %204 = vector.shape_cast %198 : vector<128x128xf32> to vector<1x128x128xf32>
    tpu.vector_store %arg6[%c0_153, %201, %c0_154], %204 {strides = array<i32>} : memref<1x256x128xf32, #tpu.memory_space<vmem>>, vector<1x128x128xf32>,
    %c2_i32_155 = arith.constant 2 : i32
    return
  }
  func.func @transform_0(%arg0: i32) -> (i32, i32, i32, i32) {
    %c0_i32 = arith.constant 0 : i32
    %c0_i32_0 = arith.constant 0 : i32
    %c0_i32_1 = arith.constant 0 : i32
    %c0_i32_2 = arith.constant 0 : i32
    return %arg0, %c0_i32, %c0_i32_0, %c0_i32_1 : i32, i32, i32, i32
  }
  func.func @transform_1(%arg0: i32) -> (i32, i32) {
    %c0_i32 = arith.constant 0 : i32
    %c0_i32_0 = arith.constant 0 : i32
    %c0_i32_1 = arith.constant 0 : i32
    return %c0_i32, %c0_i32_0 : i32, i32
  }
  func.func @transform_2(%arg0: i32) -> (i32, i32) {
    %c0_i32 = arith.constant 0 : i32
    %c0_i32_0 = arith.constant 0 : i32
    %c0_i32_1 = arith.constant 0 : i32
    return %c0_i32, %c0_i32_0 : i32, i32
  }
  func.func @transform_3(%arg0: i32) -> (i32, i32) {
    %c0_i32 = arith.constant 0 : i32
    %c0_i32_0 = arith.constant 0 : i32
    %c0_i32_1 = arith.constant 0 : i32
    return %c0_i32, %c0_i32_0 : i32, i32
  }
  func.func @transform_4(%arg0: i32) -> (i32, i32) {
    %c0_i32 = arith.constant 0 : i32
    %c0_i32_0 = arith.constant 0 : i32
    %c0_i32_1 = arith.constant 0 : i32
    return %c0_i32, %c0_i32_0 : i32, i32
  }
  func.func @transform_5(%arg0: i32) -> (i32, i32, i32) {
    %c0_i32 = arith.constant 0 : i32
    %c0_i32_0 = arith.constant 0 : i32
    %c0_i32_1 = arith.constant 0 : i32
    return %arg0, %c0_i32, %c0_i32_0 : i32, i32, i32
  }
}

</mosaic_0001>

<bundles_post_ra>
// kernel: a_call__.1
= control target key start
LH: loop header
LB: loop body
LE: loop exit
PB: predicated region body
PF: predicated region fallthrough
CT: control target
= control target key end

     0   :  { %10 = vsyncpa [#allocation5], 0  ;;  %s13917_s0 = inlined_call_operand.vmem [shape: bf16[2,16,16,4], index: 0, kind: input, shape index: {}]   ;;  %s13918_s1 = inlined_call_operand.vmem [shape: bf16[36,64], index: 1, kind: input, shape index: {}]   ;;  %s13919_s2 = inlined_call_operand.vmem [shape: f32[1,64], index: 2, kind: input, shape index: {}]   ;;  %s13920_s3 = inlined_call_operand.vmem [shape: bf16[576,128], index: 3, kind: input, shape index: {}]   ;;  %s13921_s4 = inlined_call_operand.vmem [shape: f32[1,128], index: 4, kind: input, shape index: {}]   ;;  %s13922_s5 = inlined_call_operand.hbm [shape: f32[2,256,128], index: 5, kind: output, shape index: {}]  }
   0x1   :  { %12 = vsyncpa [#allocation5 + $0x1], 0  ;;  %s9945_s18 = smov 0   ;;  %s9947_s19 = smov 0  }
   0x2   :  { %s9949_s20 = smov 0   ;;  %s9951_s21 = smov 0  }
   0x3 LB: > { %s9966_s22 = sadd.s32 4294967295, %s9901_s21   ;;  %s8537_s23 = sadd.s32 4294967294, %s9901_s21   ;;  %s9901_s21 = sphi %s9951_s21, %s14020_s21   ;;  %s9897_s20 = sphi %s9949_s20, %s14019_s20   ;;  %s9893_s19 = sphi %s9947_s19, %s14018_s19   ;;  %s9889_s18 = sphi %s9945_s18, %s14017_s18  }
   0x4   : > { %s9970_s24 = sadd.s32 1, %s9901_s21   ;;  %s135_s25 = sadd.s32 1, %s9897_s20 }
   0x5   : > { %s132_s26 = ssub.s32 %s9901_s21, %s9970_s24  ;;  %p145_p0 = scmp.ne.s32.totalorder %s9897_s20, %s9893_s19 }
   0x6   : > { %p133_p1 = scmp.eq.s32.totalorder %s132_s26, 0  ;;  %p146_p2 = scmp.eq.s32.totalorder %s9966_s22, 1 }
   0x7   : > { %p151_p3 = scmp.ne.s32.totalorder %s9893_s19, %s9889_s18  ;;  %p152_p4 = scmp.eq.s32.totalorder %s8537_s23, 1 }
   0x8   : > { %s9981_s27 = scalar_select %p133_p1, %s9897_s20, %s135_s25  }
   0x9   : > { %p9983_p5 = por %p146_p2, %p145_p0  ;;  %p9987_p6 = por %p152_p4, %p151_p3 }
   0xa   : > { %p8540_p7 = scmp.ge.s32.totalorder %s9901_s21, 1  ;;  %p190_p8 = scmp.lt.s32.totalorder %s9901_s21, 3 }
   0xc   : > { %p191_p9 = pnand %p8540_p7, %p190_p8 }
   0xe   : > { %194 = sbr.rel (%p191_p9) target bundleno = 1179 (0x49b), region = 40 }
  0x15   : > { %vm224_vm0 = vcmask 27648   ;;  %vm227_vm1 = vcmask 24576   ;;  %v13923_v0 = vmov 0   ;;  %p218_p10 = scmp.lt.s32.totalorder %s9966_s22, 1  ;;  %vm1063_vm2 = vcmask 1042432   ;;  %s9904_s10 = smov 8  }
  0x16   : > { %225 = vst.msk [vmem:[#allocation2] sm:$0xf] %vm224_vm0, %v13923_v0  ;;  %226 = vst.msk [vmem:[#allocation2 + $0x4] sm:$0xf] %vm224_vm0, %v13923_v0  ;;  %vm1064_vm3 = vcmask 1046532   ;;  %s9905_s11 = smov 4  }
  0x17   : > { %228 = vst.msk [vmem:[#allocation2 + $0x8] sm:$0x1] %vm227_vm1, %v13923_v0  ;;  %231 = vst.msk [vmem:[#allocation2 + $0x14] sm:$0x1] %vm227_vm1, %v13923_v0  ;;  %s219_s30 = scalar_select %p218_p10, %s9966_s22, 1  ;;  %vm2106_vm14 = vcmask 31744  }
  0x18   : > { %229 = vst.msk [vmem:[#allocation2 + $0xc] sm:$0xf] %vm224_vm0, %v13923_v0  ;;  %230 = vst.msk [vmem:[#allocation2 + $0x10] sm:$0xf] %vm224_vm0, %v13923_v0  ;;  %vm836_vm4 = vsmask.f32 3328 }
  0x19   : > { %232 = vst.msk [vmem:[#allocation2 + $0x18] sm:$0xf] %vm224_vm0, %v13923_v0  ;;  %233 = vst.msk [vmem:[#allocation2 + $0x1c] sm:$0xf] %vm224_vm0, %v13923_v0  ;;  %vm837_vm5 = vsmask.f32 7440 }
  0x1a   : > { %234 = vst.msk [vmem:[#allocation2 + $0x20] sm:$0x1] %vm227_vm1, %v13923_v0  ;;  %237 = vst.msk [vmem:[#allocation2 + $0x2c] sm:$0x1] %vm227_vm1, %v13923_v0  ;;  %s9095_s6 = sshll.u32 %s219_s30, 7  ;;  %s9906_s12 = smov 12  }
  0x1b   : > { %235 = vst.msk [vmem:[#allocation2 + $0x24] sm:$0xf] %vm224_vm0, %v13923_v0  ;;  %236 = vst.msk [vmem:[#allocation2 + $0x28] sm:$0xf] %vm224_vm0, %v13923_v0  ;;  %s10106_s9 = scalar_lea.vmem %s13917_s0, %s9095_s6  ;;  %vm13925_vm6 = vsmask.f32 256 }
  0x1c   : > { %238 = vst.msk [vmem:[#allocation2 + $0x30] sm:$0xf] %vm224_vm0, %v13923_v0  ;;  %239 = vst.msk [vmem:[#allocation2 + $0x34] sm:$0xf] %vm224_vm0, %v13923_v0  ;;  %v338_v2 = vld [vmem:[%s10106_s9 + $0x8] sm:$0xf] }
  0x1d   : > { %240 = vst.msk [vmem:[#allocation2 + $0x38] sm:$0x1] %vm227_vm1, %v13923_v0  ;;  %243 = vst.msk [vmem:[#allocation2 + $0x44] sm:$0x1] %vm227_vm1, %v13923_v0  ;;  %vm369_vm8 = vsmask.f32 4368 }
  0x1e   : > { %241 = vst.msk [vmem:[#allocation2 + $0x3c] sm:$0xf] %vm224_vm0, %v13923_v0  ;;  %242 = vst.msk [vmem:[#allocation2 + $0x40] sm:$0xf] %vm224_vm0, %v13923_v0  ;;  %vm13926_vm9 = vsmask.f32 7938 }
  0x1f   : > { %244 = vst.msk [vmem:[#allocation2 + $0x48] sm:$0xf] %vm224_vm0, %v13923_v0  ;;  %245 = vst.msk [vmem:[#allocation2 + $0x4c] sm:$0xf] %vm224_vm0, %v13923_v0  ;;  %v813_v3 = vld [vmem:[#allocation2 + $0x4] sm:$0xf] }
  0x20   : > { %246 = vst.msk [vmem:[#allocation2 + $0x50] sm:$0x1] %vm227_vm1, %v13923_v0  ;;  %249 = vst.msk [vmem:[#allocation2 + $0x5c] sm:$0x1] %vm227_vm1, %v13923_v0  ;;  %v828_v4 = vld [vmem:[#allocation2 + $0x8] sm:$0x1] }
  0x21   : > { %247 = vst.msk [vmem:[#allocation2 + $0x54] sm:$0xf] %vm224_vm0, %v13923_v0  ;;  %248 = vst.msk [vmem:[#allocation2 + $0x58] sm:$0xf] %vm224_vm0, %v13923_v0  ;;  %v1031_v5 = vld [vmem:[#allocation2] sm:$0xe] }
  0x22   : > { %250 = vst.msk [vmem:[#allocation2 + $0x60] sm:$0xf] %vm224_vm0, %v13923_v0  ;;  %251 = vst.msk [vmem:[#allocation2 + $0x64] sm:$0xf] %vm224_vm0, %v13923_v0  ;;  %v8544_v6 = vrot.slane %v1031_v5, 9  ;;  %v1068_v7 = vrot.slane %v813_v3, 5 }
  0x23   : > { %252 = vst.msk [vmem:[#allocation2 + $0x68] sm:$0x1] %vm227_vm1, %v13923_v0  ;;  %255 = vst.msk [vmem:[#allocation2 + $0x74] sm:$0x1] %vm227_vm1, %v13923_v0  ;;  %v1071_v8 = vrot.slane %v828_v4, 5  ;;  %v849_v10 = vshll.u32 %v813_v3, 16 }
  0x24   : > { %253 = vst.msk [vmem:[#allocation2 + $0x6c] sm:$0xf] %vm224_vm0, %v13923_v0  ;;  %254 = vst.msk [vmem:[#allocation2 + $0x70] sm:$0xf] %vm224_vm0, %v13923_v0  ;;  %v812_v9 = vld [vmem:[#allocation2] sm:$0xf] }
  0x25   : > { %256 = vst.msk [vmem:[#allocation2 + $0x78] sm:$0xf] %vm224_vm0, %v13923_v0  ;;  %257 = vst.msk [vmem:[#allocation2 + $0x7c] sm:$0xf] %vm224_vm0, %v13923_v0  ;;  %v840_v11 = vshrl.u32 %v812_v9, 16  ;;  %v843_v12 = vshll.u32 %v812_v9, 16 }
  0x26   : > { %258 = vst.msk [vmem:[#allocation2 + $0x80] sm:$0x1] %vm227_vm1, %v13923_v0  ;;  %261 = vst.msk [vmem:[#allocation2 + $0x8c] sm:$0x1] %vm227_vm1, %v13923_v0  ;;  %v853_v13 = vshrl.u32 %v813_v3, 16  ;;  %v859_v14 = vshll.u32 %v828_v4, 16 }
  0x27   : > { %259 = vst.msk [vmem:[#allocation2 + $0x84] sm:$0xf] %vm224_vm0, %v13923_v0  ;;  %260 = vst.msk [vmem:[#allocation2 + $0x88] sm:$0xf] %vm224_vm0, %v13923_v0  ;;  %v339_v15 = vld [vmem:[%s10106_s9 + $0xc] sm:$0xf] }
  0x28   : > { %262 = vst.msk [vmem:[#allocation2 + $0x90] sm:$0xf] %vm224_vm0, %v13923_v0  ;;  %263 = vst.msk [vmem:[#allocation2 + $0x94] sm:$0xf] %vm224_vm0, %v13923_v0  ;;  %v1070_v17 = vrot.slane %v1068_v7, 4  ;;  %v851_v18 = vrot.slane %v849_v10, 5 }
  0x29   : > { %264 = vst.msk [vmem:[#allocation2 + $0x98] sm:$0x1] %vm227_vm1, %v13923_v0  ;;  %267 = vst.msk [vmem:[#allocation2 + $0xa4] sm:$0x1] %vm227_vm1, %v13923_v0  ;;  %v389_v19 = vshrl.u32 %v338_v2, 16  ;;  %v842_v20 = vrot.slane %v840_v11, 4 }
  0x2a   : > { %265 = vst.msk [vmem:[#allocation2 + $0x9c] sm:$0xf] %vm224_vm0, %v13923_v0  ;;  %266 = vst.msk [vmem:[#allocation2 + $0xa0] sm:$0xf] %vm224_vm0, %v13923_v0  ;;  %v845_v21 = vrot.slane %v843_v12, 5  ;;  %v855_v22 = vrot.slane %v853_v13, 4 }
  0x2b   : > { %268 = vst.msk [vmem:[#allocation2 + $0xa8] sm:$0xf] %vm224_vm0, %v13923_v0  ;;  %269 = vst.msk [vmem:[#allocation2 + $0xac] sm:$0xf] %vm224_vm0, %v13923_v0  ;;  %v861_v23 = vrot.slane %v859_v14, 5  ;;  %v391_v26 = vrot.slane %v389_v19, 7 }
  0x2c   : > { %270 = vst.msk [vmem:[#allocation2 + $0xb0] sm:$0x1] %vm227_vm1, %v13923_v0  ;;  %273 = vst.msk [vmem:[#allocation2 + $0xbc] sm:$0x1] %vm227_vm1, %v13923_v0  ;;  %v336_v24 = vld [vmem:[%s10106_s9] sm:$0xf]  ;;  %v846_v31 = vor.u32 %v845_v21, %v842_v20  ;;  %v856_v32 = vor.u32 %v855_v22, %v851_v18 }
  0x2d   : > { %271 = vst.msk [vmem:[#allocation2 + $0xb4] sm:$0xf] %vm224_vm0, %v13923_v0  ;;  %272 = vst.msk [vmem:[#allocation2 + $0xb8] sm:$0xf] %vm224_vm0, %v13923_v0  ;;  %v392_v27 = vshll.u32 %v338_v2, 16  ;;  %v397_v28 = vshrl.u32 %v339_v15, 16 }
  0x2e   : > { %274 = vst.msk [vmem:[#allocation2 + $0xc0] sm:$0xf] %vm224_vm0, %v13923_v0  ;;  %275 = vst.msk [vmem:[#allocation2 + $0xc4] sm:$0xf] %vm224_vm0, %v13923_v0  ;;  %v337_v29 = vld [vmem:[%s10106_s9 + $0x4] sm:$0xf] }
  0x2f   : > { %276 = vst.msk [vmem:[#allocation2 + $0xc8] sm:$0x1] %vm227_vm1, %v13923_v0  ;;  %279 = vst.msk [vmem:[#allocation2 + $0xd4] sm:$0x1] %vm227_vm1, %v13923_v0  ;;  %v400_v33 = vshll.u32 %v339_v15, 16  ;;  %v394_v37 = vor.u32 %v392_v27, %v391_v26  ;;  %v395_v38 = vrot.slane %v391_v26, 4 }
  0x30   : > { %277 = vst.msk [vmem:[#allocation2 + $0xcc] sm:$0xf] %vm224_vm0, %v13923_v0  ;;  %278 = vst.msk [vmem:[#allocation2 + $0xd0] sm:$0xf] %vm224_vm0, %v13923_v0  ;;  %v704_v35 = vld [vmem:[#allocation2 + $0x18] sm:$0xf] }
  0x31   : > { %vm10108_vm7 = vmor %vm1063_vm2, %vm1064_vm3  ;;  %v399_v39 = vrot.slane %v397_v28, 7  ;;  %v372_v40 = vshrl.u32 %v336_v24, 16  ;;  %v340_v41 = vld [vmem:[%s10106_s9 + $0x10] sm:$0xf]  ;;  %v847_v42 = vrot.slane %v846_v31, 4  ;;  %v857_v43 = vrot.slane %v856_v32, 4 }
  0x32   : > { %v1069_v16 = vsel %vm10108_vm7, %v8544_v6, %v1068_v7  ;;  %v1072_v25 = vsel %vm10108_vm7, %v1070_v17, %v1071_v8  ;;  %vm10122_vm10 = vmand %vm224_vm0, %vm13926_vm9  ;;  %v375_v45 = vshll.u32 %v336_v24, 16  ;;  %v380_v46 = vshrl.u32 %v337_v29, 16  ;;  %v341_v51 = vld [vmem:[%s10106_s9 + $0x14] sm:$0xf]  ;;  %v695_v55 = vld [vmem:[#allocation2 + $0xc] sm:$0xf] }
  0x33   : > { %v8584_v30 = vcombine.low %v1069_v16, %v1072_v25  ;;  %vm10128_vm11 = vmor %vm836_vm4, %vm837_vm5  ;;  %v402_v47 = vor.u32 %v400_v33, %v399_v39  ;;  %v705_v48 = vsel %vm10122_vm10, %v394_v37, %v704_v35  ;;  %v374_v49 = vrot.slane %v372_v40, 7  ;;  %v701_v61 = vld [vmem:[#allocation2 + $0x14] sm:$0x1]  ;;  %v708_v62 = vld [vmem:[#allocation2 + $0x20] sm:$0x1]  ;;  %s9907_s13 = smov 24  }
  0x34   : > { %vm10136_vm12 = vmor %vm13925_vm6, %vm369_vm8  ;;  %v383_v50 = vshll.u32 %v337_v29, 16  ;;  %v852_v52 = vsel %vm10128_vm11, %v847_v42, %v851_v18  ;;  %v862_v53 = vsel %vm10128_vm11, %v857_v43, %v861_v23  ;;  %706 = vst [vmem:[#allocation2 + $0x18] sm:$0xf] %v705_v48  ;;  %v382_v54 = vrot.slane %v380_v46, 7  ;;  %v10157_v6 = vld [vmem:[%s10106_s9 + $0x18] sm:$0xf] }
  0x35   : > { %1834 = vrot.lane.b32.xlu1 %v8584_v30, %s9904_s10  ;;  %v406_v56 = vshrl.u32 %v340_v41, 16  ;;  %v8576_v57 = vcombine.low %v852_v52, %v862_v53  ;;  %v403_v58 = vsel %vm10136_vm12, %v395_v38, %v402_v47  ;;  %v377_v59 = vor.u32 %v375_v45, %v374_v49  ;;  %vm10152_vm13 = vmand %vm227_vm1, %vm13925_vm6  ;;  %v711_v9 = vld [vmem:[#allocation2 + $0x24] sm:$0xf]  ;;  %v715_v22 = vld [vmem:[#allocation2 + $0x2c] sm:$0x1]  ;;  %s9908_s14 = smov 20  }
  0x36   : > { %v378_v60 = vrot.slane %v374_v49, 4  ;;  %707 = vst.msk [vmem:[#allocation2 + $0x1c] sm:$0xf] %vm224_vm0, %v403_v58  ;;  %v385_v63 = vor.u32 %v383_v50, %v382_v54  ;;  %v409_v3 = vshll.u32 %v340_v41, 16  ;;  %v414_v4 = vshrl.u32 %v341_v51, 16  ;;  %s9909_s15 = smov 32  }
  0x37   : > { %v408_v2 = vrot.slane %v406_v56, 7  ;;  %1794 = vrot.lane.b32.xlu0 %v8576_v57, %s9905_s11  ;;  %v696_v7 = vsel %vm10122_vm10, %v377_v59, %v695_v55  ;;  %v417_v8 = vshll.u32 %v341_v51, 16  ;;  %v387_v10 = vrot.slane %v382_v54, 4  ;;  %v10173_v23 = vld [vmem:[%s10106_s9 + $0x1c] sm:$0xf]  ;;  %s9910_s16 = smov 16  }
  0x38   : > { %v404_v11 = vrot.slane %v399_v39, 4  ;;  %v386_v12 = vsel %vm10136_vm12, %v378_v60, %v385_v63  ;;  %697 = vst [vmem:[#allocation2 + $0xc] sm:$0xf] %v696_v7  ;;  %v416_v15 = vrot.slane %v414_v4, 7  ;;  %v423_v18 = vshrl.u32 %v10157_v6, 16  ;;  %s9911_s17 = smov 28  }
  0x39   : > { %v411_v13 = vor.u32 %v409_v3, %v408_v2  ;;  %v412_v14 = vrot.slane %v408_v2, 4  ;;  %698 = vst.msk [vmem:[#allocation2 + $0x10] sm:$0xf] %vm224_vm0, %v386_v12  ;;  %v702_v16 = vsel %vm10152_vm13, %v387_v10, %v701_v61  ;;  %v426_v24 = vshll.u32 %v10157_v6, 16  ;;  %v354_v0 = vld [vmem:[%s10106_s9 + $0x48] sm:$0xf] }
  0x3a   : > { %v709_v17 = vsel %vm10152_vm13, %v404_v11, %v708_v62  ;;  %v419_v19 = vor.u32 %v417_v8, %v416_v15  ;;  %703 = vst [vmem:[#allocation2 + $0x14] sm:$0x1] %v702_v16  ;;  %v421_v21 = vrot.slane %v416_v15, 4  ;;  %v431_v38 = vshrl.u32 %v10173_v23, 16  ;;  %v11516_v34 = vld [vmem:[#allocation2 + $0xcc] sm:$0xf] }
  0x3b   : > { %v712_v20 = vsel %vm10122_vm10, %v411_v13, %v711_v9  ;;  %710 = vst [vmem:[#allocation2 + $0x20] sm:$0x1] %v709_v17  ;;  %v1128_v25 = vld [vmem:[#allocation2 + $0x18] sm:$0xf]  ;;  %vm2131_vm15 = vcmask 64512   ;;  %vm2148_vm1 = vcmask 97280  }
  0x3c   : > { %713 = vst [vmem:[#allocation2 + $0x24] sm:$0xf] %v712_v20  ;;  %v10176_v26 = vld [vmem:[#allocation2 + $0x18] sm:$0xf]  ;;  %v1175_v28 = vshrl.u32 %v1128_v25, 16  ;;  %v1178_v29 = vshll.u32 %v1128_v25, 16  ;;  %v420_v30 = vsel %vm10136_vm12, %v412_v14, %v419_v19  ;;  %v716_v37 = vsel %vm10152_vm13, %v421_v21, %v715_v22 }
  0x3d   : > { %v1650_v27 = vld [vmem:[#allocation2 + $0x18] sm:$0xe]  ;;  %v1459_v31 = vshrl.u32 %v10176_v26, 16  ;;  %v10181_v32 = vld [vmem:[#allocation2 + $0x1c] sm:$0xf]  ;;  %v1462_v35 = vshll.u32 %v10176_v26, 16 }
  0x3e   : > { %714 = vst.msk [vmem:[#allocation2 + $0x28] sm:$0xf] %vm224_vm0, %v420_v30  ;;  %v10184_v33 = vld [vmem:[#allocation2 + $0x1c] sm:$0xf]  ;;  %v8593_v39 = vcombine.low %v1128_v25, %v10181_v32  ;;  %v10191_v40 = vrot.slane %v1175_v28, 4  ;;  %v10193_v41 = vrot.slane %v1178_v29, 5 }
  0x3f   : > { %v8560_v42 = vrot.slane %v1650_v27, 9  ;;  %717 = vst [vmem:[#allocation2 + $0x2c] sm:$0x1] %v716_v37  ;;  %v1188_v43 = vshrl.u32 %v10181_v32, 16  ;;  %v1126_v45 = vld [vmem:[#allocation2 + $0xc] sm:$0xf]  ;;  %v8616_v52 = vcombine.low %v10176_v26, %v10184_v33 }
  0x40   : > { %v10196_v46 = vrot.slane %v1459_v31, 4  ;;  %v10198_v47 = vrot.slane %v1462_v35, 5  ;;  %v1472_v48 = vshrl.u32 %v10184_v33, 16  ;;  %1884 = vrot.lane.b32.xlu1 %v8593_v39, %s9906_s12  ;;  %v10202_v49 = vld [vmem:[#allocation2 + $0x10] sm:$0xf]  ;;  %v1151_v50 = vshrl.u32 %v1126_v45, 16 }
  0x41   : > { %v1154_v51 = vshll.u32 %v1126_v45, 16  ;;  %v1342_v53 = vld [vmem:[#allocation2 + $0xc] sm:$0xe]  ;;  %v8592_v54 = vcombine.low %v1126_v45, %v10202_v49  ;;  %v10207_v55 = vld [vmem:[#allocation2 + $0x14] sm:$0x1]  ;;  %v1376_v57 = vrot.slane %v10202_v49, 5  ;;  %v1181_v58 = vor.u32 %v10193_v41, %v10191_v40 }
  0x42   : > { %v8552_v56 = vrot.slane %v1342_v53, 9  ;;  %v10212_v59 = vrot.slane %v1151_v50, 4  ;;  %v1379_v62 = vrot.slane %v10207_v55, 5  ;;  %v1684_v63 = vrot.slane %v10184_v33, 5  ;;  %v1343_v2 = vld [vmem:[#allocation2 + $0x18] sm:$0xe] }
  0x43   : > { %v10214_v60 = vrot.slane %v1154_v51, 5  ;;  %v1436_v61 = vld [vmem:[#allocation2 + $0x24] sm:$0xf]  ;;  %v1164_v3 = vshrl.u32 %v10202_v49, 16  ;;  %1882 = vrot.lane.b32.xlu0 %v8592_v54, %s9906_s12  ;;  %v1378_v8 = vrot.slane %v1376_v57, 4  ;;  %v1465_v16 = vor.u32 %v10198_v47, %v10196_v46  ;;  %s9128_s8 = sshll.u32 %s9966_s22, 12 }
  0x44   : > { %v1483_v4 = vshrl.u32 %v1436_v61, 16  ;;  %v1486_v7 = vshll.u32 %v1436_v61, 16  ;;  %v10220_v9 = vld [vmem:[#allocation2 + $0x10] sm:$0xf]  ;;  %v1377_v11 = vsel %vm10108_vm7, %v8552_v56, %v1376_v57  ;;  %v10224_v12 = vld [vmem:[#allocation2 + $0x14] sm:$0x1]  ;;  %v1685_v14 = vsel %vm10108_vm7, %v8560_v42, %v1684_v63 }
  0x45   : > { %v1437_v10 = vld [vmem:[#allocation2 + $0x28] sm:$0xf]  ;;  %v1032_v13 = vld [vmem:[#allocation2 + $0xc] sm:$0xe]  ;;  %v1157_v15 = vor.u32 %v10214_v60, %v10212_v59  ;;  %v10232_v22 = vld [vmem:[#allocation2 + $0x20] sm:$0x1]  ;;  %v1380_v25 = vsel %vm10108_vm7, %v1378_v8, %v1379_v62 }
  0x46   : > { %v1485_v17 = vrot.slane %v1483_v4, 4  ;;  %v1488_v19 = vrot.slane %v1486_v7, 5  ;;  %v1496_v20 = vshrl.u32 %v1437_v10, 16  ;;  %v8617_v21 = vcombine.low %v1436_v61, %v1437_v10  ;;  %v1143_v29 = vld [vmem:[#allocation2 + $0x20] sm:$0x1]  ;;  %s9913_s6 = smov [#allocation4]  }
  0x47   : > { %v8545_v26 = vrot.slane %v1032_v13, 9  ;;  %v1075_v27 = vrot.slane %v10220_v9, 5  ;;  %v1078_v28 = vrot.slane %v10224_v12, 5  ;;  %2010 = vrot.lane.b32.xlu0 %v8616_v52, %s9907_s13  ;;  %v8608_v30 = vcombine.low %v1377_v11, %v1380_v25  ;;  %v1451_v39 = vld [vmem:[#allocation2 + $0x2c] sm:$0x1] }
  0x48   : > { %2012 = vrot.lane.b32.xlu1 %v8617_v21, %s9907_s13  ;;  %v1686_v31 = vrot.slane %v1684_v63, 4  ;;  %v1687_v35 = vrot.slane %v10232_v22, 5  ;;  %v8553_v37 = vrot.slane %v1343_v2, 9  ;;  %v1383_v42 = vrot.slane %v10181_v32, 5  ;;  %v1651_v50 = vld [vmem:[#allocation2 + $0x24] sm:$0xe] }
  0x49   : > { %v1076_v40 = vsel %vm10108_vm7, %v8545_v26, %v1075_v27  ;;  %v1077_v41 = vrot.slane %v1075_v27, 4  ;;  %v1386_v45 = vrot.slane %v1143_v29, 5  ;;  %v8561_v53 = vrot.slane %v1651_v50, 9  ;;  %v10258_v21 = vld [vmem:[#allocation2 + $0xc] sm:$0xf] }
  0x4a   : > { %v1688_v51 = vsel %vm10108_vm7, %v1686_v31, %v1687_v35  ;;  %v1691_v54 = vrot.slane %v1437_v10, 5  ;;  %v1694_v52 = vrot.slane %v1451_v39, 5  ;;  %v1384_v61 = vsel %vm10108_vm7, %v8553_v37, %v1383_v42  ;;  %v10274_v50 = vld [vmem:[#allocation2 + $0x1c] sm:$0xf] }
  0x4b   : > { %v1079_v56 = vsel %vm10108_vm7, %v1077_v41, %v1078_v28  ;;  %v8632_v57 = vcombine.low %v1685_v14, %v1688_v51  ;;  %v1385_v62 = vrot.slane %v1383_v42, 4  ;;  %1962 = vrot.lane.b32.xlu0 %v8608_v30, %s9908_s14  ;;  %v1182_v7 = vrot.slane %v1181_v58, 4 }
  0x4c   : > { %v8585_v63 = vcombine.low %v1076_v40, %v1079_v56  ;;  %v1692_v2 = vsel %vm10108_vm7, %v8561_v53, %v1691_v54  ;;  %v1693_v4 = vrot.slane %v1691_v54, 4  ;;  %v1184_v11 = vshll.u32 %v10181_v32, 16 }
  0x4d   : > { %v1387_v8 = vsel %vm10108_vm7, %v1385_v62, %v1386_v45  ;;  %v1190_v13 = vrot.slane %v1188_v43, 4  ;;  %v1194_v14 = vshll.u32 %v1143_v29, 16  ;;  %v1489_v27 = vor.u32 %v1488_v19, %v1485_v17  ;;  %v10269_v17 = vld [vmem:[#allocation2 + $0x18] sm:$0xf] }
  0x4e   : > { %1836 = vrot.lane.b32.xlu1 %v8585_v63, %s9904_s10  ;;  %v8609_v25 = vcombine.low %v1384_v61, %v1387_v8  ;;  %v1695_v26 = vsel %vm10108_vm7, %v1693_v4, %v1694_v52  ;;  %v1492_v28 = vshll.u32 %v1437_v10, 16  ;;  %v1186_v30 = vrot.slane %v1184_v11, 5 }
  0x4f   : > { %v8633_v58 = vcombine.low %v1692_v2, %v1695_v26  ;;  %v1196_v31 = vrot.slane %v1194_v14, 5  ;;  %v1498_v35 = vrot.slane %v1496_v20, 4  ;;  %2090 = vrot.lane.b32.xlu0 %v8632_v57, %s9909_s15  ;;  %v1490_v32 = vrot.slane %v1489_v27, 4 }
  0x50   : > { %v1494_v43 = vrot.slane %v1492_v28, 5  ;;  %v1502_v29 = vshll.u32 %v1451_v39, 16  ;;  %v864_v37 = vshrl.u32 %v10258_v21, 16  ;;  %v1187_v40 = vsel %vm10128_vm11, %v1182_v7, %v1186_v30  ;;  %v10283_v7 = vld [vmem:[#allocation2 + $0x20] sm:$0x1] }
  0x51   : > { %v1191_v41 = vor.u32 %v1190_v13, %v1186_v30  ;;  %v867_v42 = vshll.u32 %v10258_v21, 16  ;;  %v873_v10 = vshll.u32 %v10220_v9, 16  ;;  %v877_v52 = vshrl.u32 %v10220_v9, 16 }
  0x52   : > { %1964 = vrot.lane.b32.xlu1 %v8609_v25, %s9908_s14  ;;  %v1495_v19 = vsel %vm10128_vm11, %v1490_v32, %v1494_v43  ;;  %v1499_v20 = vor.u32 %v1498_v35, %v1494_v43  ;;  %v1504_v45 = vrot.slane %v1502_v29, 5  ;;  %v866_v39 = vrot.slane %v864_v37, 4  ;;  %v818_v35 = vld [vmem:[#allocation2 + $0x24] sm:$0xf] }
  0x53   : > { %v1192_v51 = vrot.slane %v1191_v41, 4  ;;  %v869_v53 = vrot.slane %v867_v42, 5  ;;  %v875_v54 = vrot.slane %v873_v10, 5  ;;  %2092 = vrot.lane.b32.xlu0 %v8633_v58, %s9909_s15  ;;  %v883_v57 = vshll.u32 %v10224_v12, 16 }
  0x54   : > { %v1500_v56 = vrot.slane %v1499_v20, 4  ;;  %v888_v61 = vshrl.u32 %v10269_v17, 16  ;;  %v891_v62 = vshll.u32 %v10269_v17, 16  ;;  %v879_v4 = vrot.slane %v877_v52, 4  ;;  %v831_v20 = vld [vmem:[#allocation2 + $0x2c] sm:$0x1] }
  0x55   : > { %v1197_v63 = vsel %vm10128_vm11, %v1192_v51, %v1196_v31  ;;  %v870_v2 = vor.u32 %v869_v53, %v866_v39  ;;  %v897_v8 = vshll.u32 %v10274_v50, 16  ;;  %v885_v13 = vrot.slane %v883_v57, 5 }
  0x56   : > { %v8601_v11 = vcombine.low %v1187_v40, %v1197_v63  ;;  %v1505_v9 = vsel %vm10128_vm11, %v1500_v56, %v1504_v45  ;;  %v890_v14 = vrot.slane %v888_v61, 4  ;;  %v880_v26 = vor.u32 %v879_v4, %v875_v54  ;;  %v819_v40 = vld [vmem:[#allocation2 + $0x28] sm:$0xf]  ;;  %v1034_v63 = vld [vmem:[#allocation2 + $0x24] sm:$0xe] }
  0x57   : > { %v8625_v12 = vcombine.low %v1495_v19, %v1505_v9  ;;  %v871_v25 = vrot.slane %v870_v2, 4  ;;  %v893_v27 = vrot.slane %v891_v62, 5  ;;  %v899_v28 = vrot.slane %v897_v8, 5 }
  0x58   : > { %1924 = vrot.lane.b32.xlu1 %v8601_v11, %s9910_s16  ;;  %v901_v58 = vshrl.u32 %v10274_v50, 16  ;;  %v907_v30 = vshll.u32 %v10283_v7, 16  ;;  %v1158_v31 = vrot.slane %v1157_v15, 4  ;;  %v881_v43 = vrot.slane %v880_v26, 4 }
  0x59   : > { %v876_v32 = vsel %vm10128_vm11, %v871_v25, %v875_v54  ;;  %v894_v29 = vor.u32 %v893_v27, %v890_v14  ;;  %v1160_v37 = vshll.u32 %v10202_v49, 16  ;;  %v1166_v10 = vrot.slane %v1164_v3, 4 }
  0x5a   : > { %v903_v41 = vrot.slane %v901_v58, 4  ;;  %v909_v42 = vrot.slane %v907_v30, 5  ;;  %v1170_v19 = vshll.u32 %v10207_v55, 16  ;;  %v886_v59 = vsel %vm10128_vm11, %v881_v43, %v885_v13  ;;  %v1033_v58 = vld [vmem:[#allocation2 + $0x18] sm:$0xe] }
  0x5b   : > { %v895_v60 = vrot.slane %v894_v29, 4  ;;  %v1162_v15 = vrot.slane %v1160_v37, 5  ;;  %v912_v45 = vshrl.u32 %v818_v35, 16  ;;  %v8577_v39 = vcombine.low %v876_v32, %v886_v59  ;;  %v10327_v59 = vld [vmem:[#allocation2 + $0x24] sm:$0xf] }
  0x5c   : > { %2052 = vrot.lane.b32.xlu1 %v8625_v12, %s9911_s17  ;;  %v904_v51 = vor.u32 %v903_v41, %v899_v28  ;;  %v1172_v53 = vrot.slane %v1170_v19, 5  ;;  %v915_v54 = vshll.u32 %v818_v35, 16  ;;  %v921_v61 = vshll.u32 %v819_v40, 16 }
  0x5d   : > { %v900_v49 = vsel %vm10128_vm11, %v895_v60, %v899_v28  ;;  %v1163_v55 = vsel %vm10128_vm11, %v1158_v31, %v1162_v15  ;;  %v1167_v3 = vor.u32 %v1166_v10, %v1162_v15  ;;  %v914_v52 = vrot.slane %v912_v45, 4  ;;  %1796 = vrot.lane.b32.xlu0 %v8577_v39, %s9905_s11  ;;  %v10329_v60 = vld [vmem:[#allocation2 + $0x28] sm:$0xf]  ;;  %v718_v39 = vld [vmem:[#allocation2 + $0x30] sm:$0xf] }
  0x5e   : > { %v905_v56 = vrot.slane %v904_v51, 4  ;;  %v917_v57 = vrot.slane %v915_v54, 5  ;;  %v925_v62 = vshrl.u32 %v819_v40, 16  ;;  %v931_v4 = vshll.u32 %v831_v20, 16 }
  0x5f   : > { %v1168_v2 = vrot.slane %v1167_v3, 4  ;;  %v1466_v8 = vrot.slane %v1465_v16, 4  ;;  %v1468_v11 = vshll.u32 %v10184_v33, 16  ;;  %v923_v14 = vrot.slane %v921_v61, 5 }
  0x60   : > { %v910_v9 = vsel %vm10128_vm11, %v905_v56, %v909_v42  ;;  %v918_v13 = vor.u32 %v917_v57, %v914_v52  ;;  %v927_v12 = vrot.slane %v925_v62, 4  ;;  %v933_v27 = vrot.slane %v931_v4, 5  ;;  %v1144_v52 = vld [vmem:[#allocation2 + $0x2c] sm:$0x1]  ;;  %v1344_v56 = vld [vmem:[#allocation2 + $0x24] sm:$0xe] }
  0x61   : > { %v8578_v25 = vcombine.low %v900_v49, %v910_v9  ;;  %v1173_v26 = vsel %vm10128_vm11, %v1168_v2, %v1172_v53  ;;  %v1470_v28 = vrot.slane %v1468_v11, 5  ;;  %v1474_v46 = vrot.slane %v1472_v48, 4  ;;  %v722_v62 = vld [vmem:[#allocation2 + $0x38] sm:$0x1]  ;;  %v344_v11 = vld [vmem:[%s10106_s9 + $0x20] sm:$0xf] }
  0x62   : > { %v8600_v30 = vcombine.low %v1163_v55, %v1173_v26  ;;  %v919_v31 = vrot.slane %v918_v13, 4  ;;  %v928_v35 = vor.u32 %v927_v12, %v923_v14  ;;  %v1478_v16 = vshll.u32 %v10232_v22, 16  ;;  %v345_v26 = vld [vmem:[%s10106_s9 + $0x24] sm:$0xf] }
  0x63   : > { %1798 = vrot.lane.b32.xlu1 %v8578_v25, %s9905_s11  ;;  %v1471_v47 = vsel %vm10128_vm11, %v1466_v8, %v1470_v28  ;;  %v8547_v32 = vrot.slane %v1034_v63, 9  ;;  %v1089_v43 = vrot.slane %v819_v40, 5  ;;  %v1475_v41 = vor.u32 %v1474_v46, %v1470_v28 }
  0x64   : > { %1922 = vrot.lane.b32.xlu0 %v8600_v30, %s9910_s16  ;;  %v924_v29 = vsel %vm10128_vm11, %v919_v31, %v923_v14  ;;  %v929_v37 = vrot.slane %v928_v35, 4  ;;  %v1092_v42 = vrot.slane %v831_v20, 5  ;;  %v1480_v10 = vrot.slane %v1478_v16, 5 }
  0x65   : > { %v1090_v33 = vsel %vm10108_vm7, %v8547_v32, %v1089_v43  ;;  %v1091_v48 = vrot.slane %v1089_v43, 4  ;;  %v8546_v19 = vrot.slane %v1033_v58, 9  ;;  %v1476_v40 = vrot.slane %v1475_v41, 4 }
  0x66   : > { %v934_v22 = vsel %vm10128_vm11, %v929_v37, %v933_v27  ;;  %v1082_v15 = vrot.slane %v10274_v50, 5  ;;  %v1085_v45 = vrot.slane %v10283_v7, 5  ;;  %v425_v53 = vrot.slane %v423_v18, 7  ;;  %v10363_v27 = vld [vmem:[%s10106_s9 + $0x28] sm:$0xf] }
  0x67   : > { %v8579_v20 = vcombine.low %v924_v29, %v934_v22  ;;  %v1093_v51 = vsel %vm10108_vm7, %v1091_v48, %v1092_v42  ;;  %v433_v54 = vrot.slane %v431_v38, 7  ;;  %v1481_v49 = vsel %vm10128_vm11, %v1476_v40, %v1480_v10  ;;  %v725_v48 = vld [vmem:[#allocation2 + $0x3c] sm:$0xf] }
  0x68   : > { %v8587_v55 = vcombine.low %v1090_v33, %v1093_v51  ;;  %v1083_v3 = vsel %vm10108_vm7, %v8546_v19, %v1082_v15  ;;  %v1084_v7 = vrot.slane %v1082_v15, 4  ;;  %v8624_v57 = vcombine.low %v1471_v47, %v1481_v49 }
  0x69   : > { %1800 = vrot.lane.b32.xlu1 %v8579_v20, %s9905_s11  ;;  %v428_v18 = vor.u32 %v426_v24, %v425_v53  ;;  %v429_v61 = vrot.slane %v425_v53, 4  ;;  %v434_v38 = vshll.u32 %v10173_v23, 16  ;;  %v1199_v2 = vshrl.u32 %v10327_v59, 16 }
  0x6a   : > { %v1086_v63 = vsel %vm10108_vm7, %v1084_v7, %v1085_v45  ;;  %v1202_v4 = vshll.u32 %v10327_v59, 16  ;;  %v1212_v8 = vshrl.u32 %v10329_v60, 16  ;;  %2050 = vrot.lane.b32.xlu0 %v8624_v57, %s9911_s17  ;;  %v8594_v9 = vcombine.low %v10327_v59, %v10329_v60 }
  0x6b   : > { %v8586_v6 = vcombine.low %v1083_v3, %v1086_v63  ;;  %v436_v24 = vor.u32 %v434_v38, %v433_v54  ;;  %v719_v23 = vsel %vm10122_vm10, %v428_v18, %v718_v39  ;;  %v1201_v13 = vrot.slane %v1199_v2, 4 }
  0x6c   : > { %720 = vst [vmem:[#allocation2 + $0x30] sm:$0xf] %v719_v23  ;;  %v1204_v14 = vrot.slane %v1202_v4, 5  ;;  %v438_v12 = vrot.slane %v433_v54, 4  ;;  %v1208_v25 = vshll.u32 %v10329_v60, 16  ;;  %v1214_v58 = vrot.slane %v1212_v8, 4 }
  0x6d   : > { %1840 = vrot.lane.b32.xlu1 %v8587_v55, %s9904_s10  ;;  %v437_v28 = vsel %vm10136_vm12, %v429_v61, %v436_v24  ;;  %v1218_v30 = vshll.u32 %v1144_v52, 16  ;;  %v8554_v31 = vrot.slane %v1344_v56, 9  ;;  %v1390_v16 = vrot.slane %v10329_v60, 5 }
  0x6e   : > { %721 = vst.msk [vmem:[#allocation2 + $0x34] sm:$0xf] %vm224_vm0, %v437_v28  ;;  %v723_v35 = vsel %vm10152_vm13, %v438_v12, %v722_v62  ;;  %v1205_v46 = vor.u32 %v1204_v14, %v1201_v13  ;;  %v1210_v47 = vrot.slane %v1208_v25, 5  ;;  %1838 = vrot.lane.b32.xlu0 %v8586_v6, %s9904_s10  ;;  %v1393_v43 = vrot.slane %v1144_v52, 5 }
  0x6f   : > { %724 = vst [vmem:[#allocation2 + $0x38] sm:$0x1] %v723_v35  ;;  %v1220_v32 = vrot.slane %v1218_v30, 5  ;;  %v440_v29 = vshrl.u32 %v344_v11, 16  ;;  %v443_v37 = vshll.u32 %v344_v11, 16  ;;  %v1391_v10 = vsel %vm10108_vm7, %v8554_v31, %v1390_v16 }
  0x70   : > { %v1206_v41 = vrot.slane %v1205_v46, 4  ;;  %v1215_v42 = vor.u32 %v1214_v58, %v1210_v47  ;;  %v1392_v33 = vrot.slane %v1390_v16, 4  ;;  %v448_v59 = vshrl.u32 %v345_v26, 16  ;;  %v729_v46 = vld [vmem:[#allocation2 + $0x44] sm:$0x1] }
  0x71   : > { %v442_v19 = vrot.slane %v440_v29, 7  ;;  %v451_v22 = vshll.u32 %v345_v26, 16  ;;  %v457_v40 = vshrl.u32 %v10363_v27, 16  ;;  %v460_v39 = vshll.u32 %v10363_v27, 16  ;;  %v736_v27 = vld [vmem:[#allocation2 + $0x50] sm:$0x1] }
  0x72   : > { %v1211_v60 = vsel %vm10128_vm11, %v1206_v41, %v1210_v47  ;;  %v1216_v15 = vrot.slane %v1215_v42, 4  ;;  %v1394_v45 = vsel %vm10108_vm7, %v1392_v33, %v1393_v43  ;;  %1886 = vrot.lane.b32.xlu0 %v8594_v9, %s9906_s12  ;;  %v450_v55 = vrot.slane %v448_v59, 7 }
  0x73   : > { %v1132_v20 = vld [vmem:[#allocation2 + $0x30] sm:$0xf]  ;;  %v8610_v53 = vcombine.low %v1391_v10, %v1394_v45  ;;  %v445_v54 = vor.u32 %v443_v37, %v442_v19  ;;  %v446_v49 = vrot.slane %v442_v19, 4  ;;  %vm2165_vm2 = vcmask 130048  }
  0x74   : > { %v1345_v51 = vld [vmem:[#allocation2 + $0x30] sm:$0xe]  ;;  %v1223_v3 = vshrl.u32 %v1132_v20, 16  ;;  %v1226_v7 = vshll.u32 %v1132_v20, 16  ;;  %v1221_v52 = vsel %vm10128_vm11, %v1216_v15, %v1220_v32  ;;  %v453_v38 = vor.u32 %v451_v22, %v450_v55 }
  0x75   : > { %v8555_v56 = vrot.slane %v1345_v51, 9  ;;  %v1438_v57 = vld [vmem:[#allocation2 + $0x30] sm:$0xf]  ;;  %v1133_v18 = vld [vmem:[#allocation2 + $0x34] sm:$0xf]  ;;  %v8602_v61 = vcombine.low %v1211_v60, %v1221_v52  ;;  %v726_v62 = vsel %vm10122_vm10, %v445_v54, %v725_v48  ;;  %v455_v42 = vrot.slane %v450_v55, 4 }
  0x76   : > { %v1507_v63 = vshrl.u32 %v1438_v57, 16  ;;  %v1225_v2 = vrot.slane %v1223_v3, 4  ;;  %v1228_v4 = vrot.slane %v1226_v7, 5  ;;  %v1236_v8 = vshrl.u32 %v1133_v18, 16  ;;  %v1145_v6 = vld [vmem:[#allocation2 + $0x38] sm:$0x1] }
  0x77   : > { %v8595_v11 = vcombine.low %v1132_v20, %v1133_v18  ;;  %727 = vst [vmem:[#allocation2 + $0x3c] sm:$0xf] %v726_v62  ;;  %v1232_v24 = vshll.u32 %v1133_v18, 16  ;;  %v1242_v23 = vshll.u32 %v1145_v6, 16  ;;  %1926 = vrot.lane.b32.xlu0 %v8602_v61, %s9910_s16  ;;  %v1397_v9 = vrot.slane %v1133_v18, 5 }
  0x78   : > { %v1400_v13 = vrot.slane %v1145_v6, 5  ;;  %v10387_v14 = vld [vmem:[#allocation2 + $0x34] sm:$0xf]  ;;  %v1229_v12 = vor.u32 %v1228_v4, %v1225_v2  ;;  %v1238_v25 = vrot.slane %v1236_v8, 4  ;;  %v454_v26 = vsel %vm10136_vm12, %v446_v49, %v453_v38  ;;  %v10399_v29 = vld [vmem:[#allocation2 + $0x38] sm:$0x1] }
  0x79   : > { %1888 = vrot.lane.b32.xlu1 %v8595_v11, %s9906_s12  ;;  %v1509_v28 = vrot.slane %v1507_v63, 4  ;;  %v1234_v58 = vrot.slane %v1232_v24, 5  ;;  %v1244_v30 = vrot.slane %v1242_v23, 5  ;;  %v10394_v31 = vsel %vm10108_vm7, %v8555_v56, %v1397_v9  ;;  %728 = vst.msk [vmem:[#allocation2 + $0x40] sm:$0xf] %vm224_vm0, %v454_v26  ;;  %v9593_v2 = vld [vmem:[%s13918_s1] sm:$0xff]  }
  0x7a   : > { %v1399_v35 = vrot.slane %v1397_v9, 4  ;;  %v1230_v47 = vrot.slane %v1229_v12, 4  ;;  %v1510_v16 = vshll.u32 %v1438_v57, 16  ;;  %v1520_v32 = vshrl.u32 %v10387_v14, 16  ;;  %v1652_v33 = vld [vmem:[#allocation2 + $0x30] sm:$0xe]  ;;  %9431 = vmatprep.subr.bf16.mxu0 %v9593_v2 }
  0x7b   : > { %v8618_v43 = vcombine.low %v1438_v57, %v10387_v14  ;;  %v1239_v37 = vor.u32 %v1238_v25, %v1234_v58  ;;  %1966 = vrot.lane.b32.xlu0 %v8610_v53, %s9908_s14  ;;  %v1516_v10 = vshll.u32 %v10387_v14, 16  ;;  %v730_v45 = vsel %vm10152_vm13, %v455_v42, %v729_v46  ;;  %9432 = vmatpush3.bf16.msra.mxu0 %v9593_v2 }
  0x7c   : > { %v1401_v41 = vsel %vm10108_vm7, %v1399_v35, %v1400_v13  ;;  %v1235_v48 = vsel %vm10128_vm11, %v1230_v47, %v1234_v58  ;;  %v1512_v59 = vrot.slane %v1510_v16, 5  ;;  %v1522_v22 = vrot.slane %v1520_v32, 4  ;;  %731 = vst [vmem:[#allocation2 + $0x44] sm:$0x1] %v730_v45 }
  0x7d   : > { %v8611_v19 = vcombine.low %v10394_v31, %v1401_v41  ;;  %v1240_v60 = vrot.slane %v1239_v37, 4  ;;  %v1518_v20 = vrot.slane %v1516_v10, 5  ;;  %v1526_v51 = vshll.u32 %v10399_v29, 16  ;;  %v820_v41 = vld [vmem:[#allocation2 + $0x30] sm:$0xf] }
  0x7e   : > { %v10408_v15 = vld [vmem:[#allocation2 + $0x3c] sm:$0xf]  ;;  %v1513_v49 = vor.u32 %v1512_v59, %v1509_v28  ;;  %v8562_v3 = vrot.slane %v1652_v33, 9  ;;  %v1698_v13 = vrot.slane %v10387_v14, 5  ;;  %v1701_v58 = vrot.slane %v10399_v29, 5 }
  0x7f   : > { %v1531_v53 = vshrl.u32 %v10408_v15, 16  ;;  %v1534_v54 = vshll.u32 %v10408_v15, 16  ;;  %v1653_v55 = vld [vmem:[#allocation2 + $0x3c] sm:$0xe]  ;;  %v1245_v7 = vsel %vm10128_vm11, %v1240_v60, %v1244_v30  ;;  %2014 = vrot.lane.b32.xlu0 %v8618_v43, %s9907_s13  ;;  %v1523_v52 = vor.u32 %v1522_v22, %v1518_v20  ;;  %v10447_v59 = vld [vmem:[#allocation2 + $0x34] sm:$0xf] }
  0x80   : > { %v1528_v56 = vrot.slane %v1526_v51, 5  ;;  %v8563_v57 = vrot.slane %v1653_v55, 9  ;;  %v8603_v18 = vcombine.low %v1235_v48, %v1245_v7  ;;  %v1441_v61 = vld [vmem:[#allocation2 + $0x40] sm:$0xf]  ;;  %v1514_v63 = vrot.slane %v1513_v49, 4 }
  0x81   : > { %v1533_v38 = vrot.slane %v1531_v53, 4  ;;  %v1536_v62 = vrot.slane %v1534_v54, 5  ;;  %v1544_v4 = vshrl.u32 %v1441_v61, 16  ;;  %v8619_v8 = vcombine.low %v10408_v15, %v1441_v61  ;;  %v10426_v12 = vld [vmem:[#allocation2 + $0x3c] sm:$0xf] }
  0x82   : > { %v1540_v11 = vshll.u32 %v1441_v61, 16  ;;  %v1524_v6 = vrot.slane %v1523_v52, 4  ;;  %1928 = vrot.lane.b32.xlu1 %v8603_v18, %s9910_s16  ;;  %v1519_v23 = vsel %vm10128_vm11, %v1514_v63, %v1518_v20  ;;  %v1705_v9 = vrot.slane %v1441_v61, 5  ;;  %v10435_v47 = vld [vmem:[#allocation2 + $0x40] sm:$0xf] }
  0x83   : > { %v1537_v24 = vor.u32 %v1536_v62, %v1533_v38  ;;  %v1546_v26 = vrot.slane %v1544_v4, 4  ;;  %v1453_v14 = vld [vmem:[#allocation2 + $0x44] sm:$0x1]  ;;  %v1699_v32 = vsel %vm10108_vm7, %v8562_v3, %v1698_v13  ;;  %v1700_v43 = vrot.slane %v1698_v13, 4  ;;  %v10454_v54 = vld [vmem:[#allocation2 + $0x38] sm:$0x1] }
  0x84   : > { %v1542_v25 = vrot.slane %v1540_v11, 5  ;;  %v1529_v28 = vsel %vm10128_vm11, %v1524_v6, %v1528_v56  ;;  %v10433_v35 = vsel %vm10108_vm7, %v8563_v57, %v1705_v9  ;;  %v1707_v46 = vrot.slane %v1705_v9, 4  ;;  %v10444_v33 = vld [vmem:[#allocation2 + $0x44] sm:$0x1]  ;;  %v1036_v49 = vld [vmem:[#allocation2 + $0x3c] sm:$0xe] }
  0x85   : > { %v1538_v30 = vrot.slane %v1537_v24, 4  ;;  %v8626_v31 = vcombine.low %v1519_v23, %v1529_v28  ;;  %v960_v37 = vshrl.u32 %v10426_v12, 16  ;;  %v1550_v42 = vshll.u32 %v1453_v14, 16  ;;  %v9594_v56 = vld [vmem:[%s13918_s1 + $0x8] sm:$0xff]   ;;  %v1035_v62 = vld [vmem:[#allocation2 + $0x30] sm:$0xe] }
  0x86   : > { %v1547_v16 = vor.u32 %v1546_v26, %v1542_v25  ;;  %1968 = vrot.lane.b32.xlu1 %v8611_v19, %s9908_s14  ;;  %v1708_v10 = vrot.slane %v1453_v14, 5  ;;  %v963_v48 = vshll.u32 %v10426_v12, 16  ;;  %v1702_v60 = vsel %vm10108_vm7, %v1700_v43, %v1701_v58  ;;  %9433 = vmatprep.subr.bf16.mxu0 %v9594_v56 }
  0x87   : > { %v1543_v29 = vsel %vm10128_vm11, %v1538_v30, %v1542_v25  ;;  %2054 = vrot.lane.b32.xlu0 %v8626_v31, %s9911_s17  ;;  %v962_v15 = vrot.slane %v960_v37, 4  ;;  %v969_v19 = vshll.u32 %v10435_v47, 16  ;;  %v1552_v45 = vrot.slane %v1550_v42, 5  ;;  %9434 = vmatpush3.bf16.msra.mxu0 %v9594_v56  ;;  %v732_v42 = vld [vmem:[#allocation2 + $0x48] sm:$0xf] }
  0x88   : > { %v1548_v22 = vrot.slane %v1547_v16, 4  ;;  %v1709_v20 = vsel %vm10108_vm7, %v1707_v46, %v1708_v10  ;;  %v8634_v51 = vcombine.low %v1699_v32, %v1702_v60  ;;  %v965_v53 = vrot.slane %v963_v48, 5  ;;  %v347_v32 = vld [vmem:[%s10106_s9 + $0x2c] sm:$0xf]  ;;  %v10477_v10 = vld [vmem:[#allocation2 + $0x3c] sm:$0xf] }
  0x89   : > { %v8635_v55 = vcombine.low %v10433_v35, %v1709_v20  ;;  %v971_v3 = vrot.slane %v969_v19, 5  ;;  %v973_v7 = vshrl.u32 %v10435_v47, 16  ;;  %v979_v52 = vshll.u32 %v10444_v33, 16 }
  0x8a   : > { %2016 = vrot.lane.b32.xlu1 %v8619_v8, %s9907_s13  ;;  %v1553_v57 = vsel %vm10128_vm11, %v1548_v22, %v1552_v45  ;;  %v966_v18 = vor.u32 %v965_v53, %v962_v15  ;;  %v936_v61 = vshrl.u32 %v820_v41, 16  ;;  %v939_v38 = vshll.u32 %v820_v41, 16  ;;  %v10485_v15 = vld [vmem:[#allocation2 + $0x40] sm:$0xf] }
  0x8b   : > { %2094 = vrot.lane.b32.xlu0 %v8634_v51, %s9909_s15  ;;  %v8627_v63 = vcombine.low %v1543_v29, %v1553_v57  ;;  %v975_v2 = vrot.slane %v973_v7, 4  ;;  %v981_v4 = vrot.slane %v979_v52, 5  ;;  %v945_v11 = vshll.u32 %v10447_v59, 16  ;;  %v1146_v52 = vld [vmem:[#allocation2 + $0x44] sm:$0x1] }
  0x8c   : > { %v967_v6 = vrot.slane %v966_v18, 4  ;;  %v938_v24 = vrot.slane %v936_v61, 4  ;;  %v941_v23 = vrot.slane %v939_v38, 5  ;;  %v949_v8 = vshrl.u32 %v10447_v59, 16 }
  0x8d   : > { %v976_v9 = vor.u32 %v975_v2, %v971_v3  ;;  %v947_v13 = vrot.slane %v945_v11, 5  ;;  %v955_v25 = vshll.u32 %v10454_v54, 16  ;;  %v8549_v26 = vrot.slane %v1036_v49, 9 }
  0x8e   : > { %2056 = vrot.lane.b32.xlu1 %v8627_v63, %s9911_s17  ;;  %v972_v28 = vsel %vm10128_vm11, %v967_v6, %v971_v3  ;;  %v942_v58 = vor.u32 %v941_v23, %v938_v24  ;;  %v951_v30 = vrot.slane %v949_v8, 4  ;;  %v1103_v31 = vrot.slane %v10435_v47, 5  ;;  %v349_v8 = vld [vmem:[%s10106_s9 + $0x34] sm:$0xf] }
  0x8f   : > { %v977_v35 = vrot.slane %v976_v9, 4  ;;  %v957_v46 = vrot.slane %v955_v25, 5  ;;  %v1106_v14 = vrot.slane %v10444_v33, 5  ;;  %v8548_v16 = vrot.slane %v1035_v62, 9 }
  0x90   : > { %v943_v43 = vrot.slane %v942_v58, 4  ;;  %v952_v37 = vor.u32 %v951_v30, %v947_v13  ;;  %v1104_v41 = vsel %vm10108_vm7, %v8549_v26, %v1103_v31  ;;  %v1105_v29 = vrot.slane %v1103_v31, 4 }
  0x91   : > { %v982_v48 = vsel %vm10128_vm11, %v977_v35, %v981_v4  ;;  %v1096_v22 = vrot.slane %v10447_v59, 5  ;;  %v1099_v60 = vrot.slane %v10454_v54, 5  ;;  %v459_v33 = vrot.slane %v457_v40, 7  ;;  %v348_v4 = vld [vmem:[%s10106_s9 + $0x30] sm:$0xf] }
  0x92   : > { %2096 = vrot.lane.b32.xlu1 %v8635_v55, %s9909_s15  ;;  %v8581_v19 = vcombine.low %v972_v28, %v982_v48  ;;  %v948_v45 = vsel %vm10128_vm11, %v943_v43, %v947_v13  ;;  %v953_v20 = vrot.slane %v952_v37, 4  ;;  %v1107_v51 = vsel %vm10108_vm7, %v1105_v29, %v1106_v14 }
  0x93   : > { %v8589_v53 = vcombine.low %v1104_v41, %v1107_v51  ;;  %v1097_v59 = vsel %vm10108_vm7, %v8548_v16, %v1096_v22  ;;  %v1098_v54 = vrot.slane %v1096_v22, 4  ;;  %v462_v40 = vor.u32 %v460_v39, %v459_v33  ;;  %v1346_v39 = vld [vmem:[#allocation2 + $0x3c] sm:$0xe]  ;;  %v739_v22 = vld [vmem:[#allocation2 + $0x54] sm:$0xf] }
  0x94   : > { %v958_v49 = vsel %vm10128_vm11, %v953_v20, %v957_v46  ;;  %v463_v55 = vrot.slane %v459_v33, 4  ;;  %v465_v3 = vshrl.u32 %v347_v32, 16  ;;  %v468_v7 = vshll.u32 %v347_v32, 16  ;;  %v10526_v20 = vld [vmem:[#allocation2 + $0x4] sm:$0xf] }
  0x95   : > { %v8580_v56 = vcombine.low %v948_v45, %v958_v49  ;;  %v1100_v57 = vsel %vm10108_vm7, %v1098_v54, %v1099_v60  ;;  %v733_v18 = vsel %vm10122_vm10, %v462_v40, %v732_v42  ;;  %v1247_v61 = vshrl.u32 %v10477_v10, 16  ;;  %v10528_v51 = vld [vmem:[#allocation2] sm:$0xf] }
  0x96   : > { %1804 = vrot.lane.b32.xlu1 %v8581_v19, %s9905_s11  ;;  %v8588_v38 = vcombine.low %v1097_v59, %v1100_v57  ;;  %v467_v62 = vrot.slane %v465_v3, 7  ;;  %734 = vst [vmem:[#allocation2 + $0x48] sm:$0xf] %v733_v18  ;;  %v1250_v63 = vshll.u32 %v10477_v10, 16  ;;  %v1260_v2 = vshrl.u32 %v10485_v15, 16 }
  0x97   : > { %1802 = vrot.lane.b32.xlu0 %v8580_v56, %s9905_s11  ;;  %v1249_v11 = vrot.slane %v1247_v61, 4  ;;  %v8596_v6 = vcombine.low %v10477_v10, %v10485_v15  ;;  %v1256_v24 = vshll.u32 %v10485_v15, 16  ;;  %v1266_v23 = vshll.u32 %v1146_v52, 16 }
  0x98   : > { %v470_v9 = vor.u32 %v468_v7, %v467_v62  ;;  %v1252_v13 = vrot.slane %v1250_v63, 5  ;;  %v472_v25 = vrot.slane %v467_v62, 4  ;;  %v1262_v26 = vrot.slane %v1260_v2, 4 }
  0x99   : > { %v1258_v28 = vrot.slane %v1256_v24, 5  ;;  %v1268_v58 = vrot.slane %v1266_v23, 5  ;;  %v8556_v30 = vrot.slane %v1346_v39, 9  ;;  %v1404_v31 = vrot.slane %v10485_v15, 5  ;;  %v10547_v23 = vld [vmem:[#allocation2 + $0x10] sm:$0xf] }
  0x9a   : > { %1844 = vrot.lane.b32.xlu1 %v8589_v53, %s9904_s10  ;;  %v471_v35 = vsel %vm10136_vm12, %v463_v55, %v470_v9  ;;  %v737_v46 = vsel %vm10152_vm13, %v472_v25, %v736_v27  ;;  %v1253_v14 = vor.u32 %v1252_v13, %v1249_v11  ;;  %v1407_v16 = vrot.slane %v1146_v52, 5 }
  0x9b   : > { %1842 = vrot.lane.b32.xlu0 %v8588_v38, %s9904_s10  ;;  %735 = vst.msk [vmem:[#allocation2 + $0x4c] sm:$0xf] %vm224_vm0, %v471_v35  ;;  %738 = vst [vmem:[#allocation2 + $0x50] sm:$0x1] %v737_v46  ;;  %v1263_v32 = vor.u32 %v1262_v26, %v1258_v28  ;;  %v10522_v43 = vsel %vm10108_vm7, %v8556_v30, %v1404_v31  ;;  %v1406_v37 = vrot.slane %v1404_v31, 4  ;;  %v474_v41 = vshrl.u32 %v348_v4, 16 }
  0x9c   : > { %v1254_v29 = vrot.slane %v1253_v14, 4  ;;  %v477_v42 = vshll.u32 %v348_v4, 16  ;;  %v482_v10 = vshrl.u32 %v349_v8, 16  ;;  %v485_v48 = vshll.u32 %v349_v8, 16 }
  0x9d   : > { %v1136_v60 = vld [vmem:[#allocation2 + $0x48] sm:$0xf]  ;;  %v1264_v33 = vrot.slane %v1263_v32, 4  ;;  %v1408_v19 = vsel %vm10108_vm7, %v1406_v37, %v1407_v16  ;;  %v476_v45 = vrot.slane %v474_v41, 7  ;;  %v8568_v53 = vcombine.low %v10528_v51, %v10526_v20  ;;  %v743_v37 = vld [vmem:[#allocation2 + $0x5c] sm:$0x1] }
  0x9e   : > { %v1347_v15 = vld [vmem:[#allocation2 + $0x48] sm:$0xe]  ;;  %v1271_v59 = vshrl.u32 %v1136_v60, 16  ;;  %v1274_v54 = vshll.u32 %v1136_v60, 16  ;;  %v1259_v40 = vsel %vm10128_vm11, %v1254_v29, %v1258_v28  ;;  %v8612_v7 = vcombine.low %v10522_v43, %v1408_v19 }
  0x9f   : > { %v8557_v49 = vrot.slane %v1347_v15, 9  ;;  %v10534_v55 = vld [vmem:[#allocation2 + $0x48] sm:$0xf]  ;;  %1890 = vrot.lane.b32.xlu0 %v8596_v6, %s9906_s12  ;;  %v1269_v3 = vsel %vm10128_vm11, %v1264_v33, %v1268_v58  ;;  %v479_v52 = vor.u32 %v477_v42, %v476_v45  ;;  %v480_v56 = vrot.slane %v476_v45, 4 }
  0xa0   : > { %v10540_v57 = vld [vmem:[#allocation2 + $0x48] sm:$0xe]  ;;  %v1273_v18 = vrot.slane %v1271_v59, 4  ;;  %v1276_v61 = vrot.slane %v1274_v54, 5  ;;  %v8604_v27 = vcombine.low %v1259_v40, %v1269_v3  ;;  %v484_v39 = vrot.slane %v482_v10, 7 }
  0xa1   : > { %v740_v38 = vsel %vm10122_vm10, %v479_v52, %v739_v22  ;;  %v1555_v62 = vshrl.u32 %v10534_v55, 16  ;;  %v1558_v63 = vshll.u32 %v10534_v55, 16  ;;  %v8564_v2 = vrot.slane %v10540_v57, 9 }
  0xa2   : > { %v1137_v4 = vld [vmem:[#allocation2 + $0x4c] sm:$0xf]  ;;  %v1147_v11 = vld [vmem:[#allocation2 + $0x50] sm:$0x1]  ;;  %v1277_v6 = vor.u32 %v1276_v61, %v1273_v18  ;;  %v487_v24 = vor.u32 %v485_v48, %v484_v39  ;;  %741 = vst [vmem:[#allocation2 + $0x54] sm:$0xf] %v740_v38  ;;  %v8569_v8 = vcombine.low %v10258_v21, %v10547_v23  ;;  %v8570_v9 = vcombine.low %v10269_v17, %v10274_v50 }
  0xa3   : > { %v1284_v13 = vshrl.u32 %v1137_v4, 16  ;;  %v8597_v25 = vcombine.low %v1136_v60, %v1137_v4  ;;  %v1280_v26 = vshll.u32 %v1137_v4, 16  ;;  %v1290_v28 = vshll.u32 %v1147_v11, 16  ;;  %1930 = vrot.lane.b32.xlu0 %v8604_v27, %s9910_s16  ;;  %v1443_v58 = vld [vmem:[#allocation2 + $0x4c] sm:$0xf] }
  0xa4   : > { %v1278_v30 = vrot.slane %v1277_v6, 4  ;;  %v1411_v31 = vrot.slane %v1137_v4, 5  ;;  %v1414_v35 = vrot.slane %v1147_v11, 5  ;;  %v488_v46 = vsel %vm10136_vm12, %v480_v56, %v487_v24  ;;  %v1454_v48 = vld [vmem:[#allocation2 + $0x50] sm:$0x1] }
  0xa5   : > { %1892 = vrot.lane.b32.xlu1 %v8597_v25, %s9906_s12  ;;  %v1282_v14 = vrot.slane %v1280_v26, 5  ;;  %v1286_v16 = vrot.slane %v1284_v13, 4  ;;  %v1292_v32 = vrot.slane %v1290_v28, 5  ;;  %742 = vst.msk [vmem:[#allocation2 + $0x58] sm:$0xf] %vm224_vm0, %v488_v46  ;;  %v1557_v43 = vrot.slane %v1555_v62, 4 }
  0xa6   : > { %v1412_v41 = vsel %vm10108_vm7, %v8557_v49, %v1411_v31  ;;  %v1413_v29 = vrot.slane %v1411_v31, 4  ;;  %v1560_v42 = vrot.slane %v1558_v63, 5  ;;  %v1568_v10 = vshrl.u32 %v1443_v58, 16  ;;  %v356_v50 = vld [vmem:[%s10106_s9 + $0x50] sm:$0xf] }
  0xa7   : > { %v1283_v22 = vsel %vm10128_vm11, %v1278_v30, %v1282_v14  ;;  %v1287_v60 = vor.u32 %v1286_v16, %v1282_v14  ;;  %1970 = vrot.lane.b32.xlu0 %v8612_v7, %s9908_s14  ;;  %v8620_v33 = vcombine.low %v10534_v55, %v1443_v58  ;;  %v489_v15 = vrot.slane %v484_v39, 4 }
  0xa8   : > { %v1415_v19 = vsel %vm10108_vm7, %v1413_v29, %v1414_v35  ;;  %v1561_v45 = vor.u32 %v1560_v42, %v1557_v43  ;;  %v1564_v59 = vshll.u32 %v1443_v58, 16  ;;  %v1570_v54 = vrot.slane %v1568_v10, 4 }
  0xa9   : > { %v1288_v40 = vrot.slane %v1287_v60, 4  ;;  %v8613_v49 = vcombine.low %v1412_v41, %v1415_v19  ;;  %v10566_v3 = vld [vmem:[#allocation2 + $0x54] sm:$0xf]  ;;  %v744_v52 = vsel %vm10152_vm13, %v489_v15, %v743_v37  ;;  %v1574_v56 = vshll.u32 %v1454_v48, 16  ;;  %v10587_v60 = vpop.permute.xlu0 %1794 }
  0xaa   : > { %v1655_v18 = vld [vmem:[#allocation2 + $0x54] sm:$0xe]  ;;  %v1579_v7 = vshrl.u32 %v10566_v3, 16  ;;  %v1582_v55 = vshll.u32 %v10566_v3, 16  ;;  %745 = vst [vmem:[#allocation2 + $0x5c] sm:$0x1] %v744_v52  ;;  %v10596_v52 = vpop.permute.xlu1 %1834 }
  0xab   : > { %v1562_v61 = vrot.slane %v1561_v45, 4  ;;  %v1566_v27 = vrot.slane %v1564_v59, 5  ;;  %v1293_v39 = vsel %vm10128_vm11, %v1288_v40, %v1292_v32  ;;  %2018 = vrot.lane.b32.xlu0 %v8620_v33, %s9907_s13  ;;  %v1576_v38 = vrot.slane %v1574_v56, 5  ;;  %v826_v31 = vld [vmem:[#allocation2 + $0x54] sm:$0xf] }
  0xac   : > { %v8565_v62 = vrot.slane %v1655_v18, 9  ;;  %v1712_v63 = vrot.slane %v1443_v58, 5  ;;  %v8605_v4 = vcombine.low %v1283_v22, %v1293_v39  ;;  %v1445_v11 = vld [vmem:[#allocation2 + $0x58] sm:$0xf]  ;;  %v1581_v6 = vrot.slane %v1579_v7, 4 }
  0xad   : > { %v1584_v24 = vrot.slane %v1582_v55, 5  ;;  %v1567_v13 = vsel %vm10128_vm11, %v1562_v61, %v1566_v27  ;;  %v1592_v25 = vshrl.u32 %v1445_v11, 16  ;;  %v8621_v26 = vcombine.low %v10566_v3, %v1445_v11  ;;  %v824_v22 = vld [vmem:[#allocation2 + $0x48] sm:$0xf]  ;;  %v827_v19 = vld [vmem:[#allocation2 + $0x58] sm:$0xf] }
  0xae   : > { %v1588_v28 = vshll.u32 %v1445_v11, 16  ;;  %v1571_v30 = vor.u32 %v1570_v54, %v1566_v27  ;;  %1932 = vrot.lane.b32.xlu1 %v8605_v4, %s9910_s16  ;;  %v1719_v46 = vrot.slane %v1445_v11, 5  ;;  %v1713_v58 = vsel %vm10108_vm7, %v8564_v2, %v1712_v63  ;;  %v10598_v61 = vld [vmem:[#allocation2 + $0x4c] sm:$0xf] }
  0xaf   : > { %v1585_v35 = vor.u32 %v1584_v24, %v1581_v6  ;;  %v1714_v14 = vrot.slane %v1712_v63, 4  ;;  %v1594_v32 = vrot.slane %v1592_v25, 4  ;;  %v1715_v37 = vrot.slane %v1454_v48, 5  ;;  %v1038_v63 = vld [vmem:[#allocation2 + $0x54] sm:$0xe] }
  0xb0   : > { %v1590_v16 = vrot.slane %v1588_v28, 5  ;;  %v1572_v43 = vrot.slane %v1571_v30, 4  ;;  %v10585_v29 = vsel %vm10108_vm7, %v8565_v62, %v1719_v46  ;;  %v1721_v42 = vrot.slane %v1719_v46, 4  ;;  %v10603_v62 = vld [vmem:[#allocation2 + $0x50] sm:$0x1] }
  0xb1   : > { %v1586_v41 = vrot.slane %v1585_v35, 4  ;;  %v1008_v10 = vshrl.u32 %v826_v31, 16  ;;  %v1455_v33 = vld [vmem:[#allocation2 + $0x5c] sm:$0x1]  ;;  %v1716_v15 = vsel %vm10108_vm7, %v1714_v14, %v1715_v37  ;;  %v1011_v48 = vshll.u32 %v826_v31, 16 }
  0xb2   : > { %v1595_v57 = vor.u32 %v1594_v32, %v1590_v16  ;;  %v1577_v2 = vsel %vm10128_vm11, %v1572_v43, %v1576_v38  ;;  %1972 = vrot.lane.b32.xlu1 %v8613_v49, %s9908_s14  ;;  %v1598_v59 = vshll.u32 %v1455_v33, 16  ;;  %v1722_v40 = vrot.slane %v1455_v33, 5  ;;  %v835_v3 = vld [vmem:[#allocation2 + $0x5c] sm:$0x1]  ;;  %v1037_v37 = vld [vmem:[#allocation2 + $0x48] sm:$0xe] }
  0xb3   : > { %v1591_v45 = vsel %vm10128_vm11, %v1586_v41, %v1590_v16  ;;  %v8628_v54 = vcombine.low %v1567_v13, %v1577_v2  ;;  %v8636_v18 = vcombine.low %v1713_v58, %v1716_v15  ;;  %v1010_v7 = vrot.slane %v1008_v10, 4  ;;  %v10614_v41 = vpop.permute.xlu1 %1884  ;;  %v350_v33 = vld [vmem:[%s10106_s9 + $0x38] sm:$0xf] }
  0xb4   : > { %v1596_v56 = vrot.slane %v1595_v57, 4  ;;  %v1013_v55 = vrot.slane %v1011_v48, 5  ;;  %v1600_v27 = vrot.slane %v1598_v59, 5  ;;  %v1723_v49 = vsel %vm10108_vm7, %v1721_v42, %v1722_v40 }
  0xb5   : > { %2058 = vrot.lane.b32.xlu0 %v8628_v54, %s9911_s17  ;;  %v1017_v39 = vshll.u32 %v827_v19, 16  ;;  %v1021_v38 = vshrl.u32 %v827_v19, 16  ;;  %v8637_v4 = vcombine.low %v10585_v29, %v1723_v49  ;;  %v1027_v6 = vshll.u32 %v835_v3, 16  ;;  %v10609_v31 = vpop.permute.xlu0 %1882 }
  0xb6   : > { %v1014_v11 = vor.u32 %v1013_v55, %v1010_v7  ;;  %v984_v24 = vshrl.u32 %v824_v22, 16  ;;  %2020 = vrot.lane.b32.xlu1 %v8621_v26, %s9907_s13  ;;  %v1601_v13 = vsel %vm10128_vm11, %v1596_v56, %v1600_v27  ;;  %v987_v30 = vshll.u32 %v824_v22, 16  ;;  %v10626_v7 = vld [vmem:[#allocation2 + $0x54] sm:$0xf] }
  0xb7   : > { %v1019_v25 = vrot.slane %v1017_v39, 5  ;;  %v1023_v28 = vrot.slane %v1021_v38, 4  ;;  %v8629_v35 = vcombine.low %v1591_v45, %v1601_v13  ;;  %v1029_v58 = vrot.slane %v1027_v6, 5  ;;  %v351_v45 = vld [vmem:[%s10106_s9 + $0x3c] sm:$0xf] }
  0xb8   : > { %v1015_v46 = vrot.slane %v1014_v11, 4  ;;  %v986_v14 = vrot.slane %v984_v24, 4  ;;  %v989_v32 = vrot.slane %v987_v30, 5  ;;  %v993_v26 = vshll.u32 %v10598_v61, 16 }
  0xb9   : > { %2098 = vrot.lane.b32.xlu0 %v8636_v18, %s9909_s15  ;;  %v1024_v16 = vor.u32 %v1023_v28, %v1019_v25  ;;  %v997_v43 = vshrl.u32 %v10598_v61, 16  ;;  %v1003_v42 = vshll.u32 %v10603_v62, 16  ;;  %v8551_v10 = vrot.slane %v1038_v63, 9  ;;  %v10622_v59 = vpop.permute.xlu0 %2010 }
  0xba   : > { %v1020_v29 = vsel %vm10128_vm11, %v1015_v46, %v1019_v25  ;;  %v1117_v22 = vrot.slane %v827_v19, 5  ;;  %2060 = vrot.lane.b32.xlu1 %v8629_v35, %s9911_s17  ;;  %v990_v2 = vor.u32 %v989_v32, %v986_v14  ;;  %v995_v15 = vrot.slane %v993_v26, 5  ;;  %v10637_v25 = vld [vmem:[#allocation2 + $0x58] sm:$0xf]  ;;  %v10639_v28 = vpop.permute.xlu1 %2012 }
  0xbb   : > { %v1025_v57 = vrot.slane %v1024_v16, 4  ;;  %v999_v48 = vrot.slane %v997_v43, 4  ;;  %v1005_v54 = vrot.slane %v1003_v42, 5  ;;  %v1120_v18 = vrot.slane %v835_v3, 5  ;;  %v1348_v43 = vld [vmem:[#allocation2 + $0x54] sm:$0xe] }
  0xbc   : > { %v1118_v40 = vsel %vm10108_vm7, %v8551_v10, %v1117_v22  ;;  %v1119_v56 = vrot.slane %v1117_v22, 4  ;;  %v991_v55 = vrot.slane %v990_v2, 4  ;;  %v8550_v49 = vrot.slane %v1037_v37, 9  ;;  %v750_v22 = vld [vmem:[#allocation2 + $0x68] sm:$0x1] }
  0xbd   : > { %v1030_v19 = vsel %vm10128_vm11, %v1025_v57, %v1029_v58  ;;  %v1000_v27 = vor.u32 %v999_v48, %v995_v15  ;;  %v1110_v63 = vrot.slane %v10598_v61, 5  ;;  %v1113_v11 = vrot.slane %v10603_v62, 5  ;;  %v746_v58 = vld [vmem:[#allocation2 + $0x60] sm:$0xf]  ;;  %v1148_v62 = vld [vmem:[#allocation2 + $0x5c] sm:$0x1]  ;;  %v10643_v14 = vpop.permute.xlu0 %1962 }
  0xbe   : > { %v8583_v39 = vcombine.low %v1020_v29, %v1030_v19  ;;  %v1121_v38 = vsel %vm10108_vm7, %v1119_v56, %v1120_v18  ;;  %2100 = vrot.lane.b32.xlu1 %v8637_v4, %s9909_s15  ;;  %v996_v3 = vsel %vm10128_vm11, %v991_v55, %v995_v15  ;;  %v491_v13 = vshrl.u32 %v350_v33, 16 }
  0xbf   : > { %v1001_v6 = vrot.slane %v1000_v27, 4  ;;  %v8591_v24 = vcombine.low %v1118_v40, %v1121_v38  ;;  %v1111_v30 = vsel %vm10108_vm7, %v8550_v49, %v1110_v63  ;;  %v1112_v35 = vrot.slane %v1110_v63, 4  ;;  %v352_v27 = vld [vmem:[%s10106_s9 + $0x40] sm:$0xf] }
  0xc0   : > { %v494_v46 = vshll.u32 %v350_v33, 16  ;;  %v499_v61 = vshrl.u32 %v351_v45, 16  ;;  %v493_v16 = vrot.slane %v491_v13, 7  ;;  %v502_v32 = vshll.u32 %v351_v45, 16  ;;  %v10660_v49 = vpop.permute.xlu1 %1836 }
  0xc1   : > { %v1006_v4 = vsel %vm10128_vm11, %v1001_v6, %v1005_v54  ;;  %v1295_v26 = vshrl.u32 %v10626_v7, 16  ;;  %v1114_v29 = vsel %vm10108_vm7, %v1112_v35, %v1113_v11  ;;  %v1298_v10 = vshll.u32 %v10626_v7, 16 }
  0xc2   : > { %v8582_v37 = vcombine.low %v996_v3, %v1006_v4  ;;  %v501_v42 = vrot.slane %v499_v61, 7  ;;  %1808 = vrot.lane.b32.xlu1 %v8583_v39, %s9905_s11  ;;  %v8590_v33 = vcombine.low %v1111_v30, %v1114_v29  ;;  %v496_v57 = vor.u32 %v494_v46, %v493_v16  ;;  %v10665_v3 = vld [vmem:[%s10106_s9 + $0x44] sm:$0xf] }
  0xc3   : > { %v497_v2 = vrot.slane %v493_v16, 4  ;;  %v1297_v15 = vrot.slane %v1295_v26, 4  ;;  %v1300_v45 = vrot.slane %v1298_v10, 5  ;;  %v1308_v54 = vshrl.u32 %v10637_v25, 16 }
  0xc4   : > { %1806 = vrot.lane.b32.xlu0 %v8582_v37, %s9905_s11  ;;  %v504_v48 = vor.u32 %v502_v32, %v501_v42  ;;  %v8598_v40 = vcombine.low %v10626_v7, %v10637_v25  ;;  %v747_v56 = vsel %vm10122_vm10, %v496_v57, %v746_v58  ;;  %v506_v18 = vrot.slane %v501_v42, 4  ;;  %v10667_v7 = vpop.permute.xlu0 %2090  ;;  %v10692_v10 = vpop.permute.xlu1 %1964 }
  0xc5   : > { %v1304_v19 = vshll.u32 %v10637_v25, 16  ;;  %v1314_v55 = vshll.u32 %v1148_v62, 16  ;;  %748 = vst [vmem:[#allocation2 + $0x60] sm:$0xf] %v747_v56  ;;  %v1301_v38 = vor.u32 %v1300_v45, %v1297_v15  ;;  %v1310_v63 = vrot.slane %v1308_v54, 4 }
  0xc6   : > { %v505_v39 = vsel %vm10136_vm12, %v497_v2, %v504_v48  ;;  %v8558_v11 = vrot.slane %v1348_v43, 9  ;;  %1848 = vrot.lane.b32.xlu1 %v8591_v24, %s9904_s10  ;;  %v751_v6 = vsel %vm10152_vm13, %v506_v18, %v750_v22  ;;  %v1418_v35 = vrot.slane %v10637_v25, 5  ;;  %v753_v15 = vld [vmem:[#allocation2 + $0x6c] sm:$0xf]  ;;  %v10706_v45 = vld [vmem:[#allocation2 + $0x24] sm:$0xf] }
  0xc7   : > { %749 = vst.msk [vmem:[#allocation2 + $0x64] sm:$0xf] %vm224_vm0, %v505_v39  ;;  %v1306_v13 = vrot.slane %v1304_v19, 5  ;;  %v1316_v30 = vrot.slane %v1314_v55, 5  ;;  %752 = vst [vmem:[#allocation2 + $0x68] sm:$0x1] %v751_v6  ;;  %v2109_v32 = vsel %vm2106_vm14, %v8568_v53, %v10587_v60 }
  0xc8   : > { %1846 = vrot.lane.b32.xlu0 %v8590_v33, %s9904_s10  ;;  %v1302_v46 = vrot.slane %v1301_v38, 4  ;;  %v1421_v61 = vrot.slane %v1148_v62, 5  ;;  %v508_v58 = vshrl.u32 %v352_v27, 16  ;;  %v10677_v24 = vsel %vm10108_vm7, %v8558_v11, %v1418_v35  ;;  %v10700_v22 = vpop.permute.xlu0 %2092  ;;  %v10708_v54 = vld [vmem:[#allocation2 + $0x28] sm:$0xf] }
  0xc9   : > { %v1311_v4 = vor.u32 %v1310_v63, %v1306_v13  ;;  %v1420_v16 = vrot.slane %v1418_v35, 4  ;;  %v511_v62 = vshll.u32 %v352_v27, 16  ;;  %v516_v43 = vshrl.u32 %v10665_v3, 16 }
  0xca   : > { %v1307_v25 = vsel %vm10128_vm11, %v1302_v46, %v1306_v13  ;;  %v10686_v26 = vrot.slane %v508_v58, 7  ;;  %v519_v42 = vshll.u32 %v10665_v3, 16  ;;  %v2133_v48 = vsel %vm2131_vm15, %v2109_v32, %v10596_v52  ;;  %v10720_v32 = vpop.permute.xlu1 %1924 }
  0xcb   : > { %v1312_v37 = vrot.slane %v1311_v4, 4  ;;  %v1422_v29 = vsel %vm10108_vm7, %v1420_v16, %v1421_v61  ;;  %v10698_v60 = vrot.slane %v516_v43, 7  ;;  %vm13927_vm3 = vcmask 162816  }
  0xcc   : > { %1894 = vrot.lane.b32.xlu0 %v8598_v40, %s9906_s12  ;;  %v8614_v20 = vcombine.low %v10677_v24, %v1422_v29  ;;  %v513_v51 = vor.u32 %v511_v62, %v10686_v26  ;;  %v514_v53 = vrot.slane %v10686_v26, 4  ;;  %v1140_v33 = vld [vmem:[#allocation2 + $0x60] sm:$0xf]  ;;  %v8571_v40 = vcombine.low %v10706_v45, %v10708_v54 }
  0xcd   : > { %v1317_v57 = vsel %vm10128_vm11, %v1312_v37, %v1316_v30  ;;  %v1349_v2 = vld [vmem:[#allocation2 + $0x60] sm:$0xe]  ;;  %v1319_v19 = vshrl.u32 %v1140_v33, 16  ;;  %v1322_v55 = vshll.u32 %v1140_v33, 16  ;;  %v521_v62 = vor.u32 %v519_v42, %v10698_v60 }
  0xce   : > { %v1141_v18 = vld [vmem:[#allocation2 + $0x64] sm:$0xf]  ;;  %v8606_v27 = vcombine.low %v1307_v25, %v1317_v57  ;;  %v8559_v39 = vrot.slane %v1349_v2, 9  ;;  %v1149_v11 = vld [vmem:[#allocation2 + $0x68] sm:$0x1]  ;;  %v754_v43 = vsel %vm10122_vm10, %v513_v51, %v753_v15  ;;  %vm2294_vm4 = vcmask 1041408  }
  0xcf   : > { %v1332_v38 = vshrl.u32 %v1141_v18, 16  ;;  %v8599_v63 = vcombine.low %v1140_v33, %v1141_v18  ;;  %v1328_v3 = vshll.u32 %v1141_v18, 16  ;;  %v1425_v52 = vrot.slane %v1141_v18, 5  ;;  %v1446_v46 = vld [vmem:[#allocation2 + $0x60] sm:$0xf]  ;;  %v1797_v37 = vpop.permute.xlu0 %1796 }
  0xd0   : > { %v1321_v6 = vrot.slane %v1319_v19, 4  ;;  %v1324_v13 = vrot.slane %v1322_v55, 5  ;;  %v1338_v30 = vshll.u32 %v1149_v11, 16  ;;  %1934 = vrot.lane.b32.xlu0 %v8606_v27, %s9910_s16  ;;  %v1428_v35 = vrot.slane %v1149_v11, 5  ;;  %v1447_v16 = vld [vmem:[#allocation2 + $0x64] sm:$0xf] }
  0xd1   : > { %1896 = vrot.lane.b32.xlu1 %v8599_v63, %s9906_s12  ;;  %v1330_v61 = vrot.slane %v1328_v3, 5  ;;  %v1334_v58 = vrot.slane %v1332_v38, 4  ;;  %v10718_v4 = vsel %vm10108_vm7, %v8559_v39, %v1425_v52  ;;  %v1427_v24 = vrot.slane %v1425_v52, 4  ;;  %755 = vst [vmem:[#allocation2 + $0x6c] sm:$0xf] %v754_v43 }
  0xd2   : > { %v1325_v25 = vor.u32 %v1324_v13, %v1321_v6  ;;  %v1340_v26 = vrot.slane %v1338_v30, 5  ;;  %v1603_v57 = vshrl.u32 %v1446_v46, 16  ;;  %v1606_v2 = vshll.u32 %v1446_v46, 16  ;;  %v757_v18 = vld [vmem:[#allocation2 + $0x74] sm:$0x1] }
  0xd3   : > { %v1335_v29 = vor.u32 %v1334_v58, %v1330_v61  ;;  %v1429_v33 = vsel %vm10108_vm7, %v1427_v24, %v1428_v35  ;;  %v1456_v19 = vld [vmem:[#allocation2 + $0x68] sm:$0x1]  ;;  %v522_v42 = vsel %vm10136_vm12, %v514_v53, %v521_v62  ;;  %v1616_v39 = vshrl.u32 %v1447_v16, 16  ;;  %v1656_v51 = vld [vmem:[#allocation2 + $0x60] sm:$0xe]  ;;  %v10743_v58 = vpop.permute.xlu1 %2052 }
  0xd4   : > { %v1326_v55 = vrot.slane %v1325_v25, 4  ;;  %v8615_v27 = vcombine.low %v10718_v4, %v1429_v33  ;;  %1974 = vrot.lane.b32.xlu0 %v8614_v20, %s9908_s14  ;;  %756 = vst.msk [vmem:[#allocation2 + $0x70] sm:$0xf] %vm224_vm0, %v522_v42  ;;  %v1605_v38 = vrot.slane %v1603_v57, 4  ;;  %v1608_v63 = vrot.slane %v1606_v2, 5 }
  0xd5   : > { %v1336_v15 = vrot.slane %v1335_v29, 4  ;;  %v8622_v11 = vcombine.low %v1446_v46, %v1447_v16  ;;  %v523_v52 = vrot.slane %v10698_v60, 4  ;;  %v1612_v6 = vshll.u32 %v1447_v16, 16  ;;  %v10735_v13 = vld [vmem:[#allocation2 + $0x60] sm:$0xf] }
  0xd6   : > { %v1331_v3 = vsel %vm10128_vm11, %v1326_v55, %v1330_v61  ;;  %v10741_v53 = vsel %vm2148_vm1, %v2133_v48, %v10609_v31  ;;  %v1609_v30 = vor.u32 %v1608_v63, %v1605_v38  ;;  %v1618_v35 = vrot.slane %v1616_v39, 4  ;;  %v10748_v24 = vpop.permute.xlu0 %1922 }
  0xd7   : > { %v1341_v20 = vsel %vm10128_vm11, %v1336_v15, %v1340_v26  ;;  %v758_v60 = vsel %vm10152_vm13, %v523_v52, %v757_v18  ;;  %v1614_v61 = vrot.slane %v1612_v6, 5  ;;  %v1622_v4 = vshll.u32 %v1456_v19, 16 }
  0xd8   : > { %v8607_v46 = vcombine.low %v1331_v3, %v1341_v20  ;;  %2022 = vrot.lane.b32.xlu0 %v8622_v11, %s9907_s13  ;;  %759 = vst [vmem:[#allocation2 + $0x74] sm:$0x1] %v758_v60  ;;  %v1610_v25 = vrot.slane %v1609_v30, 4  ;;  %v8566_v26 = vrot.slane %v1656_v51, 9  ;;  %v1726_v62 = vrot.slane %v1447_v16, 5 }
  0xd9   : > { %v1729_v31 = vrot.slane %v1456_v19, 5  ;;  %v1448_v48 = vld [vmem:[#allocation2 + $0x6c] sm:$0xf]  ;;  %v1619_v43 = vor.u32 %v1618_v35, %v1614_v61  ;;  %v1624_v29 = vrot.slane %v1622_v4, 5  ;;  %v2693_v57 = vshrl.u32 %v10735_v13, 16 }
  0xda   : > { %1936 = vrot.lane.b32.xlu1 %v8607_v46, %s9910_s16  ;;  %v1657_v33 = vld [vmem:[#allocation2 + $0x6c] sm:$0xe]  ;;  %v2112_v2 = vsel %vm2106_vm14, %v8569_v8, %v1797_v37  ;;  %v1627_v18 = vshrl.u32 %v1448_v48, 16  ;;  %v1630_v55 = vshll.u32 %v1448_v48, 16  ;;  %v1615_v42 = vsel %vm10128_vm11, %v1610_v25, %v1614_v61  ;;  %v10764_v37 = vpop.permute.xlu1 %1798 }
  0xdb   : > { %v8567_v16 = vrot.slane %v1657_v33, 9  ;;  %v1449_v19 = vld [vmem:[#allocation2 + $0x70] sm:$0xf]  ;;  %v1620_v39 = vrot.slane %v1619_v43, 4  ;;  %v1727_v51 = vsel %vm10108_vm7, %v8566_v26, %v1726_v62  ;;  %v1728_v15 = vrot.slane %v1726_v62, 4 }
  0xdc   : > { %v10762_v38 = vsel %vm2131_vm15, %v2112_v2, %v10660_v49  ;;  %v1629_v63 = vrot.slane %v1627_v18, 4  ;;  %v1632_v21 = vrot.slane %v1630_v55, 5  ;;  %v1640_v23 = vshrl.u32 %v1449_v19, 16  ;;  %v2670_v20 = vld [vmem:[#allocation2 + $0x6c] sm:$0xf]  ;;  %v10773_v49 = vpop.permute.xlu0 %2050 }
  0xdd   : > { %v8623_v8 = vcombine.low %v1448_v48, %v1449_v19  ;;  %v1636_v11 = vshll.u32 %v1449_v19, 16  ;;  %v1625_v3 = vsel %vm10128_vm11, %v1620_v39, %v1624_v29  ;;  %v1733_v52 = vrot.slane %v1449_v19, 5  ;;  %v10771_v30 = vld [vmem:[#allocation2 + $0x70] sm:$0xf]  ;;  %v10775_v4 = vld [vmem:[#allocation2 + $0x6c] sm:$0xf] }
  0xde   : > { %1976 = vrot.lane.b32.xlu1 %v8615_v27, %s9908_s14  ;;  %v1730_v6 = vsel %vm10108_vm7, %v1728_v15, %v1729_v31  ;;  %v1633_v35 = vor.u32 %v1632_v21, %v1629_v63  ;;  %v1642_v46 = vrot.slane %v1640_v23, 4  ;;  %v8630_v60 = vcombine.low %v1615_v42, %v1625_v3  ;;  %v10777_v27 = vld [vmem:[#allocation2 + $0x70] sm:$0xf]  ;;  %v10786_v18 = vld [vmem:[#allocation2 + $0x64] sm:$0xf] }
  0xdf   : > { %v8638_v61 = vcombine.low %v1727_v51, %v1730_v6  ;;  %v1457_v25 = vld [vmem:[#allocation2 + $0x74] sm:$0x1]  ;;  %v1638_v26 = vrot.slane %v1636_v11, 5  ;;  %v10781_v62 = vsel %vm10108_vm7, %v8567_v16, %v1733_v52  ;;  %v1735_v31 = vrot.slane %v1733_v52, 4  ;;  %v10797_v11 = vld [vmem:[#allocation2 + $0x68] sm:$0x1] }
  0xe0   : > { %v8716_v48 = vcombine.low %v10775_v4, %v10777_v27  ;;  %v1634_v43 = vrot.slane %v1633_v35, 4  ;;  %v1646_v29 = vshll.u32 %v1457_v25, 16  ;;  %2062 = vrot.lane.b32.xlu0 %v8630_v60, %s9911_s17  ;;  %v1736_v33 = vrot.slane %v1457_v25, 5  ;;  %v2685_v42 = vld [vmem:[#allocation2 + $0x74] sm:$0x1]  ;;  %v10791_v51 = vpop.permute.xlu0 %1838 }
  0xe1   : > { %v2717_v2 = vshrl.u32 %v2670_v20, 16  ;;  %v1643_v55 = vor.u32 %v1642_v46, %v1638_v26  ;;  %v2720_v19 = vshll.u32 %v2670_v20, 16  ;;  %v2726_v16 = vshll.u32 %v10771_v30, 16  ;;  %v2885_v35 = vld [vmem:[#allocation2 + $0x6c] sm:$0xe] }
  0xe2   : > { %2024 = vrot.lane.b32.xlu1 %v8623_v8, %s9907_s13  ;;  %v2730_v39 = vshrl.u32 %v10771_v30, 16  ;;  %v1639_v15 = vsel %vm10128_vm11, %v1634_v43, %v1638_v26  ;;  %v1648_v63 = vrot.slane %v1646_v29, 5  ;;  %v1737_v21 = vsel %vm10108_vm7, %v1735_v31, %v1736_v33  ;;  %v10799_v8 = vpop.permute.xlu1 %1800 }
  0xe3   : > { %v2719_v23 = vrot.slane %v2717_v2, 4  ;;  %v1644_v3 = vrot.slane %v1643_v55, 4  ;;  %v8639_v52 = vcombine.low %v10781_v62, %v1737_v21  ;;  %v2722_v6 = vrot.slane %v2720_v19, 5 }
  0xe4   : > { %v2728_v20 = vrot.slane %v2726_v16, 5  ;;  %2102 = vrot.lane.b32.xlu0 %v8638_v61, %s9909_s15  ;;  %v2732_v46 = vrot.slane %v2730_v39, 4  ;;  %v2736_v60 = vshll.u32 %v2685_v42, 16  ;;  %v2695_v25 = vrot.slane %v2693_v57, 4  ;;  %v10808_v62 = vpop.permute.xlu0 %1886  ;;  %v2884_v16 = vld [vmem:[#allocation2 + $0x60] sm:$0xe] }
  0xe5   : > { %v2696_v26 = vshll.u32 %v10735_v13, 16  ;;  %v1649_v31 = vsel %vm10128_vm11, %v1644_v3, %v1648_v63  ;;  %v2723_v43 = vor.u32 %v2722_v6, %v2719_v23  ;;  %v2702_v29 = vshll.u32 %v10786_v18, 16 }
  0xe6   : > { %v2706_v33 = vshrl.u32 %v10786_v18, 16  ;;  %v8631_v2 = vcombine.low %v1639_v15, %v1649_v31  ;;  %v2733_v55 = vor.u32 %v2732_v46, %v2728_v20  ;;  %v2738_v19 = vrot.slane %v2736_v60, 5  ;;  %v10814_v56 = vpop.permute.xlu1 %1840 }
  0xe7   : > { %v2698_v61 = vrot.slane %v2696_v26, 5  ;;  %v2724_v39 = vrot.slane %v2723_v43, 4  ;;  %v2704_v57 = vrot.slane %v2702_v29, 5  ;;  %v2712_v13 = vshll.u32 %v10797_v11, 16 }
  0xe8   : > { %v2708_v21 = vrot.slane %v2706_v33, 4  ;;  %2064 = vrot.lane.b32.xlu1 %v8631_v2, %s9911_s17  ;;  %v2734_v63 = vrot.slane %v2733_v55, 4  ;;  %v8669_v3 = vrot.slane %v2885_v35, 9  ;;  %v2925_v6 = vrot.slane %v10771_v30, 5 }
  0xe9   : > { %v2699_v23 = vor.u32 %v2698_v61, %v2695_v25  ;;  %v2729_v15 = vsel %vm10128_vm11, %v2724_v39, %v2728_v20  ;;  %v2714_v60 = vrot.slane %v2712_v13, 5  ;;  %v2928_v26 = vrot.slane %v2685_v42, 5  ;;  %v355_v25 = vld [vmem:[%s10106_s9 + $0x4c] sm:$0xf]  ;;  %v10824_v61 = vpop.permute.xlu0 %1926 }
  0xea   : > { %v2709_v46 = vor.u32 %v2708_v21, %v2704_v57  ;;  %v2739_v31 = vsel %vm10128_vm11, %v2734_v63, %v2738_v19  ;;  %v2926_v29 = vsel %vm10108_vm7, %v8669_v3, %v2925_v6  ;;  %v2927_v33 = vrot.slane %v2925_v6, 4  ;;  %v760_v63 = vld [vmem:[#allocation2 + $0x78] sm:$0xf] }
  0xeb   : > { %v2700_v43 = vrot.slane %v2699_v23, 4  ;;  %v8701_v35 = vcombine.low %v2729_v15, %v2739_v31  ;;  %v8668_v30 = vrot.slane %v2884_v16, 9  ;;  %v2918_v55 = vrot.slane %v10786_v18, 5  ;;  %v2992_v31 = vld [vmem:[#allocation2 + $0x74] sm:$0x1] }
  0xec   : > { %v2710_v2 = vrot.slane %v2709_v46, 4  ;;  %2104 = vrot.lane.b32.xlu1 %v8639_v52, %s9909_s15  ;;  %v2929_v20 = vsel %vm10108_vm7, %v2927_v33, %v2928_v26  ;;  %v2921_v19 = vrot.slane %v10797_v11, 5  ;;  %v525_v39 = vshrl.u32 %v354_v0, 16  ;;  %v764_v26 = vld [vmem:[#allocation2 + $0x80] sm:$0x1] }
  0xed   : > { %v2705_v42 = vsel %vm10128_vm11, %v2700_v43, %v2704_v57  ;;  %v8709_v13 = vcombine.low %v2926_v29, %v2929_v20  ;;  %v2919_v18 = vsel %vm10108_vm7, %v8668_v30, %v2918_v55  ;;  %v2920_v16 = vrot.slane %v2918_v55, 4  ;;  %v10836_v57 = vpop.permute.xlu1 %1888 }
  0xee   : > { %v2715_v21 = vsel %vm10128_vm11, %v2710_v2, %v2714_v60  ;;  %v527_v52 = vrot.slane %v525_v39, 7  ;;  %v528_v3 = vshll.u32 %v354_v0, 16  ;;  %v533_v6 = vshrl.u32 %v355_v25, 16 }
  0xef   : > { %v8700_v23 = vcombine.low %v2705_v42, %v2715_v21  ;;  %v2922_v15 = vsel %vm10108_vm7, %v2920_v16, %v2921_v19  ;;  %v536_v11 = vshll.u32 %v355_v25, 16  ;;  %v3001_v46 = vshrl.u32 %v10775_v4, 16  ;;  %v3192_v25 = vld [vmem:[#allocation2 + $0x6c] sm:$0xe]  ;;  %v10845_v42 = vpop.permute.xlu0 %1966 }
  0xf0   : > { %v3004_v60 = vshll.u32 %v10775_v4, 16  ;;  %3646 = vrot.lane.b32.xlu1 %v8701_v35, %s9905_s11  ;;  %v8708_v43 = vcombine.low %v2919_v18, %v2922_v15  ;;  %v530_v29 = vor.u32 %v528_v3, %v527_v52  ;;  %v531_v0 = vrot.slane %v527_v52, 4 }
  0xf1   : > { %3644 = vrot.lane.b32.xlu0 %v8700_v23, %s9905_s11  ;;  %v535_v33 = vrot.slane %v533_v6, 7  ;;  %v3003_v2 = vrot.slane %v3001_v46, 4  ;;  %v3014_v55 = vshrl.u32 %v10777_v27, 16  ;;  %v2152_v35 = vsel %vm2148_vm1, %v10762_v38, %v10614_v41 }
  0xf2   : > { %v3006_v30 = vrot.slane %v3004_v60, 5  ;;  %v761_v19 = vsel %vm10122_vm10, %v530_v29, %v760_v63  ;;  %v10854_v21 = vsel %vm2165_vm2, %v2152_v35, %v10720_v32  ;;  %v3010_v16 = vshll.u32 %v10777_v27, 16 }
  0xf3   : > { %v538_v20 = vor.u32 %v536_v11, %v535_v33  ;;  %v540_v39 = vrot.slane %v535_v33, 4  ;;  %762 = vst [vmem:[#allocation2 + $0x78] sm:$0xf] %v761_v19  ;;  %v3016_v23 = vrot.slane %v3014_v55, 4  ;;  %v3020_v38 = vshll.u32 %v2992_v31, 16  ;;  %v10888_v29 = vpop.permute.xlu0 %2014 }
  0xf4   : > { %v3007_v18 = vor.u32 %v3006_v30, %v3003_v2  ;;  %3686 = vrot.lane.b32.xlu1 %v8709_v13, %s9904_s10  ;;  %v10868_v32 = vsel %vm2106_vm14, %v8570_v9, %v10764_v37  ;;  %v9595_v13 = vld [vmem:[%s13918_s1 + $0x10] ss:$0 sps:$4 sm:$0x33]   ;;  %v10873_v52 = vpop.permute.xlu1 %1928  ;;  %v3012_v6 = vrot.slane %v3010_v16, 5  ;;  %v2167_v17 = vsel %vm2165_vm2, %v10741_v53, %v10748_v24 }
  0xf5   : > { %3684 = vrot.lane.b32.xlu0 %v8708_v43, %s9904_s10  ;;  %v539_v63 = vsel %vm10136_vm12, %v531_v0, %v538_v20  ;;  %v765_v41 = vsel %vm10152_vm13, %v540_v39, %v764_v26  ;;  %v3022_v9 = vrot.slane %v3020_v38, 5  ;;  %v2184_v37 = vsel %vm13927_vm3, %v2167_v17, %v10643_v14  ;;  %v10886_v43 = vld [vmem:[%s10106_s9 + $0x54] sm:$0xf]  ;;  %9523 = vmatprep.subr.msk.bf16.mxu0 %vm2294_vm4, %v9595_v13 }
  0xf6   : > { %763 = vst.msk [vmem:[#allocation2 + $0x7c] sm:$0xf] %vm224_vm0, %v539_v63  ;;  %766 = vst [vmem:[#allocation2 + $0x80] sm:$0x1] %v765_v41  ;;  %v3008_v3 = vrot.slane %v3007_v18, 4  ;;  %v8676_v15 = vrot.slane %v3192_v25, 9  ;;  %v3017_v60 = vor.u32 %v3016_v23, %v3012_v6  ;;  %v10902_v24 = vsel %vm2106_vm14, %v8571_v40, %v10799_v8 }
  0xf7   : > { %v3226_v11 = vrot.slane %v10777_v27, 5  ;;  %v3229_v26 = vrot.slane %v2992_v31, 5  ;;  %vm2199_vm5 = vcmask 195584   ;;  %vm2216_vm8 = vcmask 228352  }
  0xf8   : > { %v3013_v46 = vsel %vm10128_vm11, %v3008_v3, %v3012_v6  ;;  %v10904_v31 = vpop.permute.xlu1 %1968  ;;  %v3018_v0 = vrot.slane %v3017_v60, 4  ;;  %v2201_v4 = vsel %vm2199_vm5, %v2184_v37, %v10622_v59  ;;  %v2296_v27 = vsel %vm2294_vm4, %v9595_v13, 0 }
  0xf9   : > { %3732 = vrot.lane.b32.xlu0 %v8716_v48, %s9906_s12  ;;  %v3227_v14 = vsel %vm10108_vm7, %v8676_v15, %v3226_v11  ;;  %v3228_v53 = vrot.slane %v3226_v11, 4  ;;  %v10913_v45 = vsel %vm2216_vm8, %v2201_v4, %v10773_v49  ;;  %9436 = vmatpush3.bf16.msra.mxu0 %v2296_v27  ;;  %v542_v54 = vshrl.u32 %v356_v50, 16  ;;  %v10920_v38 = vpop.permute.xlu0 %2054 }
  0xfa   : > { %v2978_v48 = vld [vmem:[#allocation2 + $0x78] sm:$0xf]  ;;  %v545_v40 = vshll.u32 %v356_v50, 16  ;;  %v3023_v59 = vsel %vm10128_vm11, %v3018_v0, %v3022_v9  ;;  %v550_v18 = vshrl.u32 %v10886_v43, 16  ;;  %v767_v50 = vld [vmem:[#allocation2 + $0x84] sm:$0xf] }
  0xfb   : > { %v3193_v33 = vld [vmem:[#allocation2 + $0x78] sm:$0xe]  ;;  %v3230_v2 = vsel %vm10108_vm7, %v3228_v53, %v3229_v26  ;;  %v3025_v8 = vshrl.u32 %v2978_v48, 16  ;;  %v3028_v30 = vshll.u32 %v2978_v48, 16  ;;  %v8724_v19 = vcombine.low %v3013_v46, %v3023_v59 }
  0xfc   : > { %v8677_v55 = vrot.slane %v3193_v33, 9  ;;  %v8732_v35 = vcombine.low %v3227_v14, %v3230_v2  ;;  %v544_v39 = vrot.slane %v542_v54, 7  ;;  %v10918_v16 = vpop.permute.xlu1 %2016  ;;  %v3284_v46 = vld [vmem:[#allocation2 + $0x78] sm:$0xf]  ;;  %v552_v27 = vrot.slane %v550_v18, 7 }
  0xfd   : > { %v2979_v25 = vld [vmem:[#allocation2 + $0x7c] sm:$0xf]  ;;  %v2993_v20 = vld [vmem:[#allocation2 + $0x80] sm:$0x1]  ;;  %v3027_v49 = vrot.slane %v3025_v8, 4  ;;  %v3030_v23 = vrot.slane %v3028_v30, 5  ;;  %3772 = vrot.lane.b32.xlu0 %v8724_v19, %s9910_s16 }
  0xfe   : > { %v3038_v63 = vshrl.u32 %v2979_v25, 16  ;;  %v8717_v41 = vcombine.low %v2978_v48, %v2979_v25  ;;  %v3034_v13 = vshll.u32 %v2979_v25, 16  ;;  %v3044_v3 = vshll.u32 %v2993_v20, 16  ;;  %v10928_v0 = vld [vmem:[#allocation2 + $0x7c] sm:$0xf] }
  0xff   : > { %v3233_v6 = vrot.slane %v2979_v25, 5  ;;  %v3236_v17 = vrot.slane %v2993_v20, 5  ;;  %v3031_v9 = vor.u32 %v3030_v23, %v3027_v49  ;;  %v547_v15 = vor.u32 %v545_v40, %v544_v39  ;;  %v10942_v20 = vpop.permute.xlu0 %2094 }
 0x100   : > { %3734 = vrot.lane.b32.xlu1 %v8717_v41, %s9906_s12  ;;  %v3040_v37 = vrot.slane %v3038_v63, 4  ;;  %v548_v11 = vrot.slane %v544_v39, 4  ;;  %v3036_v60 = vrot.slane %v3034_v13, 5  ;;  %v3046_v26 = vrot.slane %v3044_v3, 5  ;;  %v10936_v30 = vpop.permute.xlu1 %2056  ;;  %v3300_v63 = vld [vmem:[#allocation2 + $0x80] sm:$0x1] }
 0x101   : > { %v10926_v14 = vsel %vm10108_vm7, %v8677_v55, %v3233_v6  ;;  %v3235_v53 = vrot.slane %v3233_v6, 4  ;;  %v3032_v4 = vrot.slane %v3031_v9, 4  ;;  %v553_v48 = vshll.u32 %v10886_v43, 16  ;;  %3812 = vrot.lane.b32.xlu0 %v8732_v35, %s9908_s14 }
 0x102   : > { %v768_v33 = vsel %vm10122_vm10, %v547_v15, %v767_v50  ;;  %v3041_v2 = vor.u32 %v3040_v37, %v3036_v60  ;;  %v3309_v40 = vshrl.u32 %v3284_v46, 16  ;;  %v3312_v8 = vshll.u32 %v3284_v46, 16 }
 0x103   : > { %v3237_v54 = vsel %vm10108_vm7, %v3235_v53, %v3236_v17  ;;  %769 = vst [vmem:[#allocation2 + $0x84] sm:$0xf] %v768_v33  ;;  %v3037_v59 = vsel %vm10128_vm11, %v3032_v4, %v3036_v60  ;;  %v555_v43 = vor.u32 %v553_v48, %v552_v27  ;;  %v3322_v25 = vshrl.u32 %v10928_v0, 16 }
 0x104   : > { %v8733_v55 = vcombine.low %v10926_v14, %v3237_v54  ;;  %v3042_v19 = vrot.slane %v3041_v2, 4  ;;  %v3311_v39 = vrot.slane %v3309_v40, 4  ;;  %v3314_v18 = vrot.slane %v3312_v8, 5  ;;  %v10969_v15 = vpop.permute.xlu1 %2096 }
 0x105   : > { %v8740_v35 = vcombine.low %v3284_v46, %v10928_v0  ;;  %v556_v49 = vsel %vm10136_vm12, %v548_v11, %v555_v43  ;;  %vm2233_vm6 = vcmask 261120   ;;  %vm2277_vm9 = vcmask 293888  }
 0x106   : > { %v2139_v23 = vsel %vm2131_vm15, %v10902_v24, %v10814_v56  ;;  %v3047_v41 = vsel %vm10128_vm11, %v3042_v19, %v3046_v26  ;;  %770 = vst.msk [vmem:[#allocation2 + $0x88] sm:$0xf] %vm224_vm0, %v556_v49  ;;  %v2235_v13 = vsel %vm2233_vm6, %v10913_v45, %v10667_v7  ;;  %v2186_v3 = vsel %vm13927_vm3, %v10854_v21, %v10692_v10  ;;  %v771_v24 = vld [vmem:[#allocation2 + $0x8c] sm:$0x1]  ;;  %v3500_v21 = vld [vmem:[#allocation2 + $0x78] sm:$0xe] }
 0x107   : > { %3860 = vrot.lane.b32.xlu0 %v8740_v35, %s9907_s13  ;;  %v2137_v56 = vsel %vm2131_vm15, %v10868_v32, %v10791_v51  ;;  %v8725_v6 = vcombine.low %v3037_v59, %v3047_v41  ;;  %9437 = vmatprep.mubr.msk.bf16.mxu0 %vm2277_vm9, %v2235_v13  ;;  %v2203_v17 = vsel %vm2199_vm5, %v2186_v3, %v10639_v28  ;;  %v557_v50 = vrot.slane %v552_v27, 4 }
 0x108   : > { %v3315_v9 = vor.u32 %v3314_v18, %v3311_v39  ;;  %v2220_v7 = vsel %vm2216_vm8, %v2203_v17, %v10743_v58  ;;  %v3318_v45 = vshll.u32 %v10928_v0, 16  ;;  %v3324_v37 = vrot.slane %v3322_v25, 4 }
 0x109   : > { %v3328_v10 = vshll.u32 %v3300_v63, 16  ;;  %3774 = vrot.lane.b32.xlu1 %v8725_v6, %s9910_s16  ;;  %v2237_v32 = vsel %vm2233_vm6, %v2220_v7, %v10700_v22  ;;  %v772_v28 = vsel %vm10152_vm13, %v557_v50, %v771_v24  ;;  %v2156_v58 = vsel %vm2148_vm1, %v2139_v23, %v10836_v57  ;;  %v10978_v60 = vpop.permute.xlu0 %1802  ;;  %v10995_v23 = vpop.permute.xlu1 %1804 }
 0x10a   : > { %v3286_v51 = vld [vmem:[#allocation2 + $0x84] sm:$0xf]  ;;  %v3316_v11 = vrot.slane %v3315_v9, 4  ;;  %9438 = vmatmul.mubr.msk.bf16.vlgmr.msra.gmra.mrb[0].mxu0 %vm2277_vm9, %v2237_v32  ;;  %773 = vst [vmem:[#allocation2 + $0x8c] sm:$0x1] %v772_v28  ;;  %v3320_v53 = vrot.slane %v3318_v45, 5  ;;  %v2154_v22 = vsel %vm2148_vm1, %v2137_v56, %v10808_v62  ;;  %v10991_v62 = vsel %vm2165_vm2, %v2156_v58, %v10873_v52 }
 0x10b   : > { %v3501_v46 = vld [vmem:[#allocation2 + $0x84] sm:$0xe]  ;;  %v3333_v26 = vshrl.u32 %v3286_v51, 16  ;;  %v3336_v14 = vshll.u32 %v3286_v51, 16  ;;  %v3330_v4 = vrot.slane %v3328_v10, 5  ;;  %v8684_v48 = vrot.slane %v3500_v21, 9 }
 0x10c   : > { %v8685_v27 = vrot.slane %v3501_v46, 9  ;;  %v3534_v33 = vrot.slane %v10928_v0, 5  ;;  %v3321_v57 = vsel %vm10128_vm11, %v3316_v11, %v3320_v53  ;;  %v3325_v40 = vor.u32 %v3324_v37, %v3320_v53  ;;  %v2674_v49 = vld [vmem:[#allocation2 + $0x84] sm:$0xf]  ;;  %v2672_v28 = vld [vmem:[#allocation2 + $0x78] sm:$0xf] }
 0x10d   : > { %v3335_v2 = vrot.slane %v3333_v26, 4  ;;  %v3338_v54 = vrot.slane %v3336_v14, 5  ;;  %3814 = vrot.lane.b32.xlu1 %v8733_v55, %s9908_s14  ;;  %v3287_v8 = vld [vmem:[#allocation2 + $0x88] sm:$0xf]  ;;  %v3537_v25 = vrot.slane %v3300_v63, 5  ;;  %v10993_v19 = vpop.permute.xlu0 %1842  ;;  %v2171_v63 = vsel %vm2165_vm2, %v2154_v22, %v10824_v61 }
 0x10e   : > { %v3535_v59 = vsel %vm10108_vm7, %v8684_v48, %v3534_v33  ;;  %v3536_v43 = vrot.slane %v3534_v33, 4  ;;  %v3346_v0 = vshrl.u32 %v3287_v8, 16  ;;  %v8741_v39 = vcombine.low %v3286_v51, %v3287_v8  ;;  %v11001_v6 = vld [vmem:[#allocation2 + $0x88] sm:$0xf]  ;;  %v11018_v48 = vpop.permute.xlu1 %1844 }
 0x10f   : > { %v3339_v18 = vor.u32 %v3338_v54, %v3335_v2  ;;  %v3342_v35 = vshll.u32 %v3287_v8, 16  ;;  %v3326_v55 = vrot.slane %v3325_v40, 4  ;;  %v3541_v41 = vrot.slane %v3287_v8, 5 }
 0x110   : > { %v3538_v13 = vsel %vm10108_vm7, %v3536_v43, %v3537_v25  ;;  %v3348_v56 = vrot.slane %v3346_v0, 4  ;;  %v2765_v37 = vshrl.u32 %v2674_v49, 16  ;;  %v2768_v46 = vshll.u32 %v2674_v49, 16 }
 0x111   : > { %v3340_v3 = vrot.slane %v3339_v18, 4  ;;  %v3344_v52 = vrot.slane %v3342_v35, 5  ;;  %v8756_v24 = vcombine.low %v3535_v59, %v3538_v13  ;;  %3862 = vrot.lane.b32.xlu1 %v8741_v39, %s9907_s13  ;;  %v3301_v17 = vld [vmem:[#allocation2 + $0x8c] sm:$0x1]  ;;  %v3331_v50 = vsel %vm10128_vm11, %v3326_v55, %v3330_v4  ;;  %v11010_v61 = vpop.permute.xlu0 %1890 }
 0x112   : > { %v3542_v9 = vsel %vm10108_vm7, %v8685_v27, %v3541_v41  ;;  %v3543_v7 = vrot.slane %v3541_v41, 4  ;;  %v11008_v45 = vld [vmem:[#allocation2 + $0x8c] sm:$0x1]  ;;  %v3352_v51 = vshll.u32 %v3301_v17, 16  ;;  %v8748_v32 = vcombine.low %v3321_v57, %v3331_v50  ;;  %v2673_v27 = vld [vmem:[#allocation2 + $0x7c] sm:$0xf] }
 0x113   : > { %v3345_v10 = vsel %vm10128_vm11, %v3340_v3, %v3344_v52  ;;  %v3349_v21 = vor.u32 %v3348_v56, %v3344_v52  ;;  %v3544_v11 = vrot.slane %v3301_v17, 5  ;;  %v2767_v58 = vrot.slane %v2765_v37, 4  ;;  %v11022_v57 = vld [vmem:[#allocation2 + $0x80] sm:$0x1]  ;;  %v2887_v52 = vld [vmem:[#allocation2 + $0x84] sm:$0xe] }
 0x114   : > { %v2774_v26 = vshll.u32 %v11001_v6, 16  ;;  %v3354_v53 = vrot.slane %v3352_v51, 5  ;;  %3900 = vrot.lane.b32.xlu0 %v8748_v32, %s9911_s17  ;;  %v2778_v4 = vshrl.u32 %v11001_v6, 16  ;;  %v2784_v22 = vshll.u32 %v11008_v45, 16 }
 0x115   : > { %v3350_v14 = vrot.slane %v3349_v21, 4  ;;  %v3545_v33 = vsel %vm10108_vm7, %v3543_v7, %v3544_v11  ;;  %v2770_v2 = vrot.slane %v2768_v46, 5  ;;  %v2741_v40 = vshrl.u32 %v2672_v28, 16  ;;  %v11026_v49 = vpop.permute.xlu0 %1930  ;;  %v2886_v7 = vld [vmem:[#allocation2 + $0x78] sm:$0xe] }
 0x116   : > { %v2776_v54 = vrot.slane %v2774_v26, 5  ;;  %v8757_v59 = vcombine.low %v3542_v9, %v3545_v33  ;;  %v2780_v43 = vrot.slane %v2778_v4, 4  ;;  %v2786_v25 = vrot.slane %v2784_v22, 5  ;;  %v358_v46 = vld [vmem:[%s10106_s9 + $0x58] sm:$0xf] }
 0x117   : > { %v3355_v8 = vsel %vm10128_vm11, %v3350_v14, %v3354_v53  ;;  %v2771_v39 = vor.u32 %v2770_v2, %v2767_v58  ;;  %v2743_v18 = vrot.slane %v2741_v40, 4  ;;  %v2744_v35 = vshll.u32 %v2672_v28, 16  ;;  %v11036_v51 = vpop.permute.xlu1 %1892 }
 0x118   : > { %v8749_v0 = vcombine.low %v3345_v10, %v3355_v8  ;;  %3940 = vrot.lane.b32.xlu0 %v8756_v24, %s9909_s15  ;;  %v2781_v55 = vor.u32 %v2780_v43, %v2776_v54  ;;  %v2750_v41 = vshll.u32 %v2673_v27, 16  ;;  %v2754_v13 = vshrl.u32 %v2673_v27, 16 }
 0x119   : > { %v2760_v3 = vshll.u32 %v11022_v57, 16  ;;  %v2772_v56 = vrot.slane %v2771_v39, 4  ;;  %v2746_v17 = vrot.slane %v2744_v35, 5  ;;  %v2190_v50 = vsel %vm13927_vm3, %v10991_v62, %v10904_v31  ;;  %v11048_v22 = vpop.permute.xlu0 %1970 }
 0x11a   : > { %3902 = vrot.lane.b32.xlu1 %v8749_v0, %s9911_s17  ;;  %v2188_v9 = vsel %vm13927_vm3, %v2171_v63, %v10845_v42  ;;  %v2782_v24 = vrot.slane %v2781_v55, 4  ;;  %v2752_v37 = vrot.slane %v2750_v41, 5  ;;  %v2756_v10 = vrot.slane %v2754_v13, 4 }
 0x11b   : > { %v2762_v21 = vrot.slane %v2760_v3, 5  ;;  %v2777_v32 = vsel %vm10128_vm11, %v2772_v56, %v2776_v54  ;;  %v2747_v28 = vor.u32 %v2746_v17, %v2743_v18  ;;  %v8671_v11 = vrot.slane %v2887_v52, 9  ;;  %v774_v52 = vld [vmem:[#allocation2 + $0x90] sm:$0xf] }
 0x11c   : > { %v2939_v58 = vrot.slane %v11001_v6, 5  ;;  %v2787_v31 = vsel %vm10128_vm11, %v2782_v24, %v2786_v25  ;;  %v2757_v62 = vor.u32 %v2756_v10, %v2752_v37  ;;  %v2942_v42 = vrot.slane %v11008_v45, 5  ;;  %v359_v45 = vld [vmem:[%s10106_s9 + $0x5c] sm:$0xf]  ;;  %v11060_v25 = vld [vmem:[#allocation2 + $0x84] sm:$0xf] }
 0x11d   : > { %v8670_v63 = vrot.slane %v2886_v7, 9  ;;  %v8703_v26 = vcombine.low %v2777_v32, %v2787_v31  ;;  %v2748_v14 = vrot.slane %v2747_v28, 4  ;;  %v2932_v33 = vrot.slane %v2673_v27, 5 }
 0x11e   : > { %3942 = vrot.lane.b32.xlu1 %v8757_v59, %s9909_s15  ;;  %v2940_v53 = vsel %vm10108_vm7, %v8671_v11, %v2939_v58  ;;  %v2941_v4 = vrot.slane %v2939_v58, 4  ;;  %v2758_v6 = vrot.slane %v2757_v62, 4  ;;  %v2935_v2 = vrot.slane %v11022_v57, 5  ;;  %v2994_v11 = vld [vmem:[#allocation2 + $0x8c] sm:$0x1] }
 0x11f   : > { %v2207_v54 = vsel %vm2199_vm5, %v2190_v50, %v10918_v16  ;;  %v2753_v40 = vsel %vm10128_vm11, %v2748_v14, %v2752_v37  ;;  %v2205_v59 = vsel %vm2199_vm5, %v2188_v9, %v10888_v29  ;;  %v559_v43 = vshrl.u32 %v358_v46, 16  ;;  %v2981_v29 = vld [vmem:[#allocation2 + $0x88] sm:$0xf]  ;;  %v11074_v37 = vpop.permute.xlu0 %2018 }
 0x120   : > { %v2943_v8 = vsel %vm10108_vm7, %v2941_v4, %v2942_v42  ;;  %v2763_v27 = vsel %vm10128_vm11, %v2758_v6, %v2762_v21  ;;  %v2933_v16 = vsel %vm10108_vm7, %v8670_v63, %v2932_v33  ;;  %v2934_v0 = vrot.slane %v2932_v33, 4  ;;  %v11066_v39 = vpop.permute.xlu1 %1932 }
 0x121   : > { %v8711_v57 = vcombine.low %v2940_v53, %v2943_v8  ;;  %v8702_v18 = vcombine.low %v2753_v40, %v2763_v27  ;;  %v561_v35 = vrot.slane %v559_v43, 7  ;;  %v562_v55 = vshll.u32 %v358_v46, 16  ;;  %v778_v46 = vld [vmem:[#allocation2 + $0x98] sm:$0x1]  ;;  %v11099_v43 = vld [vmem:[%s10106_s9 + $0x64] sm:$0xf] }
 0x122   : > { %3650 = vrot.lane.b32.xlu1 %v8703_v26, %s9905_s11  ;;  %v567_v41 = vshrl.u32 %v359_v45, 16  ;;  %v2936_v13 = vsel %vm10108_vm7, %v2934_v0, %v2935_v2  ;;  %v570_v3 = vshll.u32 %v359_v45, 16  ;;  %v3049_v56 = vshrl.u32 %v11060_v25, 16  ;;  %v3194_v26 = vld [vmem:[#allocation2 + $0x84] sm:$0xe] }
 0x123   : > { %v3052_v17 = vshll.u32 %v11060_v25, 16  ;;  %3648 = vrot.lane.b32.xlu0 %v8702_v18, %s9905_s11  ;;  %v8710_v50 = vcombine.low %v2933_v16, %v2936_v13  ;;  %v564_v9 = vor.u32 %v562_v55, %v561_v35  ;;  %v565_v7 = vrot.slane %v561_v35, 4  ;;  %v9711_v35 = vld [vmem:[#allocation2 + $0x30] sm:$0xf]  ;;  %v9712_v55 = vld [vmem:[#allocation2 + $0x34] sm:$0xf] }
 0x124   : > { %v569_v24 = vrot.slane %v567_v41, 7  ;;  %v3051_v10 = vrot.slane %v3049_v56, 4  ;;  %v3062_v32 = vshrl.u32 %v2981_v29, 16  ;;  %v8718_v28 = vcombine.low %v11060_v25, %v2981_v29  ;;  %v11077_v58 = vpop.permute.xlu1 %1972  ;;  %v9611_v56 = vld [vmem:[%s13918_s1 + $0x8] sm:$0xff]  }
 0x125   : > { %v3054_v21 = vrot.slane %v3052_v17, 5  ;;  %v775_v62 = vsel %vm10122_vm10, %v564_v9, %v774_v52  ;;  %v2224_v42 = vsel %vm2216_vm8, %v2207_v54, %v10936_v30  ;;  %v2222_v63 = vsel %vm2216_vm8, %v2205_v59, %v10920_v38  ;;  %v360_v54 = vld [vmem:[%s10106_s9 + $0x60] sm:$0xf] }
 0x126   : > { %3690 = vrot.lane.b32.xlu1 %v8711_v57, %s9904_s10  ;;  %v572_v31 = vor.u32 %v570_v3, %v569_v24  ;;  %776 = vst [vmem:[#allocation2 + $0x90] sm:$0xf] %v775_v62  ;;  %v574_v14 = vrot.slane %v569_v24, 4  ;;  %v3058_v4 = vshll.u32 %v2981_v29, 16  ;;  %v3064_v6 = vrot.slane %v3062_v32, 4  ;;  %v9610_v52 = vld [vmem:[%s13918_s1] sm:$0xff]  }
 0x127   : > { %v3055_v53 = vor.u32 %v3054_v21, %v3051_v10  ;;  %3688 = vrot.lane.b32.xlu0 %v8710_v50, %s9904_s10  ;;  %v3068_v2 = vshll.u32 %v2994_v11, 16  ;;  %v2241_v30 = vsel %vm2233_vm6, %v2224_v42, %v10969_v15  ;;  %v2239_v38 = vsel %vm2233_vm6, %v2222_v63, %v10942_v20  ;;  %v11107_v16 = vpop.permute.xlu0 %2058  ;;  %9453 = vmatprep.subr.bf16.mxu1 %v9610_v52  ;;  %v781_v63 = vld [vmem:[#allocation2 + $0x9c] sm:$0xf] }
 0x128   : > { %v573_v33 = vsel %vm10136_vm12, %v565_v7, %v572_v31  ;;  %v779_v45 = vsel %vm10152_vm13, %v574_v14, %v778_v46  ;;  %v3060_v8 = vrot.slane %v3058_v4, 5  ;;  %v8678_v59 = vrot.slane %v3194_v26, 9  ;;  %9441 = vmatprep.mubr.msk.bf16.mxu0 %vm2277_vm9, %v2239_v38  ;;  %9454 = vmatpush3.bf16.msra.mxu1 %v9610_v52 }
 0x129   : > { %777 = vst.msk [vmem:[#allocation2 + $0x94] sm:$0xf] %vm224_vm0, %v573_v33  ;;  %v3056_v40 = vrot.slane %v3055_v53, 4  ;;  %780 = vst [vmem:[#allocation2 + $0x98] sm:$0x1] %v779_v45  ;;  %v3070_v25 = vrot.slane %v3068_v2, 5  ;;  %9442 = vmatmul.mubr.msk.bf16.gmra.mrb[4].mxu0 %vm2277_vm9, %v2241_v30  ;;  %v13953_v20 = vcombine.low %v10426_v12, %v10435_v47  ;;  %v8572_v41 = vcombine.low %v9711_v35, %v9712_v55 }
 0x12a   : > { %v3240_v27 = vrot.slane %v2981_v29, 5  ;;  %v3243_v15 = vrot.slane %v2994_v11, 5  ;;  %v3065_v18 = vor.u32 %v3064_v6, %v3060_v8  ;;  %v576_v13 = vshrl.u32 %v360_v54, 16  ;;  %v11111_v29 = vpop.permute.xlu1 %2020  ;;  %9455 = vmatprep.subr.bf16.mxu1 %v9611_v56 }
 0x12b   : > { %v2124_v57 = vsel %vm2106_vm14, %v13953_v20, %v10995_v23  ;;  %v3061_v0 = vsel %vm10128_vm11, %v3056_v40, %v3060_v8  ;;  %3736 = vrot.lane.b32.xlu0 %v8718_v28, %s9906_s12  ;;  %v579_v47 = vshll.u32 %v360_v54, 16  ;;  %v584_v23 = vshrl.u32 %v11099_v43, 16  ;;  %v11143_v4 = vpop.permute.xlu0 %2098 }
 0x12c   : > { %v11116_v3 = vsel %vm10108_vm7, %v8678_v59, %v3240_v27  ;;  %v3242_v12 = vrot.slane %v3240_v27, 4  ;;  %v3066_v17 = vrot.slane %v3065_v18, 4  ;;  %v2121_v50 = vsel %vm2106_vm14, %v8572_v41, %v10978_v60  ;;  %9456 = vmatpush3.bf16.msra.mxu1 %v9611_v56 }
 0x12d   : > { %v578_v9 = vrot.slane %v576_v13, 7  ;;  %v587_v7 = vshll.u32 %v11099_v43, 16  ;;  %v2982_v24 = vld [vmem:[#allocation2 + $0x90] sm:$0xf]  ;;  %v11130_v32 = vrot.slane %v584_v23, 7  ;;  %v11134_v28 = vsel %vm2131_vm15, %v2124_v57, %v11018_v48 }
 0x12e   : > { %v3195_v10 = vld [vmem:[#allocation2 + $0x90] sm:$0xe]  ;;  %v3244_v21 = vsel %vm10108_vm7, %v3242_v12, %v3243_v15  ;;  %v11138_v11 = vsel %vm2131_vm15, %v2121_v50, %v10993_v19  ;;  %v3073_v60 = vshrl.u32 %v2982_v24, 16  ;;  %v3076_v31 = vshll.u32 %v2982_v24, 16  ;;  %v11148_v54 = vpop.permute.xlu1 %2060 }
 0x12f   : > { %v3071_v62 = vsel %vm10128_vm11, %v3066_v17, %v3070_v25  ;;  %v8679_v42 = vrot.slane %v3195_v10, 9  ;;  %v8734_v14 = vcombine.low %v11116_v3, %v3244_v21  ;;  %v581_v53 = vor.u32 %v579_v47, %v578_v9  ;;  %v9612_v19 = vld [vmem:[%s13918_s1 + $0x10] ss:$0 sps:$4 sm:$0x33]   ;;  %v785_v21 = vld [vmem:[#allocation2 + $0xa4] sm:$0x1] }
 0x130   : > { %v2983_v46 = vld [vmem:[#allocation2 + $0x94] sm:$0xf]  ;;  %v8726_v26 = vcombine.low %v3061_v0, %v3071_v62  ;;  %v582_v48 = vrot.slane %v578_v9, 4  ;;  %v3075_v6 = vrot.slane %v3073_v60, 4  ;;  %v3078_v33 = vrot.slane %v3076_v31, 5  ;;  %9524 = vmatprep.subr.msk.bf16.mxu1 %vm2294_vm4, %v9612_v19 }
 0x131   : > { %v3086_v2 = vshrl.u32 %v2983_v46, 16  ;;  %v8719_v30 = vcombine.low %v2982_v24, %v2983_v46  ;;  %v2995_v38 = vld [vmem:[#allocation2 + $0x98] sm:$0x1]  ;;  %v3082_v45 = vshll.u32 %v2983_v46, 16  ;;  %v3247_v8 = vrot.slane %v2983_v46, 5 }
 0x132   : > { %v3092_v40 = vshll.u32 %v2995_v38, 16  ;;  %3776 = vrot.lane.b32.xlu0 %v8726_v26, %s9910_s16  ;;  %v3250_v59 = vrot.slane %v2995_v38, 5  ;;  %v3288_v43 = vld [vmem:[#allocation2 + $0x90] sm:$0xf]  ;;  %v3079_v25 = vor.u32 %v3078_v33, %v3075_v6  ;;  %v589_v15 = vor.u32 %v587_v7, %v11130_v32  ;;  %v11155_v57 = vld [vmem:[#allocation2 + $0x94] sm:$0xf]  ;;  %v11177_v31 = vpop.permute.xlu1 %2100 }
 0x133   : > { %3738 = vrot.lane.b32.xlu1 %v8719_v30, %s9906_s12  ;;  %v3088_v27 = vrot.slane %v3086_v2, 4  ;;  %v782_v20 = vsel %vm10122_vm10, %v581_v53, %v781_v63  ;;  %v3084_v0 = vrot.slane %v3082_v45, 5  ;;  %v11159_v35 = vsel %vm10108_vm7, %v8679_v42, %v3247_v8  ;;  %v11170_v17 = vld [vmem:[#allocation2 + $0x98] sm:$0x1]  ;;  %v3502_v60 = vld [vmem:[#allocation2 + $0x90] sm:$0xe] }
 0x134   : > { %v3094_v18 = vrot.slane %v3092_v40, 5  ;;  %v3249_v55 = vrot.slane %v3247_v8, 4  ;;  %783 = vst [vmem:[#allocation2 + $0x9c] sm:$0xf] %v782_v20  ;;  %v3080_v41 = vrot.slane %v3079_v25, 4  ;;  %v590_v13 = vsel %vm10136_vm12, %v582_v48, %v589_v15 }
 0x135   : > { %v3357_v3 = vshrl.u32 %v3288_v43, 16  ;;  %v3360_v12 = vshll.u32 %v3288_v43, 16  ;;  %v3089_v47 = vor.u32 %v3088_v27, %v3084_v0  ;;  %784 = vst.msk [vmem:[#allocation2 + $0xa0] sm:$0xf] %vm224_vm0, %v590_v13  ;;  %v3370_v52 = vshrl.u32 %v11155_v57, 16 }
 0x136   : > { %v3251_v23 = vsel %vm10108_vm7, %v3249_v55, %v3250_v59  ;;  %3816 = vrot.lane.b32.xlu0 %v8734_v14, %s9908_s14  ;;  %v8742_v56 = vcombine.low %v3288_v43, %v11155_v57  ;;  %v11172_v50 = vpop.permute.xlu0 %1806  ;;  %v3085_v9 = vsel %vm10128_vm11, %v3080_v41, %v3084_v0  ;;  %v591_v42 = vrot.slane %v11130_v32, 4  ;;  %v11208_v0 = vpop.permute.xlu1 %1808 }
 0x137   : > { %v8735_v7 = vcombine.low %v11159_v35, %v3251_v23  ;;  %v3359_v24 = vrot.slane %v3357_v3, 4  ;;  %v3362_v10 = vrot.slane %v3360_v12, 5  ;;  %v3090_v62 = vrot.slane %v3089_v47, 4 }
 0x138   : > { %v3366_v63 = vshll.u32 %v11155_v57, 16  ;;  %v3372_v46 = vrot.slane %v3370_v52, 4  ;;  %v3376_v14 = vshll.u32 %v11170_v17, 16  ;;  %v2160_v53 = vsel %vm2148_vm1, %v11134_v28, %v11036_v51 }
 0x139   : > { %v3363_v26 = vor.u32 %v3362_v10, %v3359_v24  ;;  %v2158_v48 = vsel %vm2148_vm1, %v11138_v11, %v11010_v61  ;;  %v3095_v19 = vsel %vm10128_vm11, %v3090_v62, %v3094_v18  ;;  %v786_v32 = vsel %vm10152_vm13, %v591_v42, %v785_v21 }
 0x13a   : > { %3864 = vrot.lane.b32.xlu0 %v8742_v56, %s9907_s13  ;;  %v3368_v6 = vrot.slane %v3366_v63, 5  ;;  %v8686_v33 = vrot.slane %v3502_v60, 9  ;;  %v8727_v2 = vcombine.low %v3085_v9, %v3095_v19  ;;  %787 = vst [vmem:[#allocation2 + $0xa4] sm:$0x1] %v786_v32  ;;  %v3378_v45 = vrot.slane %v3376_v14, 5  ;;  %v11197_v59 = vpop.permute.xlu0 %1846  ;;  %v11227_v19 = vpop.permute.xlu1 %1848 }
 0x13b   : > { %v3290_v30 = vld [vmem:[#allocation2 + $0x9c] sm:$0xf]  ;;  %v3364_v38 = vrot.slane %v3363_v26, 4  ;;  %v11195_v28 = vsel %vm2165_vm2, %v2160_v53, %v11066_v39  ;;  %v3548_v27 = vrot.slane %v11155_v57, 5  ;;  %v3551_v15 = vrot.slane %v11170_v17, 5 }
 0x13c   : > { %v3503_v51 = vld [vmem:[#allocation2 + $0x9c] sm:$0xe]  ;;  %v3381_v61 = vshrl.u32 %v3290_v30, 16  ;;  %v3384_v11 = vshll.u32 %v3290_v30, 16  ;;  %v3373_v40 = vor.u32 %v3372_v46, %v3368_v6  ;;  %3778 = vrot.lane.b32.xlu1 %v8727_v2, %s9910_s16  ;;  %v3291_v43 = vld [vmem:[#allocation2 + $0xa0] sm:$0xf]  ;;  %v11206_v39 = vsel %vm2165_vm2, %v2158_v48, %v11026_v49 }
 0x13d   : > { %v8687_v8 = vrot.slane %v3503_v51, 9  ;;  %v3369_v25 = vsel %vm10128_vm11, %v3364_v38, %v3368_v6  ;;  %v2678_v20 = vld [vmem:[#allocation2 + $0x9c] sm:$0xf]  ;;  %v3394_v55 = vshrl.u32 %v3291_v43, 16  ;;  %v8743_v41 = vcombine.low %v3290_v30, %v3291_v43  ;;  %v11219_v10 = vld [vmem:[#allocation2 + $0xa0] sm:$0xf] }
 0x13e   : > { %v3383_v18 = vrot.slane %v3381_v61, 4  ;;  %v3386_v35 = vrot.slane %v3384_v11, 5  ;;  %v3390_v13 = vshll.u32 %v3291_v43, 16  ;;  %v3374_v3 = vrot.slane %v3373_v40, 4  ;;  %v11225_v46 = vpop.permute.xlu0 %1894  ;;  %v2676_v30 = vld [vmem:[#allocation2 + $0x90] sm:$0xf] }
 0x13f   : > { %v3555_v12 = vrot.slane %v3291_v43, 5  ;;  %v3549_v47 = vsel %vm10108_vm7, %v8686_v33, %v3548_v27  ;;  %v3396_v23 = vrot.slane %v3394_v55, 4  ;;  %v3550_v52 = vrot.slane %v3548_v27, 4  ;;  %v2677_v11 = vld [vmem:[#allocation2 + $0x94] sm:$0xf] }
 0x140   : > { %v3387_v57 = vor.u32 %v3386_v35, %v3383_v18  ;;  %v2813_v56 = vshrl.u32 %v2678_v20, 16  ;;  %3818 = vrot.lane.b32.xlu1 %v8735_v7, %s9908_s14  ;;  %v3392_v49 = vrot.slane %v3390_v13, 5  ;;  %v3379_v17 = vsel %vm10128_vm11, %v3374_v3, %v3378_v45  ;;  %v11239_v27 = vld [vmem:[#allocation2 + $0x98] sm:$0x1] }
 0x141   : > { %v11217_v9 = vsel %vm10108_vm7, %v8687_v8, %v3555_v12  ;;  %v3557_v24 = vrot.slane %v3555_v12, 4  ;;  %v3303_v21 = vld [vmem:[#allocation2 + $0xa4] sm:$0x1]  ;;  %v8750_v62 = vcombine.low %v3369_v25, %v3379_v17  ;;  %v3552_v42 = vsel %vm10108_vm7, %v3550_v52, %v3551_v15 }
 0x142   : > { %v3388_v60 = vrot.slane %v3387_v57, 4  ;;  %v11223_v63 = vld [vmem:[#allocation2 + $0xa4] sm:$0x1]  ;;  %v2815_v7 = vrot.slane %v2813_v56, 4  ;;  %v3397_v26 = vor.u32 %v3396_v23, %v3392_v49  ;;  %v3400_v14 = vshll.u32 %v3303_v21, 16  ;;  %v11245_v12 = vpop.permute.xlu0 %1934 }
 0x143   : > { %v3558_v53 = vrot.slane %v3303_v21, 5  ;;  %v8758_v48 = vcombine.low %v3549_v47, %v3552_v42  ;;  %3904 = vrot.lane.b32.xlu0 %v8750_v62, %s9911_s17  ;;  %v2816_v6 = vshll.u32 %v2678_v20, 16  ;;  %v2822_v33 = vshll.u32 %v11219_v10, 16  ;;  %v11248_v56 = vpop.permute.xlu1 %1896  ;;  %v2889_v21 = vld [vmem:[#allocation2 + $0x9c] sm:$0xe] }
 0x144   : > { %v3393_v32 = vsel %vm10128_vm11, %v3388_v60, %v3392_v49  ;;  %v2826_v2 = vshrl.u32 %v11219_v10, 16  ;;  %3866 = vrot.lane.b32.xlu1 %v8743_v41, %s9907_s13  ;;  %v3398_v38 = vrot.slane %v3397_v26, 4  ;;  %v3402_v45 = vrot.slane %v3400_v14, 5 }
 0x145   : > { %v3559_v51 = vsel %vm10108_vm7, %v3557_v24, %v3558_v53  ;;  %v2832_v61 = vshll.u32 %v11223_v63, 16  ;;  %v2818_v8 = vrot.slane %v2816_v6, 5  ;;  %v2824_v43 = vrot.slane %v2822_v33, 5 }
 0x146   : > { %v8759_v40 = vcombine.low %v11217_v9, %v3559_v51  ;;  %v2828_v25 = vrot.slane %v2826_v2, 4  ;;  %v3403_v15 = vsel %vm10128_vm11, %v3398_v38, %v3402_v45  ;;  %v2956_v18 = vrot.slane %v11223_v63, 5  ;;  %v363_v51 = vld [vmem:[%s10106_s9 + $0x6c] sm:$0xf] }
 0x147   : > { %v2834_v20 = vrot.slane %v2832_v61, 5  ;;  %v2789_v35 = vshrl.u32 %v2676_v30, 16  ;;  %v8751_v55 = vcombine.low %v3393_v32, %v3403_v15  ;;  %3944 = vrot.lane.b32.xlu0 %v8758_v48, %s9909_s15  ;;  %v2819_v41 = vor.u32 %v2818_v8, %v2815_v7  ;;  %v2888_v7 = vld [vmem:[#allocation2 + $0x90] sm:$0xe]  ;;  %v11268_v61 = vpop.permute.xlu0 %1974 }
 0x148   : > { %v2829_v13 = vor.u32 %v2828_v25, %v2824_v43  ;;  %v2792_v3 = vshll.u32 %v2676_v30, 16  ;;  %v2798_v57 = vshll.u32 %v2677_v11, 16  ;;  %v2802_v23 = vshrl.u32 %v2677_v11, 16  ;;  %v362_v30 = vld [vmem:[%s10106_s9 + $0x68] sm:$0xf] }
 0x149   : > { %v2791_v47 = vrot.slane %v2789_v35, 4  ;;  %v2808_v52 = vshll.u32 %v11239_v27, 16  ;;  %3906 = vrot.lane.b32.xlu1 %v8751_v55, %s9911_s17  ;;  %v2820_v49 = vrot.slane %v2819_v41, 4  ;;  %v2949_v24 = vrot.slane %v11239_v27, 5  ;;  %v11280_v27 = vld [vmem:[#allocation2 + $0x9c] sm:$0xf] }
 0x14a   : > { %v2830_v17 = vrot.slane %v2829_v13, 4  ;;  %v2794_v9 = vrot.slane %v2792_v3, 5  ;;  %v2800_v60 = vrot.slane %v2798_v57, 5  ;;  %v2804_v62 = vrot.slane %v2802_v23, 4  ;;  %v11286_v55 = vld [vmem:[#allocation2 + $0xa0] sm:$0xf] }
 0x14b   : > { %v2810_v42 = vrot.slane %v2808_v52, 5  ;;  %v2194_v63 = vsel %vm13927_vm3, %v11195_v28, %v11077_v58  ;;  %v2825_v26 = vsel %vm10128_vm11, %v2820_v49, %v2824_v43  ;;  %v2192_v48 = vsel %vm13927_vm3, %v11206_v39, %v11048_v22  ;;  %v788_v49 = vld [vmem:[#allocation2 + $0xa8] sm:$0xf] }
 0x14c   : > { %v2835_v14 = vsel %vm10128_vm11, %v2830_v17, %v2834_v20  ;;  %v2795_v53 = vor.u32 %v2794_v9, %v2791_v47  ;;  %v2805_v6 = vor.u32 %v2804_v62, %v2800_v60  ;;  %v8673_v33 = vrot.slane %v2889_v21, 9  ;;  %v11274_v43 = vpop.permute.xlu1 %1936  ;;  %v2996_v62 = vld [vmem:[#allocation2 + $0xa4] sm:$0x1] }
 0x14d   : > { %v8705_v32 = vcombine.low %v2825_v26, %v2835_v14  ;;  %v2953_v2 = vrot.slane %v11219_v10, 5  ;;  %3946 = vrot.lane.b32.xlu1 %v8759_v40, %s9909_s15  ;;  %v8672_v28 = vrot.slane %v2888_v7, 9  ;;  %v2946_v38 = vrot.slane %v2677_v11, 5  ;;  %v792_v14 = vld [vmem:[#allocation2 + $0xb0] sm:$0x1] }
 0x14e   : > { %v2796_v58 = vrot.slane %v2795_v53, 4  ;;  %v2211_v45 = vsel %vm2199_vm5, %v2194_v63, %v11111_v29  ;;  %v2806_v8 = vrot.slane %v2805_v6, 4  ;;  %v2209_v10 = vsel %vm2199_vm5, %v2192_v48, %v11074_v37 }
 0x14f   : > { %v2954_v22 = vsel %vm10108_vm7, %v8673_v33, %v2953_v2  ;;  %v2955_v39 = vrot.slane %v2953_v2, 4  ;;  %v2947_v11 = vsel %vm10108_vm7, %v8672_v28, %v2946_v38  ;;  %v2948_v29 = vrot.slane %v2946_v38, 4  ;;  %v3196_v2 = vld [vmem:[#allocation2 + $0x9c] sm:$0xe] }
 0x150   : > { %v2801_v40 = vsel %vm10128_vm11, %v2796_v58, %v2800_v60  ;;  %v593_v25 = vshrl.u32 %v362_v30, 16  ;;  %v2811_v15 = vsel %vm10128_vm11, %v2806_v8, %v2810_v42  ;;  %v596_v35 = vshll.u32 %v362_v30, 16  ;;  %v11295_v42 = vpop.permute.xlu0 %2022  ;;  %v11301_v53 = vpop.permute.xlu1 %1976  ;;  %v364_v8 = vld [vmem:[%s10106_s9 + $0x70] sm:$0xf] }
 0x151   : > { %v2957_v20 = vsel %vm10108_vm7, %v2955_v39, %v2956_v18  ;;  %v601_v37 = vshrl.u32 %v363_v51, 16  ;;  %3654 = vrot.lane.b32.xlu1 %v8705_v32, %s9905_s11  ;;  %v8704_v41 = vcombine.low %v2801_v40, %v2811_v15  ;;  %v2950_v3 = vsel %vm10108_vm7, %v2948_v29, %v2949_v24  ;;  %v9715_v15 = vld [vmem:[#allocation2 + $0x48] sm:$0xf] }
 0x152   : > { %v8713_v13 = vcombine.low %v2954_v22, %v2957_v20  ;;  %v595_v47 = vrot.slane %v593_v25, 7  ;;  %v8712_v57 = vcombine.low %v2947_v11, %v2950_v3  ;;  %v604_v52 = vshll.u32 %v363_v51, 16  ;;  %v9713_v25 = vld [vmem:[#allocation2 + $0x54] sm:$0xf]  ;;  %v9716_v20 = vld [vmem:[#allocation2 + $0x4c] sm:$0xf] }
 0x153   : > { %v603_v23 = vrot.slane %v601_v37, 7  ;;  %v3097_v17 = vshrl.u32 %v11280_v27, 16  ;;  %3652 = vrot.lane.b32.xlu0 %v8704_v41, %s9905_s11  ;;  %v3100_v21 = vshll.u32 %v11280_v27, 16  ;;  %v3110_v60 = vshrl.u32 %v11286_v55, 16 }
 0x154   : > { %v598_v18 = vor.u32 %v596_v35, %v595_v47  ;;  %v599_v9 = vrot.slane %v595_v47, 4  ;;  %v8720_v7 = vcombine.low %v11280_v27, %v11286_v55  ;;  %v2228_v26 = vsel %vm2216_vm8, %v2211_v45, %v11148_v54  ;;  %v9714_v27 = vld [vmem:[#allocation2 + $0x58] sm:$0xf]  ;;  %v11324_v35 = vld [vmem:[%s10106_s9 + $0x74] sm:$0xf]  ;;  %v11326_v37 = vpop.permute.xlu0 %2062  ;;  %v11330_v47 = vpop.permute.xlu1 %2024 }
 0x155   : > { %v606_v63 = vor.u32 %v604_v52, %v603_v23  ;;  %v3099_v24 = vrot.slane %v3097_v17, 4  ;;  %3694 = vrot.lane.b32.xlu1 %v8713_v13, %s9904_s10  ;;  %v3102_v32 = vrot.slane %v3100_v21, 5  ;;  %v2226_v6 = vsel %vm2216_vm8, %v2209_v10, %v11107_v16 }
 0x156   : > { %v789_v48 = vsel %vm10122_vm10, %v598_v18, %v788_v49  ;;  %v608_v33 = vrot.slane %v603_v23, 4  ;;  %v3106_v54 = vshll.u32 %v11286_v55, 16  ;;  %v3112_v58 = vrot.slane %v3110_v60, 4 }
 0x157   : > { %v607_v30 = vsel %vm10136_vm12, %v599_v9, %v606_v63  ;;  %790 = vst [vmem:[#allocation2 + $0xa8] sm:$0xf] %v789_v48  ;;  %v3116_v28 = vshll.u32 %v2996_v62, 16  ;;  %3692 = vrot.lane.b32.xlu0 %v8712_v57, %s9904_s10  ;;  %v3103_v45 = vor.u32 %v3102_v32, %v3099_v24  ;;  %v2245_v16 = vsel %vm2233_vm6, %v2228_v26, %v11177_v31 }
 0x158   : > { %791 = vst.msk [vmem:[#allocation2 + $0xac] sm:$0xf] %vm224_vm0, %v607_v30  ;;  %v793_v38 = vsel %vm10152_vm13, %v608_v33, %v792_v14  ;;  %v2243_v51 = vsel %vm2233_vm6, %v2226_v6, %v11143_v4  ;;  %v3108_v22 = vrot.slane %v3106_v54, 5  ;;  %v8680_v10 = vrot.slane %v3196_v2, 9 }
 0x159   : > { %794 = vst [vmem:[#allocation2 + $0xb0] sm:$0x1] %v793_v38  ;;  %v3118_v39 = vrot.slane %v3116_v28, 5  ;;  %v3254_v40 = vrot.slane %v11286_v55, 5  ;;  %9445 = vmatprep.mubr.msk.bf16.mxu0 %vm2277_vm9, %v2243_v51  ;;  %v3104_v11 = vrot.slane %v3103_v45, 4  ;;  %v3257_v29 = vrot.slane %v2996_v62, 5 }
 0x15a   : > { %9446 = vmatmul.mubr.msk.bf16.gmra.mrb[8].mxu0 %vm2277_vm9, %v2245_v16  ;;  %v8575_v31 = vcombine.low %v9713_v25, %v9714_v27  ;;  %v8574_v4 = vcombine.low %v9715_v15, %v9716_v20  ;;  %v3113_v41 = vor.u32 %v3112_v58, %v3108_v22  ;;  %v610_v3 = vshrl.u32 %v364_v8, 16  ;;  %v11353_v58 = vpop.permute.xlu0 %2102  ;;  %v11355_v16 = vpop.permute.xlu1 %2064 }
 0x15b   : > { %v3255_v55 = vsel %vm10108_vm7, %v8680_v10, %v3254_v40  ;;  %v3256_v13 = vrot.slane %v3254_v40, 4  ;;  %3740 = vrot.lane.b32.xlu0 %v8720_v7, %s9906_s12  ;;  %v3109_v57 = vsel %vm10128_vm11, %v3104_v11, %v3108_v22  ;;  %v613_v49 = vshll.u32 %v364_v8, 16 }
 0x15c   : > { %v2130_v23 = vsel %vm2106_vm14, %v8575_v31, %v11208_v0  ;;  %v2127_v52 = vsel %vm2106_vm14, %v8574_v4, %v11172_v50  ;;  %v3114_v17 = vrot.slane %v3113_v41, 4  ;;  %v612_v9 = vrot.slane %v610_v3, 7 }
 0x15d   : > { %v3258_v18 = vsel %vm10108_vm7, %v3256_v13, %v3257_v29  ;;  %v618_v21 = vshrl.u32 %v11324_v35, 16  ;;  %v621_v24 = vshll.u32 %v11324_v35, 16  ;;  %v11345_v7 = vsel %vm2131_vm15, %v2130_v23, %v11227_v19 }
 0x15e   : > { %v2986_v60 = vld [vmem:[#allocation2 + $0xa8] sm:$0xf]  ;;  %v8736_v63 = vcombine.low %v3255_v55, %v3258_v18  ;;  %v11349_v50 = vsel %vm2131_vm15, %v2127_v52, %v11197_v59  ;;  %v3119_v48 = vsel %vm10128_vm11, %v3114_v17, %v3118_v39  ;;  %v795_v59 = vld [vmem:[#allocation2 + $0xb4] sm:$0xf]  ;;  %v615_v39 = vor.u32 %v613_v49, %v612_v9 }
 0x15f   : > { %v3197_v62 = vld [vmem:[#allocation2 + $0xa8] sm:$0xe]  ;;  %v2987_v0 = vld [vmem:[#allocation2 + $0xac] sm:$0xf]  ;;  %v3121_v26 = vshrl.u32 %v2986_v60, 16  ;;  %v3124_v14 = vshll.u32 %v2986_v60, 16  ;;  %v8728_v54 = vcombine.low %v3109_v57, %v3119_v48 }
 0x160   : > { %v8681_v32 = vrot.slane %v3197_v62, 9  ;;  %v3134_v6 = vshrl.u32 %v2987_v0, 16  ;;  %v8721_v33 = vcombine.low %v2986_v60, %v2987_v0  ;;  %v2997_v2 = vld [vmem:[#allocation2 + $0xb0] sm:$0x1]  ;;  %v3130_v30 = vshll.u32 %v2987_v0, 16 }
 0x161   : > { %v3123_v19 = vrot.slane %v3121_v26, 4  ;;  %v3126_v28 = vrot.slane %v3124_v14, 5  ;;  %v3140_v38 = vshll.u32 %v2997_v2, 16  ;;  %v3261_v45 = vrot.slane %v2987_v0, 5  ;;  %3780 = vrot.lane.b32.xlu0 %v8728_v54, %s9910_s16  ;;  %v3292_v10 = vld [vmem:[#allocation2 + $0xa8] sm:$0xf]  ;;  %v11373_v0 = vpop.permute.xlu1 %2104 }
 0x162   : > { %3742 = vrot.lane.b32.xlu1 %v8721_v33, %s9906_s12  ;;  %v3132_v51 = vrot.slane %v3130_v30, 5  ;;  %v3136_v8 = vrot.slane %v3134_v6, 4  ;;  %v3264_v22 = vrot.slane %v2997_v2, 5  ;;  %v3293_v27 = vld [vmem:[#allocation2 + $0xac] sm:$0xf]  ;;  %v616_v15 = vrot.slane %v612_v9, 4 }
 0x163   : > { %v3127_v40 = vor.u32 %v3126_v28, %v3123_v19  ;;  %v3142_v11 = vrot.slane %v3140_v38, 5  ;;  %v11361_v29 = vsel %vm10108_vm7, %v8681_v32, %v3261_v45  ;;  %v3263_v25 = vrot.slane %v3261_v45, 4  ;;  %v3304_v49 = vld [vmem:[#allocation2 + $0xb0] sm:$0x1]  ;;  %v11369_v17 = vpop.permute.xlu0 %3644  ;;  %v799_v62 = vld [vmem:[#allocation2 + $0xbc] sm:$0x1] }
 0x164   : > { %v3137_v31 = vor.u32 %v3136_v8, %v3132_v51  ;;  %v620_v20 = vrot.slane %v618_v21, 7  ;;  %v796_v4 = vsel %vm10122_vm10, %v615_v39, %v795_v59  ;;  %v3405_v55 = vshrl.u32 %v3292_v10, 16  ;;  %v3504_v48 = vld [vmem:[#allocation2 + $0xa8] sm:$0xe] }
 0x165   : > { %v3128_v35 = vrot.slane %v3127_v40, 4  ;;  %v3265_v41 = vsel %vm10108_vm7, %v3263_v25, %v3264_v22  ;;  %797 = vst [vmem:[#allocation2 + $0xb4] sm:$0xf] %v796_v4  ;;  %v3408_v13 = vshll.u32 %v3292_v10, 16  ;;  %3820 = vrot.lane.b32.xlu0 %v8736_v63, %s9908_s14  ;;  %v3418_v52 = vshrl.u32 %v3293_v27, 16 }
 0x166   : > { %v3138_v3 = vrot.slane %v3137_v31, 4  ;;  %v8737_v57 = vcombine.low %v11361_v29, %v3265_v41  ;;  %v623_v23 = vor.u32 %v621_v24, %v620_v20  ;;  %v3407_v9 = vrot.slane %v3405_v55, 4  ;;  %v11390_v8 = vld [vmem:[#allocation2 + $0xa8] sm:$0xf]  ;;  %v11406_v31 = vpop.permute.xlu1 %3646 }
 0x167   : > { %v3133_v18 = vsel %vm10128_vm11, %v3128_v35, %v3132_v51  ;;  %v3410_v21 = vrot.slane %v3408_v13, 5  ;;  %v8744_v60 = vcombine.low %v3292_v10, %v3293_v27  ;;  %v625_v24 = vrot.slane %v620_v20, 4 }
 0x168   : > { %v3143_v26 = vsel %vm10128_vm11, %v3138_v3, %v3142_v11  ;;  %v624_v63 = vsel %vm10136_vm12, %v616_v15, %v623_v23  ;;  %v3414_v14 = vshll.u32 %v3293_v27, 16  ;;  %v3420_v33 = vrot.slane %v3418_v52, 4 }
 0x169   : > { %v8729_v32 = vcombine.low %v3133_v18, %v3143_v26  ;;  %798 = vst.msk [vmem:[#allocation2 + $0xb8] sm:$0xf] %vm224_vm0, %v624_v63  ;;  %v3411_v6 = vor.u32 %v3410_v21, %v3407_v9  ;;  %v3424_v2 = vshll.u32 %v3304_v49, 16  ;;  %3868 = vrot.lane.b32.xlu0 %v8744_v60, %s9907_s13  ;;  %v800_v30 = vsel %vm10152_vm13, %v625_v24, %v799_v62 }
 0x16a   : > { %v3416_v54 = vrot.slane %v3414_v14, 5  ;;  %v2164_v19 = vsel %vm2148_vm1, %v11345_v7, %v11248_v56  ;;  %v2162_v28 = vsel %vm2148_vm1, %v11349_v50, %v11225_v46  ;;  %801 = vst [vmem:[#allocation2 + $0xbc] sm:$0x1] %v800_v30  ;;  %v8688_v59 = vrot.slane %v3504_v48, 9  ;;  %v11400_v7 = vpop.permute.xlu0 %3684 }
 0x16b   : > { %3782 = vrot.lane.b32.xlu1 %v8729_v32, %s9910_s16  ;;  %v3412_v38 = vrot.slane %v3411_v6, 4  ;;  %v3426_v45 = vrot.slane %v3424_v2, 5  ;;  %v3562_v51 = vrot.slane %v3293_v27, 5  ;;  %v3565_v40 = vrot.slane %v3304_v49, 5 }
 0x16c   : > { %v3294_v22 = vld [vmem:[#allocation2 + $0xb4] sm:$0xf]  ;;  %v3421_v39 = vor.u32 %v3420_v33, %v3416_v54  ;;  %v11394_v56 = vsel %vm2165_vm2, %v2164_v19, %v11274_v43  ;;  %v11398_v46 = vsel %vm2165_vm2, %v2162_v28, %v11245_v12  ;;  %v2837_v55 = vshrl.u32 %v11390_v8, 16 }
 0x16d   : > { %v3505_v10 = vld [vmem:[#allocation2 + $0xb4] sm:$0xe]  ;;  %v3429_v50 = vshrl.u32 %v3294_v22, 16  ;;  %v3432_v11 = vshll.u32 %v3294_v22, 16  ;;  %v3417_v29 = vsel %vm10128_vm11, %v3412_v38, %v3416_v54  ;;  %v3563_v43 = vsel %vm10108_vm7, %v8688_v59, %v3562_v51  ;;  %v11426_v54 = vpop.permute.xlu1 %3686 }
 0x16e   : > { %v8689_v25 = vrot.slane %v3505_v10, 9  ;;  %v11404_v27 = vld [vmem:[#allocation2 + $0xb4] sm:$0xf]  ;;  %v3422_v15 = vrot.slane %v3421_v39, 4  ;;  %v3564_v20 = vrot.slane %v3562_v51, 4  ;;  %v2840_v49 = vshll.u32 %v11390_v8, 16  ;;  %v11421_v48 = vpop.permute.xlu0 %3732 }
 0x16f   : > { %v2861_v12 = vshrl.u32 %v11404_v27, 16  ;;  %3822 = vrot.lane.b32.xlu1 %v8737_v57, %s9908_s14  ;;  %v3431_v4 = vrot.slane %v3429_v50, 4  ;;  %v3434_v35 = vrot.slane %v3432_v11, 5  ;;  %v2864_v41 = vshll.u32 %v11404_v27, 16  ;;  %v11434_v10 = vld [vmem:[#allocation2 + $0xac] sm:$0xf] }
 0x170   : > { %v3295_v13 = vld [vmem:[#allocation2 + $0xb8] sm:$0xf]  ;;  %v3427_v3 = vsel %vm10128_vm11, %v3422_v15, %v3426_v45  ;;  %v3566_v23 = vsel %vm10108_vm7, %v3564_v20, %v3565_v40 }
 0x171   : > { %v2863_v52 = vrot.slane %v2861_v12, 4  ;;  %v3442_v18 = vshrl.u32 %v3295_v13, 16  ;;  %v8745_v9 = vcombine.low %v3294_v22, %v3295_v13  ;;  %v3435_v21 = vor.u32 %v3434_v35, %v3431_v4  ;;  %v3305_v60 = vld [vmem:[#allocation2 + $0xbc] sm:$0x1]  ;;  %v11419_v24 = vld [vmem:[#allocation2 + $0xb8] sm:$0xf] }
 0x172   : > { %v3438_v57 = vshll.u32 %v3295_v13, 16  ;;  %v8752_v62 = vcombine.low %v3417_v29, %v3427_v3  ;;  %v3569_v26 = vrot.slane %v3295_v13, 5  ;;  %v8760_v63 = vcombine.low %v3563_v43, %v3566_v23  ;;  %v11424_v30 = vld [vmem:[#allocation2 + $0xbc] sm:$0x1]  ;;  %v11442_v3 = vpop.permute.xlu0 %3772 }
 0x173   : > { %v2866_v14 = vrot.slane %v2864_v41, 5  ;;  %3870 = vrot.lane.b32.xlu1 %v8745_v9, %s9907_s13  ;;  %v3436_v32 = vrot.slane %v3435_v21, 4  ;;  %v3444_v33 = vrot.slane %v3442_v18, 4  ;;  %v3448_v2 = vshll.u32 %v3305_v60, 16  ;;  %v2891_v21 = vld [vmem:[#allocation2 + $0xb4] sm:$0xe] }
 0x174   : > { %v3440_v6 = vrot.slane %v3438_v57, 5  ;;  %3908 = vrot.lane.b32.xlu0 %v8752_v62, %s9911_s17  ;;  %v3570_v19 = vsel %vm10108_vm7, %v8689_v25, %v3569_v26  ;;  %v3571_v28 = vrot.slane %v3569_v26, 4  ;;  %v3572_v38 = vrot.slane %v3305_v60, 5  ;;  %v2690_v25 = vld [vmem:[#allocation2 + $0xb0] sm:$0x1] }
 0x175   : > { %v2867_v45 = vor.u32 %v2866_v14, %v2863_v52  ;;  %v3450_v22 = vrot.slane %v3448_v2, 5  ;;  %v2870_v39 = vshll.u32 %v11419_v24, 16  ;;  %v2874_v11 = vshrl.u32 %v11419_v24, 16  ;;  %v2890_v26 = vld [vmem:[#allocation2 + $0xa8] sm:$0xe] }
 0x176   : > { %v3441_v59 = vsel %vm10128_vm11, %v3436_v32, %v3440_v6  ;;  %v3445_v51 = vor.u32 %v3444_v33, %v3440_v6  ;;  %v3573_v40 = vsel %vm10108_vm7, %v3571_v28, %v3572_v38  ;;  %v2880_v29 = vshll.u32 %v11424_v30, 16 }
 0x177   : > { %v2868_v50 = vrot.slane %v2867_v45, 4  ;;  %v8761_v43 = vcombine.low %v3570_v19, %v3573_v40  ;;  %v2872_v20 = vrot.slane %v2870_v39, 5  ;;  %v2839_v12 = vrot.slane %v2837_v55, 4  ;;  %v11449_v55 = vpop.permute.xlu1 %3734  ;;  %v11468_v39 = vpop.permute.xlu0 %3812 }
 0x178   : > { %v3446_v15 = vrot.slane %v3445_v51, 4  ;;  %3948 = vrot.lane.b32.xlu0 %v8760_v63, %s9909_s15  ;;  %v2876_v4 = vrot.slane %v2874_v11, 4  ;;  %v2882_v35 = vrot.slane %v2880_v29, 5  ;;  %v2842_v41 = vrot.slane %v2840_v49, 5  ;;  %v367_v29 = vld [vmem:[%s10106_s9 + $0x7c] sm:$0xf] }
 0x179   : > { %v2846_v13 = vshll.u32 %v11434_v10, 16  ;;  %v2873_v52 = vsel %vm10128_vm11, %v2868_v50, %v2872_v20  ;;  %v2850_v18 = vshrl.u32 %v11434_v10, 16  ;;  %v2856_v9 = vshll.u32 %v2690_v25, 16 }
 0x17a   : > { %v3451_v23 = vsel %vm10128_vm11, %v3446_v15, %v3450_v22  ;;  %v2877_v60 = vor.u32 %v2876_v4, %v2872_v20  ;;  %v2843_v62 = vor.u32 %v2842_v41, %v2839_v12  ;;  %v2198_v32 = vsel %vm13927_vm3, %v11394_v56, %v11301_v53  ;;  %v366_v22 = vld [vmem:[%s10106_s9 + $0x78] sm:$0xf]  ;;  %v11482_v41 = vld [vmem:[#allocation2 + $0xb4] sm:$0xf]  ;;  %s9843_s9 = sshll.u32 %s9913_s6, 4  ;;  %s9844_s9 = int_to_ptr.vmem [resolvable:$false] %s9843_s9 }
 0x17b   : > { %v8753_v57 = vcombine.low %v3441_v59, %v3451_v23  ;;  %v2848_v49 = vrot.slane %v2846_v13, 5  ;;  %v2852_v63 = vrot.slane %v2850_v18, 4  ;;  %v2858_v14 = vrot.slane %v2856_v9, 5  ;;  %v11473_v15 = vpop.permute.xlu1 %3774  ;;  %v11486_v9 = vld [vmem:[#allocation2 + $0xb8] sm:$0xf] }
 0x17c   : > { %v2196_v6 = vsel %vm13927_vm3, %v11398_v46, %v11268_v61  ;;  %v2878_v33 = vrot.slane %v2877_v60, 4  ;;  %v2844_v2 = vrot.slane %v2843_v62, 4  ;;  %v8675_v19 = vrot.slane %v2891_v21, 9 }
 0x17d   : > { %3910 = vrot.lane.b32.xlu1 %v8753_v57, %s9911_s17  ;;  %v2967_v28 = vrot.slane %v11419_v24, 5  ;;  %v2853_v38 = vor.u32 %v2852_v63, %v2848_v49  ;;  %v2970_v45 = vrot.slane %v11424_v30, 5  ;;  %v8674_v59 = vrot.slane %v2890_v26, 9  ;;  %v802_v26 = vld [vmem:[#allocation2 + $0xc0] sm:$0xf] }
 0x17e   : > { %v2960_v51 = vrot.slane %v11434_v10, 5  ;;  %v2883_v53 = vsel %vm10128_vm11, %v2878_v33, %v2882_v35  ;;  %v2849_v61 = vsel %vm10128_vm11, %v2844_v2, %v2848_v49  ;;  %v2963_v12 = vrot.slane %v2690_v25, 5  ;;  %v11499_v33 = vpop.permute.xlu0 %3860 }
 0x17f   : > { %v2968_v56 = vsel %vm10108_vm7, %v8675_v19, %v2967_v28  ;;  %v2969_v46 = vrot.slane %v2967_v28, 4  ;;  %v8707_v40 = vcombine.low %v2873_v52, %v2883_v53  ;;  %v2854_v50 = vrot.slane %v2853_v38, 4 }
 0x180   : > { %v2961_v30 = vsel %vm10108_vm7, %v8674_v59, %v2960_v51  ;;  %v2962_v11 = vrot.slane %v2960_v51, 4  ;;  %v2215_v4 = vsel %vm2199_vm5, %v2198_v32, %v11330_v47  ;;  %v2213_v35 = vsel %vm2199_vm5, %v2196_v6, %v11295_v42  ;;  %v2998_v6 = vld [vmem:[#allocation2 + $0xbc] sm:$0x1]  ;;  %v11501_v59 = vpop.permute.xlu1 %3814 }
 0x181   : > { %3950 = vrot.lane.b32.xlu1 %v8761_v43, %s9909_s15  ;;  %v2971_v20 = vsel %vm10108_vm7, %v2969_v46, %v2970_v45  ;;  %v2859_v13 = vsel %vm10128_vm11, %v2854_v50, %v2858_v14  ;;  %v627_v52 = vshrl.u32 %v366_v22, 16  ;;  %v630_v18 = vshll.u32 %v366_v22, 16  ;;  %v806_v45 = vld [vmem:[#allocation2 + $0xc8] sm:$0x1]  ;;  %v3198_v46 = vld [vmem:[#allocation2 + $0xb4] sm:$0xe] }
 0x182   : > { %v8715_v23 = vcombine.low %v2968_v56, %v2971_v20  ;;  %v8706_v43 = vcombine.low %v2849_v61, %v2859_v13  ;;  %v2964_v25 = vsel %vm10108_vm7, %v2962_v11, %v2963_v12  ;;  %v635_v21 = vshrl.u32 %v367_v29, 16 }
 0x183   : > { %v638_v57 = vshll.u32 %v367_v29, 16  ;;  %v8714_v47 = vcombine.low %v2961_v30, %v2964_v25  ;;  %v629_v60 = vrot.slane %v627_v52, 7  ;;  %v3145_v42 = vshrl.u32 %v11482_v41, 16  ;;  %v9718_v52 = vld [vmem:[#allocation2 + $0x70] sm:$0xf] }
 0x184   : > { %v3148_v62 = vshll.u32 %v11482_v41, 16  ;;  %3656 = vrot.lane.b32.xlu0 %v8706_v43, %s9905_s11  ;;  %v637_v49 = vrot.slane %v635_v21, 7  ;;  %v3158_v63 = vshrl.u32 %v11486_v9, 16  ;;  %v8722_v14 = vcombine.low %v11482_v41, %v11486_v9  ;;  %v9719_v43 = vld [vmem:[#allocation2 + $0x60] sm:$0xf] }
 0x185   : > { %3658 = vrot.lane.b32.xlu1 %v8707_v40, %s9905_s11  ;;  %v2232_v32 = vsel %vm2216_vm8, %v2215_v4, %v11355_v16  ;;  %v632_v2 = vor.u32 %v630_v18, %v629_v60  ;;  %v633_v19 = vrot.slane %v629_v60, 4  ;;  %v3147_v28 = vrot.slane %v3145_v42, 4  ;;  %v9720_v25 = vld [vmem:[#allocation2 + $0x64] sm:$0xf]  ;;  %s9845_s11 = scalar_lea.vmem %s9844_s9, 8192 }
 0x186   : > { %v3150_v38 = vrot.slane %v3148_v62, 5  ;;  %v640_v51 = vor.u32 %v638_v57, %v637_v49  ;;  %v2230_v53 = vsel %vm2216_vm8, %v2213_v35, %v11326_v37  ;;  %v642_v61 = vrot.slane %v637_v49, 4  ;;  %v11523_v18 = vpop.permute.xlu0 %3900  ;;  %v11533_v62 = vld [vmem:[#allocation2 + $0xd0] sm:$0xf] }
 0x187   : > { %v3154_v56 = vshll.u32 %v11486_v9, 16  ;;  %v803_v16 = vsel %vm10122_vm10, %v632_v2, %v802_v26  ;;  %v3160_v40 = vrot.slane %v3158_v63, 4  ;;  %v3164_v50 = vshll.u32 %v2998_v6, 16 }
 0x188   : > { %v3151_v22 = vor.u32 %v3150_v38, %v3147_v28  ;;  %3696 = vrot.lane.b32.xlu0 %v8714_v47, %s9904_s10  ;;  %v641_v30 = vsel %vm10136_vm12, %v633_v19, %v640_v51  ;;  %804 = vst [vmem:[#allocation2 + $0xc0] sm:$0xf] %v803_v16  ;;  %v807_v37 = vsel %vm10152_vm13, %v642_v61, %v806_v45  ;;  %v8682_v35 = vrot.slane %v3198_v46, 9  ;;  %v11528_v47 = vpop.permute.xlu1 %3862 }
 0x189   : > { %3698 = vrot.lane.b32.xlu1 %v8715_v23, %s9904_s10  ;;  %v3156_v11 = vrot.slane %v3154_v56, 5  ;;  %v2249_v29 = vsel %vm2233_vm6, %v2232_v32, %v11373_v0  ;;  %805 = vst.msk [vmem:[#allocation2 + $0xc4] sm:$0xf] %vm224_vm0, %v641_v30  ;;  %808 = vst [vmem:[#allocation2 + $0xc8] sm:$0x1] %v807_v37  ;;  %v3166_v12 = vrot.slane %v3164_v50, 5  ;;  %v2247_v4 = vsel %vm2233_vm6, %v2230_v53, %v11353_v58 }
 0x18a   : > { %v3152_v20 = vrot.slane %v3151_v22, 4  ;;  %v3268_v13 = vrot.slane %v11486_v9, 5  ;;  %v3271_v5 = vrot.slane %v2998_v6, 5  ;;  %9449 = vmatprep.mubr.msk.bf16.mxu0 %vm2277_vm9, %v2247_v4  ;;  %v9717_v23 = vld [vmem:[#allocation2 + $0x6c] sm:$0xf]  ;;  %v8692_v21 = vcombine.low %v9719_v43, %v9720_v25  ;;  %v11550_v22 = vpop.permute.xlu0 %3940 }
 0x18b   : > { %v3161_v41 = vor.u32 %v3160_v40, %v3156_v11  ;;  %v8693_v0 = vcombine.low %v9717_v23, %v9718_v52  ;;  %9450 = vmatmul.mubr.msk.bf16.gmra.mrb[12].mxu0 %vm2277_vm9, %v2249_v29  ;;  %v3477_v57 = vshrl.u32 %v11516_v34, 16  ;;  %v3480_v58 = vshll.u32 %v11516_v34, 16 }
 0x18c   : > { %3744 = vrot.lane.b32.xlu0 %v8722_v14, %s9906_s12  ;;  %v3157_v9 = vsel %vm10128_vm11, %v3152_v20, %v3156_v11  ;;  %v3270_v42 = vrot.slane %v3268_v13, 4  ;;  %v3269_v49 = vsel %vm10108_vm7, %v8682_v35, %v3268_v13  ;;  %v3958_v14 = vsel %vm2106_vm14, %v8692_v21, %v11369_v17  ;;  %v11553_v11 = vpop.permute.xlu1 %3902 }
 0x18d   : > { %v3162_v60 = vrot.slane %v3161_v41, 4  ;;  %v3961_v26 = vsel %vm2106_vm14, %v8693_v0, %v11406_v31  ;;  %v3479_v6 = vrot.slane %v3477_v57, 4  ;;  %v3482_v38 = vrot.slane %v3480_v58, 5 }
 0x18e   : > { %v3272_v32 = vsel %vm10108_vm7, %v3270_v42, %v3271_v5  ;;  %v3490_v45 = vshrl.u32 %v11533_v62, 16  ;;  %v8747_v51 = vcombine.low %v11516_v34, %v11533_v62  ;;  %v3983_v16 = vsel %vm2131_vm15, %v3961_v26, %v11426_v54 }
 0x18f   : > { %v3167_v63 = vsel %vm10128_vm11, %v3162_v60, %v3166_v12  ;;  %v2990_v2 = vld [vmem:[#allocation2 + $0xc0] sm:$0xf]  ;;  %v8738_v46 = vcombine.low %v3269_v49, %v3272_v32  ;;  %v3981_v5 = vsel %vm2131_vm15, %v3958_v14, %v11400_v7  ;;  %v3483_v7 = vor.u32 %v3482_v38, %v3479_v6 }
 0x190   : > { %v8730_v19 = vcombine.low %v3157_v9, %v3167_v63  ;;  %v3199_v28 = vld [vmem:[#allocation2 + $0xc0] sm:$0xe]  ;;  %v2991_v31 = vld [vmem:[#allocation2 + $0xc4] sm:$0xf]  ;;  %v3169_v53 = vshrl.u32 %v2990_v2, 16  ;;  %v3172_v61 = vshll.u32 %v2990_v2, 16 }
 0x191   : > { %v2999_v56 = vld [vmem:[#allocation2 + $0xc8] sm:$0x1]  ;;  %v3182_v17 = vshrl.u32 %v2991_v31, 16  ;;  %v8723_v40 = vcombine.low %v2990_v2, %v2991_v31  ;;  %v3178_v50 = vshll.u32 %v2991_v31, 16  ;;  %v3296_v37 = vld [vmem:[#allocation2 + $0xc0] sm:$0xf] }
 0x192   : > { %v3188_v30 = vshll.u32 %v2999_v56, 16  ;;  %3784 = vrot.lane.b32.xlu0 %v8730_v19, %s9910_s16  ;;  %v3171_v29 = vrot.slane %v3169_v53, 4  ;;  %v3174_v20 = vrot.slane %v3172_v61, 5  ;;  %v8683_v12 = vrot.slane %v3199_v28, 9  ;;  %v11555_v35 = vld [vmem:[#allocation2 + $0xc4] sm:$0xf]  ;;  %v11572_v28 = vpop.permute.xlu1 %3942 }
 0x193   : > { %v3275_v4 = vrot.slane %v2991_v31, 5  ;;  %3746 = vrot.lane.b32.xlu1 %v8723_v40, %s9906_s12  ;;  %v3180_v54 = vrot.slane %v3178_v50, 5  ;;  %v3184_v41 = vrot.slane %v3182_v17, 4  ;;  %v3278_v13 = vrot.slane %v2999_v56, 5  ;;  %v11563_v9 = vld [vmem:[#allocation2 + $0xd4] sm:$0x1] }
 0x194   : > { %v3175_v23 = vor.u32 %v3174_v20, %v3171_v29  ;;  %v3190_v52 = vrot.slane %v3188_v30, 5  ;;  %v3453_v43 = vshrl.u32 %v3296_v37, 16  ;;  %v3456_v21 = vshll.u32 %v3296_v37, 16  ;;  %v3306_v19 = vld [vmem:[#allocation2 + $0xc8] sm:$0x1]  ;;  %s9912_s12 = smov 64  }
 0x195   : > { %v3277_v0 = vrot.slane %v3275_v4, 4  ;;  %v3185_v25 = vor.u32 %v3184_v41, %v3180_v54  ;;  %v3466_v57 = vshrl.u32 %v11555_v35, 16  ;;  %v8746_v58 = vcombine.low %v3296_v37, %v11555_v35  ;;  %v11567_v26 = vpop.permute.xlu0 %3648  ;;  %v3506_v29 = vld [vmem:[#allocation2 + $0xc0] sm:$0xe] }
 0x196   : > { %3824 = vrot.lane.b32.xlu0 %v8738_v46, %s9908_s14  ;;  %v3176_v60 = vrot.slane %v3175_v23, 4  ;;  %v3276_v42 = vsel %vm10108_vm7, %v8683_v12, %v3275_v4  ;;  %v3455_v49 = vrot.slane %v3453_v43, 4  ;;  %v3458_v14 = vrot.slane %v3456_v21, 5 }
 0x197   : > { %v3186_v63 = vrot.slane %v3185_v25, 4  ;;  %v3279_v32 = vsel %vm10108_vm7, %v3277_v0, %v3278_v13  ;;  %v3486_v2 = vshll.u32 %v11533_v62, 16  ;;  %v3492_v53 = vrot.slane %v3490_v45, 4 }
 0x198   : > { %v3181_v31 = vsel %vm10128_vm11, %v3176_v60, %v3180_v54  ;;  %v3496_v61 = vshll.u32 %v11563_v9, 16  ;;  %v3462_v6 = vshll.u32 %v11555_v35, 16  ;;  %v3459_v46 = vor.u32 %v3458_v14, %v3455_v49 }
 0x199   : > { %v3191_v38 = vsel %vm10128_vm11, %v3186_v63, %v3190_v52  ;;  %v3488_v56 = vrot.slane %v3486_v2, 5  ;;  %v3468_v17 = vrot.slane %v3466_v57, 4  ;;  %v3484_v50 = vrot.slane %v3483_v7, 4  ;;  %v11581_v20 = vpop.permute.xlu0 %3688  ;;  %v11586_v52 = vld [vmem:[#allocation2 + $0xcc] sm:$0xe] }
 0x19a   : > { %3872 = vrot.lane.b32.xlu0 %v8746_v58, %s9907_s13  ;;  %v8731_v40 = vcombine.low %v3181_v31, %v3191_v38  ;;  %v3464_v30 = vrot.slane %v3462_v6, 5  ;;  %v3472_v37 = vshll.u32 %v3306_v19, 16  ;;  %v8739_v45 = vcombine.low %v3276_v42, %v3279_v32  ;;  %v11592_v58 = vpop.permute.xlu1 %3650 }
 0x19b   : > { %v3493_v12 = vor.u32 %v3492_v53, %v3488_v56  ;;  %v3460_v4 = vrot.slane %v3459_v46, 4  ;;  %v3999_v54 = vsel %vm2148_vm1, %v3983_v16, %v11449_v55  ;;  %v3498_v41 = vrot.slane %v3496_v61, 5 }
 0x19c   : > { %3786 = vrot.lane.b32.xlu1 %v8731_v40, %s9910_s16  ;;  %v3469_v13 = vor.u32 %v3468_v17, %v3464_v30  ;;  %v3474_v23 = vrot.slane %v3472_v37, 5  ;;  %v3583_v0 = vrot.slane %v11533_v62, 5  ;;  %v3997_v25 = vsel %vm2148_vm1, %v3981_v5, %v11421_v48 }
 0x19d   : > { %v3494_v43 = vrot.slane %v3493_v12, 4  ;;  %v8690_v21 = vrot.slane %v3506_v29, 9  ;;  %v3576_v57 = vrot.slane %v11555_v35, 5  ;;  %v3489_v55 = vsel %vm10128_vm11, %v3484_v50, %v3488_v56  ;;  %v11598_v49 = vpop.permute.xlu0 %3736 }
 0x19e   : > { %v3465_v16 = vsel %vm10128_vm11, %v3460_v4, %v3464_v30  ;;  %v3470_v60 = vrot.slane %v3469_v13, 4  ;;  %v3579_v42 = vrot.slane %v3306_v19, 5  ;;  %v8691_v7 = vrot.slane %v11586_v52, 9 }
 0x19f   : > { %v11603_v48 = vrot.slane %v3583_v0, 4  ;;  %v3586_v35 = vrot.slane %v11563_v9, 5  ;;  %v3578_v5 = vrot.slane %v3576_v57, 4  ;;  %v3499_v63 = vsel %vm10128_vm11, %v3494_v43, %v3498_v41  ;;  %v9722_v43 = vld [vmem:[#allocation2 + $0x78] sm:$0xf] }
 0x1a0   : > { %3826 = vrot.lane.b32.xlu1 %v8739_v45, %s9908_s14  ;;  %v3475_v32 = vsel %vm10128_vm11, %v3470_v60, %v3474_v23  ;;  %v11613_v14 = vsel %vm10108_vm7, %v8690_v21, %v3576_v57  ;;  %v4015_v2 = vsel %vm2165_vm2, %v3999_v54, %v11473_v15  ;;  %v4013_v53 = vsel %vm2165_vm2, %v3997_v25, %v11442_v3  ;;  %v9721_v15 = vld [vmem:[%s13918_s1 + $0x10] ss:$0 sps:$4 sm:$0x33]   ;;  %v9723_v25 = vld [vmem:[#allocation2 + $0x7c] sm:$0xf]  ;;  %s215_s14 = sand.u32 1, %s9893_s19  }
 0x1a1   : > { %v8754_v19 = vcombine.low %v3465_v16, %v3475_v32  ;;  %v3580_v31 = vsel %vm10108_vm7, %v3578_v5, %v3579_v42  ;;  %v4031_v61 = vsel %vm13927_vm3, %v4015_v2, %v11501_v59  ;;  %v4029_v6 = vsel %vm13927_vm3, %v4013_v53, %v11468_v39  ;;  %v11637_v39 = vpop.permute.xlu1 %3690  ;;  %v9724_v2 = vld [vmem:[#allocation2 + $0x84] sm:$0xf]  ;;  %s13875_s30 = scalar_lea.sflag [#allocation5], %s215_s14 }
 0x1a2   : > { %v4047_v38 = vsel %vm2199_vm5, %v4031_v61, %v11528_v47  ;;  %v4136_v56 = vsel %vm2294_vm4, %v9721_v15, 0  ;;  %v8762_v46 = vcombine.low %v11613_v14, %v3580_v31  ;;  %v4045_v3 = vsel %vm2199_vm5, %v4029_v6, %v11499_v33 }
 0x1a3   : > { %3912 = vrot.lane.b32.xlu0 %v8754_v19, %s9911_s17  ;;  %v4063_v59 = vsel %vm2216_vm8, %v4047_v38, %v11553_v11  ;;  %9458 = vmatpush3.bf16.msra.mxu1 %v4136_v56  ;;  %vm280_vm0 = vcmask 519168   ;;  %v11643_v47 = vcombine.low %v3489_v55, %v3499_v63  ;;  %v4061_v17 = vsel %vm2216_vm8, %v4045_v3, %v11523_v18  ;;  %v9725_v19 = vld [vmem:[#allocation2 + $0x88] sm:$0xf] }
 0x1a4   : > { %3874 = vrot.lane.b32.xlu1 %v8747_v51, %s9907_s13  ;;  %v4079_v33 = vsel %vm2233_vm6, %v4063_v59, %v11572_v28  ;;  %v11649_v40 = vpop.permute.xlu0 %3776  ;;  %v13954_v11 = vmov 0   ;;  %v3584_v34 = vsel %vm10108_vm7, %v8691_v7, %v3583_v0  ;;  %v3587_v18 = vsel %vm10108_vm7, %v11603_v48, %v3586_v35 }
 0x1a5   : > { %288 = vst.msk [vmem:[#allocation3 + $0x18] sm:$0xf] %vm280_vm0, %v13954_v11  ;;  %281 = vst.msk [vmem:[#allocation3] sm:$0xf] %vm280_vm0, %v13954_v11  ;;  %v4077_v51 = vsel %vm2233_vm6, %v4061_v17, %v11550_v22  ;;  %v8699_v28 = vcombine.low %v11404_v27, %v11419_v24  ;;  %v8698_v62 = vcombine.low %v11390_v8, %v11434_v10  ;;  %vm283_vm10 = vcmask 516096   ;;  %v3739_v9 = vpop.permute.xlu1 %3738  ;;  %v9630_v27 = vld [vmem:[%s13920_s3 + $0x90] sm:$0xff]  }
 0x1a6   : > { %282 = vst.msk [vmem:[#allocation3 + $0x4] sm:$0xf] %vm280_vm0, %v13954_v11  ;;  %285 = vst.msk [vmem:[#allocation3 + $0xc] sm:$0xf] %vm280_vm0, %v13954_v11  ;;  %9459 = vmatprep.mubr.msk.bf16.mxu1 %vm2277_vm9, %v4077_v51  ;;  %v8763_v22 = vcombine.low %v3584_v34, %v3587_v18  ;;  %v8694_v21 = vcombine.low %v9722_v43, %v9723_v25  ;;  %v8695_v31 = vcombine.low %v9724_v2, %v9725_v19  ;;  %vm13955_vm13 = vsmask.f32 7938 }
 0x1a7   : > { %286 = vst.msk [vmem:[#allocation3 + $0x10] sm:$0xf] %vm280_vm0, %v13954_v11  ;;  %289 = vst.msk [vmem:[#allocation3 + $0x1c] sm:$0xf] %vm280_vm0, %v13954_v11  ;;  %3952 = vrot.lane.b32.xlu0 %v8762_v46, %s9909_s15  ;;  %9460 = vmatmul.mubr.msk.bf16.vlgmr.msra.gmra.mrb[0].mxu1 %vm2277_vm9, %v4079_v33 }
 0x1a8   : > { %291 = vst.msk [vmem:[#allocation3 + $0x24] sm:$0xf] %vm280_vm0, %v13954_v11  ;;  %292 = vst.msk [vmem:[#allocation3 + $0x28] sm:$0xf] %vm280_vm0, %v13954_v11  ;;  %3914 = vrot.lane.b32.xlu1 %v11643_v47, %s9911_s17  ;;  %v3817_v50 = vpop.permute.xlu0 %3816  ;;  %v3964_v5 = vsel %vm2106_vm14, %v8694_v21, %v11567_v26  ;;  %v3967_v56 = vsel %vm2106_vm14, %v8695_v31, %v11592_v58 }
 0x1a9   : > { %294 = vst.msk [vmem:[#allocation3 + $0x30] sm:$0xf] %vm280_vm0, %v13954_v11  ;;  %295 = vst.msk [vmem:[#allocation3 + $0x34] sm:$0xf] %vm280_vm0, %v13954_v11  ;;  %v3985_v63 = vsel %vm2131_vm15, %v3964_v5, %v11581_v20 }
 0x1aa   : > { %297 = vst.msk [vmem:[#allocation3 + $0x3c] sm:$0xf] %vm280_vm0, %v13954_v11  ;;  %298 = vst.msk [vmem:[#allocation3 + $0x40] sm:$0xf] %vm280_vm0, %v13954_v11  ;;  %v4001_v53 = vsel %vm2148_vm1, %v3985_v63, %v11598_v49  ;;  %v3987_v49 = vsel %vm2131_vm15, %v3967_v56, %v11637_v39  ;;  %v9728_v63 = vld [vmem:[#allocation2 + $0x9c] sm:$0xf] }
 0x1ab   : > { %300 = vst.msk [vmem:[#allocation3 + $0x48] sm:$0xf] %vm280_vm0, %v13954_v11  ;;  %301 = vst.msk [vmem:[#allocation3 + $0x4c] sm:$0xf] %vm280_vm0, %v13954_v11  ;;  %v4017_v26 = vsel %vm2165_vm2, %v4001_v53, %v11649_v40  ;;  %v4003_v47 = vsel %vm2148_vm1, %v3987_v49, %v3739_v9 }
 0x1ac   : > { %303 = vst.msk [vmem:[#allocation3 + $0x54] sm:$0xf] %vm280_vm0, %v13954_v11  ;;  %304 = vst.msk [vmem:[#allocation3 + $0x58] sm:$0xf] %vm280_vm0, %v13954_v11  ;;  %v4503_v30 = vld [vmem:[#allocation3] sm:$0xf]  ;;  %3954 = vrot.lane.b32.xlu1 %v8763_v22, %s9909_s15  ;;  %v3865_v57 = vpop.permute.xlu0 %3864  ;;  %v4033_v20 = vsel %vm13927_vm3, %v4017_v26, %v3817_v50 }
 0x1ad   : > { %306 = vst.msk [vmem:[#allocation3 + $0x60] sm:$0xf] %vm280_vm0, %v13954_v11  ;;  %307 = vst.msk [vmem:[#allocation3 + $0x64] sm:$0xf] %vm280_vm0, %v13954_v11  ;;  %v4504_v37 = vld [vmem:[#allocation3 + $0x4] sm:$0xf]  ;;  %v4049_v15 = vsel %vm2199_vm5, %v4033_v20, %v3865_v57 }
 0x1ae   : > { %309 = vst.msk [vmem:[#allocation3 + $0x6c] sm:$0xf] %vm280_vm0, %v13954_v11  ;;  %310 = vst.msk [vmem:[#allocation3 + $0x70] sm:$0xf] %vm280_vm0, %v13954_v11  ;;  %v4528_v29 = vshrl.u32 %v4503_v30, 16  ;;  %v4531_v45 = vshll.u32 %v4503_v30, 16  ;;  %v3779_v41 = vpop.permute.xlu1 %3778 }
 0x1af   : > { %312 = vst.msk [vmem:[#allocation3 + $0x78] sm:$0xf] %vm280_vm0, %v13954_v11  ;;  %313 = vst.msk [vmem:[#allocation3 + $0x7c] sm:$0xf] %vm280_vm0, %v13954_v11  ;;  %v4537_v12 = vshll.u32 %v4504_v37, 16  ;;  %v4541_v4 = vshrl.u32 %v4504_v37, 16  ;;  %v4019_v33 = vsel %vm2165_vm2, %v4003_v47, %v3779_v41 }
 0x1b0   : > { %315 = vst.msk [vmem:[#allocation3 + $0x84] sm:$0xf] %vm280_vm0, %v13954_v11  ;;  %316 = vst.msk [vmem:[#allocation3 + $0x88] sm:$0xf] %vm280_vm0, %v13954_v11  ;;  %v4530_v13 = vrot.slane %v4528_v29, 4  ;;  %v4533_v23 = vrot.slane %v4531_v45, 5 }
 0x1b1   : > { %318 = vst.msk [vmem:[#allocation3 + $0x90] sm:$0xf] %vm280_vm0, %v13954_v11  ;;  %319 = vst.msk [vmem:[#allocation3 + $0x94] sm:$0xf] %vm280_vm0, %v13954_v11  ;;  %v4539_v52 = vrot.slane %v4537_v12, 5  ;;  %v4543_v0 = vrot.slane %v4541_v4, 4 }
 0x1b2   : > { %321 = vst.msk [vmem:[#allocation3 + $0x9c] sm:$0xf] %vm280_vm0, %v13954_v11  ;;  %322 = vst.msk [vmem:[#allocation3 + $0xa0] sm:$0xf] %vm280_vm0, %v13954_v11  ;;  %v4534_v16 = vor.u32 %v4533_v23, %v4530_v13  ;;  %v3819_v7 = vpop.permute.xlu1 %3818  ;;  %v11820_v45 = vld [vmem:[%s13919_s2] ss:$0 sm:$0xff] }
 0x1b3   : > { %324 = vst.msk [vmem:[#allocation3 + $0xa8] sm:$0xf] %vm280_vm0, %v13954_v11  ;;  %325 = vst.msk [vmem:[#allocation3 + $0xac] sm:$0xf] %vm280_vm0, %v13954_v11  ;;  %v4544_v60 = vor.u32 %v4543_v0, %v4539_v52  ;;  %v4035_v40 = vsel %vm13927_vm3, %v4019_v33, %v3819_v7  ;;  %v9726_v4 = vld [vmem:[#allocation2 + $0x90] sm:$0xf] }
 0x1b4   : > { %327 = vst.msk [vmem:[#allocation3 + $0xb4] sm:$0xf] %vm280_vm0, %v13954_v11  ;;  %328 = vst.msk [vmem:[#allocation3 + $0xb8] sm:$0xf] %vm280_vm0, %v13954_v11  ;;  %v4535_v48 = vrot.slane %v4534_v16, 4  ;;  %s8541_s15 = sshll.u32 %s215_s14, 8 }
 0x1b5   : > { %330 = vst.msk [vmem:[#allocation3 + $0xc0] sm:$0xf] %vm280_vm0, %v13954_v11  ;;  %331 = vst.msk [vmem:[#allocation3 + $0xc4] sm:$0xf] %vm280_vm0, %v13954_v11  ;;  %v4545_v35 = vrot.slane %v4544_v60, 4  ;;  %v3905_v61 = vpop.permute.xlu0 %3904  ;;  %s13783_s16 = scalar_lea.vmem [#allocation4], %s8541_s15 }
 0x1b6   : > { %333 = vst.msk [vmem:[#allocation3 + $0xcc] sm:$0xf] %vm280_vm0, %v13954_v11  ;;  %334 = vst.msk [vmem:[#allocation3 + $0xd0] sm:$0xf] %vm280_vm0, %v13954_v11  ;;  %v4540_v32 = vsel %vm10128_vm11, %v4535_v48, %v4539_v52  ;;  %v3867_v38 = vpop.permute.xlu1 %3866  ;;  %v4065_v46 = vsel %vm2216_vm8, %v4049_v15, %v3905_v61  ;;  %v2616_v56 = vld [vmem:[#allocation3 + $0x18] sm:$0xf] }
 0x1b7   : > { %290 = vst.msk [vmem:[#allocation3 + $0x20] sm:$0x1] %vm283_vm10, %v13954_v11  ;;  %284 = vst.msk [vmem:[#allocation3 + $0x8] sm:$0x1] %vm283_vm10, %v13954_v11  ;;  %s8465_s23 = sshll.u32 %s13783_s16, 4  ;;  %s13870_s23 = int_to_ptr.vmem [resolvable:$true] %s8465_s23 }
 0x1b8   : > { %287 = vst.msk [vmem:[#allocation3 + $0x14] sm:$0x1] %vm283_vm10, %v13954_v11  ;;  %293 = vst.msk [vmem:[#allocation3 + $0x2c] sm:$0x1] %vm283_vm10, %v13954_v11  ;;  %s9839_s22 = scalar_lea.vmem %s13870_s23, 4096  ;;  %p9846_p0 = scmp.lt.s32.totalorder %s13870_s23, %s9844_s9 }
 0x1b9   : > { %296 = vst.msk [vmem:[#allocation3 + $0x38] sm:$0x1] %vm283_vm10, %v13954_v11  ;;  %299 = vst.msk [vmem:[#allocation3 + $0x44] sm:$0x1] %vm283_vm10, %v13954_v11  ;;  %v3945_v3 = vpop.permute.xlu0 %3944  ;;  %p9840_p11 = scmp.ne.s32.totalorder %s13870_s23, %s9839_s22  ;;  %p9847_p1 = scmp.lt.s32.totalorder %s9845_s11, %s9839_s22 }
 0x1ba   : > { %302 = vst.msk [vmem:[#allocation3 + $0x50] sm:$0x1] %vm283_vm10, %v13954_v11  ;;  %305 = vst.msk [vmem:[#allocation3 + $0x5c] sm:$0x1] %vm283_vm10, %v13954_v11  ;;  %v4081_v59 = vsel %vm2233_vm6, %v4065_v46, %v3945_v3 }
 0x1bb   : > { %308 = vst.msk [vmem:[#allocation3 + $0x68] sm:$0x1] %vm283_vm10, %v13954_v11  ;;  %311 = vst.msk [vmem:[#allocation3 + $0x74] sm:$0x1] %vm283_vm10, %v13954_v11  ;;  %v3907_v17 = vpop.permute.xlu1 %3906  ;;  %9463 = vmatprep.mubr.msk.bf16.mxu1 %vm2277_vm9, %v4081_v59  ;;  %p9841_p12 = pnand %p9840_p11, %p9983_p5  ;;  %p9848_p2 = por %p9847_p1, %p9846_p0 }
 0x1bc   : > { %314 = vst.msk [vmem:[#allocation3 + $0x80] sm:$0x1] %vm283_vm10, %v13954_v11  ;;  %317 = vst.msk [vmem:[#allocation3 + $0x8c] sm:$0x1] %vm283_vm10, %v13954_v11 }
 0x1bd   : > { %320 = vst.msk [vmem:[#allocation3 + $0x98] sm:$0x1] %vm283_vm10, %v13954_v11  ;;  %323 = vst.msk [vmem:[#allocation3 + $0xa4] sm:$0x1] %vm283_vm10, %v13954_v11  ;;  %p9842_p13 = pneg %p9841_p12 }
 0x1be   : > { %326 = vst.msk [vmem:[#allocation3 + $0xb0] sm:$0x1] %vm283_vm10, %v13954_v11  ;;  %329 = vst.msk [vmem:[#allocation3 + $0xbc] sm:$0x1] %vm283_vm10, %v13954_v11  ;;  %v4519_v54 = vld [vmem:[#allocation3 + $0x8] sm:$0x1] }
 0x1bf   : > { %332 = vst.msk [vmem:[#allocation3 + $0xc8] sm:$0x1] %vm283_vm10, %v13954_v11  ;;  %335 = vst.msk [vmem:[#allocation3 + $0xd4] sm:$0x1] %vm283_vm10, %v13954_v11  ;;  %v4547_v55 = vshll.u32 %v4519_v54, 16  ;;  %v4051_v11 = vsel %vm2199_vm5, %v4035_v40, %v3867_v38  ;;  %v3947_v34 = vpop.permute.xlu1 %3946  ;;  %p9849_p3 = pnand %p9848_p2, %p9842_p13 }
 0x1c0   : > { %v4067_v58 = vsel %vm2216_vm8, %v4051_v11, %v3907_v17  ;;  %v9727_v54 = vld [vmem:[#allocation2 + $0x94] sm:$0xf]  ;;  %vm11837_vm4 = vmand %vm280_vm0, %vm13955_vm13  ;;  %v2607_v17 = vld [vmem:[#allocation3 + $0xc] sm:$0xf] }
 0x1c1   : > { %v4549_v42 = vrot.slane %v4547_v55, 5  ;;  %v4083_v18 = vsel %vm2233_vm6, %v4067_v58, %v3947_v34  ;;  %v8696_v41 = vcombine.low %v9726_v4, %v9727_v54 }
 0x1c2   : > { %9464 = vmatmul.mubr.msk.bf16.gmra.mrb[4].mxu1 %vm2277_vm9, %v4083_v18 }
 0x1c3   : > { %v4550_v14 = vsel %vm10128_vm11, %v4545_v35, %v4549_v42  ;;  %v11811_v22 = vpop.permute.xlu1 %3654 }
 0x1c4   : > { %v8824_v6 = vcombine.low %v4540_v32, %v4550_v14  ;;  %v9729_v32 = vld [vmem:[#allocation2 + $0xa0] sm:$0xf] }
 0x1c5   : > { %v3653_v39 = vpop.permute.xlu0 %3652  ;;  %v8697_v14 = vcombine.low %v9728_v63, %v9729_v32  ;;  %v9619_v63 = vld [vmem:[%s13920_s3 + $0x48] sm:$0xff]  }
 0x1c6   : > { %5473 = vrot.lane.b32.xlu1 %v8824_v6, %s9912_s12  ;;  %v3970_v16 = vsel %vm2106_vm14, %v8696_v41, %v3653_v39  ;;  %v2620_v39 = vld [vmem:[#allocation3 + $0x20] sm:$0x1]  ;;  %v2613_v41 = vld [vmem:[#allocation3 + $0x14] sm:$0x1] }
 0x1c7   : > { %v11813_v50 = vpop.permute.xlu1 %3694 }
 0x1c9   : > { %v3693_v51 = vpop.permute.xlu0 %3692 }
 0x1ca   : > { %v3989_v48 = vsel %vm2131_vm15, %v3970_v16, %v3693_v51 }
 0x1cd   : > { %v3741_v9 = vpop.permute.xlu0 %3740 }
 0x1ce   : > { %v4005_v2 = vsel %vm2148_vm1, %v3989_v48, %v3741_v9  ;;  %v9618_v48 = vld [vmem:[%s13920_s3] sm:$0xff]  }
 0x1d3   : > { %v3781_v30 = vpop.permute.xlu0 %3780 }
 0x1d4   : > { %v11815_v37 = vpop.permute.xlu1 %3742  ;;  %v4021_v53 = vsel %vm2165_vm2, %v4005_v2, %v3781_v30  ;;  %v9621_v2 = vld [vmem:[%s13920_s3 + $0x8] sm:$0xff]  }
 0x1d7   : > { %v3821_v29 = vpop.permute.xlu0 %3820 }
 0x1d8   : > { %v4037_v38 = vsel %vm13927_vm3, %v4021_v53, %v3821_v29  ;;  %vm13958_vm3 = vsmask.f32 256 }
 0x1d9   : > { %vm11845_vm13 = vmand %vm283_vm10, %vm13958_vm3  ;;  %vm13961_vm3 = vcmask 162816  }
 0x1db   : > { %v3869_v0 = vpop.permute.xlu0 %3868 }
 0x1dc   : > { %v4053_v59 = vsel %vm2199_vm5, %v4037_v38, %v3869_v0 }
 0x1dd   : > { %v11822_v12 = vpop.permute.xlu1 %3782  ;;  %v9439_v13 = vpop.f32.mrb[0].mxu0 }
 0x1de   : > { %v2341_v23 = vadd.f32 %v9439_v13, %v11820_v45  ;;  %v2332_v52 = vpop.f32.mrb[1].mxu0 }
 0x1df   : > { %v2333_v43 = vadd.f32 %v11820_v45, %v2332_v52  ;;  %v9440_v25 = vpop.f32.mrb[2].mxu0 }
 0x1e0   : > { %v9098_v21 = vpack.c.bf16 %v2341_v23, %v2341_v23  ;;  %v2344_v57 = vadd.f32 %v9440_v25, %v11820_v45  ;;  %v2335_v55 = vpop.f32.mrb[3].mxu0 }
 0x1e1   : > { %v11828_v60 = vpop.permute.xlu1 %3822  ;;  %v9096_v42 = vpack.c.bf16 %v2333_v43, %v2333_v43  ;;  %v2336_v7 = vadd.f32 %v11820_v45, %v2335_v55  ;;  %v3973_v55 = vsel %vm2106_vm14, %v8697_v14, %v11811_v22  ;;  %v9617_v22 = vld [vmem:[%s13920_s3 + $0x40] sm:$0xff]  }
 0x1e2   : > { %v2461_v35 = vshrl.u32 %v9098_v21, 16  ;;  %v9099_v5 = vpack.c.bf16 %v2344_v57, %v2344_v57  ;;  %v2464_v6 = vshll.u32 %v9098_v21, 16  ;;  %9151 = vmatprep.subr.bf16.mxu0 %v9617_v22  ;;  %v9622_v14 = vld [vmem:[%s13920_s3 + $0x80] sm:$0xff]  }
 0x1e3   : > { %v2444_v19 = vshrl.u32 %v9096_v42, 16  ;;  %v9097_v31 = vpack.c.bf16 %v2336_v7, %v2336_v7  ;;  %v2447_v3 = vshll.u32 %v9096_v42, 16  ;;  %v3991_v7 = vsel %vm2131_vm15, %v3973_v55, %v11813_v50  ;;  %v9620_v50 = vld [vmem:[%s13920_s3 + $0xc0] sm:$0xff]   ;;  %9152 = vmatpush3.bf16.msra.mxu0 %v9618_v48 }
 0x1e4   : > { %v2463_v61 = vrot.slane %v2461_v35, 7  ;;  %v2469_v26 = vshrl.u32 %v9099_v5, 16  ;;  %v2472_v40 = vshll.u32 %v9099_v5, 16  ;;  %v4007_v35 = vsel %vm2148_vm1, %v3991_v7, %v11815_v37  ;;  %9215 = vmatprep.subr.bf16.mxu1 %v9620_v50  ;;  %9153 = vmatprep.subr.bf16.mxu0 %v9619_v63 }
 0x1e5   : > { %v2446_v46 = vrot.slane %v2444_v19, 7  ;;  %v2452_v49 = vshrl.u32 %v9097_v31, 16  ;;  %v3871_v11 = vpop.permute.xlu1 %3870  ;;  %v2455_v9 = vshll.u32 %v9097_v31, 16  ;;  %v4023_v32 = vsel %vm2165_vm2, %v4007_v35, %v11822_v12  ;;  %9216 = vmatpush3.bf16.msra.mxu1 %v9622_v14  ;;  %v9623_v35 = vld [vmem:[%s13920_s3 + $0x50] sm:$0xff]  }
 0x1e6   : > { %v3909_v20 = vpop.permute.xlu0 %3908  ;;  %v2466_v47 = vor.u32 %v2464_v6, %v2463_v61  ;;  %v2471_v33 = vrot.slane %v2469_v26, 7  ;;  %v2467_v30 = vrot.slane %v2463_v61, 4  ;;  %v4039_v37 = vsel %vm13961_vm3, %v4023_v32, %v11828_v60 }
 0x1e7   : > { %v4069_v58 = vsel %vm2216_vm8, %v4053_v59, %v3909_v20  ;;  %v2449_v34 = vor.u32 %v2447_v3, %v2446_v46  ;;  %v2454_v51 = vrot.slane %v2452_v49, 7  ;;  %v2450_v23 = vrot.slane %v2446_v46, 4  ;;  %9154 = vmatpush3.bf16.msra.mxu0 %v9621_v2 }
 0x1e8   : > { %v2617_v29 = vsel %vm11837_vm4, %v2466_v47, %v2616_v56  ;;  %v2474_v4 = vor.u32 %v2472_v40, %v2471_v33  ;;  %v2476_v54 = vrot.slane %v2471_v33, 4  ;;  %v4055_v19 = vsel %vm2199_vm5, %v4039_v37, %v3871_v11  ;;  %9155 = vmatprep.subr.bf16.mxu0 %v9623_v35 }
 0x1e9   : > { %2618 = vst [vmem:[#allocation3 + $0x18] sm:$0xf] %v2617_v29  ;;  %v2608_v52 = vsel %vm11837_vm4, %v2449_v34, %v2607_v17  ;;  %v2457_v0 = vor.u32 %v2455_v9, %v2454_v51  ;;  %v2459_v43 = vrot.slane %v2454_v51, 4 }
 0x1ea   : > { %v3949_v13 = vpop.permute.xlu0 %3948  ;;  %2609 = vst [vmem:[#allocation3 + $0xc] sm:$0xf] %v2608_v52  ;;  %v2475_v21 = vsel %vm10136_vm12, %v2467_v30, %v2474_v4  ;;  %v2621_v57 = vsel %vm11845_vm13, %v2476_v54, %v2620_v39 }
 0x1eb   : > { %v4085_v25 = vsel %vm2233_vm6, %v4069_v58, %v3949_v13  ;;  %2619 = vst.msk [vmem:[#allocation3 + $0x1c] sm:$0xf] %vm280_vm0, %v2475_v21  ;;  %2622 = vst [vmem:[#allocation3 + $0x20] sm:$0x1] %v2621_v57  ;;  %v2458_v16 = vsel %vm10136_vm12, %v2450_v23, %v2457_v0  ;;  %v2614_v42 = vsel %vm11845_vm13, %v2459_v43, %v2613_v41 }
 0x1ec   : > { %9467 = vmatprep.mubr.msk.bf16.mxu1 %vm2277_vm9, %v4085_v25  ;;  %2610 = vst.msk [vmem:[#allocation3 + $0x10] sm:$0xf] %vm280_vm0, %v2458_v16  ;;  %2615 = vst [vmem:[#allocation3 + $0x14] sm:$0x1] %v2614_v42 }
 0x1ef   : > { %v3911_v5 = vpop.permute.xlu1 %3910 }
 0x1f0   : > { %v5113_v31 = vld [vmem:[#allocation3 + $0x18] sm:$0xf]  ;;  %v4071_v12 = vsel %vm2216_vm8, %v4055_v19, %v3911_v5  ;;  %v9624_v5 = vld [vmem:[%s13920_s3 + $0xc8] sm:$0xff]  }
 0x1f1   : > { %v5023_v61 = vld [vmem:[#allocation3 + $0xc] sm:$0xe]  ;;  %v5138_v6 = vshrl.u32 %v5113_v31, 16  ;;  %v5141_v26 = vshll.u32 %v5113_v31, 16  ;;  %9217 = vmatprep.subr.bf16.mxu1 %v9624_v5  ;;  %v2623_v5 = vld [vmem:[#allocation3 + $0x24] sm:$0xf] }
 0x1f2   : > { %v5114_v60 = vld [vmem:[#allocation3 + $0x1c] sm:$0xf]  ;;  %v11897_v20 = vld [vmem:[#allocation3 + $0xc] sm:$0xf]  ;;  %v8800_v49 = vrot.slane %v5023_v61, 9 }
 0x1f3   : > { %v3951_v53 = vpop.permute.xlu1 %3950  ;;  %v11899_v56 = vld [vmem:[#allocation3 + $0x10] sm:$0xf]  ;;  %v11901_v46 = vld [vmem:[#allocation3 + $0x14] sm:$0x1]  ;;  %v5129_v47 = vld [vmem:[#allocation3 + $0x20] sm:$0x1] }
 0x1f4   : > { %v4087_v38 = vsel %vm2233_vm6, %v4071_v12, %v3951_v53  ;;  %v8840_v3 = vcombine.low %v11897_v20, %v11899_v56  ;;  %v5057_v59 = vrot.slane %v11899_v56, 5  ;;  %v11906_v17 = vld [vmem:[#allocation3 + $0xc] sm:$0xf]  ;;  %v5140_v40 = vrot.slane %v5138_v6, 4  ;;  %v11910_v34 = vld [vmem:[#allocation3 + $0x10] sm:$0xf] }
 0x1f5   : > { %9468 = vmatmul.mubr.msk.bf16.gmra.mrb[8].mxu1 %vm2277_vm9, %v4087_v38  ;;  %13962 = vst [vmem:[#allocation7_spill] sm:$0xff] %v11906_v17  ;;  %v5143_v11 = vrot.slane %v5141_v26, 5  ;;  %v5147_v58 = vshll.u32 %v5114_v60, 16  ;;  %13963 = vst [vmem:[#allocation8_spill] sm:$0xff] %v11910_v34  ;;  %v5060_v9 = vrot.slane %v11901_v46, 5  ;;  %v5151_v4 = vshrl.u32 %v5114_v60, 16 }
 0x1f6   : > { %v11908_v33 = vpop.permute.xlu0 %3656  ;;  %5545 = vrot.lane.b32.xlu0 %v8840_v3, %s9912_s12  ;;  %v5058_v39 = vsel %vm10108_vm7, %v8800_v49, %v5057_v59  ;;  %v5059_v51 = vrot.slane %v5057_v59, 4  ;;  %v5157_v54 = vshll.u32 %v5129_v47, 16  ;;  %v4552_v13 = vshrl.u32 %v11906_v17, 16  ;;  %v11926_v7 = vld [vmem:[#allocation3 + $0x14] sm:$0x1] }
 0x1f7   : > { %v5144_v30 = vor.u32 %v5143_v11, %v5140_v40  ;;  %v5149_v29 = vrot.slane %v5147_v58, 5  ;;  %v4555_v23 = vshll.u32 %v11906_v17, 16  ;;  %v4561_v52 = vshll.u32 %v11910_v34, 16  ;;  %v11923_v16 = vpop.permute.xlu1 %3658  ;;  %v11946_v11 = vld [vmem:[#allocation3 + $0x1c] sm:$0xf] }
 0x1f8   : > { %v5061_v41 = vsel %vm10108_vm7, %v5059_v51, %v5060_v9  ;;  %v5153_v25 = vrot.slane %v5151_v4, 4  ;;  %v4554_v57 = vrot.slane %v4552_v13, 4  ;;  %v4565_v48 = vshrl.u32 %v11910_v34, 16  ;;  %v11953_v13 = vld [vmem:[#allocation3 + $0x18] sm:$0xf] }
 0x1f9   : > { %v8856_v43 = vcombine.low %v5058_v39, %v5061_v41  ;;  %v5145_v21 = vrot.slane %v5144_v30, 4  ;;  %v4557_v55 = vrot.slane %v4555_v23, 5  ;;  %v4563_v22 = vrot.slane %v4561_v52, 5 }
 0x1fa   : > { %v11921_v0 = vpop.permute.xlu0 %3696  ;;  %v5154_v42 = vor.u32 %v5153_v25, %v5149_v29  ;;  %v5159_v50 = vrot.slane %v5157_v54, 5  ;;  %v4567_v31 = vrot.slane %v4565_v48, 4  ;;  %v4571_v6 = vshll.u32 %v11926_v7, 16 }
 0x1fb   : > { %5609 = vrot.lane.b32.xlu1 %v8856_v43, %s9912_s12  ;;  %v4558_v19 = vor.u32 %v4557_v55, %v4554_v57  ;;  %v5150_v61 = vsel %vm10128_vm11, %v5145_v21, %v5149_v29  ;;  %v11948_v58 = vpop.permute.xlu1 %3698  ;;  %v8841_v25 = vcombine.low %v11953_v13, %v11946_v11  ;;  %v2630_v21 = vld [vmem:[#allocation3 + $0x30] sm:$0xf] }
 0x1fc   : > { %v9443_v63 = vpop.f32.mrb[4].mxu0  ;;  %v5155_v2 = vrot.slane %v5154_v42, 4  ;;  %v4568_v49 = vor.u32 %v4567_v31, %v4563_v22  ;;  %v4573_v41 = vrot.slane %v4571_v6, 5  ;;  %v2634_v31 = vld [vmem:[#allocation3 + $0x38] sm:$0x1] }
 0x1fd   : > { %v2357_v14 = vadd.f32 %v9443_v63, %v11820_v45  ;;  %v2348_v37 = vpop.f32.mrb[5].mxu0  ;;  %v4559_v9 = vrot.slane %v4558_v19, 4 }
 0x1fe   : > { %v11935_v32 = vpop.permute.xlu0 %3744  ;;  %v2349_v12 = vadd.f32 %v11820_v45, %v2348_v37  ;;  %v9444_v53 = vpop.f32.mrb[6].mxu0  ;;  %v5160_v3 = vsel %vm10128_vm11, %v5155_v2, %v5159_v50  ;;  %v4569_v30 = vrot.slane %v4568_v49, 4  ;;  %v9625_v37 = vld [vmem:[%s13920_s3 + $0x10] sm:$0xff]   ;;  %v9626_v2 = vld [vmem:[%s13920_s3 + $0x88] sm:$0xff]  }
 0x1ff   : > { %v9102_v26 = vpack.c.bf16 %v2357_v14, %v2357_v14  ;;  %v2360_v38 = vadd.f32 %v9444_v53, %v11820_v45  ;;  %v2351_v60 = vpop.f32.mrb[7].mxu0  ;;  %v8872_v40 = vcombine.low %v5150_v61, %v5160_v3  ;;  %v4564_v14 = vsel %vm10128_vm11, %v4559_v9, %v4563_v22  ;;  %v2627_v3 = vld [vmem:[#allocation3 + $0x2c] sm:$0x1]  ;;  %v11972_v49 = vld [vmem:[#allocation3 + $0x18] sm:$0xf]  ;;  %9156 = vmatpush3.bf16.msra.mxu0 %v9625_v37 }
 0x200   : > { %v9100_v59 = vpack.c.bf16 %v2349_v12, %v2349_v12  ;;  %v2352_v47 = vadd.f32 %v11820_v45, %v2351_v60  ;;  %v4574_v48 = vsel %vm10128_vm11, %v4569_v30, %v4573_v41  ;;  %13964 = vst [vmem:[#allocation9_spill] sm:$0xff] %v11972_v49  ;;  %9218 = vmatpush3.bf16.msra.mxu1 %v9626_v2  ;;  %v11979_v9 = vld [vmem:[#allocation3 + $0x20] sm:$0x1]  ;;  %v5024_v30 = vld [vmem:[#allocation3 + $0x18] sm:$0xe]  ;;  %v9631_v2 = vld [vmem:[%s13920_s3 + $0x60] sm:$0xff]  }
 0x201   : > { %v2495_v39 = vshrl.u32 %v9102_v26, 16  ;;  %v9103_v51 = vpack.c.bf16 %v2360_v38, %v2360_v38  ;;  %5681 = vrot.lane.b32.xlu0 %v8872_v40, %s9912_s12  ;;  %v2498_v52 = vshll.u32 %v9102_v26, 16  ;;  %v8825_v61 = vcombine.low %v4564_v14, %v4574_v48  ;;  %v9629_v48 = vld [vmem:[%s13920_s3 + $0x18] sm:$0xff]  }
 0x202   : > { %v2478_v4 = vshrl.u32 %v9100_v59, 16  ;;  %v9101_v54 = vpack.c.bf16 %v2352_v47, %v2352_v47  ;;  %v2481_v55 = vshll.u32 %v9100_v59, 16  ;;  %v8801_v24 = vrot.slane %v5024_v30, 9 }
 0x203   : > { %v2497_v23 = vrot.slane %v2495_v39, 7  ;;  %v2503_v43 = vshrl.u32 %v9103_v51, 16  ;;  %v2506_v50 = vshll.u32 %v9103_v51, 16  ;;  %5475 = vrot.lane.b32.xlu1 %v8825_v61, %s9912_s12 }
 0x204   : > { %v11950_v29 = vpop.permute.xlu0 %3784  ;;  %v2480_v57 = vrot.slane %v2478_v4, 7  ;;  %v2486_v42 = vshrl.u32 %v9101_v54, 16  ;;  %v2489_v53 = vshll.u32 %v9101_v54, 16  ;;  %v4832_v4 = vshrl.u32 %v11897_v20, 16 }
 0x205   : > { %v2500_v35 = vor.u32 %v2498_v52, %v2497_v23  ;;  %v2505_v63 = vrot.slane %v2503_v43, 7  ;;  %5547 = vrot.lane.b32.xlu0 %v8841_v25, %s9912_s12  ;;  %v11968_v6 = vpop.permute.xlu1 %3746  ;;  %v2501_v26 = vrot.slane %v2497_v23, 4  ;;  %v5064_v23 = vrot.slane %v11946_v11, 5  ;;  %v11987_v52 = vld [vmem:[#allocation3 + $0x1c] sm:$0xf]  ;;  %v9627_v43 = vld [vmem:[%s13920_s3 + $0x58] sm:$0xff]  }
 0x206   : > { %v2483_v19 = vor.u32 %v2481_v55, %v2480_v57  ;;  %v2488_v12 = vrot.slane %v2486_v42, 7  ;;  %v2484_v47 = vrot.slane %v2480_v57, 4  ;;  %13965 = vst [vmem:[#allocation10_spill] sm:$0xff] %v11987_v52  ;;  %v9628_v25 = vld [vmem:[%s13920_s3 + $0xd0] sm:$0xff]   ;;  %v4576_v42 = vshrl.u32 %v11972_v49, 16  ;;  %9157 = vmatprep.subr.bf16.mxu0 %v9627_v43 }
 0x207   : > { %v2631_v22 = vsel %vm11837_vm4, %v2500_v35, %v2630_v21  ;;  %v2508_v38 = vor.u32 %v2506_v50, %v2505_v63  ;;  %v2510_v60 = vrot.slane %v2505_v63, 4  ;;  %v3979_v21 = vsel %vm2106_vm14, %v8699_v28, %v11923_v16  ;;  %v12014_v35 = vld [vmem:[#allocation3 + $0x20] sm:$0x1]  ;;  %9219 = vmatprep.subr.bf16.mxu1 %v9628_v25  ;;  %9158 = vmatpush3.bf16.msra.mxu0 %v9629_v48 }
 0x208   : > { %v11974_v59 = vpop.permute.xlu0 %3824  ;;  %2632 = vst [vmem:[#allocation3 + $0x30] sm:$0xf] %v2631_v22  ;;  %v2624_v40 = vsel %vm11837_vm4, %v2483_v19, %v2623_v5  ;;  %v2491_v39 = vor.u32 %v2489_v53, %v2488_v12  ;;  %v2493_v51 = vrot.slane %v2488_v12, 4  ;;  %v5066_v28 = vrot.slane %v5064_v23, 4  ;;  %9220 = vmatpush3.bf16.msra.mxu1 %v9630_v27  ;;  %v9632_v19 = vld [vmem:[%s13920_s3 + $0xd8] sm:$0xff]   ;;  %v9633_v12 = vld [vmem:[%s13920_s3 + $0x20] sm:$0xff]   ;;  %9159 = vmatprep.subr.bf16.mxu0 %v9631_v2 }
 0x209   : > { %2625 = vst [vmem:[#allocation3 + $0x24] sm:$0xf] %v2624_v40  ;;  %v2509_v54 = vsel %vm10136_vm12, %v2501_v26, %v2508_v38  ;;  %v2635_v41 = vsel %vm11845_vm13, %v2510_v60, %v2634_v31  ;;  %v5067_v16 = vrot.slane %v11979_v9, 5  ;;  %v4579_v5 = vshll.u32 %v11972_v49, 16  ;;  %v9634_v53 = vld [vmem:[%s13920_s3 + $0x98] sm:$0xff]   ;;  %9221 = vmatprep.subr.bf16.mxu1 %v9632_v19 }
 0x20a   : > { %2633 = vst.msk [vmem:[#allocation3 + $0x34] sm:$0xf] %vm280_vm0, %v2509_v54  ;;  %2636 = vst [vmem:[#allocation3 + $0x38] sm:$0x1] %v2635_v41  ;;  %v2492_v57 = vsel %vm10136_vm12, %v2484_v47, %v2491_v39  ;;  %v2628_v55 = vsel %vm11845_vm13, %v2493_v51, %v2627_v3  ;;  %v3976_v63 = vsel %vm2106_vm14, %v8698_v62, %v11908_v33  ;;  %v4578_v50 = vrot.slane %v4576_v42, 4 }
 0x20b   : > { %2626 = vst.msk [vmem:[#allocation3 + $0x28] sm:$0xf] %vm280_vm0, %v2492_v57  ;;  %2629 = vst [vmem:[#allocation3 + $0x2c] sm:$0x1] %v2628_v55  ;;  %v4585_v14 = vshll.u32 %v11987_v52, 16  ;;  %v4589_v37 = vshrl.u32 %v11987_v52, 16  ;;  %v3993_v8 = vsel %vm2131_vm15, %v3976_v63, %v11921_v0  ;;  %v5065_v62 = vsel %vm10108_vm7, %v8801_v24, %v5064_v23  ;;  %9160 = vmatpush3.bf16.msra.mxu0 %v9633_v12 }
 0x20c   : > { %v5068_v33 = vsel %vm10108_vm7, %v5066_v28, %v5067_v16  ;;  %v4581_v31 = vrot.slane %v4579_v5, 5  ;;  %v3873_v61 = vpop.permute.xlu0 %3872  ;;  %v4595_v38 = vshll.u32 %v12014_v35, 16  ;;  %v3995_v60 = vsel %vm2131_vm15, %v3979_v21, %v11948_v58  ;;  %9222 = vmatpush3.bf16.msra.mxu1 %v9634_v53  ;;  %vm13967_vm14 = vmmov %vm13961_vm3 }
 0x20d   : > { %v8857_v26 = vcombine.low %v5065_v62, %v5068_v33  ;;  %v4587_v0 = vrot.slane %v4585_v14, 5  ;;  %v4591_v22 = vrot.slane %v4589_v37, 4  ;;  %v4009_v3 = vsel %vm2148_vm1, %v3993_v8, %v11935_v32  ;;  %vm13969_vm15 = vmmov %vm13961_vm3 }
 0x20e   : > { %v12032_v10 = vpop.permute.xlu1 %3786  ;;  %v4835_v47 = vshll.u32 %v11897_v20, 16  ;;  %v4582_v40 = vor.u32 %v4581_v31, %v4578_v50  ;;  %v4025_v39 = vsel %vm2165_vm2, %v4009_v3, %v11950_v29  ;;  %v4011_v32 = vsel %vm2148_vm1, %v3995_v60, %v11968_v6 }
 0x20f   : > { %5611 = vrot.lane.b32.xlu1 %v8857_v26, %s9912_s12  ;;  %v4592_v51 = vor.u32 %v4591_v22, %v4587_v0  ;;  %v4041_v21 = vsel %vm13967_vm14, %v4025_v39, %v11974_v59  ;;  %v4597_v55 = vrot.slane %v4595_v38, 5  ;;  %v4845_v20 = vshrl.u32 %v11899_v56, 16 }
 0x210   : > { %v5025_v30 = vld [vmem:[#allocation3 + $0x24] sm:$0xe]  ;;  %v4583_v43 = vrot.slane %v4582_v40, 4  ;;  %v4057_v19 = vsel %vm2199_vm5, %v4041_v21, %v3873_v61  ;;  %v9635_v40 = vld [vmem:[%s13920_s3 + $0x68] sm:$0xff]   ;;  %v9636_v21 = vld [vmem:[%s13920_s3 + $0xe0] sm:$0xff]  }
 0x211   : > { %v12053_v54 = vld [vmem:[#allocation3 + $0x24] sm:$0xf]  ;;  %v4593_v57 = vrot.slane %v4592_v51, 4  ;;  %v8802_v24 = vrot.slane %v5025_v30, 9  ;;  %9161 = vmatprep.subr.bf16.mxu0 %v9635_v40  ;;  %9223 = vmatprep.subr.bf16.mxu1 %v9636_v21  ;;  %v9645_v21 = vld [vmem:[%s13920_s3 + $0xf0] sm:$0xff]  }
 0x212   : > { %v12055_v41 = vld [vmem:[#allocation3 + $0x24] sm:$0xf]  ;;  %v3827_v23 = vpop.permute.xlu1 %3826  ;;  %v4600_v25 = vshrl.u32 %v12053_v54, 16  ;;  %v4603_v29 = vshll.u32 %v12053_v54, 16  ;;  %v12065_v42 = vld [vmem:[#allocation3 + $0x28] sm:$0xf]  ;;  %v4588_v6 = vsel %vm10128_vm11, %v4583_v43, %v4587_v0 }
 0x213   : > { %13966 = vst [vmem:[#allocation11_spill] sm:$0xff] %v12055_v41  ;;  %v12067_v48 = vld [vmem:[#allocation3 + $0x2c] sm:$0x1]  ;;  %v5071_v28 = vrot.slane %v12065_v42, 5  ;;  %v12074_v16 = vld [vmem:[#allocation3 + $0x28] sm:$0xf]  ;;  %v4598_v63 = vsel %vm10128_vm11, %v4593_v57, %v4597_v55 }
 0x214   : > { %v5162_v5 = vshrl.u32 %v12055_v41, 16  ;;  %v4602_v50 = vrot.slane %v4600_v25, 4  ;;  %v4605_v14 = vrot.slane %v4603_v29, 5  ;;  %v4609_v37 = vshll.u32 %v12074_v16, 16  ;;  %v12082_v31 = vld [vmem:[#allocation3 + $0x2c] sm:$0x1] }
 0x215   : > { %v3913_v59 = vpop.permute.xlu0 %3912  ;;  %v8826_v8 = vcombine.low %v4588_v6, %v4598_v63  ;;  %v5073_v62 = vrot.slane %v5071_v28, 4  ;;  %v5074_v33 = vrot.slane %v12067_v48, 5  ;;  %v12084_v12 = vld [vmem:[#allocation3 + $0x28] sm:$0xf]  ;;  %v4613_v22 = vshrl.u32 %v12074_v16, 16  ;;  %v9644_v40 = vld [vmem:[%s13920_s3 + $0x78] sm:$0xff]  }
 0x216   : > { %v3875_v2 = vpop.permute.xlu1 %3874  ;;  %v4073_v53 = vsel %vm2216_vm8, %v4057_v19, %v3913_v59  ;;  %v4606_v26 = vor.u32 %v4605_v14, %v4602_v50  ;;  %v4611_v0 = vrot.slane %v4609_v37, 5  ;;  %v5072_v38 = vsel %vm10108_vm7, %v8802_v24, %v5071_v28  ;;  %v12098_v25 = vld [vmem:[#allocation3 + $0x2c] sm:$0x1]  ;;  %v9637_v59 = vld [vmem:[%s13920_s3 + $0x28] sm:$0xff]   ;;  %v4826_v37 = vld [vmem:[#allocation3 + $0x38] sm:$0x1] }
 0x217   : > { %5477 = vrot.lane.b32.xlu1 %v8826_v8, %s9912_s12  ;;  %v5075_v61 = vsel %vm10108_vm7, %v5073_v62, %v5074_v33  ;;  %v5164_v60 = vrot.slane %v5162_v5, 4  ;;  %v5165_v3 = vshll.u32 %v12055_v41, 16  ;;  %v4615_v30 = vrot.slane %v4613_v22, 4  ;;  %13968 = vst [vmem:[#allocation12_spill] sm:$0xff] %v12098_v25  ;;  %v12106_v5 = vld [vmem:[#allocation3 + $0x34] sm:$0xf]  ;;  %9162 = vmatpush3.bf16.msra.mxu0 %v9637_v59 }
 0x218   : > { %v8858_v51 = vcombine.low %v5072_v38, %v5075_v61  ;;  %v4619_v43 = vshll.u32 %v12082_v31, 16  ;;  %v5171_v29 = vshll.u32 %v12084_v12, 16  ;;  %v4607_v6 = vrot.slane %v4606_v26, 4  ;;  %v5026_v19 = vld [vmem:[#allocation3 + $0x30] sm:$0xe]  ;;  %v9638_v8 = vld [vmem:[%s13920_s3 + $0xa0] sm:$0xff]  }
 0x219   : > { %v3953_v39 = vpop.permute.xlu0 %3952  ;;  %v5167_v24 = vrot.slane %v5165_v3, 5  ;;  %v5175_v28 = vshrl.u32 %v12084_v12, 16  ;;  %v4027_v63 = vsel %vm2165_vm2, %v4011_v32, %v12032_v10  ;;  %v4616_v50 = vor.u32 %v4615_v30, %v4611_v0  ;;  %v9640_v10 = vld [vmem:[%s13920_s3 + $0x70] sm:$0xff]   ;;  %v9641_v32 = vld [vmem:[%s13920_s3 + $0xe8] sm:$0xff]   ;;  %9224 = vmatpush3.bf16.msra.mxu1 %v9638_v8  ;;  %v9646_v8 = vld [vmem:[%s13920_s3 + $0x38] sm:$0xff]  }
 0x21a   : > { %v3915_v57 = vpop.permute.xlu1 %3914  ;;  %v4089_v55 = vsel %vm2233_vm6, %v4073_v53, %v3953_v39  ;;  %v5173_v14 = vrot.slane %v5171_v29, 5  ;;  %v4043_v62 = vsel %vm13969_vm15, %v4027_v63, %v3827_v23  ;;  %v5181_v26 = vshll.u32 %v12098_v25, 16  ;;  %v9642_v22 = vld [vmem:[%s13920_s3 + $0x30] sm:$0xff]   ;;  %v9643_v3 = vld [vmem:[%s13920_s3 + $0xa8] sm:$0xff]   ;;  %9163 = vmatprep.subr.bf16.mxu0 %v9640_v10  ;;  %9225 = vmatprep.subr.bf16.mxu1 %v9641_v32 }
 0x21b   : > { %9471 = vmatprep.mubr.msk.bf16.mxu1 %vm2277_vm9, %v4089_v55  ;;  %5613 = vrot.lane.b32.xlu1 %v8858_v51, %s9912_s12  ;;  %v5168_v33 = vor.u32 %v5167_v24, %v5164_v60  ;;  %v5177_v53 = vrot.slane %v5175_v28, 4  ;;  %v4059_v23 = vsel %vm2199_vm5, %v4043_v62, %v3875_v2  ;;  %v4617_v38 = vrot.slane %v4616_v50, 4  ;;  %v12149_v50 = vld [vmem:[#allocation3 + $0x34] sm:$0xf] }
 0x21c   : > { %v4621_v61 = vrot.slane %v4619_v43, 5  ;;  %v5078_v60 = vrot.slane %v12106_v5, 5  ;;  %v4075_v39 = vsel %vm2216_vm8, %v4059_v23, %v3915_v57  ;;  %v4612_v30 = vsel %vm10128_vm11, %v4607_v6, %v4611_v0  ;;  %v12140_v43 = vld [vmem:[#allocation3 + $0x30] sm:$0xf]  ;;  %9164 = vmatpush3.bf16.msra.mxu0 %v9642_v22  ;;  %v12174_v22 = vld [vmem:[#allocation3 + $0x24] sm:$0xf] }
 0x21d   : > { %v5169_v2 = vrot.slane %v5168_v33, 4  ;;  %v5178_v29 = vor.u32 %v5177_v53, %v5173_v14  ;;  %v5081_v28 = vrot.slane %v4826_v37, 5  ;;  %v5183_v59 = vrot.slane %v5181_v26, 5  ;;  %v12162_v26 = vld [vmem:[#allocation3 + $0x30] sm:$0xf]  ;;  %9226 = vmatpush3.bf16.msra.mxu1 %v9643_v3  ;;  %9165 = vmatprep.subr.bf16.mxu0 %v9644_v40 }
 0x21e   : > { %v3955_v51 = vpop.permute.xlu1 %3954  ;;  %v4622_v24 = vsel %vm10128_vm11, %v4617_v38, %v4621_v61  ;;  %v5080_v57 = vrot.slane %v5078_v60, 4  ;;  %v8803_v63 = vrot.slane %v5026_v19, 9  ;;  %v12156_v62 = vrot.slane %v4832_v4, 4  ;;  %v9647_v19 = vld [vmem:[%s13920_s3 + $0xb0] sm:$0xff]   ;;  %v12177_v38 = vld [vmem:[#allocation3 + $0x34] sm:$0xf]  ;;  %9227 = vmatprep.subr.bf16.mxu1 %v9645_v21 }
 0x21f   : > { %v4091_v55 = vsel %vm2233_vm6, %v4075_v39, %v3955_v51  ;;  %v8827_v0 = vcombine.low %v4612_v30, %v4622_v24  ;;  %v5179_v6 = vrot.slane %v5178_v29, 4  ;;  %v4856_v33 = vshrl.u32 %v11953_v13, 16  ;;  %v9648_v61 = vld [vmem:[%s13920_s3 + $0xf8] sm:$0xff]   ;;  %v4523_v40 = vld [vmem:[#allocation3 + $0x38] sm:$0x1] }
 0x220   : > { %9472 = vmatmul.mubr.msk.bf16.gmra.mrb[12].mxu1 %vm2277_vm9, %v4091_v55  ;;  %v5082_v37 = vsel %vm10108_vm7, %v5080_v57, %v5081_v28  ;;  %v4624_v53 = vshrl.u32 %v12140_v43, 16  ;;  %v5174_v4 = vsel %vm10128_vm11, %v5169_v2, %v5173_v14  ;;  %v5079_v32 = vsel %vm10108_vm7, %v8803_v63, %v5078_v60  ;;  %v5131_v29 = vld [vmem:[#allocation3 + $0x38] sm:$0x1]  ;;  %9166 = vmatpush3.bf16.msra.mxu0 %v9646_v8 }
 0x221   : > { %5479 = vrot.lane.b32.xlu1 %v8827_v0, %s9912_s12  ;;  %v5184_v10 = vsel %vm10128_vm11, %v5179_v6, %v5183_v59  ;;  %v4627_v23 = vshll.u32 %v12140_v43, 16  ;;  %v8842_v14 = vcombine.low %v12174_v22, %v12065_v42  ;;  %v4633_v51 = vshll.u32 %v12149_v50, 16  ;;  %9228 = vmatpush3.bf16.msra.mxu1 %v9647_v19  ;;  %v9649_v0 = vld [vmem:[%s13920_s3 + $0xb8] sm:$0xff]  }
 0x222   : > { %v8873_v3 = vcombine.low %v5174_v4, %v5184_v10  ;;  %v4626_v39 = vrot.slane %v4624_v53, 4  ;;  %v8859_v60 = vcombine.low %v5079_v32, %v5082_v37  ;;  %v4637_v2 = vshrl.u32 %v12149_v50, 16  ;;  %9229 = vmatprep.subr.bf16.mxu1 %v9648_v61 }
 0x223   : > { %v4629_v30 = vrot.slane %v4627_v23, 5  ;;  %v5186_v55 = vshrl.u32 %v12162_v26, 16  ;;  %v4635_v21 = vrot.slane %v4633_v51, 5  ;;  %v5189_v24 = vshll.u32 %v12162_v26, 16 }
 0x224   : > { %5683 = vrot.lane.b32.xlu0 %v8873_v3, %s9912_s12  ;;  %v5195_v57 = vshll.u32 %v12177_v38, 16  ;;  %v5199_v28 = vshrl.u32 %v12177_v38, 16  ;;  %v4639_v59 = vrot.slane %v4637_v2, 4  ;;  %v4643_v63 = vshll.u32 %v4523_v40, 16 }
 0x225   : > { %5615 = vrot.lane.b32.xlu1 %v8859_v60, %s9912_s12  ;;  %v4630_v6 = vor.u32 %v4629_v30, %v4626_v39  ;;  %v5188_v8 = vrot.slane %v5186_v55, 4  ;;  %v5191_v37 = vrot.slane %v5189_v24, 5  ;;  %v5205_v10 = vshll.u32 %v5131_v29, 16  ;;  %9230 = vmatpush3.bf16.msra.mxu1 %v9649_v0 }
 0x226   : > { %v5197_v53 = vrot.slane %v5195_v57, 5  ;;  %v5201_v4 = vrot.slane %v5199_v28, 4  ;;  %v4837_v32 = vrot.slane %v4835_v47, 5  ;;  %v4859_v19 = vshll.u32 %v11953_v13, 16 }
 0x227   : > { %v4631_v23 = vrot.slane %v4630_v6, 4  ;;  %v4640_v3 = vor.u32 %v4639_v59, %v4635_v21  ;;  %v5192_v51 = vor.u32 %v5191_v37, %v5188_v8  ;;  %v4841_v39 = vshll.u32 %v11899_v56, 16 }
 0x228   : > { %5549 = vrot.lane.b32.xlu0 %v8842_v14, %s9912_s12  ;;  %v5202_v60 = vor.u32 %v5201_v4, %v5197_v53  ;;  %v12200_v40 = vrot.slane %v4856_v33, 4  ;;  %v4645_v30 = vrot.slane %v4643_v63, 5  ;;  %v5207_v55 = vrot.slane %v5205_v10, 5  ;;  %v12218_v4 = vld [vmem:[#allocation3 + $0xc] sm:$0xe] }
 0x229   : > { %v4641_v61 = vrot.slane %v4640_v3, 4  ;;  %v5193_v2 = vrot.slane %v5192_v51, 4  ;;  %v12203_v47 = vrot.slane %v4859_v19, 5  ;;  %v4636_v13 = vsel %vm10128_vm11, %v4631_v23, %v4635_v21  ;;  %v12222_v19 = vld [vmem:[#allocation3 + $0x30] sm:$0xf] }
 0x22a   : > { %v5203_v29 = vrot.slane %v5202_v60, 4  ;;  %v4838_v24 = vor.u32 %v4837_v32, %v12156_v62  ;;  %v4843_v6 = vrot.slane %v4841_v39, 5  ;;  %v4847_v37 = vrot.slane %v4845_v20, 4 }
 0x22b   : > { %v4646_v14 = vsel %vm10128_vm11, %v4641_v61, %v4645_v30  ;;  %v5198_v28 = vsel %vm10128_vm11, %v5193_v2, %v5197_v53  ;;  %v4851_v62 = vshll.u32 %v11901_v46, 16  ;;  %v4862_v3 = vor.u32 %v12203_v47, %v12200_v40  ;;  %v2644_v40 = vld [vmem:[#allocation3 + $0x48] sm:$0xf] }
 0x22c   : > { %v8828_v33 = vcombine.low %v4636_v13, %v4646_v14  ;;  %v5208_v0 = vsel %vm10128_vm11, %v5203_v29, %v5207_v55  ;;  %v4839_v23 = vrot.slane %v4838_v24, 4  ;;  %v8843_v46 = vcombine.low %v12222_v19, %v12106_v5 }
 0x22d   : > { %v9447_v57 = vpop.f32.mrb[8].mxu0  ;;  %v8874_v63 = vcombine.low %v5198_v28, %v5208_v0  ;;  %v4848_v39 = vor.u32 %v4847_v37, %v4843_v6  ;;  %v8793_v29 = vrot.slane %v12218_v4, 9  ;;  %v4853_v14 = vrot.slane %v4851_v62, 5 }
 0x22e   : > { %v2373_v56 = vadd.f32 %v9447_v57, %v11820_v45  ;;  %v2364_v59 = vpop.f32.mrb[9].mxu0  ;;  %5481 = vrot.lane.b32.xlu1 %v8828_v33, %s9912_s12  ;;  %vm5721_vm6 = vcmask 523264  }
 0x22f   : > { %v2365_v21 = vadd.f32 %v11820_v45, %v2364_v59  ;;  %v9448_v8 = vpop.f32.mrb[10].mxu0  ;;  %5685 = vrot.lane.b32.xlu0 %v8874_v63, %s9912_s12  ;;  %v4849_v13 = vrot.slane %v4848_v39, 4  ;;  %v2637_v63 = vld [vmem:[#allocation3 + $0x3c] sm:$0xf] }
 0x230   : > { %v9106_v10 = vpack.c.bf16 %v2373_v56, %v2373_v56  ;;  %v2376_v53 = vadd.f32 %v9448_v8, %v11820_v45  ;;  %v2367_v32 = vpop.f32.mrb[11].mxu0 }
 0x231   : > { %v9104_v51 = vpack.c.bf16 %v2365_v21, %v2365_v21  ;;  %v2368_v60 = vadd.f32 %v11820_v45, %v2367_v32  ;;  %v4844_v45 = vsel %vm10128_vm11, %v4839_v23, %v4843_v6  ;;  %v4854_v56 = vsel %vm10128_vm11, %v4849_v13, %v4853_v14 }
 0x232   : > { %v2529_v61 = vshrl.u32 %v9106_v10, 16  ;;  %v2532_v30 = vshll.u32 %v9106_v10, 16  ;;  %v9107_v2 = vpack.c.bf16 %v2376_v53, %v2376_v53  ;;  %v12235_v37 = vcombine.low %v4844_v45, %v4854_v56  ;;  %v2648_v10 = vld [vmem:[#allocation3 + $0x50] sm:$0x1] }
 0x233   : > { %v2512_v55 = vshrl.u32 %v9104_v51, 16  ;;  %v9105_v20 = vpack.c.bf16 %v2368_v60, %v2368_v60  ;;  %v2515_v57 = vshll.u32 %v9104_v51, 16  ;;  %5551 = vrot.lane.b32.xlu0 %v8843_v46, %s9912_s12  ;;  %v4760_v32 = vrot.slane %v11910_v34, 5  ;;  %v2641_v46 = vld [vmem:[#allocation3 + $0x44] sm:$0x1] }
 0x234   : > { %v2531_v24 = vrot.slane %v2529_v61, 7  ;;  %v2537_v33 = vshrl.u32 %v9107_v2, 16  ;;  %v2540_v28 = vshll.u32 %v9107_v2, 16  ;;  %v4763_v2 = vrot.slane %v11926_v7, 5 }
 0x235   : > { %v2514_v47 = vrot.slane %v2512_v55, 7  ;;  %v2520_v0 = vshrl.u32 %v9105_v20, 16  ;;  %v2523_v8 = vshll.u32 %v9105_v20, 16  ;;  %v4762_v13 = vrot.slane %v4760_v32, 4 }
 0x236   : > { %v2534_v59 = vor.u32 %v2532_v30, %v2531_v24  ;;  %v2539_v21 = vrot.slane %v2537_v33, 7  ;;  %v2535_v62 = vrot.slane %v2531_v24, 4  ;;  %v4865_v33 = vshll.u32 %v11946_v11, 16 }
 0x237   : > { %v2517_v4 = vor.u32 %v2515_v57, %v2514_v47  ;;  %v2522_v53 = vrot.slane %v2520_v0, 7  ;;  %v2518_v23 = vrot.slane %v2514_v47, 4  ;;  %v12254_v57 = vrot.slane %v4862_v3, 4  ;;  %v4721_v3 = vld [vmem:[#allocation3 + $0x18] sm:$0xe] }
 0x238   : > { %v2645_v6 = vsel %vm11837_vm4, %v2534_v59, %v2644_v40  ;;  %v2542_v51 = vor.u32 %v2540_v28, %v2539_v21  ;;  %v2544_v60 = vrot.slane %v2539_v21, 4  ;;  %v12260_v45 = vsel %vm10108_vm7, %v8793_v29, %v4760_v32 }
 0x239   : > { %2646 = vst [vmem:[#allocation3 + $0x48] sm:$0xf] %v2645_v6  ;;  %v2638_v39 = vsel %vm11837_vm4, %v2517_v4, %v2637_v63  ;;  %v2525_v61 = vor.u32 %v2523_v8, %v2522_v53  ;;  %v2527_v30 = vrot.slane %v2522_v53, 4  ;;  %v12264_v40 = vsel %vm10108_vm7, %v4762_v13, %v4763_v2 }
 0x23a   : > { %2639 = vst [vmem:[#allocation3 + $0x3c] sm:$0xf] %v2638_v39  ;;  %v2543_v55 = vsel %vm10136_vm12, %v2535_v62, %v2542_v51  ;;  %v2649_v20 = vsel %vm11845_vm13, %v2544_v60, %v2648_v10  ;;  %v12268_v28 = vrot.slane %v4865_v33, 5  ;;  %v4767_v0 = vrot.slane %v11987_v52, 5 }
 0x23b   : > { %2647 = vst.msk [vmem:[#allocation3 + $0x4c] sm:$0xf] %vm280_vm0, %v2543_v55  ;;  %2650 = vst [vmem:[#allocation3 + $0x50] sm:$0x1] %v2649_v20  ;;  %v2526_v24 = vsel %vm10136_vm12, %v2518_v23, %v2525_v61  ;;  %v2642_v7 = vsel %vm11845_vm13, %v2527_v30, %v2641_v46  ;;  %v4770_v29 = vrot.slane %v12014_v35, 5  ;;  %v8794_v63 = vrot.slane %v4721_v3, 9 }
 0x23c   : > { %2640 = vst.msk [vmem:[#allocation3 + $0x40] sm:$0xf] %vm280_vm0, %v2526_v24  ;;  %2643 = vst [vmem:[#allocation3 + $0x44] sm:$0x1] %v2642_v7  ;;  %v4769_v59 = vrot.slane %v4767_v0, 4  ;;  %v4869_v2 = vshrl.u32 %v11946_v11, 16 }
 0x23d   : > { %v12289_v6 = vsel %vm10108_vm7, %v8794_v63, %v4767_v0  ;;  %v4875_v47 = vshll.u32 %v11979_v9, 16 }
 0x23e   : > { %v12282_v62 = vsel %vm10108_vm7, %v4769_v59, %v4770_v29  ;;  %13972 = vst [vmem:[#allocation15_spill] sm:$0xff] %v12289_v6 }
 0x23f   : > { %13971 = vst [vmem:[#allocation14_spill] sm:$0xff] %v12282_v62 }
 0x241   : > { %v12276_v21 = vld [vmem:[#allocation3 + $0x3c] sm:$0xf] }
 0x242   : > { %v12278_v8 = vld [vmem:[#allocation3 + $0x3c] sm:$0xf]  ;;  %v5210_v10 = vshrl.u32 %v12276_v21, 16  ;;  %v5213_v53 = vshll.u32 %v12276_v21, 16  ;;  %v4525_v52 = vld [vmem:[#allocation3 + $0x50] sm:$0x1] }
 0x243   : > { %13970 = vst [vmem:[#allocation13_spill] sm:$0xff] %v12278_v8  ;;  %v5027_v4 = vld [vmem:[#allocation3 + $0x3c] sm:$0xe]  ;;  %v4648_v32 = vshrl.u32 %v12278_v8, 16  ;;  %v12291_v35 = vld [vmem:[#allocation3 + $0x40] sm:$0xf] }
 0x244   : > { %v4827_v23 = vld [vmem:[#allocation3 + $0x44] sm:$0x1]  ;;  %v12293_v51 = vld [vmem:[#allocation3 + $0x40] sm:$0xf]  ;;  %v5085_v46 = vrot.slane %v12291_v35, 5  ;;  %v5212_v61 = vrot.slane %v5210_v10, 4 }
 0x245   : > { %v5132_v39 = vld [vmem:[#allocation3 + $0x44] sm:$0x1]  ;;  %v5215_v30 = vrot.slane %v5213_v53, 5  ;;  %v8804_v55 = vrot.slane %v5027_v4, 9  ;;  %v5088_v20 = vrot.slane %v4827_v23, 5  ;;  %v5219_v13 = vshll.u32 %v12293_v51, 16 }
 0x246   : > { %v5223_v24 = vshrl.u32 %v12293_v51, 16  ;;  %v12301_v7 = vld [vmem:[#allocation3 + $0x40] sm:$0xf]  ;;  %v5087_v33 = vrot.slane %v5085_v46, 4  ;;  %v4650_v0 = vrot.slane %v4648_v32, 4  ;;  %v4651_v59 = vshll.u32 %v12278_v8, 16 }
 0x247   : > { %13973 = vst [vmem:[#allocation16_spill] sm:$0xff] %v12301_v7  ;;  %v5216_v3 = vor.u32 %v5215_v30, %v5212_v61  ;;  %v5221_v29 = vrot.slane %v5219_v13, 5  ;;  %v5229_v27 = vshll.u32 %v5132_v39, 16  ;;  %v12304_v10 = vld [vmem:[#allocation3 + $0x44] sm:$0x1]  ;;  %v4657_v11 = vshll.u32 %v12301_v7, 16 }
 0x248   : > { %v5225_v63 = vrot.slane %v5223_v24, 4  ;;  %v5086_v4 = vsel %vm10108_vm7, %v8804_v55, %v5085_v46  ;;  %v5089_v53 = vsel %vm10108_vm7, %v5087_v33, %v5088_v20  ;;  %v4653_v23 = vrot.slane %v4651_v59, 5  ;;  %v12312_v13 = vld [vmem:[#allocation3 + $0x4c] sm:$0xf]  ;;  %v4828_v20 = vld [vmem:[#allocation3 + $0x50] sm:$0x1] }
 0x249   : > { %v4661_v60 = vshrl.u32 %v12301_v7, 16  ;;  %v8860_v61 = vcombine.low %v5086_v4, %v5089_v53  ;;  %v5217_v32 = vrot.slane %v5216_v3, 4  ;;  %v4659_v14 = vrot.slane %v4657_v11, 5  ;;  %v4515_v33 = vld [vmem:[#allocation3 + $0x48] sm:$0xf] }
 0x24a   : > { %v5226_v30 = vor.u32 %v5225_v63, %v5221_v29  ;;  %v4654_v39 = vor.u32 %v4653_v23, %v4650_v0  ;;  %v4667_v58 = vshll.u32 %v12304_v10, 16  ;;  %v5231_v55 = vrot.slane %v5229_v27, 5  ;;  %v12317_v4 = vld [vmem:[#allocation3 + $0x3c] sm:$0xf]  ;;  %v4516_v63 = vld [vmem:[#allocation3 + $0x4c] sm:$0xf] }
 0x24b   : > { %v4663_v24 = vrot.slane %v4661_v60, 4  ;;  %5617 = vrot.lane.b32.xlu1 %v8860_v61, %s9912_s12  ;;  %v5092_v3 = vrot.slane %v12312_v13, 5  ;;  %v5222_v60 = vsel %vm10128_vm11, %v5217_v32, %v5221_v29  ;;  %v8844_v9 = vcombine.low %v12317_v4, %v12291_v35  ;;  %v5121_v11 = vld [vmem:[#allocation3 + $0x48] sm:$0xf] }
 0x24c   : > { %v5227_v46 = vrot.slane %v5226_v30, 4  ;;  %v4655_v59 = vrot.slane %v4654_v39, 4  ;;  %v4871_v27 = vrot.slane %v4869_v2, 4  ;;  %v4669_v61 = vrot.slane %v4667_v58, 5  ;;  %v5028_v30 = vld [vmem:[#allocation3 + $0x48] sm:$0xe] }
 0x24d   : > { %v4664_v56 = vor.u32 %v4663_v24, %v4659_v14  ;;  %v5095_v39 = vrot.slane %v4828_v20, 5  ;;  %v5094_v24 = vrot.slane %v5092_v3, 4  ;;  %v4672_v49 = vshrl.u32 %v4515_v33, 16  ;;  %v5122_v2 = vld [vmem:[#allocation3 + $0x4c] sm:$0xf] }
 0x24e   : > { %v5232_v0 = vsel %vm10128_vm11, %v5227_v46, %v5231_v55  ;;  %v4675_v62 = vshll.u32 %v4515_v33, 16  ;;  %v4681_v6 = vshll.u32 %v4516_v63, 16  ;;  %v4660_v29 = vsel %vm10128_vm11, %v4655_v59, %v4659_v14  ;;  %v5133_v14 = vld [vmem:[#allocation3 + $0x50] sm:$0x1] }
 0x24f   : > { %v8875_v53 = vcombine.low %v5222_v60, %v5232_v0  ;;  %v4665_v23 = vrot.slane %v4664_v56, 4  ;;  %v4685_v46 = vshrl.u32 %v4516_v63, 16  ;;  %v5234_v55 = vshrl.u32 %v5121_v11, 16 }
 0x250   : > { %v8805_v58 = vrot.slane %v5028_v30, 9  ;;  %v4674_v60 = vrot.slane %v4672_v49, 4  ;;  %v4677_v20 = vrot.slane %v4675_v62, 5  ;;  %v5096_v0 = vsel %vm10108_vm7, %v5094_v24, %v5095_v39 }
 0x251   : > { %5687 = vrot.lane.b32.xlu0 %v8875_v53, %s9912_s12  ;;  %v4670_v32 = vsel %vm10128_vm11, %v4665_v23, %v4669_v61  ;;  %v4683_v33 = vrot.slane %v4681_v6, 5  ;;  %v4687_v41 = vrot.slane %v4685_v46, 4  ;;  %v4691_v34 = vshll.u32 %v4525_v52, 16 }
 0x252   : > { %v8829_v56 = vcombine.low %v4660_v29, %v4670_v32  ;;  %v4678_v53 = vor.u32 %v4677_v20, %v4674_v60  ;;  %v5236_v59 = vrot.slane %v5234_v55, 4  ;;  %v5237_v17 = vshll.u32 %v5121_v11, 16  ;;  %v9730_v55 = vld [vmem:[#allocation3 + $0x4] sm:$0xf] }
 0x253   : > { %v5243_v23 = vshll.u32 %v5122_v2, 16  ;;  %v5093_v63 = vsel %vm10108_vm7, %v8805_v58, %v5092_v3  ;;  %v4688_v49 = vor.u32 %v4687_v41, %v4683_v33  ;;  %v5247_v62 = vshrl.u32 %v5122_v2, 16  ;;  %v4719_v2 = vld [vmem:[#allocation3] sm:$0xe] }
 0x254   : > { %5483 = vrot.lane.b32.xlu1 %v8829_v56, %s9912_s12  ;;  %v4872_v61 = vor.u32 %v4871_v27, %v12268_v28  ;;  %v8861_v30 = vcombine.low %v5093_v63, %v5096_v0  ;;  %v4679_v6 = vrot.slane %v4678_v53, 4  ;;  %v5239_v39 = vrot.slane %v5237_v17, 5 }
 0x255   : > { %5553 = vrot.lane.b32.xlu0 %v8844_v9, %s9912_s12  ;;  %v5245_v52 = vrot.slane %v5243_v23, 5  ;;  %v4689_v24 = vrot.slane %v4688_v49, 4  ;;  %v4693_v29 = vrot.slane %v4691_v34, 5  ;;  %v5249_v32 = vrot.slane %v5247_v62, 4 }
 0x256   : > { %v5253_v46 = vshll.u32 %v5133_v14, 16  ;;  %v5240_v11 = vor.u32 %v5239_v39, %v5236_v59  ;;  %v4753_v9 = vrot.slane %v9730_v55, 5  ;;  %v4877_v56 = vrot.slane %v4875_v47, 5  ;;  %v12361_v39 = vld [vmem:[#allocation3 + $0x18] sm:$0xf] }
 0x257   : > { %v4684_v41 = vsel %vm10128_vm11, %v4679_v6, %v4683_v33  ;;  %v4694_v3 = vsel %vm10128_vm11, %v4689_v24, %v4693_v29  ;;  %v5250_v27 = vor.u32 %v5249_v32, %v5245_v52  ;;  %v4873_v17 = vrot.slane %v4872_v61, 4  ;;  %v12363_v24 = vld [vmem:[#allocation3 + $0x1c] sm:$0xf] }
 0x258   : > { %5619 = vrot.lane.b32.xlu1 %v8861_v30, %s9912_s12  ;;  %v8830_v58 = vcombine.low %v4684_v41, %v4694_v3  ;;  %v5241_v60 = vrot.slane %v5240_v11, 4  ;;  %v4880_v34 = vshrl.u32 %v12174_v22, 16  ;;  %v5255_v0 = vrot.slane %v5253_v46, 5  ;;  %v9734_v46 = vld [vmem:[#allocation3] sm:$0xf] }
 0x259   : > { %v5251_v20 = vrot.slane %v5250_v27, 4  ;;  %v4878_v53 = vsel %vm10128_vm11, %v4873_v17, %v4877_v56  ;;  %v4883_v47 = vshll.u32 %v12174_v22, 16  ;;  %v4904_v14 = vshrl.u32 %v12222_v19, 16  ;;  %v9731_v22 = vld [vmem:[#allocation3 + $0x8] sm:$0x1] }
 0x25a   : > { %v8792_v33 = vrot.slane %v4719_v2, 9  ;;  %v13974_v59 = vsel %vm10128_vm11, %v12254_v57, %v12268_v28  ;;  %v5246_v63 = vsel %vm10128_vm11, %v5241_v60, %v5245_v52  ;;  %v4755_v62 = vrot.slane %v4753_v9, 4  ;;  %v9735_v3 = vld [vmem:[%s13919_s2] ss:$0 sm:$0xff] }
 0x25b   : > { %v12354_v23 = vcombine.low %v13974_v59, %v4878_v53  ;;  %v5256_v49 = vsel %vm10128_vm11, %v5251_v20, %v5255_v0  ;;  %v4756_v61 = vrot.slane %v9731_v22, 5  ;;  %v12368_v29 = vrot.slane %v4880_v34, 4  ;;  %v12380_v60 = vld [vmem:[#allocation3 + $0x48] sm:$0xf]  ;;  %v5474_v59 = vpop.permute.xlu1 %5473 }
 0x25c   : > { %5485 = vrot.lane.b32.xlu1 %v8830_v58, %s9912_s12  ;;  %v8876_v6 = vcombine.low %v5246_v63, %v5256_v49  ;;  %v4907_v52 = vshll.u32 %v12222_v19, 16  ;;  %v8816_v11 = vcombine.low %v9734_v46, %v9730_v55  ;;  %v12371_v56 = vrot.slane %v4883_v47, 5  ;;  %v2662_v30 = vld [vmem:[#allocation3 + $0x68] sm:$0x1] }
 0x25d   : > { %v12373_v41 = vrot.slane %v4904_v14, 4  ;;  %v4928_v19 = vshrl.u32 %v12317_v4, 16  ;;  %v4754_v55 = vsel %vm10108_vm7, %v8792_v33, %v4753_v9  ;;  %v4757_v34 = vsel %vm10108_vm7, %v4755_v62, %v4756_v61 }
 0x25e   : > { %v9451_v32 = vpop.f32.mrb[12].mxu0  ;;  %5689 = vrot.lane.b32.xlu0 %v8876_v6, %s9912_s12  ;;  %v4931_v47 = vshll.u32 %v12317_v4, 16  ;;  %v8845_v14 = vcombine.low %v12380_v60, %v12312_v13  ;;  %v12389_v63 = vrot.slane %v4907_v52, 5  ;;  %v5724_v6 = vsel %vm5721_vm6, %v8816_v11, %v5474_v59 }
 0x25f   : > { %v2389_v27 = vadd.f32 %v9735_v3, %v9451_v32  ;;  %v2380_v2 = vpop.f32.mrb[13].mxu0  ;;  %v8832_v33 = vcombine.low %v4754_v55, %v4757_v34  ;;  %v4930_v46 = vrot.slane %v4928_v19, 4  ;;  %v4886_v13 = vor.u32 %v12371_v56, %v12368_v29  ;;  %v2651_v34 = vld [vmem:[#allocation3 + $0x54] sm:$0xf] }
 0x260   : > { %v2381_v17 = vadd.f32 %v9735_v3, %v2380_v2  ;;  %v9452_v58 = vpop.f32.mrb[14].mxu0 }
 0x261   : > { %v9110_v20 = vpack.c.bf16 %v2389_v27, %v2389_v27  ;;  %v2392_v0 = vadd.f32 %v9735_v3, %v9452_v58  ;;  %v2383_v53 = vpop.f32.mrb[15].mxu0 }
 0x262   : > { %v9108_v49 = vpack.c.bf16 %v2381_v17, %v2381_v17  ;;  %v2384_v22 = vadd.f32 %v9735_v3, %v2383_v53  ;;  %5555 = vrot.lane.b32.xlu0 %v8845_v14, %s9912_s12  ;;  %v4933_v3 = vrot.slane %v4931_v47, 5  ;;  %v2658_v17 = vld [vmem:[#allocation3 + $0x60] sm:$0xf]  ;;  %v4952_v53 = vshrl.u32 %v12380_v60, 16 }
 0x263   : > { %v2563_v32 = vshrl.u32 %v9110_v20, 16  ;;  %v9111_v9 = vpack.c.bf16 %v2392_v0, %v2392_v0  ;;  %v2566_v27 = vshll.u32 %v9110_v20, 16 }
 0x264   : > { %v2546_v61 = vshrl.u32 %v9108_v49, 16  ;;  %v9109_v4 = vpack.c.bf16 %v2384_v22, %v2384_v22  ;;  %v2549_v58 = vshll.u32 %v9108_v49, 16  ;;  %v4955_v22 = vshll.u32 %v12380_v60, 16 }
 0x265   : > { %v2565_v52 = vrot.slane %v2563_v32, 7  ;;  %v2571_v2 = vshrl.u32 %v9111_v9, 16  ;;  %v2574_v59 = vshll.u32 %v9111_v9, 16 }
 0x266   : > { %v2548_v11 = vrot.slane %v2546_v61, 7  ;;  %v2554_v0 = vshrl.u32 %v9109_v4, 16  ;;  %v2557_v56 = vshll.u32 %v9109_v4, 16  ;;  %v2655_v61 = vld [vmem:[#allocation3 + $0x5c] sm:$0x1] }
 0x267   : > { %v2568_v55 = vor.u32 %v2566_v27, %v2565_v52  ;;  %v2573_v14 = vrot.slane %v2571_v2, 7  ;;  %v2569_v19 = vrot.slane %v2565_v52, 4 }
 0x268   : > { %v2551_v28 = vor.u32 %v2549_v58, %v2548_v11  ;;  %v2556_v29 = vrot.slane %v2554_v0, 7  ;;  %v2552_v47 = vrot.slane %v2548_v11, 4  ;;  %v5546_v62 = vpop.permute.xlu0 %5545  ;;  %v12417_v58 = vld [vmem:[#allocation3 + $0x24] sm:$0xe]  ;;  %v12420_v0 = vrot.slane %v4952_v53, 4 }
 0x269   : > { %v2659_v20 = vsel %vm11837_vm4, %v2568_v55, %v2658_v17  ;;  %v2576_v32 = vor.u32 %v2574_v59, %v2573_v14  ;;  %v2578_v49 = vrot.slane %v2573_v14, 4  ;;  %v5756_v60 = vsel %vm5721_vm6, %v8832_v33, %v5546_v62 }
 0x26a   : > { %2660 = vst [vmem:[#allocation3 + $0x60] sm:$0xf] %v2659_v20  ;;  %v2652_v27 = vsel %vm11837_vm4, %v2551_v28, %v2651_v34  ;;  %v2559_v9 = vor.u32 %v2557_v56, %v2556_v29  ;;  %v2561_v2 = vrot.slane %v2556_v29, 4  ;;  %6201 = vmatprep.mubr.bf16.mxu0 %v5756_v60  ;;  %v4889_v17 = vshll.u32 %v12065_v42, 16  ;;  %13975 = vst [vmem:[#allocation17_spill] sm:$0xff] %v12420_v0 }
 0x26b   : > { %2653 = vst [vmem:[#allocation3 + $0x54] sm:$0xf] %v2652_v27  ;;  %v2577_v4 = vsel %vm10136_vm12, %v2569_v19, %v2576_v32  ;;  %v2663_v52 = vsel %vm11845_vm13, %v2578_v49, %v2662_v30  ;;  %6202 = vmatmul.mubr.bf16.vlgmr.msra.gmra.mrb[16].mxu0 %v5724_v6  ;;  %v4893_v62 = vshrl.u32 %v12065_v42, 16  ;;  %v4934_v30 = vor.u32 %v4933_v3, %v4930_v46  ;;  %v4724_v19 = vld [vmem:[#allocation3 + $0x3c] sm:$0xe] }
 0x26c   : > { %2661 = vst.msk [vmem:[#allocation3 + $0x64] sm:$0xf] %vm280_vm0, %v2577_v4  ;;  %2664 = vst [vmem:[#allocation3 + $0x68] sm:$0x1] %v2663_v52  ;;  %v2560_v28 = vsel %vm10136_vm12, %v2552_v47, %v2559_v9  ;;  %v2656_v33 = vsel %vm11845_vm13, %v2561_v2, %v2655_v61  ;;  %v4899_v55 = vshll.u32 %v12067_v48, 16  ;;  %v4910_v34 = vor.u32 %v12389_v63, %v12373_v41 }
 0x26d   : > { %2654 = vst.msk [vmem:[#allocation3 + $0x58] sm:$0xf] %vm280_vm0, %v2560_v28  ;;  %2657 = vst [vmem:[#allocation3 + $0x5c] sm:$0x1] %v2656_v33  ;;  %v4937_v14 = vshll.u32 %v12291_v35, 16  ;;  %v12426_v59 = vrot.slane %v4955_v22, 5 }
 0x26e   : > { %v13935_v6 = vrot.slane %v12074_v16, 5  ;;  %v12429_v42 = vrot.slane %v4934_v30, 4  ;;  %v4788_v46 = vrot.slane %v12301_v7, 5  ;;  %v12432_v3 = vrot.slane %v4886_v13, 4 }
 0x26f   : > { %13976 = vst [vmem:[#allocation18_spill] sm:$0xff] %v12426_v59  ;;  %v12434_v53 = vrot.slane %v4889_v17, 5  ;;  %v12437_v29 = vrot.slane %v4937_v14, 5  ;;  %v12439_v41 = vrot.slane %v4893_v62, 4  ;;  %v4791_v63 = vrot.slane %v12304_v10, 5 }
 0x270   : > { %v4790_v35 = vrot.slane %v4788_v46, 4  ;;  %v12444_v56 = vrot.slane %v4899_v55, 5  ;;  %v8797_v47 = vrot.slane %v4724_v19, 9  ;;  %v12453_v61 = vrot.slane %v13935_v6, 4  ;;  %v12484_v14 = vld [vmem:[%s13919_s2] ss:$0 sm:$0xff] }
 0x271   : > { %v12455_v10 = vrot.slane %v4910_v34, 4  ;;  %v4917_v7 = vshrl.u32 %v12106_v5, 16 }
 0x272   : > { %v5123_v32 = vld [vmem:[#allocation3 + $0x54] sm:$0xf]  ;;  %v12461_v9 = vsel %vm10108_vm7, %v4790_v35, %v4791_v63  ;;  %v12465_v17 = vsel %vm10108_vm7, %v8797_v47, %v4788_v46  ;;  %v4913_v47 = vshll.u32 %v12106_v5, 16 }
 0x273   : > { %v4517_v49 = vld [vmem:[#allocation3 + $0x54] sm:$0xf]  ;;  %13977 = vst [vmem:[#allocation19_spill] sm:$0xff] %v12461_v9  ;;  %v5258_v60 = vshrl.u32 %v5123_v32, 16  ;;  %v5261_v4 = vshll.u32 %v5123_v32, 16  ;;  %13978 = vst [vmem:[#allocation20_spill] sm:$0xff] %v12465_v17 }
 0x274   : > { %v5029_v2 = vld [vmem:[#allocation3 + $0x54] sm:$0xe]  ;;  %v4696_v52 = vshrl.u32 %v4517_v49, 16  ;;  %v12467_v28 = vld [vmem:[#allocation3 + $0x58] sm:$0xf]  ;;  %v4699_v6 = vshll.u32 %v4517_v49, 16 }
 0x275   : > { %v4829_v33 = vld [vmem:[#allocation3 + $0x5c] sm:$0x1]  ;;  %v5124_v62 = vld [vmem:[#allocation3 + $0x58] sm:$0xf]  ;;  %v5099_v19 = vrot.slane %v12467_v28, 5  ;;  %v5260_v35 = vrot.slane %v5258_v60, 4 }
 0x276   : > { %v5134_v46 = vld [vmem:[#allocation3 + $0x5c] sm:$0x1]  ;;  %v5263_v63 = vrot.slane %v5261_v4, 5  ;;  %v8806_v32 = vrot.slane %v5029_v2, 9  ;;  %v5102_v22 = vrot.slane %v4829_v33, 5  ;;  %v5267_v13 = vshll.u32 %v5124_v62, 16 }
 0x277   : > { %v5271_v27 = vshrl.u32 %v5124_v62, 16  ;;  %v4518_v11 = vld [vmem:[#allocation3 + $0x58] sm:$0xf]  ;;  %v5101_v30 = vrot.slane %v5099_v19, 4  ;;  %v4698_v48 = vrot.slane %v4696_v52, 4  ;;  %v5277_v60 = vshll.u32 %v5134_v46, 16 }
 0x278   : > { %v5264_v20 = vor.u32 %v5263_v63, %v5260_v35  ;;  %v5269_v34 = vrot.slane %v5267_v13, 5  ;;  %v4705_v4 = vshll.u32 %v4518_v11, 16  ;;  %v5100_v2 = vsel %vm10108_vm7, %v8806_v32, %v5099_v19  ;;  %v4526_v62 = vld [vmem:[#allocation3 + $0x5c] sm:$0x1]  ;;  %v12548_v17 = vld [vmem:[#allocation3 + $0x38] sm:$0x1] }
 0x279   : > { %v5273_v57 = vrot.slane %v5271_v27, 4  ;;  %v5103_v33 = vsel %vm10108_vm7, %v5101_v30, %v5102_v22  ;;  %v4701_v55 = vrot.slane %v4699_v6, 5  ;;  %v4709_v35 = vshrl.u32 %v4518_v11, 16 }
 0x27a   : > { %v8862_v52 = vcombine.low %v5100_v2, %v5103_v33  ;;  %v9461_v49 = vpop.f32.mrb[0].mxu1  ;;  %v5265_v63 = vrot.slane %v5264_v20, 4  ;;  %v4707_v59 = vrot.slane %v4705_v4, 5  ;;  %v5279_v30 = vrot.slane %v5277_v60, 5 }
 0x27b   : > { %v5274_v25 = vor.u32 %v5273_v57, %v5269_v34  ;;  %v4181_v0 = vadd.f32 %v9461_v49, %v12484_v14  ;;  %v4172_v13 = vpop.f32.mrb[1].mxu1  ;;  %v4702_v27 = vor.u32 %v4701_v55, %v4698_v48  ;;  %v4711_v46 = vrot.slane %v4709_v35, 4 }
 0x27c   : > { %5621 = vrot.lane.b32.xlu1 %v8862_v52, %s9912_s12  ;;  %v4173_v19 = vadd.f32 %v12484_v14, %v4172_v13  ;;  %v4715_v6 = vshll.u32 %v4526_v62, 16  ;;  %v9462_v11 = vpop.f32.mrb[2].mxu1  ;;  %v5270_v48 = vsel %vm10128_vm11, %v5265_v63, %v5269_v34  ;;  %v12500_v60 = vrot.slane %v4913_v47, 5 }
 0x27d   : > { %v5275_v22 = vrot.slane %v5274_v25, 4  ;;  %v9114_v32 = vpack.c.bf16 %v4181_v0, %v4181_v0  ;;  %v4703_v2 = vrot.slane %v4702_v27, 4  ;;  %v4712_v20 = vor.u32 %v4711_v46, %v4707_v59  ;;  %v4175_v4 = vpop.f32.mrb[3].mxu1 }
 0x27e   : > { %v4184_v57 = vadd.f32 %v9462_v11, %v12484_v14  ;;  %v9112_v33 = vpack.c.bf16 %v4173_v19, %v4173_v19  ;;  %v4176_v55 = vadd.f32 %v12484_v14, %v4175_v4  ;;  %v12502_v62 = vrot.slane %v4917_v7, 4  ;;  %v4452_v19 = vld [vmem:[#allocation3 + $0x78] sm:$0xf]  ;;  %v4445_v11 = vld [vmem:[#allocation3 + $0x6c] sm:$0xf] }
 0x27f   : > { %v5280_v5 = vsel %vm10128_vm11, %v5275_v22, %v5279_v30  ;;  %v4301_v35 = vshrl.u32 %v9114_v32, 16  ;;  %v4713_v52 = vrot.slane %v4712_v20, 4  ;;  %v4717_v49 = vrot.slane %v4715_v6, 5  ;;  %v12509_v4 = vld [vmem:[#allocation3 + $0x54] sm:$0xf]  ;;  %v9656_v6 = vld [vmem:[%s13920_s3 + $0x100] sm:$0xff]  }
 0x280   : > { %v8877_v25 = vcombine.low %v5270_v48, %v5280_v5  ;;  %v4284_v0 = vshrl.u32 %v9112_v33, 16  ;;  %v9115_v13 = vpack.c.bf16 %v4184_v57, %v4184_v57  ;;  %v4304_v46 = vshll.u32 %v9114_v32, 16  ;;  %v4456_v57 = vld [vmem:[#allocation3 + $0x80] sm:$0x1]  ;;  %9475 = vmatprep.subr.bf16.mxu0 %v9656_v6 }
 0x281   : > { %v4303_v27 = vrot.slane %v4301_v35, 7  ;;  %v4708_v34 = vsel %vm10128_vm11, %v4703_v2, %v4707_v59  ;;  %v9113_v63 = vpack.c.bf16 %v4176_v55, %v4176_v55  ;;  %v4287_v30 = vshll.u32 %v9112_v33, 16  ;;  %v12516_v2 = vld [vmem:[#allocation3 + $0x64] sm:$0xf]  ;;  %v5030_v33 = vld [vmem:[#allocation3 + $0x60] sm:$0xe]  ;;  %9476 = vmatpush3.bf16.msra.mxu0 %v9656_v6 }
 0x282   : > { %5691 = vrot.lane.b32.xlu0 %v8877_v25, %s9912_s12  ;;  %v4286_v22 = vrot.slane %v4284_v0, 7  ;;  %v4718_v7 = vsel %vm10128_vm11, %v4713_v52, %v4717_v49  ;;  %v4309_v47 = vshrl.u32 %v9115_v13, 16  ;;  %v8846_v59 = vcombine.low %v12509_v4, %v12467_v28  ;;  %v5125_v0 = vld [vmem:[#allocation3 + $0x60] sm:$0xf]  ;;  %v4830_v28 = vld [vmem:[#allocation3 + $0x68] sm:$0x1] }
 0x283   : > { %v4306_v32 = vor.u32 %v4304_v46, %v4303_v27  ;;  %v8831_v20 = vcombine.low %v4708_v34, %v4718_v7  ;;  %v4292_v48 = vshrl.u32 %v9113_v63, 16  ;;  %v4307_v5 = vrot.slane %v4303_v27, 4 }
 0x284   : > { %v4289_v55 = vor.u32 %v4287_v30, %v4286_v22  ;;  %v4311_v35 = vrot.slane %v4309_v47, 7  ;;  %v4312_v25 = vshll.u32 %v9115_v13, 16  ;;  %v4290_v49 = vrot.slane %v4286_v22, 4  ;;  %v4449_v13 = vld [vmem:[#allocation3 + $0x74] sm:$0x1] }
 0x285   : > { %v4453_v52 = vsel %vm11837_vm4, %v4306_v32, %v4452_v19  ;;  %5487 = vrot.lane.b32.xlu1 %v8831_v20, %s9912_s12  ;;  %v4294_v46 = vrot.slane %v4292_v48, 7  ;;  %v4295_v34 = vshll.u32 %v9113_v63, 16  ;;  %v5106_v47 = vrot.slane %v12516_v2, 5  ;;  %v5126_v20 = vld [vmem:[#allocation3 + $0x64] sm:$0xf] }
 0x286   : > { %5557 = vrot.lane.b32.xlu0 %v8846_v59, %s9912_s12  ;;  %4454 = vst [vmem:[#allocation3 + $0x78] sm:$0xf] %v4453_v52  ;;  %v4446_v27 = vsel %vm11837_vm4, %v4289_v55, %v4445_v11  ;;  %v4314_v30 = vor.u32 %v4312_v25, %v4311_v35  ;;  %v4316_v7 = vrot.slane %v4311_v35, 4  ;;  %v8807_v32 = vrot.slane %v5030_v33, 9  ;;  %v6478_v55 = vld [vmem:[#allocation3 + $0x60] sm:$0xf] }
 0x287   : > { %4447 = vst [vmem:[#allocation3 + $0x6c] sm:$0xf] %v4446_v27  ;;  %v4297_v19 = vor.u32 %v4295_v34, %v4294_v46  ;;  %v4299_v22 = vrot.slane %v4294_v46, 4  ;;  %v5282_v48 = vshrl.u32 %v5125_v0, 16  ;;  %v5108_v52 = vrot.slane %v5106_v47, 4  ;;  %v5682_v27 = vpop.permute.xlu0 %5681 }
 0x288   : > { %v4315_v63 = vsel %vm10136_vm12, %v4307_v5, %v4314_v30  ;;  %v4457_v59 = vsel %vm11845_vm13, %v4316_v7, %v4456_v57  ;;  %v5109_v11 = vrot.slane %v4830_v28, 5  ;;  %v5135_v35 = vld [vmem:[#allocation3 + $0x68] sm:$0x1]  ;;  %v5285_v46 = vshll.u32 %v5125_v0, 16  ;;  %v6479_v34 = vld [vmem:[#allocation3 + $0x64] sm:$0xf]  ;;  %v5610_v5 = vpop.permute.xlu1 %5609 }
 0x289   : > { %4455 = vst.msk [vmem:[#allocation3 + $0x7c] sm:$0xf] %vm280_vm0, %v4315_v63  ;;  %4458 = vst [vmem:[#allocation3 + $0x80] sm:$0x1] %v4457_v59  ;;  %v4298_v6 = vsel %vm10136_vm12, %v4290_v49, %v4297_v19  ;;  %v4450_v33 = vsel %vm11845_vm13, %v4299_v22, %v4449_v13  ;;  %v5284_v25 = vrot.slane %v5282_v48, 4  ;;  %v5107_v57 = vsel %vm10108_vm7, %v8807_v32, %v5106_v47 }
 0x28a   : > { %4448 = vst.msk [vmem:[#allocation3 + $0x70] sm:$0xf] %vm280_vm0, %v4298_v6  ;;  %4451 = vst [vmem:[#allocation3 + $0x74] sm:$0x1] %v4450_v33  ;;  %v5110_v28 = vsel %vm10108_vm7, %v5108_v52, %v5109_v11  ;;  %v5291_v30 = vshll.u32 %v5126_v20, 16  ;;  %v5295_v49 = vshrl.u32 %v5126_v20, 16 }
 0x28b   : > { %v8863_v7 = vcombine.low %v5107_v57, %v5110_v28  ;;  %v5287_v19 = vrot.slane %v5285_v46, 5  ;;  %v6494_v13 = vld [vmem:[#allocation3 + $0x68] sm:$0x1]  ;;  %v6503_v22 = vshrl.u32 %v6478_v55, 16  ;;  %v6506_v48 = vshll.u32 %v6478_v55, 16  ;;  %v5548_v9 = vpop.permute.xlu0 %5547 }
 0x28c   : > { %v5293_v0 = vrot.slane %v5291_v30, 5  ;;  %v5297_v63 = vrot.slane %v5295_v49, 4  ;;  %v5301_v59 = vshll.u32 %v5135_v35, 16  ;;  %v6512_v8 = vshll.u32 %v6479_v34, 16  ;;  %v9658_v6 = vld [vmem:[%s13920_s3 + $0x40] sm:$0xff]   ;;  %v5476_v49 = vpop.permute.xlu1 %5475 }
 0x28d   : > { %5623 = vrot.lane.b32.xlu1 %v8863_v7, %s9912_s12  ;;  %v5288_v47 = vor.u32 %v5287_v19, %v5284_v25  ;;  %v6505_v32 = vrot.slane %v6503_v22, 4  ;;  %v6508_v52 = vrot.slane %v6506_v48, 5  ;;  %v6516_v11 = vshrl.u32 %v6479_v34, 16  ;;  %9291 = vmatprep.subr.bf16.mxu1 %v9658_v6 }
 0x28e   : > { %v5298_v20 = vor.u32 %v5297_v63, %v5293_v0  ;;  %v6514_v33 = vrot.slane %v6512_v8, 5  ;;  %v6522_v46 = vshll.u32 %v6494_v13, 16  ;;  %v13979_v55 = vor.u32 %v12439_v41, %v12434_v53  ;;  %v6480_v8 = vld [vmem:[#allocation3 + $0x6c] sm:$0xf] }
 0x28f   : > { %v5289_v35 = vrot.slane %v5288_v47, 4  ;;  %v6509_v28 = vor.u32 %v6508_v52, %v6505_v32  ;;  %v6518_v30 = vrot.slane %v6516_v11, 4  ;;  %v4923_v25 = vshll.u32 %v12548_v17, 16  ;;  %v9659_v32 = vld [vmem:[%s13920_s3] sm:$0xff]   ;;  %v9668_v17 = vld [vmem:[%s13920_s3 + $0x58] sm:$0xff]  }
 0x290   : > { %v12546_v57 = vrot.slane %v13979_v55, 4  ;;  %v5299_v7 = vrot.slane %v5298_v20, 4  ;;  %v5303_v34 = vrot.slane %v5301_v59, 5  ;;  %v6524_v19 = vrot.slane %v6522_v46, 5 }
 0x291   : > { %v4920_v13 = vor.u32 %v12502_v62, %v12500_v60  ;;  %v5294_v41 = vsel %vm10128_vm11, %v5289_v35, %v5293_v0  ;;  %v6510_v22 = vrot.slane %v6509_v28, 4  ;;  %v6519_v48 = vor.u32 %v6518_v30, %v6514_v33  ;;  %v6481_v6 = vld [vmem:[#allocation3 + $0x70] sm:$0xf]  ;;  %v6495_v47 = vld [vmem:[#allocation3 + $0x74] sm:$0x1] }
 0x292   : > { %v5788_v63 = vsel %vm5721_vm6, %v12235_v37, %v5610_v5  ;;  %v5304_v59 = vsel %vm10128_vm11, %v5299_v7, %v5303_v34  ;;  %v13980_v52 = vcombine.low %v12361_v39, %v12363_v24  ;;  %v13981_v0 = vcombine.low %v12260_v45, %v12264_v40  ;;  %v13982_v37 = vld [vmem:[#allocation7_spill] sm:$0xff]  ;;  %v13983_v5 = vld [vmem:[#allocation8_spill] sm:$0xff]  ;;  %v5127_v35 = vld [vmem:[#allocation3 + $0x6c] sm:$0xf] }
 0x293   : > { %v13984_v46 = vcombine.low %v13982_v37, %v13983_v5  ;;  %v8878_v28 = vcombine.low %v5294_v41, %v5304_v59  ;;  %v6515_v30 = vsel %vm10128_vm11, %v6510_v22, %v6514_v33  ;;  %v6520_v7 = vrot.slane %v6519_v48, 4  ;;  %v5128_v41 = vld [vmem:[#allocation3 + $0x70] sm:$0xf]  ;;  %v12579_v48 = vld [vmem:[#allocation3 + $0x60] sm:$0xf] }
 0x294   : > { %v5820_v11 = vsel %vm5721_vm6, %v13980_v52, %v5682_v27  ;;  %v5760_v20 = vsel %vm5721_vm6, %v13981_v0, %v5548_v9  ;;  %v6527_v39 = vshrl.u32 %v6480_v8, 16  ;;  %v6530_v24 = vshll.u32 %v6480_v8, 16  ;;  %v9672_v62 = vld [vmem:[%s13920_s3 + $0x68] sm:$0xff]  }
 0x295   : > { %v5728_v55 = vsel %vm5721_vm6, %v13984_v46, %v5476_v49  ;;  %6298 = vmatprep.mubr.bf16.mxu1 %v5820_v11  ;;  %6209 = vmatprep.mubr.bf16.mxu0 %v5760_v20  ;;  %v6536_v45 = vshll.u32 %v6481_v6, 16  ;;  %v6540_v40 = vshrl.u32 %v6481_v6, 16  ;;  %v6546_v9 = vshll.u32 %v6495_v47, 16  ;;  %v9465_v49 = vpop.f32.mrb[4].mxu1  ;;  %v9660_v47 = vld [vmem:[%s13920_s3 + $0x108] sm:$0xff]  }
 0x296   : > { %6299 = vmatmul.mubr.bf16.vlgmr.msra.gmra.mrb[16].mxu1 %v5788_v63  ;;  %6210 = vmatmul.mubr.bf16.gmra.mrb[20].mxu0 %v5728_v55  ;;  %v6525_v27 = vsel %vm10128_vm11, %v6520_v7, %v6524_v19  ;;  %v6529_v34 = vrot.slane %v6527_v39, 4  ;;  %v5306_v59 = vshrl.u32 %v5127_v35, 16  ;;  %v5309_v33 = vshll.u32 %v5127_v35, 16  ;;  %v4188_v8 = vpop.f32.mrb[5].mxu1  ;;  %v5136_v20 = vld [vmem:[#allocation3 + $0x74] sm:$0x1] }
 0x297   : > { %5693 = vrot.lane.b32.xlu0 %v8878_v28, %s9912_s12  ;;  %9292 = vmatpush3.bf16.msra.mxu1 %v9659_v32  ;;  %v8965_v22 = vcombine.low %v6515_v30, %v6525_v27  ;;  %v4197_v63 = vadd.f32 %v9465_v49, %v12484_v14  ;;  %v6532_v52 = vrot.slane %v6530_v24, 5  ;;  %v6538_v6 = vrot.slane %v6536_v45, 5  ;;  %v9466_v37 = vpop.f32.mrb[6].mxu1  ;;  %v9662_v30 = vld [vmem:[%s13920_s3 + $0x110] sm:$0xff]  }
 0x298   : > { %v8847_v19 = vcombine.low %v12579_v48, %v12516_v2  ;;  %v4189_v11 = vadd.f32 %v12484_v14, %v4188_v8  ;;  %v6542_v0 = vrot.slane %v6540_v40, 4  ;;  %v5308_v32 = vrot.slane %v5306_v59, 4  ;;  %v4191_v28 = vpop.f32.mrb[7].mxu1  ;;  %9477 = vmatprep.subr.bf16.mxu0 %v9660_v47 }
 0x299   : > { %7448 = vrot.lane.b32.xlu1 %v8965_v22, %s9912_s12  ;;  %v9118_v5 = vpack.c.bf16 %v4197_v63, %v4197_v63  ;;  %v6533_v46 = vor.u32 %v6532_v52, %v6529_v34  ;;  %v5311_v55 = vrot.slane %v5309_v33, 5  ;;  %v5315_v35 = vshll.u32 %v5128_v41, 16  ;;  %9478 = vmatpush3.bf16.msra.mxu0 %v9660_v47  ;;  %v9663_v34 = vld [vmem:[%s13920_s3 + $0x48] sm:$0xff]  }
 0x29a   : > { %v9116_v2 = vpack.c.bf16 %v4189_v11, %v4189_v11  ;;  %v6543_v7 = vor.u32 %v6542_v0, %v6538_v6  ;;  %v6548_v39 = vrot.slane %v6546_v9, 5  ;;  %v5319_v24 = vshrl.u32 %v5128_v41, 16  ;;  %9479 = vmatprep.subr.bf16.mxu0 %v9662_v30  ;;  %9293 = vmatprep.subr.bf16.mxu1 %v9663_v34  ;;  %v9664_v47 = vld [vmem:[%s13920_s3 + $0x8] sm:$0xff]   ;;  %v9666_v11 = vld [vmem:[%s13920_s3 + $0x50] sm:$0xff]  }
 0x29b   : > { %5559 = vrot.lane.b32.xlu0 %v8847_v19, %s9912_s12  ;;  %v4335_v45 = vshrl.u32 %v9118_v5, 16  ;;  %v6534_v40 = vrot.slane %v6533_v46, 4  ;;  %v5312_v27 = vor.u32 %v5311_v55, %v5308_v32  ;;  %v5325_v49 = vshll.u32 %v5136_v20, 16  ;;  %v9665_v19 = vld [vmem:[%s13920_s3 + $0x118] sm:$0xff]   ;;  %v4466_v0 = vld [vmem:[#allocation3 + $0x90] sm:$0xf]  ;;  %v12614_v55 = vpop.permute.xlu0 %5683  ;;  %9294 = vmatpush3.bf16.msra.mxu1 %v9664_v47 }
 0x29c   : > { %v4338_v59 = vshll.u32 %v9118_v5, 16  ;;  %v4318_v33 = vshrl.u32 %v9116_v2, 16  ;;  %v6544_v22 = vrot.slane %v6543_v7, 4  ;;  %v5317_v63 = vrot.slane %v5315_v35, 5  ;;  %v6482_v46 = vld [vmem:[#allocation3 + $0x78] sm:$0xf]  ;;  %9295 = vmatprep.subr.bf16.mxu1 %v9666_v11 }
 0x29d   : > { %v12596_v8 = vrot.slane %v4335_v45, 7  ;;  %v4321_v52 = vshll.u32 %v9116_v2, 16  ;;  %v6539_v9 = vsel %vm10128_vm11, %v6534_v40, %v6538_v6  ;;  %v5321_v41 = vrot.slane %v5319_v24, 4  ;;  %9480 = vmatpush3.bf16.msra.mxu0 %v9662_v30  ;;  %v4459_v2 = vld [vmem:[#allocation3 + $0x84] sm:$0xf] }
 0x29e   : > { %v12609_v20 = vrot.slane %v4318_v33, 7  ;;  %v6549_v6 = vsel %vm10128_vm11, %v6544_v22, %v6548_v39  ;;  %v5313_v32 = vrot.slane %v5312_v27, 4  ;;  %v4200_v5 = vadd.f32 %v9466_v37, %v12484_v14  ;;  %9481 = vmatprep.subr.bf16.mxu0 %v9665_v19  ;;  %v9667_v39 = vld [vmem:[%s13920_s3 + $0x10] sm:$0xff]  }
 0x29f   : > { %v4340_v35 = vor.u32 %v4338_v59, %v12596_v8  ;;  %v8966_v7 = vcombine.low %v6539_v9, %v6549_v6  ;;  %v5327_v24 = vrot.slane %v5325_v49, 5  ;;  %v12619_v45 = vrot.slane %v4923_v25, 5  ;;  %v6483_v34 = vld [vmem:[#allocation3 + $0x7c] sm:$0xf]  ;;  %9296 = vmatpush3.bf16.msra.mxu1 %v9667_v39  ;;  %v4470_v39 = vld [vmem:[#allocation3 + $0x98] sm:$0x1] }
 0x2a0   : > { %v4341_v37 = vrot.slane %v12596_v8, 4  ;;  %v4323_v40 = vor.u32 %v4321_v52, %v12609_v20  ;;  %v5322_v30 = vor.u32 %v5321_v41, %v5317_v63  ;;  %v9119_v27 = vpack.c.bf16 %v4200_v5, %v4200_v5  ;;  %v6496_v41 = vld [vmem:[#allocation3 + $0x80] sm:$0x1]  ;;  %v12640_v5 = vpop.permute.xlu1 %5611  ;;  %9297 = vmatprep.subr.bf16.mxu1 %v9668_v17 }
 0x2a1   : > { %v4467_v25 = vsel %vm11837_vm4, %v4340_v35, %v4466_v0  ;;  %7450 = vrot.lane.b32.xlu1 %v8966_v7, %s9912_s12  ;;  %v4192_v49 = vadd.f32 %v12484_v14, %v4191_v28  ;;  %v6551_v59 = vshrl.u32 %v6482_v46, 16  ;;  %v6554_v33 = vshll.u32 %v6482_v46, 16  ;;  %9482 = vmatpush3.bf16.msra.mxu0 %v9665_v19  ;;  %v9669_v28 = vld [vmem:[%s13920_s3 + $0x18] sm:$0xff]   ;;  %v9670_v19 = vld [vmem:[%s13920_s3 + $0x60] sm:$0xff]  }
 0x2a2   : > { %4468 = vst [vmem:[#allocation3 + $0x90] sm:$0xf] %v4467_v25  ;;  %v4460_v22 = vsel %vm11837_vm4, %v4323_v40, %v4459_v2  ;;  %v5318_v8 = vsel %vm10128_vm11, %v5313_v32, %v5317_v63  ;;  %v5323_v52 = vrot.slane %v5322_v30, 4  ;;  %v4343_v9 = vshrl.u32 %v9119_v27, 16  ;;  %v12644_v2 = vpop.permute.xlu0 %5549 }
 0x2a3   : > { %4461 = vst [vmem:[#allocation3 + $0x84] sm:$0xf] %v4460_v22  ;;  %v9117_v47 = vpack.c.bf16 %v4192_v49, %v4192_v49  ;;  %v6553_v11 = vrot.slane %v6551_v59, 4  ;;  %v6556_v0 = vrot.slane %v6554_v33, 5  ;;  %v6560_v6 = vshll.u32 %v6483_v34, 16  ;;  %9298 = vmatpush3.bf16.msra.mxu1 %v9669_v28 }
 0x2a4   : > { %v5328_v46 = vsel %vm10128_vm11, %v5323_v52, %v5327_v24  ;;  %v4345_v63 = vrot.slane %v4343_v9, 7  ;;  %v4346_v32 = vshll.u32 %v9119_v27, 16  ;;  %v6564_v35 = vshrl.u32 %v6483_v34, 16  ;;  %v12650_v34 = vld [vmem:[#allocation3 + $0x70] sm:$0xf]  ;;  %9299 = vmatprep.subr.bf16.mxu1 %v9670_v19 }
 0x2a5   : > { %v8879_v7 = vcombine.low %v5318_v8, %v5328_v46  ;;  %v4326_v40 = vshrl.u32 %v9117_v47, 16  ;;  %v6557_v30 = vor.u32 %v6556_v0, %v6553_v11  ;;  %v6570_v25 = vshll.u32 %v6496_v41, 16  ;;  %v9671_v41 = vld [vmem:[%s13920_s3 + $0x20] sm:$0xff]   ;;  %v12672_v46 = vld [vmem:[#allocation3 + $0x30] sm:$0xe] }
 0x2a6   : > { %v4348_v49 = vor.u32 %v4346_v32, %v4345_v63  ;;  %v4350_v59 = vrot.slane %v4345_v63, 4  ;;  %v6562_v33 = vrot.slane %v6560_v6, 5  ;;  %v6566_v22 = vrot.slane %v6564_v35, 4  ;;  %v4463_v11 = vld [vmem:[#allocation3 + $0x8c] sm:$0x1] }
 0x2a7   : > { %5695 = vrot.lane.b32.xlu0 %v8879_v7, %s9912_s12  ;;  %v4328_v24 = vrot.slane %v4326_v40, 7  ;;  %v4329_v27 = vshll.u32 %v9117_v47, 16  ;;  %v13985_v17 = vrot.slane %v12074_v16, 5  ;;  %v13986_v52 = vrot.slane %v12417_v58, 9  ;;  %v12679_v63 = vld [vmem:[#allocation3 + $0x6c] sm:$0xf]  ;;  %v5478_v7 = vpop.permute.xlu1 %5477  ;;  %9300 = vmatpush3.bf16.msra.mxu1 %v9671_v41 }
 0x2a8   : > { %v12663_v9 = vrot.slane %v4920_v13, 4  ;;  %v4349_v47 = vsel %vm10136_vm12, %v4341_v37, %v4348_v49  ;;  %v4471_v58 = vsel %vm11845_vm13, %v4350_v59, %v4470_v39  ;;  %v6558_v0 = vrot.slane %v6557_v30, 4  ;;  %v9737_v32 = vld [vmem:[#allocation3 + $0x34] sm:$0xf]  ;;  %v5686_v30 = vpop.permute.xlu0 %5685  ;;  %9301 = vmatprep.subr.bf16.mxu1 %v9672_v62  ;;  %v7088_v41 = vld [vmem:[#allocation3 + $0x78] sm:$0xf] }
 0x2a9   : > { %v12658_v8 = vsel %vm10108_vm7, %v13986_v52, %v13985_v17  ;;  %v6567_v6 = vor.u32 %v6566_v22, %v6562_v33  ;;  %v4324_v13 = vrot.slane %v12609_v20, 4  ;;  %4469 = vst.msk [vmem:[#allocation3 + $0x94] sm:$0xf] %vm280_vm0, %v4349_v47  ;;  %4472 = vst [vmem:[#allocation3 + $0x98] sm:$0x1] %v4471_v58  ;;  %v4331_v28 = vor.u32 %v4329_v27, %v4328_v24  ;;  %v13991_v62 = vld [vmem:[#allocation14_spill] sm:$0xff] }
 0x2aa   : > { %v4333_v37 = vrot.slane %v4328_v24, 4  ;;  %v4781_v35 = vrot.slane %v9737_v32, 5  ;;  %v6572_v40 = vrot.slane %v6570_v25, 5  ;;  %v8981_v19 = vcombine.low %v12679_v63, %v12650_v34  ;;  %v12694_v24 = vld [vmem:[#allocation3 + $0x7c] sm:$0xf] }
 0x2ab   : > { %v6568_v39 = vrot.slane %v6567_v6, 4  ;;  %v13987_v49 = vrot.slane %v12082_v31, 5  ;;  %v4332_v59 = vsel %vm10136_vm12, %v4324_v13, %v4331_v28  ;;  %v4902_v25 = vsel %vm10128_vm11, %v12546_v57, %v12444_v56  ;;  %v6784_v17 = vld [vmem:[#allocation3 + $0x78] sm:$0xf]  ;;  %v7089_v47 = vld [vmem:[#allocation3 + $0x7c] sm:$0xf]  ;;  %v5614_v6 = vpop.permute.xlu1 %5613 }
 0x2ac   : > { %v4464_v22 = vsel %vm11845_vm13, %v4333_v37, %v4463_v11  ;;  %v4926_v31 = vsel %vm10128_vm11, %v12663_v9, %v12619_v45  ;;  %4462 = vst.msk [vmem:[#allocation3 + $0x88] sm:$0xf] %vm280_vm0, %v4332_v59  ;;  %7520 = vrot.lane.b32.xlu0 %v8981_v19, %s9912_s12  ;;  %v13988_v56 = vld [vmem:[#allocation11_spill] sm:$0xff]  ;;  %v8796_v45 = vrot.slane %v12672_v46, 9  ;;  %v4783_v11 = vrot.slane %v4781_v35, 4 }
 0x2ad   : > { %v12688_v20 = vsel %vm10108_vm7, %v12453_v61, %v13987_v49  ;;  %4465 = vst [vmem:[#allocation3 + $0x8c] sm:$0x1] %v4464_v22  ;;  %v6563_v61 = vsel %vm10128_vm11, %v6558_v0, %v6562_v33  ;;  %v6573_v27 = vsel %vm10128_vm11, %v6568_v39, %v6572_v40  ;;  %v13989_v57 = vcombine.low %v13988_v56, %v12084_v12  ;;  %v9673_v0 = vld [vmem:[%s13920_s3 + $0x28] sm:$0xff]   ;;  %v13990_v46 = vld [vmem:[#allocation15_spill] sm:$0xff]  ;;  %v7104_v28 = vld [vmem:[#allocation3 + $0x80] sm:$0x1]  ;;  %v5552_v22 = vpop.permute.xlu0 %5551 }
 0x2ae   : > { %v8967_v9 = vcombine.low %v6563_v61, %v6573_v27  ;;  %v5792_v33 = vsel %vm5721_vm6, %v12354_v23, %v12640_v5  ;;  %v8835_v58 = vcombine.low %v12658_v8, %v12688_v20  ;;  %v13992_v13 = vcombine.low %v13990_v46, %v13991_v62  ;;  %v9674_v32 = vld [vmem:[%s13920_s3 + $0x70] sm:$0xff]   ;;  %v13994_v39 = vld [vmem:[#allocation9_spill] sm:$0xff]  ;;  %9302 = vmatpush3.bf16.msra.mxu1 %v9673_v0  ;;  %v9677_v0 = vld [vmem:[%s13920_s3 + $0x78] sm:$0xff]  }
 0x2af   : > { %v5824_v52 = vsel %vm5721_vm6, %v13989_v57, %v12614_v55  ;;  %v8982_v55 = vcombine.low %v6784_v17, %v12694_v24  ;;  %v13993_v5 = vsel %vm10128_vm11, %v12432_v3, %v12434_v53  ;;  %v4916_v37 = vsel %vm10128_vm11, %v12455_v10, %v12500_v60  ;;  %v13995_v3 = vld [vmem:[#allocation10_spill] sm:$0xff]  ;;  %v6484_v60 = vld [vmem:[#allocation3 + $0x84] sm:$0xf]  ;;  %v9738_v20 = vld [vmem:[#allocation3 + $0x38] sm:$0x1]  ;;  %9303 = vmatprep.subr.bf16.mxu1 %v9674_v32 }
 0x2b0   : > { %6306 = vmatprep.mubr.bf16.mxu1 %v5824_v52  ;;  %v5764_v23 = vsel %vm5721_vm6, %v13992_v13, %v12644_v2  ;;  %v8850_v8 = vcombine.low %v13993_v5, %v4902_v25  ;;  %v9676_v2 = vld [vmem:[%s13920_s3 + $0xc0] sm:$0xff]   ;;  %7452 = vrot.lane.b32.xlu1 %v8967_v9, %s9912_s12  ;;  %v13996_v53 = vcombine.low %v13994_v39, %v13995_v3  ;;  %v4784_v59 = vrot.slane %v9738_v20, 5  ;;  %v6786_v57 = vld [vmem:[#allocation3 + $0x84] sm:$0xf]  ;;  %v5480_v13 = vpop.permute.xlu1 %5479  ;;  %v12781_v39 = vld [vmem:[#allocation3 + $0x94] sm:$0xf] }
 0x2b1   : > { %6307 = vmatmul.mubr.bf16.gmra.mrb[20].mxu1 %v5792_v33  ;;  %6217 = vmatprep.mubr.bf16.mxu0 %v5764_v23  ;;  %v13997_v19 = vcombine.low %v12162_v26, %v12177_v38  ;;  %v12754_v49 = vcombine.low %v4916_v37, %v4926_v31  ;;  %v7113_v25 = vshrl.u32 %v7088_v41, 16  ;;  %v7116_v61 = vshll.u32 %v7088_v41, 16  ;;  %v12763_v26 = vld [vmem:[#allocation3 + $0x4c] sm:$0xf] }
 0x2b2   : > { %v5732_v40 = vsel %vm5721_vm6, %v13996_v53, %v5478_v7  ;;  %7522 = vrot.lane.b32.xlu0 %v8982_v55, %s9912_s12  ;;  %v12759_v27 = vsel %vm10108_vm7, %v8796_v45, %v4781_v35  ;;  %v12761_v7 = vld [vmem:[#allocation3 + $0x48] sm:$0xf]  ;;  %v7126_v31 = vshrl.u32 %v7089_v47, 16  ;;  %v7132_v17 = vshll.u32 %v7104_v28, 16  ;;  %v9675_v35 = vld [vmem:[%s13920_s3 + $0x30] sm:$0xff]   ;;  %9355 = vmatprep.subr.bf16.mxu0 %v9676_v2 }
 0x2b3   : > { %v5828_v10 = vsel %vm5721_vm6, %v13997_v19, %v5686_v30  ;;  %6218 = vmatmul.mubr.bf16.gmra.mrb[24].mxu0 %v5732_v40  ;;  %v8868_v38 = vcombine.low %v12761_v7, %v12763_v26  ;;  %v7122_v30 = vshll.u32 %v7089_v47, 16  ;;  %v12769_v56 = vsel %vm10108_vm7, %v4783_v11, %v4784_v59  ;;  %v12774_v41 = vld [vmem:[#allocation3 + $0x88] sm:$0xf]  ;;  %v9741_v11 = vld [vmem:[#allocation3 + $0x40] sm:$0xf]  ;;  %9304 = vmatpush3.bf16.msra.mxu1 %v9675_v35 }
 0x2b4   : > { %6314 = vmatprep.mubr.bf16.mxu1 %v5828_v10  ;;  %v7115_v52 = vrot.slane %v7113_v25, 4  ;;  %v7118_v45 = vrot.slane %v7116_v61, 5  ;;  %v6575_v9 = vshrl.u32 %v6484_v60, 16  ;;  %v6578_v33 = vshll.u32 %v6484_v60, 16  ;;  %v6485_v28 = vld [vmem:[#allocation3 + $0x88] sm:$0xf]  ;;  %9305 = vmatprep.subr.bf16.mxu1 %v9677_v0 }
 0x2b5   : > { %v7124_v47 = vrot.slane %v7122_v30, 5  ;;  %v7128_v55 = vrot.slane %v7126_v31, 4  ;;  %v5768_v46 = vsel %vm5721_vm6, %v8835_v58, %v5552_v22  ;;  %v4941_v62 = vshrl.u32 %v9741_v11, 16  ;;  %v6497_v37 = vld [vmem:[#allocation3 + $0x8c] sm:$0x1]  ;;  %v9679_v19 = vld [vmem:[%s13920_s3 + $0x38] sm:$0xff]  }
 0x2b6   : > { %v8983_v23 = vcombine.low %v6786_v57, %v12774_v41  ;;  %v7119_v5 = vor.u32 %v7118_v45, %v7115_v52  ;;  %v6577_v32 = vrot.slane %v6575_v9, 4  ;;  %v6580_v2 = vrot.slane %v6578_v33, 5  ;;  %6225 = vmatprep.mubr.bf16.mxu0 %v5768_v46  ;;  %v6486_v22 = vld [vmem:[#allocation3 + $0x90] sm:$0xf]  ;;  %v9742_v45 = vld [vmem:[#allocation3 + $0x44] sm:$0x1] }
 0x2b7   : > { %v5796_v3 = vsel %vm5721_vm6, %v8850_v8, %v5614_v6  ;;  %v7129_v58 = vor.u32 %v7128_v55, %v7124_v47  ;;  %v6584_v53 = vshll.u32 %v6485_v28, 16  ;;  %v6588_v40 = vshrl.u32 %v6485_v28, 16  ;;  %v6788_v25 = vld [vmem:[#allocation3 + $0x90] sm:$0xf]  ;;  %v6798_v46 = vld [vmem:[#allocation3 + $0x74] sm:$0x1]  ;;  %9306 = vmatpush3.bf16.msra.mxu1 %v9679_v19 }
 0x2b8   : > { %7524 = vrot.lane.b32.xlu0 %v8983_v23, %s9912_s12  ;;  %v7120_v10 = vrot.slane %v7119_v5, 4  ;;  %v7134_v60 = vrot.slane %v7132_v17, 5  ;;  %v6581_v20 = vor.u32 %v6580_v2, %v6577_v32  ;;  %v6594_v59 = vshll.u32 %v6497_v37, 16  ;;  %v6487_v17 = vld [vmem:[#allocation3 + $0x94] sm:$0xf] }
 0x2b9   : > { %6315 = vmatmul.mubr.bf16.gmra.mrb[24].mxu1 %v5796_v3  ;;  %v7130_v61 = vrot.slane %v7129_v58, 4  ;;  %v6586_v30 = vrot.slane %v6584_v53, 5  ;;  %v6590_v6 = vrot.slane %v6588_v40, 4  ;;  %v13998_v8 = vcombine.low %v12053_v54, %v12074_v16  ;;  %v6498_v5 = vld [vmem:[#allocation3 + $0x98] sm:$0x1] }
 0x2ba   : > { %v8984_v35 = vcombine.low %v6788_v25, %v12781_v39  ;;  %v6582_v57 = vrot.slane %v6581_v20, 4  ;;  %v7032_v52 = vrot.slane %v12650_v34, 5  ;;  %v4947_v9 = vshll.u32 %v9742_v45, 16  ;;  %v6998_v58 = vld [vmem:[#allocation3 + $0x6c] sm:$0xe] }
 0x2bb   : > { %v5736_v31 = vsel %vm5721_vm6, %v13998_v8, %v5480_v13  ;;  %v7135_v33 = vsel %vm10128_vm11, %v7130_v61, %v7134_v60  ;;  %v6591_v55 = vor.u32 %v6590_v6, %v6586_v30  ;;  %v6599_v11 = vshrl.u32 %v6486_v22, 16  ;;  %v7091_v61 = vld [vmem:[#allocation3 + $0x88] sm:$0xf] }
 0x2bc   : > { %6226 = vmatmul.mubr.bf16.gmra.mrb[28].mxu0 %v5736_v31  ;;  %v6602_v23 = vshll.u32 %v6486_v22, 16  ;;  %7526 = vrot.lane.b32.xlu0 %v8984_v35, %s9912_s12  ;;  %v7125_v54 = vsel %vm10128_vm11, %v7120_v10, %v7124_v47  ;;  %v6596_v16 = vrot.slane %v6594_v59, 5  ;;  %v7034_v0 = vrot.slane %v7032_v52, 4  ;;  %v6799_v31 = vld [vmem:[#allocation3 + $0x80] sm:$0x1] }
 0x2bd   : > { %v4943_v13 = vrot.slane %v4941_v62, 4  ;;  %v6592_v34 = vrot.slane %v6591_v55, 4  ;;  %v6601_v28 = vrot.slane %v6599_v11, 4  ;;  %v6608_v32 = vshll.u32 %v6487_v17, 16  ;;  %v5616_v62 = vpop.permute.xlu1 %5615  ;;  %v7090_v55 = vld [vmem:[#allocation3 + $0x84] sm:$0xf] }
 0x2be   : > { %v6604_v37 = vrot.slane %v6602_v23, 5  ;;  %v4976_v2 = vshrl.u32 %v12509_v4, 16  ;;  %v9013_v3 = vcombine.low %v7125_v54, %v7135_v33  ;;  %v7035_v53 = vrot.slane %v6798_v46, 5  ;;  %v6999_v33 = vld [vmem:[#allocation3 + $0x78] sm:$0xe] }
 0x2bf   : > { %v6612_v40 = vshrl.u32 %v6487_v17, 16  ;;  %v6587_v19 = vsel %vm10128_vm11, %v6582_v57, %v6586_v30  ;;  %v6597_v47 = vsel %vm10128_vm11, %v6592_v34, %v6596_v16  ;;  %v6610_v60 = vrot.slane %v6608_v32, 5 }
 0x2c0   : > { %v6605_v10 = vor.u32 %v6604_v37, %v6601_v28  ;;  %7656 = vrot.lane.b32.xlu0 %v9013_v3, %s9912_s12  ;;  %v8968_v20 = vcombine.low %v6587_v19, %v6597_v47  ;;  %v6618_v22 = vshll.u32 %v6498_v5, 16  ;;  %v7039_v25 = vrot.slane %v12694_v24, 5  ;;  %v7105_v47 = vld [vmem:[#allocation3 + $0x8c] sm:$0x1] }
 0x2c1   : > { %v6614_v59 = vrot.slane %v6612_v40, 4  ;;  %v8941_v6 = vrot.slane %v6998_v58, 9  ;;  %v7036_v8 = vsel %vm10108_vm7, %v7034_v0, %v7035_v53  ;;  %v8836_v30 = vcombine.low %v12759_v27, %v12769_v56  ;;  %v7092_v0 = vld [vmem:[#allocation3 + $0x90] sm:$0xf] }
 0x2c2   : > { %v4949_v35 = vrot.slane %v4947_v9, 5  ;;  %v12810_v57 = vrot.slane %v4976_v2, 4  ;;  %7454 = vrot.lane.b32.xlu1 %v8968_v20, %s9912_s12  ;;  %v6606_v17 = vrot.slane %v6605_v10, 4  ;;  %v4944_v24 = vor.u32 %v4943_v13, %v12437_v29  ;;  %v7093_v13 = vld [vmem:[#allocation3 + $0x94] sm:$0xf]  ;;  %v5482_v2 = vpop.permute.xlu1 %5481 }
 0x2c3   : > { %v6615_v45 = vor.u32 %v6614_v59, %v6610_v60  ;;  %v7033_v46 = vsel %vm10108_vm7, %v8941_v6, %v7032_v52  ;;  %v7041_v11 = vrot.slane %v7039_v25, 4  ;;  %v7146_v23 = vshll.u32 %v7091_v61, 16  ;;  %v5688_v28 = vpop.permute.xlu0 %5687 }
 0x2c4   : > { %v7150_v54 = vshrl.u32 %v7091_v61, 16  ;;  %v4979_v16 = vshll.u32 %v12509_v4, 16  ;;  %v8997_v27 = vcombine.low %v7033_v46, %v7036_v8  ;;  %v6620_v9 = vrot.slane %v6618_v22, 5 }
 0x2c5   : > { %v6616_v56 = vrot.slane %v6615_v45, 4  ;;  %v8942_v34 = vrot.slane %v6999_v33, 9  ;;  %v7042_v5 = vrot.slane %v6799_v31, 5  ;;  %v5800_v37 = vsel %vm5721_vm6, %v12754_v49, %v5616_v62 }
 0x2c6   : > { %v7137_v32 = vshrl.u32 %v7090_v55, 16  ;;  %7584 = vrot.lane.b32.xlu1 %v8997_v27, %s9912_s12  ;;  %v6611_v52 = vsel %vm10128_vm11, %v6606_v17, %v6610_v60  ;;  %v13999_v58 = vcombine.low %v12276_v21, %v12293_v51  ;;  %v7140_v40 = vshll.u32 %v7090_v55, 16 }
 0x2c7   : > { %v6621_v3 = vsel %vm10128_vm11, %v6616_v56, %v6620_v9  ;;  %v7043_v49 = vsel %vm10108_vm7, %v7041_v11, %v7042_v5  ;;  %v12830_v10 = vrot.slane %v7146_v23, 5  ;;  %v7152_v62 = vrot.slane %v7150_v54, 4  ;;  %v5554_v51 = vpop.permute.xlu0 %5553 }
 0x2c8   : > { %v5832_v53 = vsel %vm5721_vm6, %v13999_v58, %v5688_v28  ;;  %v8969_v19 = vcombine.low %v6611_v52, %v6621_v3  ;;  %v4945_v60 = vrot.slane %v4944_v24, 4  ;;  %v7161_v20 = vshrl.u32 %v7092_v0, 16  ;;  %v9469_v17 = vpop.f32.mrb[8].mxu1  ;;  %v7106_v58 = vld [vmem:[#allocation3 + $0x98] sm:$0x1] }
 0x2c9   : > { %6322 = vmatprep.mubr.bf16.mxu1 %v5832_v53  ;;  %v7164_v59 = vshll.u32 %v7092_v0, 16  ;;  %v7170_v22 = vshll.u32 %v7093_v13, 16  ;;  %v7040_v21 = vsel %vm10108_vm7, %v8942_v34, %v7039_v25  ;;  %v14000_v61 = vcombine.low %v12140_v43, %v12149_v50  ;;  %v4204_v46 = vpop.f32.mrb[9].mxu1 }
 0x2ca   : > { %6323 = vmatmul.mubr.bf16.gmra.mrb[28].mxu1 %v5800_v37  ;;  %v12838_v8 = vrot.slane %v7137_v32, 4  ;;  %v7174_v31 = vshrl.u32 %v7093_v13, 16  ;;  %7456 = vrot.lane.b32.xlu1 %v8969_v19, %s9912_s12  ;;  %v8998_v45 = vcombine.low %v7040_v21, %v7043_v49  ;;  %v5772_v33 = vsel %vm5721_vm6, %v8836_v30, %v5554_v51  ;;  %v9470_v54 = vpop.f32.mrb[10].mxu1  ;;  %v5618_v13 = vpop.permute.xlu1 %5617  ;;  %v4480_v21 = vld [vmem:[#allocation3 + $0xa8] sm:$0xf] }
 0x2cb   : > { %v5740_v6 = vsel %vm5721_vm6, %v14000_v61, %v5482_v2  ;;  %v7156_v55 = vshll.u32 %v7105_v47, 16  ;;  %v4950_v24 = vsel %vm10128_vm11, %v4945_v60, %v4949_v35  ;;  %v4213_v25 = vadd.f32 %v9469_v17, %v12484_v14  ;;  %6233 = vmatprep.mubr.bf16.mxu0 %v5772_v33  ;;  %v4207_v5 = vpop.f32.mrb[11].mxu1  ;;  %v4473_v17 = vld [vmem:[#allocation3 + $0x9c] sm:$0xf] }
 0x2cc   : > { %v12845_v43 = vrot.slane %v7140_v40, 5  ;;  %v7153_v50 = vor.u32 %v7152_v62, %v12830_v10  ;;  %v14001_v11 = vsel %vm10128_vm11, %v12429_v42, %v12437_v29  ;;  %v4205_v30 = vadd.f32 %v12484_v14, %v4204_v46  ;;  %6234 = vmatmul.mubr.bf16.gmra.mrb[32].mxu0 %v5740_v6  ;;  %v12864_v29 = vld [vmem:[%s13919_s2] ss:$0 sm:$0xff]  ;;  %v4484_v46 = vld [vmem:[#allocation3 + $0xb0] sm:$0x1] }
 0x2cd   : > { %v8852_v23 = vcombine.low %v14001_v11, %v4950_v24  ;;  %v12854_v27 = vrot.slane %v7161_v20, 4  ;;  %v7166_v35 = vrot.slane %v7164_v59, 5  ;;  %v12856_v56 = vrot.slane %v7170_v22, 5  ;;  %v9694_v40 = vld [vmem:[%s13920_s3 + $0x100] sm:$0xff]  }
 0x2ce   : > { %v5000_v9 = vshrl.u32 %v12579_v48, 16  ;;  %v9122_v0 = vpack.c.bf16 %v4213_v25, %v4213_v25  ;;  %v4216_v34 = vadd.f32 %v9470_v54, %v12484_v14  ;;  %v7176_v28 = vrot.slane %v7174_v31, 4  ;;  %7586 = vrot.lane.b32.xlu1 %v8998_v45, %s9912_s12  ;;  %9499 = vmatprep.subr.bf16.mxu1 %v9694_v40 }
 0x2cf   : > { %v5003_v37 = vshll.u32 %v12579_v48, 16  ;;  %v9120_v42 = vpack.c.bf16 %v4205_v30, %v4205_v30  ;;  %v4208_v32 = vadd.f32 %v12864_v29, %v4207_v5  ;;  %v12868_v2 = vrot.slane %v7156_v55, 5  ;;  %v7001_v48 = vld [vmem:[#allocation3 + $0x90] sm:$0xe] }
 0x2d0   : > { %v4369_v52 = vshrl.u32 %v9122_v0, 16  ;;  %v9123_v3 = vpack.c.bf16 %v4216_v34, %v4216_v34  ;;  %v7143_v14 = vor.u32 %v12845_v43, %v12838_v8  ;;  %v7177_v53 = vor.u32 %v7176_v28, %v12856_v56  ;;  %v5690_v11 = vpop.permute.xlu0 %5689 }
 0x2d1   : > { %v4352_v19 = vshrl.u32 %v9120_v42, 16  ;;  %v9121_v49 = vpack.c.bf16 %v4208_v32, %v4208_v32  ;;  %v12876_v47 = vrot.slane %v7153_v50, 4  ;;  %v7167_v62 = vor.u32 %v7166_v35, %v12854_v27  ;;  %v4477_v27 = vld [vmem:[#allocation3 + $0xa4] sm:$0x1] }
 0x2d2   : > { %v4371_v60 = vrot.slane %v4369_v52, 7  ;;  %v4372_v20 = vshll.u32 %v9122_v0, 16  ;;  %v4377_v59 = vshrl.u32 %v9123_v3, 16  ;;  %v5804_v22 = vsel %vm5721_vm6, %v8852_v23, %v5618_v13  ;;  %v5484_v13 = vpop.permute.xlu1 %5483 }
 0x2d3   : > { %v4354_v51 = vrot.slane %v4352_v19, 7  ;;  %v4355_v61 = vshll.u32 %v9120_v42, 16  ;;  %v4360_v6 = vshrl.u32 %v9121_v49, 16  ;;  %v7180_v8 = vshll.u32 %v7106_v58, 16  ;;  %v14002_v19 = vld [vmem:[#allocation20_spill] sm:$0xff] }
 0x2d4   : > { %v4374_v31 = vor.u32 %v4372_v20, %v4371_v60  ;;  %v4379_v45 = vrot.slane %v4377_v59, 7  ;;  %v4380_v33 = vshll.u32 %v9123_v3, 16  ;;  %v7178_v55 = vrot.slane %v7177_v53, 4  ;;  %v5556_v3 = vpop.permute.xlu0 %5555  ;;  %v14006_v59 = vld [vmem:[#allocation16_spill] sm:$0xff] }
 0x2d5   : > { %v4375_v24 = vrot.slane %v4371_v60, 4  ;;  %v4357_v25 = vor.u32 %v4355_v61, %v4354_v51  ;;  %v4362_v43 = vrot.slane %v4360_v6, 7  ;;  %v4363_v50 = vshll.u32 %v9121_v49, 16  ;;  %v14003_v49 = vld [vmem:[#allocation19_spill] sm:$0xff]  ;;  %v14009_v61 = vld [vmem:[#allocation18_spill] sm:$0xff] }
 0x2d6   : > { %v4481_v23 = vsel %vm11837_vm4, %v4374_v31, %v4480_v21  ;;  %v4382_v30 = vor.u32 %v4380_v33, %v4379_v45  ;;  %v4384_v54 = vrot.slane %v4379_v45, 4  ;;  %v5836_v35 = vsel %vm5721_vm6, %v8868_v38, %v5690_v11  ;;  %v7000_v21 = vld [vmem:[#allocation3 + $0x84] sm:$0xe]  ;;  %v12933_v31 = vld [vmem:[#allocation3 + $0x4c] sm:$0xf] }
 0x2d7   : > { %4482 = vst [vmem:[#allocation3 + $0xa8] sm:$0xf] %v4481_v23  ;;  %v4358_v0 = vrot.slane %v4354_v51, 4  ;;  %v4474_v34 = vsel %vm11837_vm4, %v4357_v25, %v4473_v17  ;;  %v4365_v5 = vor.u32 %v4363_v50, %v4362_v43  ;;  %v4367_v28 = vrot.slane %v4362_v43, 4  ;;  %6330 = vmatprep.mubr.bf16.mxu1 %v5836_v35  ;;  %v6801_v51 = vld [vmem:[#allocation3 + $0x98] sm:$0x1] }
 0x2d8   : > { %4475 = vst [vmem:[#allocation3 + $0x9c] sm:$0xf] %v4474_v34  ;;  %v4383_v42 = vsel %vm10136_vm12, %v4375_v24, %v4382_v30  ;;  %v4485_v32 = vsel %vm11845_vm13, %v4384_v54, %v4484_v46  ;;  %v7144_v52 = vrot.slane %v7143_v14, 4  ;;  %6331 = vmatmul.mubr.bf16.gmra.mrb[32].mxu1 %v5804_v22  ;;  %v7168_v7 = vrot.slane %v7167_v62, 4  ;;  %v9746_v43 = vld [vmem:[#allocation3 + $0x4c] sm:$0xf] }
 0x2d9   : > { %4483 = vst.msk [vmem:[#allocation3 + $0xac] sm:$0xf] %vm280_vm0, %v4383_v42  ;;  %4486 = vst [vmem:[#allocation3 + $0xb0] sm:$0x1] %v4485_v32  ;;  %v4366_v26 = vsel %vm10136_vm12, %v4358_v0, %v4365_v5  ;;  %v4478_v38 = vsel %vm11845_vm13, %v4367_v28, %v4477_v27  ;;  %v7182_v58 = vrot.slane %v7180_v8, 5  ;;  %v7046_v53 = vrot.slane %v12774_v41, 5 }
 0x2da   : > { %v12900_v40 = vrot.slane %v4979_v16, 5  ;;  %4476 = vst.msk [vmem:[#allocation3 + $0xa0] sm:$0xf] %vm280_vm0, %v4366_v26  ;;  %4479 = vst [vmem:[#allocation3 + $0xa4] sm:$0x1] %v4478_v38  ;;  %v7159_v14 = vsel %vm10128_vm11, %v12876_v47, %v12868_v2  ;;  %v14004_v62 = vcombine.low %v14002_v19, %v14003_v49  ;;  %v7053_v20 = vrot.slane %v12781_v39, 5 }
 0x2db   : > { %v12914_v4 = vrot.slane %v5000_v9, 4  ;;  %v12918_v41 = vrot.slane %v5003_v37, 5  ;;  %v14005_v16 = vld [vmem:[#allocation13_spill] sm:$0xff]  ;;  %v7183_v47 = vsel %vm10128_vm11, %v7178_v55, %v7182_v58  ;;  %v7149_v39 = vsel %vm10128_vm11, %v7144_v52, %v12830_v10  ;;  %v12945_v28 = vld [vmem:[#allocation3 + $0x50] sm:$0x1] }
 0x2dc   : > { %v5776_v60 = vsel %vm5721_vm6, %v14004_v62, %v5556_v3  ;;  %v14007_v22 = vcombine.low %v14005_v16, %v14006_v59  ;;  %v6800_v9 = vld [vmem:[#allocation3 + $0x8c] sm:$0x1]  ;;  %v12931_v8 = vld [vmem:[#allocation3 + $0x48] sm:$0xf]  ;;  %v9014_v33 = vcombine.low %v7149_v39, %v7159_v14  ;;  %v7173_v10 = vsel %vm10128_vm11, %v7168_v7, %v12856_v56  ;;  %v12962_v38 = vld [vmem:[#allocation3 + $0x54] sm:$0xf] }
 0x2dd   : > { %6241 = vmatprep.mubr.bf16.mxu0 %v5776_v60  ;;  %v14008_v37 = vld [vmem:[#allocation17_spill] sm:$0xff]  ;;  %v8822_v17 = vcombine.low %v12931_v8, %v12933_v31  ;;  %v7048_v55 = vrot.slane %v7046_v53, 4  ;;  %v12941_v24 = vcombine.low %v7173_v10, %v7183_v47  ;;  %v8943_v25 = vrot.slane %v7000_v21, 9  ;;  %v12964_v3 = vld [vmem:[#allocation3 + $0x58] sm:$0xf]  ;;  %v12975_v60 = vpop.permute.xlu1 %5619 }
 0x2de   : > { %v5744_v2 = vsel %vm5721_vm6, %v14007_v22, %v5484_v13  ;;  %v4958_v6 = vor.u32 %v14009_v61, %v14008_v37  ;;  %v7055_v46 = vrot.slane %v7053_v20, 4  ;;  %v4961_v50 = vshll.u32 %v9746_v43, 16  ;;  %v6490_v34 = vld [vmem:[#allocation3 + $0xa8] sm:$0xf] }
 0x2df   : > { %6242 = vmatmul.mubr.bf16.gmra.mrb[36].mxu0 %v5744_v2  ;;  %v6488_v11 = vld [vmem:[#allocation3 + $0x9c] sm:$0xf]  ;;  %v7049_v23 = vrot.slane %v6800_v9, 5  ;;  %v8944_v30 = vrot.slane %v7001_v48, 9  ;;  %v7056_v54 = vrot.slane %v6801_v51, 5  ;;  %v4965_v27 = vshrl.u32 %v9746_v43, 16 }
 0x2e0   : > { %v6623_v35 = vshrl.u32 %v6488_v11, 16  ;;  %v6626_v0 = vshll.u32 %v6488_v11, 16  ;;  %v12943_v5 = vrot.slane %v4958_v6, 4  ;;  %v4971_v56 = vshll.u32 %v12945_v28, 16  ;;  %v6790_v42 = vld [vmem:[#allocation3 + $0x9c] sm:$0xf] }
 0x2e1   : > { %v12948_v32 = vld [vmem:[#allocation3 + $0xa0] sm:$0xf]  ;;  %v12952_v52 = vsel %vm10108_vm7, %v8943_v25, %v7046_v53  ;;  %v12956_v7 = vsel %vm10108_vm7, %v7048_v55, %v7049_v23  ;;  %v12960_v26 = vsel %vm10108_vm7, %v8944_v30, %v7053_v20  ;;  %v8869_v58 = vcombine.low %v12962_v38, %v12964_v3  ;;  %v6499_v19 = vld [vmem:[#allocation3 + $0xa4] sm:$0x1]  ;;  %v6491_v22 = vld [vmem:[#allocation3 + $0xac] sm:$0xf] }
 0x2e2   : > { %v6489_v13 = vld [vmem:[#allocation3 + $0xa0] sm:$0xf]  ;;  %v8985_v14 = vcombine.low %v6790_v42, %v12948_v32  ;;  %v6625_v53 = vrot.slane %v6623_v35, 4  ;;  %v12971_v49 = vsel %vm10108_vm7, %v7055_v46, %v7056_v54  ;;  %v12973_v62 = vrot.slane %v4961_v50, 5  ;;  %v12978_v6 = vld [vmem:[#allocation3 + $0x48] sm:$0xe] }
 0x2e3   : > { %v6628_v20 = vrot.slane %v6626_v0, 5  ;;  %v6632_v16 = vshll.u32 %v6489_v13, 16  ;;  %v6636_v59 = vshrl.u32 %v6489_v13, 16  ;;  %v4967_v2 = vrot.slane %v4965_v27, 4  ;;  %v6500_v10 = vld [vmem:[#allocation3 + $0xb0] sm:$0x1] }
 0x2e4   : > { %7528 = vrot.lane.b32.xlu0 %v8985_v14, %s9912_s12  ;;  %v6647_v47 = vshrl.u32 %v6490_v34, 16  ;;  %v6650_v21 = vshll.u32 %v6490_v34, 16  ;;  %v6656_v39 = vshll.u32 %v6491_v22, 16  ;;  %v6660_v9 = vshrl.u32 %v6491_v22, 16  ;;  %v12982_v50 = vld [vmem:[#allocation3 + $0xac] sm:$0xf]  ;;  %v5486_v14 = vpop.permute.xlu1 %5485 }
 0x2e5   : > { %v6629_v51 = vor.u32 %v6628_v20, %v6625_v53  ;;  %v6634_v48 = vrot.slane %v6632_v16, 5  ;;  %v6638_v37 = vrot.slane %v6636_v59, 4  ;;  %v6642_v61 = vshll.u32 %v6499_v19, 16  ;;  %v7094_v27 = vld [vmem:[#allocation3 + $0x9c] sm:$0xf] }
 0x2e6   : > { %v6649_v55 = vrot.slane %v6647_v47, 4  ;;  %v6652_v25 = vrot.slane %v6650_v21, 5  ;;  %v12980_v46 = vrot.slane %v6656_v39, 5  ;;  %v6662_v43 = vrot.slane %v6660_v9, 4  ;;  %v7095_v13 = vld [vmem:[#allocation3 + $0xa0] sm:$0xf] }
 0x2e7   : > { %v6630_v11 = vrot.slane %v6629_v51, 4  ;;  %v6639_v23 = vor.u32 %v6638_v37, %v6634_v48  ;;  %v8999_v30 = vcombine.low %v12952_v52, %v12956_v7  ;;  %v4968_v54 = vor.u32 %v4967_v2, %v12973_v62  ;;  %v6792_v19 = vld [vmem:[#allocation3 + $0xa8] sm:$0xf] }
 0x2e8   : > { %7658 = vrot.lane.b32.xlu0 %v9014_v33, %s9912_s12  ;;  %v6663_v35 = vor.u32 %v6662_v43, %v12980_v46  ;;  %v9000_v0 = vcombine.low %v12960_v26, %v12971_v49  ;;  %v8798_v34 = vrot.slane %v12978_v6, 9  ;;  %v4795_v42 = vrot.slane %v12933_v31, 5 }
 0x2e9   : > { %v6640_v53 = vrot.slane %v6639_v23, 4  ;;  %v6644_v20 = vrot.slane %v6642_v61, 5  ;;  %v6653_v52 = vor.u32 %v6652_v25, %v6649_v55  ;;  %v6666_v7 = vshll.u32 %v6500_v10, 16  ;;  %v7107_v10 = vld [vmem:[#allocation3 + $0xa4] sm:$0x1] }
 0x2ea   : > { %v8986_v16 = vcombine.low %v6792_v19, %v12982_v50  ;;  %v6635_v33 = vsel %vm10128_vm11, %v6630_v11, %v6634_v48  ;;  %v4969_v59 = vrot.slane %v4968_v54, 4  ;;  %v7185_v22 = vshrl.u32 %v7094_v27, 16 }
 0x2eb   : > { %v6645_v2 = vsel %vm10128_vm11, %v6640_v53, %v6644_v20  ;;  %v6664_v47 = vrot.slane %v6663_v35, 4  ;;  %v7188_v21 = vshll.u32 %v7094_v27, 16  ;;  %v7194_v39 = vshll.u32 %v7095_v13, 16  ;;  %v9752_v20 = vld [vmem:[#allocation3 + $0x5c] sm:$0x1] }
 0x2ec   : > { %7530 = vrot.lane.b32.xlu0 %v8986_v16, %s9912_s12  ;;  %v8970_v9 = vcombine.low %v6635_v33, %v6645_v2  ;;  %v4973_v51 = vrot.slane %v4971_v56, 5  ;;  %v4797_v37 = vrot.slane %v4795_v42, 4  ;;  %v13005_v48 = vsel %vm5721_vm6, %v8822_v17, %v5486_v14  ;;  %v9750_v17 = vld [vmem:[#allocation3 + $0x50] sm:$0x1]  ;;  %v4726_v16 = vld [vmem:[#allocation3 + $0x54] sm:$0xe] }
 0x2ed   : > { %v6654_v61 = vrot.slane %v6653_v52, 4  ;;  %v6668_v6 = vrot.slane %v6666_v7, 5  ;;  %v7187_v55 = vrot.slane %v7185_v22, 4  ;;  %v7190_v25 = vrot.slane %v7188_v21, 5  ;;  %v13039_v22 = vld [vmem:[#allocation3 + $0x58] sm:$0xf] }
 0x2ee   : > { %7458 = vrot.lane.b32.xlu1 %v8970_v9, %s9912_s12  ;;  %v4964_v28 = vsel %vm10128_vm11, %v12943_v5, %v12973_v62  ;;  %v4974_v56 = vsel %vm10128_vm11, %v4969_v59, %v4973_v51  ;;  %v13014_v43 = vrot.slane %v7194_v39, 5  ;;  %v7198_v8 = vshrl.u32 %v7095_v13, 16  ;;  %v9751_v62 = vld [vmem:[#allocation3 + $0x58] sm:$0xf]  ;;  %v13047_v39 = vld [vmem:[#allocation3 + $0x60] sm:$0xf] }
 0x2ef   : > { %v6669_v31 = vsel %vm10128_vm11, %v6664_v47, %v6668_v6  ;;  %v4798_v11 = vrot.slane %v9750_v17, 5  ;;  %v7191_v23 = vor.u32 %v7190_v25, %v7187_v55  ;;  %v4982_v54 = vor.u32 %v12900_v40, %v12810_v57  ;;  %v13049_v9 = vld [vmem:[#allocation3 + $0x64] sm:$0xf]  ;;  %v13056_v6 = vld [vmem:[#allocation3 + $0x18] sm:$0xe] }
 0x2f0   : > { %7660 = vrot.lane.b32.xlu0 %v12941_v24, %s9912_s12  ;;  %v7200_v27 = vrot.slane %v7198_v8, 4  ;;  %v7204_v5 = vshll.u32 %v7107_v10, 16  ;;  %v4985_v35 = vshll.u32 %v9751_v62, 16  ;;  %v4989_v14 = vshrl.u32 %v9751_v62, 16 }
 0x2f1   : > { %v6659_v13 = vsel %vm10128_vm11, %v6654_v61, %v12980_v46  ;;  %v8853_v19 = vcombine.low %v4964_v28, %v4974_v56  ;;  %v13027_v53 = vsel %vm10108_vm7, %v4797_v37, %v4798_v11  ;;  %v4995_v52 = vshll.u32 %v9752_v20, 16  ;;  %v9757_v56 = vld [vmem:[#allocation3 + $0x5c] sm:$0x1] }
 0x2f2   : > { %7588 = vrot.lane.b32.xlu1 %v8999_v30, %s9912_s12  ;;  %v13030_v57 = vrot.slane %v7191_v23, 4  ;;  %v7201_v40 = vor.u32 %v7200_v27, %v13014_v43  ;;  %v13033_v24 = vrot.slane %v4985_v35, 5  ;;  %v4991_v7 = vrot.slane %v4989_v14, 4  ;;  %v13072_v23 = vld [vmem:[#allocation3 + $0x54] sm:$0xf] }
 0x2f3   : > { %v8971_v33 = vcombine.low %v6659_v13, %v6669_v31  ;;  %v4796_v46 = vsel %vm10108_vm7, %v8798_v34, %v4795_v42  ;;  %v13037_v59 = vrot.slane %v4982_v54, 4  ;;  %v4802_v2 = vrot.slane %v13039_v22, 5  ;;  %v7096_v42 = vld [vmem:[#allocation3 + $0xa8] sm:$0xf]  ;;  %v9473_v31 = vpop.f32.mrb[12].mxu1 }
 0x2f4   : > { %v5808_v30 = vsel %vm5721_vm6, %v8853_v19, %v12975_v60  ;;  %v8838_v47 = vcombine.low %v4796_v46, %v13027_v53  ;;  %v13045_v21 = vrot.slane %v7204_v5, 5  ;;  %v13053_v51 = vrot.slane %v7201_v40, 4  ;;  %v13058_v60 = vld [vmem:[#allocation3 + $0x1c] sm:$0xf]  ;;  %v5692_v17 = vpop.permute.xlu0 %5691  ;;  %v4220_v35 = vpop.f32.mrb[13].mxu1 }
 0x2f5   : > { %v4992_v37 = vor.u32 %v4991_v7, %v13033_v24  ;;  %v8799_v61 = vrot.slane %v4726_v16, 9  ;;  %v5363_v10 = vrot.slane %v13058_v60, 5  ;;  %v7197_v55 = vsel %vm10128_vm11, %v13030_v57, %v13014_v43  ;;  %v9474_v20 = vpop.f32.mrb[14].mxu1  ;;  %v4491_v54 = vld [vmem:[#allocation3 + $0xbc] sm:$0x1] }
 0x2f6   : > { %7460 = vrot.lane.b32.xlu1 %v8971_v33, %s9912_s12  ;;  %v13066_v25 = vrot.slane %v4995_v52, 5  ;;  %v4804_v28 = vrot.slane %v4802_v2, 4  ;;  %v4805_v8 = vrot.slane %v9757_v56, 5  ;;  %v4988_v11 = vsel %vm10128_vm11, %v13037_v59, %v13033_v24  ;;  %v4223_v33 = vpop.f32.mrb[15].mxu1  ;;  %v7002_v59 = vld [vmem:[#allocation3 + $0x9c] sm:$0xe] }
 0x2f7   : > { %v7209_v27 = vshrl.u32 %v7096_v42, 16  ;;  %v7212_v5 = vshll.u32 %v7096_v42, 16  ;;  %v4229_v62 = vadd.f32 %v12864_v29, %v9473_v31  ;;  %v5840_v14 = vsel %vm5721_vm6, %v8869_v58, %v5692_v17  ;;  %v7097_v58 = vld [vmem:[#allocation3 + $0xac] sm:$0xf]  ;;  %v7003_v60 = vld [vmem:[#allocation3 + $0xa8] sm:$0xe] }
 0x2f8   : > { %v13083_v13 = vsel %vm10108_vm7, %v8799_v61, %v4802_v2  ;;  %v8808_v19 = vrot.slane %v13056_v6, 9  ;;  %v4221_v53 = vadd.f32 %v12864_v29, %v4220_v35  ;;  %6338 = vmatprep.mubr.bf16.mxu1 %v5840_v14  ;;  %v7207_v52 = vsel %vm10128_vm11, %v13053_v51, %v13045_v21  ;;  %v9759_v2 = vld [vmem:[#allocation3 + $0x20] sm:$0x1]  ;;  %v5558_v56 = vpop.permute.xlu0 %5557  ;;  %v6802_v21 = vld [vmem:[#allocation3 + $0xa4] sm:$0x1] }
 0x2f9   : > { %v13091_v40 = vrot.slane %v4992_v37, 4  ;;  %v5365_v38 = vrot.slane %v5363_v10, 4  ;;  %v9126_v7 = vpack.c.bf16 %v4229_v62, %v4229_v62  ;;  %v4232_v16 = vadd.f32 %v12864_v29, %v9474_v20  ;;  %6339 = vmatmul.mubr.bf16.gmra.mrb[36].mxu1 %v5808_v30  ;;  %v6803_v51 = vld [vmem:[#allocation3 + $0xb0] sm:$0x1] }
 0x2fa   : > { %7590 = vrot.lane.b32.xlu1 %v9000_v0, %s9912_s12  ;;  %v13102_v46 = vsel %vm10108_vm7, %v4804_v28, %v4805_v8  ;;  %v5366_v42 = vrot.slane %v9759_v2, 5  ;;  %v9124_v37 = vpack.c.bf16 %v4221_v53, %v4221_v53  ;;  %v4224_v61 = vadd.f32 %v12864_v29, %v4223_v33  ;;  %v4494_v8 = vld [vmem:[#allocation3 + $0xc0] sm:$0xf]  ;;  %v4487_v53 = vld [vmem:[#allocation3 + $0xb4] sm:$0xf] }
 0x2fb   : > { %v7211_v31 = vrot.slane %v7209_v27, 4  ;;  %v7214_v17 = vrot.slane %v7212_v5, 5  ;;  %v4403_v62 = vshrl.u32 %v9126_v7, 16  ;;  %v9127_v35 = vpack.c.bf16 %v4232_v16, %v4232_v16 }
 0x2fc   : > { %v5780_v14 = vsel %vm5721_vm6, %v8838_v47, %v5558_v56  ;;  %v7218_v20 = vshll.u32 %v7097_v58, 16  ;;  %v4386_v26 = vshrl.u32 %v9124_v37, 16  ;;  %v9125_v49 = vpack.c.bf16 %v4224_v61, %v4224_v61 }
 0x2fd   : > { %6249 = vmatprep.mubr.bf16.mxu0 %v5780_v14  ;;  %v4998_v0 = vsel %vm10128_vm11, %v13091_v40, %v13066_v25  ;;  %v13112_v30 = vsel %vm10108_vm7, %v5365_v38, %v5366_v42  ;;  %v4405_v29 = vrot.slane %v4403_v62, 7  ;;  %v4406_v28 = vshll.u32 %v9126_v7, 16  ;;  %v4498_v14 = vld [vmem:[#allocation3 + $0xc8] sm:$0x1]  ;;  %v5622_v40 = vpop.permute.xlu1 %5621  ;;  %v7108_v62 = vld [vmem:[#allocation3 + $0xb0] sm:$0x1] }
 0x2fe   : > { %v4389_v27 = vshll.u32 %v9124_v37, 16  ;;  %v4411_v5 = vshrl.u32 %v9127_v35, 16  ;;  %6250 = vmatmul.mubr.bf16.gmra.mrb[40].mxu0 %v13005_v48  ;;  %v4388_v47 = vrot.slane %v4386_v26, 7  ;;  %v4414_v16 = vshll.u32 %v9127_v35, 16 }
 0x2ff   : > { %v4394_v33 = vshrl.u32 %v9125_v49, 16  ;;  %v7215_v2 = vor.u32 %v7214_v17, %v7211_v31  ;;  %v4408_v61 = vor.u32 %v4406_v28, %v4405_v29  ;;  %v4397_v25 = vshll.u32 %v9125_v49, 16 }
 0x300   : > { %v4413_v56 = vrot.slane %v4411_v5, 7  ;;  %v13115_v45 = vrot.slane %v7218_v20, 5  ;;  %v4409_v38 = vrot.slane %v4405_v29, 4  ;;  %v4391_v42 = vor.u32 %v4389_v27, %v4388_v47 }
 0x301   : > { %v4396_v7 = vrot.slane %v4394_v33, 7  ;;  %v7222_v37 = vshrl.u32 %v7097_v58, 16  ;;  %v4495_v48 = vsel %vm11837_vm4, %v4408_v61, %v4494_v8  ;;  %v4392_v26 = vrot.slane %v4388_v47, 4 }
 0x302   : > { %v4416_v34 = vor.u32 %v4414_v16, %v4413_v56  ;;  %v4418_v35 = vrot.slane %v4413_v56, 4  ;;  %4496 = vst [vmem:[#allocation3 + $0xc0] sm:$0xf] %v4495_v48  ;;  %v4488_v31 = vsel %vm11837_vm4, %v4391_v42, %v4487_v53  ;;  %v7216_v28 = vrot.slane %v7215_v2, 4  ;;  %v5330_v53 = vld [vmem:[#allocation3 + $0x24] sm:$0xe] }
 0x303   : > { %v4399_v17 = vor.u32 %v4397_v25, %v4396_v7  ;;  %v4401_v49 = vrot.slane %v4396_v7, 4  ;;  %v7224_v20 = vrot.slane %v7222_v37, 4  ;;  %4489 = vst [vmem:[#allocation3 + $0xb4] sm:$0xf] %v4488_v31  ;;  %v7228_v8 = vshll.u32 %v7108_v62, 16 }
 0x304   : > { %v4417_v29 = vsel %vm10136_vm12, %v4409_v38, %v4416_v34  ;;  %v4499_v58 = vsel %vm11845_vm13, %v4418_v35, %v4498_v14  ;;  %v7060_v47 = vrot.slane %v12948_v32, 5  ;;  %v5488_v34 = vpop.permute.xlu1 %5487  ;;  %v13143_v44 = vcombine.low %v7197_v55, %v7207_v52 }
 0x305   : > { %4497 = vst.msk [vmem:[#allocation3 + $0xc4] sm:$0xf] %vm280_vm0, %v4417_v29  ;;  %4500 = vst [vmem:[#allocation3 + $0xc8] sm:$0x1] %v4499_v58  ;;  %v4400_v27 = vsel %vm10136_vm12, %v4392_v26, %v4399_v17  ;;  %v4492_v15 = vsel %vm11845_vm13, %v4401_v49, %v4491_v54  ;;  %v7225_v5 = vor.u32 %v7224_v20, %v13115_v45  ;;  %v7067_v43 = vrot.slane %v12982_v50, 5 }
 0x306   : > { %4490 = vst.msk [vmem:[#allocation3 + $0xb8] sm:$0xf] %vm280_vm0, %v4400_v27  ;;  %4493 = vst [vmem:[#allocation3 + $0xbc] sm:$0x1] %v4492_v15  ;;  %v8854_v18 = vcombine.low %v4988_v11, %v4998_v0  ;;  %v13156_v32 = vsel %vm10108_vm7, %v8808_v19, %v5363_v10  ;;  %v8839_v57 = vcombine.low %v13083_v13, %v13102_v46  ;;  %v7062_v11 = vrot.slane %v7060_v47, 4 }
 0x307   : > { %v8880_v55 = vcombine.low %v13156_v32, %v13112_v30  ;;  %v7226_v24 = vrot.slane %v7225_v5, 4  ;;  %v7230_v54 = vrot.slane %v7228_v8, 5  ;;  %v7069_v52 = vrot.slane %v7067_v43, 4  ;;  %v5331_v0 = vld [vmem:[#allocation3 + $0x30] sm:$0xe] }
 0x308   : > { %v5812_v6 = vsel %vm5721_vm6, %v8854_v18, %v5622_v40  ;;  %v14010_v10 = vrot.slane %v12084_v12, 5  ;;  %v14011_v50 = vcombine.low %v13072_v23, %v13039_v22  ;;  %v7221_v46 = vsel %vm10128_vm11, %v7216_v28, %v13115_v45  ;;  %v14012_v45 = vld [vmem:[#allocation12_spill] sm:$0xff]  ;;  %v9760_v49 = vld [vmem:[#allocation3 + $0x34] sm:$0xf] }
 0x309   : > { %v7063_v16 = vrot.slane %v6802_v21, 5  ;;  %v7070_v33 = vrot.slane %v6803_v51, 5  ;;  %v7231_v2 = vsel %vm10128_vm11, %v7226_v24, %v7230_v54  ;;  %v8945_v61 = vrot.slane %v7002_v59, 9  ;;  %v5694_v25 = vpop.permute.xlu0 %5693  ;;  %v13195_v48 = vld [vmem:[#allocation3 + $0xc0] sm:$0xf] }
 0x30a   : > { %v5372_v19 = vrot.slane %v14010_v10, 4  ;;  %v5752_v13 = vsel %vm5721_vm6, %v14011_v50, %v5488_v34  ;;  %v8946_v56 = vrot.slane %v7003_v60, 9  ;;  %v8809_v14 = vrot.slane %v5330_v53, 9  ;;  %v13175_v40 = vld [vmem:[#allocation3 + $0xb4] sm:$0xf] }
 0x30b   : > { %v13179_v22 = vsel %vm10108_vm7, %v7062_v11, %v7063_v16  ;;  %v13183_v23 = vsel %vm10108_vm7, %v7069_v52, %v7070_v33  ;;  %v14013_v38 = vrot.slane %v14012_v45, 5  ;;  %v8810_v7 = vrot.slane %v5331_v0, 9  ;;  %v13206_v29 = vld [vmem:[#allocation3 + $0xb4] sm:$0xf]  ;;  %v7100_v45 = vld [vmem:[#allocation3 + $0xc0] sm:$0xf] }
 0x30c   : > { %v14014_v62 = vcombine.low %v13047_v39, %v13049_v9  ;;  %v13197_v26 = vld [vmem:[#allocation3 + $0xc4] sm:$0xf]  ;;  %v6671_v35 = vshrl.u32 %v13175_v40, 16  ;;  %v14015_v31 = vmov %v14010_v10  ;;  %v5377_v20 = vrot.slane %v9760_v49, 5  ;;  %v13237_v59 = vld [vmem:[#allocation3 + $0xb4] sm:$0xf] }
 0x30d   : > { %v13189_v42 = vsel %vm10108_vm7, %v5372_v19, %v14013_v38  ;;  %v13204_v17 = vsel %vm10108_vm7, %v8809_v14, %v14015_v31  ;;  %v13208_v58 = vld [vmem:[#allocation3 + $0xb8] sm:$0xf]  ;;  %v13212_v28 = vcombine.low %v7221_v46, %v7231_v2  ;;  %v13216_v8 = vsel %vm10108_vm7, %v8945_v61, %v7060_v47  ;;  %v13228_v53 = vld [vmem:[#allocation3 + $0xbc] sm:$0x1]  ;;  %v5560_v18 = vpop.permute.xlu0 %5559  ;;  %v7101_v32 = vld [vmem:[#allocation3 + $0xc4] sm:$0xf] }
 0x30e   : > { %v5844_v37 = vsel %vm5721_vm6, %v14014_v62, %v5694_v25  ;;  %v13210_v39 = vld [vmem:[#allocation3 + $0xb8] sm:$0xf]  ;;  %v13220_v12 = vsel %vm10108_vm7, %v8946_v56, %v7067_v43  ;;  %v8881_v27 = vcombine.low %v13204_v17, %v13189_v42  ;;  %v8987_v15 = vcombine.low %v13206_v29, %v13208_v58  ;;  %v7109_v54 = vld [vmem:[#allocation3 + $0xbc] sm:$0x1]  ;;  %v9681_v42 = vld [vmem:[%s13920_s3 + $0x88] sm:$0xff]  }
 0x30f   : > { %6346 = vmatprep.mubr.bf16.mxu1 %v5844_v37  ;;  %v8988_v5 = vcombine.low %v13195_v48, %v13197_v26  ;;  %v9001_v47 = vcombine.low %v13216_v8, %v13179_v22  ;;  %v9002_v34 = vcombine.low %v13220_v12, %v13183_v23  ;;  %v6673_v21 = vrot.slane %v6671_v35, 4  ;;  %v9761_v62 = vld [vmem:[#allocation3 + $0x38] sm:$0x1]  ;;  %v9685_v12 = vld [vmem:[%s13920_s3 + $0x98] sm:$0xff]  }
 0x310   : > { %6347 = vmatmul.mubr.bf16.gmra.mrb[40].mxu1 %v5812_v6  ;;  %v6674_v51 = vshll.u32 %v13175_v40, 16  ;;  %v6680_v43 = vshll.u32 %v13210_v39, 16  ;;  %v6684_v24 = vshrl.u32 %v13210_v39, 16  ;;  %7532 = vrot.lane.b32.xlu0 %v8987_v15, %s9912_s12  ;;  %v6690_v11 = vshll.u32 %v13228_v53, 16  ;;  %v13242_v6 = vld [vmem:[#allocation3 + $0xb8] sm:$0xf] }
 0x311   : > { %v5784_v60 = vsel %vm5721_vm6, %v8839_v57, %v5560_v18  ;;  %v7233_v52 = vshrl.u32 %v13237_v59, 16  ;;  %v5378_v10 = vsel %vm10108_vm7, %v8810_v7, %v5377_v20  ;;  %v7236_v46 = vshll.u32 %v13237_v59, 16  ;;  %v9683_v22 = vld [vmem:[%s13920_s3 + $0x90] sm:$0xff]  }
 0x312   : > { %v6676_v19 = vrot.slane %v6674_v51, 5  ;;  %v6682_v0 = vrot.slane %v6680_v43, 5  ;;  %v6686_v50 = vrot.slane %v6684_v24, 4  ;;  %6257 = vmatprep.mubr.bf16.mxu0 %v5784_v60  ;;  %v6692_v16 = vrot.slane %v6690_v11, 5  ;;  %v7004_v24 = vld [vmem:[#allocation3 + $0xb4] sm:$0xe] }
 0x313   : > { %6258 = vmatmul.mubr.bf16.gmra.mrb[44].mxu0 %v5752_v13  ;;  %v7235_v33 = vrot.slane %v7233_v52, 4  ;;  %v7242_v2 = vshll.u32 %v13242_v6, 16  ;;  %v7246_v57 = vshrl.u32 %v13242_v6, 16  ;;  %v7238_v14 = vrot.slane %v7236_v46, 5  ;;  %v9678_v11 = vld [vmem:[%s13920_s3 + $0x80] sm:$0xff]  }
 0x314   : > { %v6677_v61 = vor.u32 %v6676_v19, %v6673_v21  ;;  %v6687_v56 = vor.u32 %v6686_v50, %v6682_v0  ;;  %9483 = vmatprep.mubr.msk.bf16.mxu0 %vm5721_vm6, %v8880_v55  ;;  %v7252_v25 = vshll.u32 %v7109_v54, 16  ;;  %7662 = vrot.lane.b32.xlu0 %v13143_v44, %s9912_s12  ;;  %v5379_v7 = vrot.slane %v5377_v20, 4  ;;  %v7110_v55 = vld [vmem:[#allocation3 + $0xc8] sm:$0x1] }
 0x315   : > { %v7244_v38 = vrot.slane %v7242_v2, 5  ;;  %v7248_v13 = vrot.slane %v7246_v57, 4  ;;  %v5380_v37 = vrot.slane %v9761_v62, 5  ;;  %v7239_v31 = vor.u32 %v7238_v14, %v7235_v33  ;;  %v6804_v33 = vld [vmem:[#allocation3 + $0xbc] sm:$0x1] }
 0x316   : > { %v6678_v48 = vrot.slane %v6677_v61, 4  ;;  %v6688_v35 = vrot.slane %v6687_v56, 4  ;;  %v7254_v49 = vrot.slane %v7252_v25, 5  ;;  %v7257_v18 = vshrl.u32 %v7100_v45, 16  ;;  %v6805_v56 = vld [vmem:[#allocation3 + $0xc8] sm:$0x1] }
 0x317   : > { %v7249_v15 = vor.u32 %v7248_v13, %v7244_v38  ;;  %v5381_v30 = vsel %vm10108_vm7, %v5379_v7, %v5380_v37  ;;  %v7260_v21 = vshll.u32 %v7100_v45, 16  ;;  %v7240_v51 = vrot.slane %v7239_v31, 4  ;;  %v7005_v14 = vld [vmem:[#allocation3 + $0xc0] sm:$0xe]  ;;  %v5332_v7 = vld [vmem:[#allocation3 + $0x3c] sm:$0xe] }
 0x318   : > { %v6683_v44 = vsel %vm10128_vm11, %v6678_v48, %v6682_v0  ;;  %v6693_v20 = vsel %vm10128_vm11, %v6688_v35, %v6692_v16  ;;  %v8882_v43 = vcombine.low %v5378_v10, %v5381_v30  ;;  %7534 = vrot.lane.b32.xlu0 %v8988_v5, %s9912_s12  ;;  %v7259_v52 = vrot.slane %v7257_v18, 4  ;;  %v9680_v0 = vld [vmem:[%s13920_s3 + $0xc8] sm:$0xff]   ;;  %v9682_v48 = vld [vmem:[%s13920_s3 + $0xd0] sm:$0xff]   ;;  %v5333_v30 = vld [vmem:[#allocation3 + $0x48] sm:$0xe] }
 0x319   : > { %v8972_v60 = vcombine.low %v6683_v44, %v6693_v20  ;;  %v7250_v54 = vrot.slane %v7249_v15, 4  ;;  %v7262_v19 = vrot.slane %v7260_v21, 5  ;;  %v7245_v50 = vsel %vm10128_vm11, %v7240_v51, %v7244_v38  ;;  %v5696_v37 = vpop.permute.xlu0 %5695  ;;  %v9762_v18 = vld [vmem:[#allocation3 + $0x40] sm:$0xf] }
 0x31a   : > { %v7266_v46 = vshll.u32 %v7101_v32, 16  ;;  %v7270_v10 = vshrl.u32 %v7101_v32, 16  ;;  %v7276_v16 = vshll.u32 %v7110_v55, 16  ;;  %v8947_v57 = vrot.slane %v7004_v24, 9 }
 0x31b   : > { %7462 = vrot.lane.b32.xlu1 %v8972_v60, %s9912_s12  ;;  %v7255_v5 = vsel %vm10128_vm11, %v7250_v54, %v7254_v49  ;;  %9484 = vmatmul.mubr.msk.bf16.vlgmr.msra.gmra.mrb[48].mxu0 %vm5721_vm6, %v8881_v27  ;;  %v7263_v2 = vor.u32 %v7262_v19, %v7259_v52  ;;  %v7074_v61 = vrot.slane %v13208_v58, 5  ;;  %v7077_v62 = vrot.slane %v6804_v33, 5  ;;  %v9684_v60 = vld [vmem:[%s13920_s3 + $0xd8] sm:$0xff]   ;;  %v9764_v19 = vld [vmem:[#allocation3 + $0x4c] sm:$0xf] }
 0x31c   : > { %v9018_v25 = vcombine.low %v7245_v50, %v7255_v5  ;;  %9487 = vmatprep.mubr.msk.bf16.mxu0 %vm5721_vm6, %v8882_v43  ;;  %v7268_v45 = vrot.slane %v7266_v46, 5  ;;  %v7272_v38 = vrot.slane %v7270_v10, 4  ;;  %v7278_v13 = vrot.slane %v7276_v16, 5  ;;  %9356 = vmatpush3.bf16.msra.mxu0 %v9678_v11  ;;  %v9763_v43 = vld [vmem:[#allocation3 + $0x44] sm:$0x1] }
 0x31d   : > { %7664 = vrot.lane.b32.xlu0 %v13212_v28, %s9912_s12  ;;  %v7264_v17 = vrot.slane %v7263_v2, 4  ;;  %v13287_v58 = vsel %vm10108_vm7, %v8947_v57, %v7074_v61  ;;  %v7076_v27 = vrot.slane %v7074_v61, 4  ;;  %9357 = vmatprep.subr.bf16.mxu0 %v9680_v0  ;;  %v8948_v31 = vrot.slane %v7005_v14, 9  ;;  %v9765_v50 = vld [vmem:[#allocation3 + $0x50] sm:$0x1] }
 0x31e   : > { %v7273_v35 = vor.u32 %v7272_v38, %v7268_v45  ;;  %v7081_v49 = vrot.slane %v13197_v26, 5  ;;  %v7084_v15 = vrot.slane %v6805_v56, 5  ;;  %v8811_v55 = vrot.slane %v5332_v7, 9  ;;  %v13321_v10 = vpop.permute.xlu0 %7520  ;;  %v9766_v2 = vld [vmem:[#allocation3 + $0x6c] sm:$0xf] }
 0x31f   : > { %7592 = vrot.lane.b32.xlu1 %v9001_v47, %s9912_s12  ;;  %v7269_v28 = vsel %vm10128_vm11, %v7264_v17, %v7268_v45  ;;  %v7078_v32 = vsel %vm10108_vm7, %v7076_v27, %v7077_v62  ;;  %v5384_v21 = vrot.slane %v9762_v18, 5  ;;  %v5387_v24 = vrot.slane %v9763_v43, 5  ;;  %v13331_v57 = vld [vmem:[#allocation3 + $0x70] sm:$0xf]  ;;  %v6694_v56 = vld [vmem:[#allocation3 + $0x60] sm:$0xe] }
 0x320   : > { %v7274_v44 = vrot.slane %v7273_v35, 4  ;;  %v9003_v20 = vcombine.low %v13287_v58, %v7078_v32  ;;  %v13304_v26 = vsel %vm10108_vm7, %v8948_v31, %v7081_v49  ;;  %v7083_v51 = vrot.slane %v7081_v49, 4  ;;  %9358 = vmatpush3.bf16.msra.mxu0 %v9681_v42  ;;  %v9768_v38 = vld [vmem:[#allocation3 + $0x64] sm:$0xf]  ;;  %v9769_v42 = vld [vmem:[#allocation3 + $0x68] sm:$0x1] }
 0x321   : > { %7666 = vrot.lane.b32.xlu0 %v9018_v25, %s9912_s12  ;;  %v5385_v8 = vsel %vm10108_vm7, %v8811_v55, %v5384_v21  ;;  %v5386_v47 = vrot.slane %v5384_v21, 4  ;;  %v8812_v11 = vrot.slane %v5333_v30, 9  ;;  %9359 = vmatprep.subr.bf16.mxu0 %v9682_v48  ;;  %v5391_v0 = vrot.slane %v9764_v19, 5  ;;  %v5334_v58 = vld [vmem:[#allocation3 + $0x54] sm:$0xe] }
 0x322   : > { %v7279_v54 = vsel %vm10128_vm11, %v7274_v44, %v7278_v13  ;;  %v13319_v52 = vsel %vm10108_vm7, %v7083_v51, %v7084_v15  ;;  %v5394_v46 = vrot.slane %v9765_v50, 5  ;;  %v8871_v61 = vcombine.low %v9766_v2, %v13331_v57  ;;  %v5335_v30 = vld [vmem:[#allocation3 + $0x60] sm:$0xe]  ;;  %v9771_v18 = vld [vmem:[#allocation3 + $0x68] sm:$0x1] }
 0x323   : > { %7594 = vrot.lane.b32.xlu1 %v9002_v34, %s9912_s12  ;;  %v9019_v16 = vcombine.low %v7269_v28, %v7279_v54  ;;  %v9004_v33 = vcombine.low %v13304_v26, %v13319_v52  ;;  %v5388_v5 = vsel %vm10108_vm7, %v5386_v47, %v5387_v24  ;;  %v5392_v25 = vsel %vm10108_vm7, %v8812_v11, %v5391_v0  ;;  %v5624_v28 = vpop.permute.xlu1 %5623  ;;  %v9772_v47 = vld [vmem:[#allocation3 + $0x5c] sm:$0x1]  ;;  %v13364_v24 = vld [vmem:[#allocation3 + $0xcc] sm:$0xf]  ;;  %v9688_v11 = vld [vmem:[%s13920_s3 + $0xe8] sm:$0xff]  }
 0x324   : > { %v8883_v14 = vcombine.low %v5385_v8, %v5388_v5  ;;  %v5393_v45 = vrot.slane %v5391_v0, 4  ;;  %v5006_v23 = vor.u32 %v12918_v41, %v12914_v4  ;;  %9360 = vmatpush3.bf16.msra.mxu0 %v9683_v22  ;;  %v5848_v34 = vsel %vm5721_vm6, %v8871_v61, %v5696_v37  ;;  %v9686_v4 = vld [vmem:[%s13920_s3 + $0xe0] sm:$0xff]   ;;  %v13349_v37 = vld [vmem:[#allocation3 + $0x64] sm:$0xf]  ;;  %v13355_v26 = vpop.permute.xlu0 %7522  ;;  %v13372_v50 = vld [vmem:[#allocation3 + $0xd0] sm:$0xf] }
 0x325   : > { %7668 = vrot.lane.b32.xlu0 %v9019_v16, %s9912_s12  ;;  %v5009_v13 = vshll.u32 %v9768_v38, 16  ;;  %v5013_v7 = vshrl.u32 %v9768_v38, 16  ;;  %v5019_v17 = vshll.u32 %v9769_v42, 16  ;;  %9361 = vmatprep.subr.bf16.mxu0 %v9684_v60  ;;  %v8933_v62 = vrot.slane %v6694_v56, 9  ;;  %v9773_v19 = vld [vmem:[#allocation3 + $0x68] sm:$0x1] }
 0x326   : > { %9488 = vmatmul.mubr.msk.bf16.gmra.mrb[52].mxu0 %vm5721_vm6, %v8883_v14  ;;  %v5395_v41 = vsel %vm10108_vm7, %v5393_v45, %v5394_v46  ;;  %6354 = vmatprep.mubr.bf16.mxu1 %v5848_v34  ;;  %v5007_v27 = vrot.slane %v5006_v23, 4  ;;  %v6728_v48 = vrot.slane %v13349_v37, 5  ;;  %v6731_v21 = vrot.slane %v9771_v18, 5  ;;  %v13389_v23 = vld [vmem:[#allocation3 + $0xd4] sm:$0x1] }
 0x327   : > { %7596 = vrot.lane.b32.xlu1 %v9003_v20, %s9912_s12  ;;  %v8884_v35 = vcombine.low %v5392_v25, %v5395_v41  ;;  %v5011_v31 = vrot.slane %v5009_v13, 5  ;;  %v5015_v49 = vrot.slane %v5013_v7, 4  ;;  %v5021_v15 = vrot.slane %v5019_v17, 5  ;;  %v9687_v20 = vld [vmem:[%s13920_s3 + $0xa0] sm:$0xff]   ;;  %v13392_v34 = vpop.permute.xlu1 %7448 }
 0x328   : > { %v6729_v32 = vsel %vm10108_vm7, %v8933_v62, %v6728_v48  ;;  %v6730_v55 = vrot.slane %v6728_v48, 4  ;;  %v8813_v44 = vrot.slane %v5334_v58, 9  ;;  %9362 = vmatpush3.bf16.msra.mxu0 %v9685_v12  ;;  %v5398_v8 = vrot.slane %v12964_v3, 5  ;;  %v5336_v18 = vld [vmem:[#allocation3 + $0x6c] sm:$0xe] }
 0x329   : > { %9491 = vmatprep.mubr.msk.bf16.mxu0 %vm5721_vm6, %v8884_v35  ;;  %v5012_v51 = vsel %vm10128_vm11, %v5007_v27, %v5011_v31  ;;  %v5016_v22 = vor.u32 %v5015_v49, %v5011_v31  ;;  %v5401_v43 = vrot.slane %v9772_v47, 5  ;;  %9363 = vmatprep.subr.bf16.mxu0 %v9686_v4  ;;  %v8814_v54 = vrot.slane %v5335_v30, 9  ;;  %v9690_v27 = vld [vmem:[%s13920_s3 + $0xf0] sm:$0xff]   ;;  %v6695_v35 = vld [vmem:[#allocation3 + $0x6c] sm:$0xe] }
 0x32a   : > { %v6732_v60 = vsel %vm10108_vm7, %v6730_v55, %v6731_v21  ;;  %v5405_v52 = vrot.slane %v13049_v9, 5  ;;  %v5408_v0 = vrot.slane %v9773_v19, 5  ;;  %v5399_v16 = vsel %vm10108_vm7, %v8813_v44, %v5398_v8  ;;  %v13381_v14 = vpop.permute.xlu0 %7524  ;;  %v13406_v31 = vld [vmem:[#allocation3 + $0x70] sm:$0xf] }
 0x32b   : > { %7598 = vrot.lane.b32.xlu1 %v9004_v33, %s9912_s12  ;;  %v5017_v3 = vrot.slane %v5016_v22, 4  ;;  %v8973_v46 = vcombine.low %v6729_v32, %v6732_v60  ;;  %v5400_v5 = vrot.slane %v5398_v8, 4  ;;  %v7281_v56 = vshrl.u32 %v13364_v24, 16  ;;  %v13414_v44 = vpop.permute.xlu1 %7450 }
 0x32c   : > { %v5406_v2 = vsel %vm10108_vm7, %v8814_v54, %v5405_v52  ;;  %v5407_v61 = vrot.slane %v5405_v52, 4  ;;  %v7284_v9 = vshll.u32 %v13364_v24, 16  ;;  %9364 = vmatpush3.bf16.msra.mxu0 %v9687_v20  ;;  %v7290_v12 = vshll.u32 %v13372_v50, 16  ;;  %v9692_v52 = vld [vmem:[%s13920_s3 + $0xf8] sm:$0xff]  }
 0x32d   : > { %v5022_v33 = vsel %vm10128_vm11, %v5017_v3, %v5021_v15  ;;  %v7730_v25 = vsel %vm5721_vm6, %v8973_v46, %v13321_v10  ;;  %v5402_v45 = vsel %vm10108_vm7, %v5400_v5, %v5401_v43  ;;  %9365 = vmatprep.subr.bf16.mxu0 %v9688_v11  ;;  %v7283_v42 = vrot.slane %v7281_v56, 4  ;;  %v9689_v10 = vld [vmem:[%s13920_s3 + $0xa8] sm:$0xff]   ;;  %v9775_v15 = vld [vmem:[#allocation3 + $0x6c] sm:$0xf]  ;;  %v9691_v43 = vld [vmem:[%s13920_s3 + $0xb0] sm:$0xff]  }
 0x32e   : > { %v8855_v38 = vcombine.low %v5012_v51, %v5022_v33  ;;  %v8885_v13 = vcombine.low %v5399_v16, %v5402_v45  ;;  %v5409_v7 = vsel %vm10108_vm7, %v5407_v61, %v5408_v0  ;;  %v7286_v58 = vrot.slane %v7284_v9, 5  ;;  %v9776_v51 = vld [vmem:[#allocation3 + $0x74] sm:$0x1]  ;;  %v13417_v47 = vpop.permute.xlu0 %7526  ;;  %v9778_v5 = vld [vmem:[#allocation3 + $0x60] sm:$0xf] }
 0x32f   : > { %v8886_v17 = vcombine.low %v5406_v2, %v5409_v7  ;;  %v7292_v4 = vrot.slane %v7290_v12, 5  ;;  %v7294_v41 = vshrl.u32 %v13372_v50, 16  ;;  %v7300_v48 = vshll.u32 %v13389_v23, 16  ;;  %v9777_v3 = vld [vmem:[#allocation3 + $0x74] sm:$0x1] }
 0x330   : > { %v5816_v62 = vsel %vm5721_vm6, %v8855_v38, %v5624_v28  ;;  %9492 = vmatmul.mubr.msk.bf16.gmra.mrb[56].mxu0 %vm5721_vm6, %v8885_v13  ;;  %v6735_v49 = vrot.slane %v13406_v31, 5  ;;  %v6810_v30 = vshll.u32 %v9775_v15, 16  ;;  %v7287_v32 = vor.u32 %v7286_v58, %v7283_v42  ;;  %v6696_v45 = vld [vmem:[#allocation3 + $0x78] sm:$0xe]  ;;  %v13436_v12 = vld [vmem:[#allocation3 + $0x7c] sm:$0xf] }
 0x331   : > { %6355 = vmatmul.mubr.bf16.gmra.mrb[44].mxu1 %v5816_v62  ;;  %9495 = vmatprep.mubr.msk.bf16.mxu0 %vm5721_vm6, %v8886_v17  ;;  %v7296_v55 = vrot.slane %v7294_v41, 4  ;;  %v14016_v21 = vshrl.u32 %v12679_v63, 16  ;;  %v6738_v22 = vrot.slane %v9776_v51, 5  ;;  %v5412_v8 = vrot.slane %v13331_v57, 5  ;;  %v9693_v42 = vld [vmem:[%s13920_s3 + $0xb8] sm:$0xff]   ;;  %v13446_v17 = vpop.permute.xlu1 %7452 }
 0x332   : > { %8175 = vmatprep.mubr.bf16.mxu1 %v7730_v25  ;;  %v6737_v20 = vrot.slane %v6735_v49, 4  ;;  %9366 = vmatpush3.bf16.msra.mxu0 %v9689_v10  ;;  %v7288_v11 = vrot.slane %v7287_v32, 4  ;;  %v7302_v63 = vrot.slane %v7300_v48, 5  ;;  %v8934_v54 = vrot.slane %v6695_v35, 9  ;;  %v9780_v41 = vld [vmem:[#allocation3 + $0x80] sm:$0x1]  ;;  %v7657_v62 = vpop.permute.xlu0 %7656 }
 0x333   : > { %v13412_v28 = vrot.slane %v14016_v21, 4  ;;  %v7297_v60 = vor.u32 %v7296_v55, %v7292_v4  ;;  %9367 = vmatprep.subr.bf16.mxu0 %v9690_v27  ;;  %v8815_v57 = vrot.slane %v5336_v18, 9  ;;  %v5414_v0 = vrot.slane %v5412_v8, 4  ;;  %v9695_v48 = vld [vmem:[%s13920_s3 + $0x108] sm:$0xff]   ;;  %v13454_v15 = vld [vmem:[#allocation3 + $0x88] sm:$0xf] }
 0x334   : > { %v6739_v19 = vsel %vm10108_vm7, %v6737_v20, %v6738_v22  ;;  %v5415_v46 = vrot.slane %v9777_v3, 5  ;;  %v6812_v16 = vrot.slane %v6810_v30, 5  ;;  %v8957_v2 = vcombine.low %v9778_v5, %v13349_v37  ;;  %v9782_v30 = vld [vmem:[#allocation3 + $0x78] sm:$0xf]  ;;  %v13457_v32 = vld [vmem:[#allocation3 + $0x7c] sm:$0xf] }
 0x335   : > { %v7293_v61 = vsel %vm10128_vm11, %v7288_v11, %v7292_v4  ;;  %v7298_v56 = vrot.slane %v7297_v60, 4  ;;  %v6736_v9 = vsel %vm10108_vm7, %v8934_v54, %v6735_v49  ;;  %v5413_v33 = vsel %vm10108_vm7, %v8815_v57, %v5412_v8  ;;  %v9784_v21 = vld [vmem:[#allocation3 + $0x70] sm:$0xf]  ;;  %v9785_v8 = vld [vmem:[%s13920_s3 + $0x100] sm:$0xff]   ;;  %v13470_v11 = vpop.permute.xlu1 %7454 }
 0x336   : > { %v5416_v25 = vsel %vm10108_vm7, %v5414_v0, %v5415_v46  ;;  %v6742_v38 = vrot.slane %v13436_v12, 5  ;;  %9368 = vmatpush3.bf16.msra.mxu0 %v9691_v43  ;;  %v8974_v13 = vcombine.low %v6736_v9, %v6739_v19  ;;  %v7698_v10 = vsel %vm5721_vm6, %v8957_v2, %v13392_v34  ;;  %v9787_v57 = vld [vmem:[#allocation3 + $0x6c] sm:$0xf]  ;;  %v6697_v2 = vld [vmem:[#allocation3 + $0x84] sm:$0xe] }
 0x337   : > { %v7303_v37 = vsel %vm10128_vm11, %v7298_v56, %v7302_v63  ;;  %v8887_v7 = vcombine.low %v5413_v33, %v5416_v25  ;;  %9369 = vmatprep.subr.bf16.mxu0 %v9692_v52  ;;  %v6745_v27 = vrot.slane %v9780_v41, 5  ;;  %v8935_v49 = vrot.slane %v6696_v45, 9  ;;  %v9786_v52 = vld [vmem:[#allocation3 + $0x74] sm:$0x1]  ;;  %v9788_v56 = vld [vmem:[#allocation3 + $0x8c] sm:$0x1] }
 0x338   : > { %v9020_v58 = vcombine.low %v7293_v61, %v7303_v37  ;;  %v6744_v4 = vrot.slane %v6742_v38, 4  ;;  %v7734_v35 = vsel %vm5721_vm6, %v8974_v13, %v13355_v26  ;;  %v6749_v34 = vrot.slane %v13454_v15, 5  ;;  %v9789_v41 = vld [vmem:[#allocation3 + $0x78] sm:$0xf] }
 0x339   : > { %8176 = vmatmul.mubr.bf16.vlgmr.msra.gmra.mrb[48].mxu1 %v7698_v10  ;;  %9496 = vmatmul.mubr.msk.bf16.gmra.mrb[60].mxu0 %vm5721_vm6, %v8887_v7  ;;  %v9005_v55 = vcombine.low %v9782_v30, %v13457_v32  ;;  %v6813_v26 = vor.u32 %v6812_v16, %v13412_v28  ;;  %v6816_v20 = vshll.u32 %v9784_v21, 16  ;;  %v6820_v51 = vshrl.u32 %v9784_v21, 16  ;;  %v9697_v28 = vld [vmem:[%s13920_s3 + $0x110] sm:$0xff]   ;;  %v7585_v37 = vpop.permute.xlu1 %7584 }
 0x33a   : > { %7670 = vrot.lane.b32.xlu0 %v9020_v58, %s9912_s12  ;;  %8183 = vmatprep.mubr.bf16.mxu1 %v7734_v35  ;;  %v6746_v18 = vsel %vm10108_vm7, %v6744_v4, %v6745_v27  ;;  %v6743_v43 = vsel %vm10108_vm7, %v8935_v49, %v6742_v38  ;;  %v6826_v19 = vshll.u32 %v9786_v52, 16  ;;  %v8958_v0 = vcombine.low %v9787_v57, %v13406_v31  ;;  %v9698_v31 = vld [vmem:[%s13920_s3 + $0x118] sm:$0xff]   ;;  %v9790_v30 = vld [vmem:[#allocation3 + $0x7c] sm:$0xf]  ;;  %v6698_v52 = vld [vmem:[#allocation3 + $0x90] sm:$0xe]  ;;  %s13867_s12 = scalar_lea.hbm %s13922_s5, %s9128_s8 }
 0x33b   : > { %v7794_v22 = vsel %vm5721_vm6, %v9005_v55, %v7657_v62  ;;  %9370 = vmatpush3.bf16.msra.mxu0 %v9693_v42  ;;  %9500 = vmatpush3.bf16.msra.mxu1 %v9785_v8  ;;  %v6818_v60 = vrot.slane %v6816_v20, 5  ;;  %v6822_v63 = vrot.slane %v6820_v51, 4  ;;  %v8975_v54 = vcombine.low %v6743_v43, %v6746_v18  ;;  %v9794_v57 = vld [vmem:[#allocation3 + $0x98] sm:$0x1] }
 0x33c   : > { %8272 = vmatprep.mubr.bf16.mxu0 %v7794_v22  ;;  %9501 = vmatprep.subr.bf16.mxu1 %v9695_v48  ;;  %v6751_v3 = vrot.slane %v6749_v34, 4  ;;  %v6814_v46 = vrot.slane %v6813_v26, 4  ;;  %v7702_v61 = vsel %vm5721_vm6, %v8958_v0, %v13414_v44  ;;  %v6752_v9 = vrot.slane %v9788_v56, 5  ;;  %v9791_v26 = vld [vmem:[#allocation3 + $0x78] sm:$0xf] }
 0x33d   : > { %v6823_v16 = vor.u32 %v6822_v63, %v6818_v60  ;;  %v7738_v5 = vsel %vm5721_vm6, %v8975_v54, %v13381_v14  ;;  %v6828_v25 = vrot.slane %v6826_v19, 5  ;;  %v8936_v45 = vrot.slane %v6697_v2, 9  ;;  %v9793_v22 = vld [vmem:[#allocation3 + $0x84] sm:$0xf] }
 0x33e   : > { %v6753_v14 = vsel %vm10108_vm7, %v6751_v3, %v6752_v9  ;;  %v6819_v38 = vsel %vm10128_vm11, %v6814_v46, %v6818_v60  ;;  %v9167_v42 = vpop.f32.mrb[16].mxu0  ;;  %v8959_v27 = vcombine.low %v9789_v41, %v13436_v12  ;;  %v6840_v55 = vshll.u32 %v9790_v30, 16  ;;  %v9792_v12 = vld [vmem:[#allocation3 + $0x94] sm:$0xf]  ;;  %v9795_v3 = vld [vmem:[#allocation3 + $0x88] sm:$0xf] }
 0x33f   : > { %9502 = vmatpush3.bf16.msra.mxu1 %v9695_v48  ;;  %v6824_v33 = vrot.slane %v6823_v16, 4  ;;  %v6750_v7 = vsel %vm10108_vm7, %v8936_v45, %v6749_v34  ;;  %v9168_v4 = vpop.f32.mrb[17].mxu0  ;;  %v6844_v18 = vshrl.u32 %v9790_v30, 16  ;;  %v6831_v21 = vshrl.u32 %v9791_v26, 16  ;;  %v7457_v45 = vpop.permute.xlu1 %7456  ;;  %v9799_v41 = vld [vmem:[#allocation3 + $0x90] sm:$0xf] }
 0x340   : > { %9503 = vmatprep.subr.bf16.mxu1 %v9697_v28  ;;  %v8976_v10 = vcombine.low %v6750_v7, %v6753_v14  ;;  %v9170_v62 = vpop.f32.mrb[18].mxu0  ;;  %v13495_v35 = vadd.f32 %v9168_v4, %v9167_v42  ;;  %v7706_v34 = vsel %vm5721_vm6, %v8959_v27, %v13446_v17  ;;  %v6834_v20 = vshll.u32 %v9791_v26, 16 }
 0x341   : > { %8184 = vmatmul.mubr.bf16.gmra.mrb[52].mxu1 %v7702_v61  ;;  %v6829_v44 = vsel %vm10128_vm11, %v6824_v33, %v6828_v25  ;;  %v9171_v49 = vpop.f32.mrb[19].mxu0  ;;  %v6756_v51 = vrot.slane %v9792_v12, 5  ;;  %v6842_v8 = vrot.slane %v6840_v55, 5  ;;  %v6846_v43 = vrot.slane %v6844_v18, 4  ;;  %v9797_v61 = vld [vmem:[#allocation3 + $0x80] sm:$0x1] }
 0x342   : > { %8191 = vmatprep.mubr.bf16.mxu1 %v7738_v5  ;;  %v8989_v13 = vcombine.low %v6819_v38, %v6829_v44  ;;  %v7742_v48 = vsel %vm5721_vm6, %v8976_v10, %v13417_v47  ;;  %v8960_v47 = vcombine.low %v9793_v22, %v13454_v15  ;;  %v13500_v60 = vadd.f32 %v9171_v49, %v9170_v62  ;;  %v9796_v5 = vld [vmem:[#allocation3 + $0x84] sm:$0xf]  ;;  %v6699_v62 = vld [vmem:[#allocation3 + $0x9c] sm:$0xe] }
 0x343   : > { %9504 = vmatpush3.bf16.msra.mxu1 %v9697_v28  ;;  %v6833_v63 = vrot.slane %v6831_v21, 4  ;;  %v6836_v28 = vrot.slane %v6834_v20, 5  ;;  %v6758_v54 = vrot.slane %v6756_v51, 4  ;;  %v6847_v19 = vor.u32 %v6846_v43, %v6842_v8  ;;  %v9800_v55 = vld [vmem:[#allocation3 + $0xa4] sm:$0x1]  ;;  %v7587_v21 = vpop.permute.xlu1 %7586 }
 0x344   : > { %9505 = vmatprep.subr.bf16.mxu1 %v9698_v31  ;;  %v7762_v58 = vsel %vm5721_vm6, %v8989_v13, %v7585_v37  ;;  %v7710_v17 = vsel %vm5721_vm6, %v8960_v47, %v13470_v11  ;;  %v6759_v0 = vrot.slane %v9794_v57, 5  ;;  %v6864_v46 = vshll.u32 %v9795_v3, 16  ;;  %v9798_v11 = vld [vmem:[#allocation3 + $0xa0] sm:$0xf]  ;;  %v13512_v20 = vld [vmem:[#allocation3 + $0x88] sm:$0xf] }
 0x345   : > { %8273 = vmatmul.mubr.bf16.vlgmr.msra.gmra.mrb[64].mxu0 %v7762_v58  ;;  %v6868_v16 = vshrl.u32 %v9795_v3, 16  ;;  %v6855_v15 = vshrl.u32 %v9796_v5, 16  ;;  %v6837_v2 = vor.u32 %v6836_v28, %v6833_v63  ;;  %v6850_v56 = vshll.u32 %v9797_v61, 16 }
 0x346   : > { %v6858_v9 = vshll.u32 %v9796_v5, 16  ;;  %v8937_v33 = vrot.slane %v6698_v52, 9  ;;  %v6760_v25 = vsel %vm10108_vm7, %v6758_v54, %v6759_v0  ;;  %v6848_v14 = vrot.slane %v6847_v19, 4  ;;  %v9803_v54 = vld [vmem:[#allocation3 + $0x8c] sm:$0x1] }
 0x347   : > { %9506 = vmatpush3.bf16.msra.mxu1 %v9698_v31  ;;  %v6763_v31 = vrot.slane %v9798_v11, 5  ;;  %v6866_v44 = vrot.slane %v6864_v46, 5  ;;  %v6870_v37 = vrot.slane %v6868_v16, 4  ;;  %v6838_v7 = vrot.slane %v6837_v2, 4  ;;  %v9804_v2 = vld [vmem:[#allocation3 + $0x9c] sm:$0xf] }
 0x348   : > { %v6757_v38 = vsel %vm10108_vm7, %v8937_v33, %v6756_v51  ;;  %v6852_v42 = vrot.slane %v6850_v56, 5  ;;  %v6857_v10 = vrot.slane %v6855_v15, 4  ;;  %v6860_v58 = vrot.slane %v6858_v9, 5  ;;  %v9802_v51 = vld [vmem:[#allocation3 + $0x84] sm:$0xf] }
 0x349   : > { %8192 = vmatmul.mubr.bf16.gmra.mrb[56].mxu1 %v7706_v34  ;;  %v8977_v13 = vcombine.low %v6757_v38, %v6760_v25  ;;  %v8961_v27 = vcombine.low %v9799_v41, %v9792_v12  ;;  %v6766_v18 = vrot.slane %v9800_v55, 5  ;;  %v6871_v26 = vor.u32 %v6870_v37, %v6866_v44  ;;  %v9805_v25 = vld [vmem:[#allocation3 + $0x90] sm:$0xf] }
 0x34a   : > { %8199 = vmatprep.mubr.bf16.mxu1 %v7742_v48  ;;  %v6765_v48 = vrot.slane %v6763_v31, 4  ;;  %v6853_v34 = vsel %vm10128_vm11, %v6848_v14, %v6852_v42  ;;  %v9006_v12 = vcombine.low %v9802_v51, %v13512_v20  ;;  %v6843_v22 = vsel %vm10128_vm11, %v6838_v7, %v6842_v8  ;;  %v13537_v42 = vld [vmem:[%s13921_s4] ss:$0 sm:$0xff]  ;;  %v9807_v51 = vld [vmem:[#allocation3 + $0x90] sm:$0xf] }
 0x34b   : > { %v7714_v30 = vsel %vm5721_vm6, %v8961_v27, %v7457_v45  ;;  %v8938_v47 = vrot.slane %v6699_v62, 9  ;;  %v8990_v63 = vcombine.low %v6843_v22, %v6853_v34  ;;  %v6874_v52 = vshll.u32 %v9803_v54, 16  ;;  %v13527_v45 = vld [vmem:[#allocation3 + $0x94] sm:$0xf] }
 0x34c   : > { %v6767_v28 = vsel %vm10108_vm7, %v6765_v48, %v6766_v18  ;;  %v6872_v3 = vrot.slane %v6871_v26, 4  ;;  %v8962_v61 = vcombine.low %v9804_v2, %v9798_v11  ;;  %v6207_v48 = vadd.f32 %v13500_v60, %v13537_v42  ;;  %v9808_v22 = vld [vmem:[#allocation3 + $0x94] sm:$0xf] }
 0x34d   : > { %v7766_v57 = vsel %vm5721_vm6, %v8990_v63, %v7587_v21  ;;  %v6764_v0 = vsel %vm10108_vm7, %v8938_v47, %v6763_v31  ;;  %v6876_v5 = vrot.slane %v6874_v52, 5  ;;  %v9007_v31 = vcombine.low %v9805_v25, %v13527_v45  ;;  %v6700_v25 = vld [vmem:[#allocation3 + $0xa8] sm:$0xe] }
 0x34e   : > { %v8978_v8 = vcombine.low %v6764_v0, %v6767_v28  ;;  %v6888_v47 = vshll.u32 %v9808_v22, 16 }
 0x34f   : > { %v6877_v9 = vsel %vm10128_vm11, %v6872_v3, %v6876_v5  ;;  %v9811_v3 = vld [vmem:[#allocation3 + $0x9c] sm:$0xf]  ;;  %v7345_v5 = vrot.slane %v13512_v20, 5 }
 0x350   : > { %v13554_v52 = vrot.slane %v6888_v47, 5  ;;  %v9816_v47 = vld [vmem:[#allocation3 + $0xa8] sm:$0xf] }
 0x351   : > { %8200 = vmatmul.mubr.bf16.gmra.mrb[60].mxu1 %v7710_v17  ;;  %v6861_v17 = vor.u32 %v6860_v58, %v6857_v10 }
 0x353   : > { %v6862_v16 = vrot.slane %v6861_v17, 4  ;;  %v13551_v17 = vld [vmem:[#allocation3 + $0xac] sm:$0xf] }
 0x354   : > { %v6770_v54 = vrot.slane %v13551_v17, 5 }
 0x355   : > { %v6867_v38 = vsel %vm10128_vm11, %v6862_v16, %v6866_v44 }
 0x356   : > { %v7529_v4 = vpop.permute.xlu0 %7528  ;;  %v8991_v11 = vcombine.low %v6867_v38, %v6877_v9  ;;  %v6772_v2 = vrot.slane %v6770_v54, 4 }
 0x357   : > { %v7746_v49 = vsel %vm5721_vm6, %v8977_v13, %v7529_v4  ;;  %v6204_v4 = vadd.f32 %v13495_v35, %v13537_v42  ;;  %v6882_v35 = vshll.u32 %v9807_v51, 16 }
 0x358   : > { %8207 = vmatprep.mubr.bf16.mxu1 %v7746_v49 }
 0x359   : > { %8208 = vmatmul.mubr.bf16.gmra.mrb[64].mxu1 %v7714_v30  ;;  %v6884_v60 = vrot.slane %v6882_v35, 5 }
 0x35a   : > { %v7659_v43 = vpop.permute.xlu0 %7658 }
 0x35b   : > { %v7798_v19 = vsel %vm5721_vm6, %v9006_v12, %v7659_v43  ;;  %v6879_v12 = vshrl.u32 %v9807_v51, 16  ;;  %v6892_v43 = vshrl.u32 %v9808_v22, 16 }
 0x35c   : > { %8280 = vmatprep.mubr.bf16.mxu0 %v7798_v19 }
 0x35d   : > { %8281 = vmatmul.mubr.bf16.gmra.mrb[68].mxu0 %v7766_v57  ;;  %v6881_v28 = vrot.slane %v6879_v12, 4  ;;  %v6894_v19 = vrot.slane %v6892_v43, 4  ;;  %v9810_v57 = vld [vmem:[#allocation3 + $0xa8] sm:$0xf]  ;;  %v7338_v12 = vrot.slane %v13457_v32, 5  ;;  %v8963_v43 = vcombine.low %v9816_v47, %v13551_v17 }
 0x35e   : > { %v7531_v46 = vpop.permute.xlu0 %7530  ;;  %v6927_v0 = vshrl.u32 %v9810_v57, 16  ;;  %v6930_v16 = vshll.u32 %v9810_v57, 16  ;;  %v6780_v32 = vrot.slane %v13228_v53, 5  ;;  %v8964_v17 = vcombine.low %v13175_v40, %v13210_v39 }
 0x35f   : > { %v7750_v15 = vsel %vm5721_vm6, %v8978_v8, %v7531_v46  ;;  %v6903_v8 = vshrl.u32 %v9811_v3, 16  ;;  %v6906_v46 = vshll.u32 %v9811_v3, 16  ;;  %v13580_v3 = vld [vmem:[#allocation3 + $0xa0] sm:$0xf] }
 0x360   : > { %v7459_v56 = vpop.permute.xlu1 %7458  ;;  %8215 = vmatprep.mubr.bf16.mxu1 %v7750_v15  ;;  %v6951_v15 = vshrl.u32 %v13206_v29, 16  ;;  %v13564_v38 = vrot.slane %v6927_v0, 4  ;;  %v9817_v0 = vld [vmem:[#allocation3 + $0x9c] sm:$0xf] }
 0x361   : > { %v7718_v33 = vsel %vm5721_vm6, %v8962_v61, %v7459_v56  ;;  %v6885_v61 = vor.u32 %v6884_v60, %v6881_v28  ;;  %v13558_v56 = vld [vmem:[#allocation3 + $0x8c] sm:$0x1]  ;;  %v7304_v28 = vld [vmem:[#allocation3 + $0x78] sm:$0xe] }
 0x362   : > { %8216 = vmatmul.mubr.bf16.gmra.mrb[68].mxu1 %v7718_v33  ;;  %v7661_v14 = vpop.permute.xlu0 %7660  ;;  %v7348_v9 = vrot.slane %v13558_v56, 5  ;;  %v6954_v33 = vshll.u32 %v13206_v29, 16  ;;  %v8939_v29 = vrot.slane %v6700_v25, 9  ;;  %v8949_v25 = vrot.slane %v7304_v28, 9 }
 0x363   : > { %v7802_v37 = vsel %vm5721_vm6, %v9007_v31, %v7661_v14  ;;  %v6895_v31 = vor.u32 %v6894_v19, %v13554_v52  ;;  %v6777_v14 = vrot.slane %v13210_v39, 5 }
 0x364   : > { %v7589_v13 = vpop.permute.xlu1 %7588  ;;  %8288 = vmatprep.mubr.bf16.mxu0 %v7802_v37  ;;  %v9813_v37 = vld [vmem:[#allocation3 + $0xb0] sm:$0x1]  ;;  %v6771_v22 = vsel %vm10108_vm7, %v8939_v29, %v6770_v54 }
 0x365   : > { %v7770_v7 = vsel %vm5721_vm6, %v8991_v11, %v7589_v13  ;;  %v6773_v11 = vrot.slane %v9813_v37, 5  ;;  %v9814_v13 = vld [vmem:[#allocation3 + $0xa0] sm:$0xf]  ;;  %v6779_v51 = vrot.slane %v6777_v14, 4 }
 0x366   : > { %8289 = vmatmul.mubr.bf16.gmra.mrb[72].mxu0 %v7770_v7  ;;  %v6912_v7 = vshll.u32 %v9814_v13, 16 }
 0x368   : > { %v7461_v35 = vpop.permute.xlu1 %7460  ;;  %v13578_v60 = vrot.slane %v6912_v7, 5 }
 0x369   : > { %v9231_v10 = vpop.f32.mrb[16].mxu1  ;;  %v9173_v58 = vpop.f32.mrb[20].mxu0  ;;  %v7722_v7 = vsel %vm5721_vm6, %v8963_v43, %v7461_v35 }
 0x36a   : > { %v9232_v41 = vpop.f32.mrb[17].mxu1  ;;  %v9174_v62 = vpop.f32.mrb[21].mxu0 }
 0x36b   : > { %v9233_v44 = vadd.f32 %v9232_v41, %v9231_v10  ;;  %v9234_v27 = vpop.f32.mrb[18].mxu1  ;;  %v13543_v34 = vadd.f32 %v9174_v62, %v9173_v58  ;;  %v9176_v30 = vpop.f32.mrb[22].mxu0  ;;  %v6916_v10 = vshrl.u32 %v9814_v13, 16  ;;  %v6905_v58 = vrot.slane %v6903_v8, 4 }
 0x36c   : > { %v9235_v49 = vpop.f32.mrb[19].mxu1  ;;  %v9177_v18 = vpop.f32.mrb[23].mxu0  ;;  %v13566_v41 = vrot.slane %v6930_v16, 5  ;;  %v13568_v62 = vrot.slane %v6951_v15, 4  ;;  %v9008_v8 = vcombine.low %v9817_v0, %v13580_v3 }
 0x36d   : > { %v9236_v55 = vadd.f32 %v9235_v49, %v9234_v27  ;;  %v13545_v26 = vadd.f32 %v9177_v18, %v9176_v30  ;;  %v13547_v21 = vadd.f32 %v9233_v44, %v6204_v4  ;;  %v6908_v4 = vrot.slane %v6906_v46, 5  ;;  %v9815_v44 = vld [vmem:[#allocation3 + $0x98] sm:$0x1]  ;;  %v6701_v18 = vld [vmem:[#allocation3 + $0xb4] sm:$0xe] }
 0x36e   : > { %v6898_v27 = vshll.u32 %v9815_v44, 16  ;;  %v6886_v49 = vrot.slane %v6885_v61, 4  ;;  %v13572_v30 = vrot.slane %v6954_v33, 5  ;;  %v6918_v19 = vrot.slane %v6916_v10, 4  ;;  %v13598_v44 = vld [vmem:[#allocation3 + $0xa8] sm:$0xf] }
 0x36f   : > { %v13549_v63 = vadd.f32 %v9236_v55, %v6207_v48  ;;  %v6774_v48 = vsel %vm10108_vm7, %v6772_v2, %v6773_v11  ;;  %v6896_v55 = vrot.slane %v6895_v31, 4  ;;  %v8940_v16 = vrot.slane %v6701_v18, 9  ;;  %v9819_v11 = vld [vmem:[#allocation3 + $0xac] sm:$0xf] }
 0x370   : > { %v8979_v57 = vcombine.low %v6771_v22, %v6774_v48  ;;  %v6900_v46 = vrot.slane %v6898_v27, 5  ;;  %v6891_v54 = vsel %vm10128_vm11, %v6886_v49, %v13554_v52  ;;  %v6909_v15 = vor.u32 %v6908_v4, %v6905_v58  ;;  %v9820_v58 = vld [vmem:[#allocation3 + $0x80] sm:$0x1]  ;;  %v13600_v27 = vld [vmem:[#allocation3 + $0xac] sm:$0xf]  ;;  %v7591_v49 = vpop.permute.xlu1 %7590 }
 0x371   : > { %v6781_v33 = vsel %vm10108_vm7, %v6779_v51, %v6780_v32  ;;  %v7340_v31 = vrot.slane %v7338_v12, 4  ;;  %v6919_v37 = vor.u32 %v6918_v19, %v13578_v60  ;;  %v6936_v52 = vshll.u32 %v9819_v11, 16 }
 0x372   : > { %v6901_v61 = vsel %vm10128_vm11, %v6896_v55, %v6900_v46  ;;  %v6940_v13 = vshrl.u32 %v9819_v11, 16  ;;  %v6778_v10 = vsel %vm10108_vm7, %v8940_v16, %v6777_v14  ;;  %v7341_v4 = vrot.slane %v9820_v58, 5  ;;  %v9823_v14 = vld [vmem:[#allocation3 + $0xa4] sm:$0x1]  ;;  %v13627_v11 = vld [vmem:[#allocation3 + $0x90] sm:$0xe] }
 0x373   : > { %v9009_v29 = vcombine.low %v13598_v44, %v13600_v27  ;;  %v8980_v55 = vcombine.low %v6778_v10, %v6781_v33  ;;  %v13606_v18 = vsel %vm10108_vm7, %v8949_v25, %v7338_v12  ;;  %v13608_v51 = vrot.slane %v6909_v15, 4 }
 0x374   : > { %v6922_v35 = vshll.u32 %v9823_v14, 16  ;;  %v8992_v43 = vcombine.low %v6891_v54, %v6901_v61  ;;  %v6212_v28 = vadd.f32 %v13543_v34, %v13537_v42  ;;  %v7342_v19 = vsel %vm10108_vm7, %v7340_v31, %v7341_v4  ;;  %v13620_v34 = vld [vmem:[#allocation3 + $0x84] sm:$0xe]  ;;  %v9824_v14 = vld [vmem:[#allocation3 + $0xb8] sm:$0xf] }
 0x375   : > { %v6920_v32 = vrot.slane %v6919_v37, 4  ;;  %v13615_v12 = vrot.slane %v6936_v52, 5  ;;  %v6942_v16 = vrot.slane %v6940_v13, 4  ;;  %v6215_v54 = vadd.f32 %v13545_v26, %v13537_v42 }
 0x376   : > { %v7774_v33 = vsel %vm5721_vm6, %v8992_v43, %v7591_v49  ;;  %v7347_v37 = vrot.slane %v7345_v5, 4  ;;  %v6915_v26 = vsel %vm10128_vm11, %v13608_v51, %v13578_v60  ;;  %v9010_v10 = vcombine.low %v13237_v59, %v13242_v6 }
 0x377   : > { %v7352_v58 = vrot.slane %v13527_v45, 5  ;;  %v8950_v51 = vrot.slane %v13620_v34, 9  ;;  %v8951_v59 = vrot.slane %v13627_v11, 9  ;;  %v6964_v6 = vshrl.u32 %v9824_v14, 16 }
 0x378   : > { %v7359_v44 = vrot.slane %v13580_v3, 5 }
 0x382   : > { %v7533_v2 = vpop.permute.xlu0 %7532 }
 0x383   : > { %v7754_v53 = vsel %vm5721_vm6, %v8979_v57, %v7533_v2 }
 0x384   : > { %8223 = vmatprep.mubr.bf16.mxu1 %v7754_v53  ;;  %v9237_v48 = vpop.f32.mrb[20].mxu1  ;;  %v6924_v53 = vrot.slane %v6922_v35, 5  ;;  %v6960_v35 = vshll.u32 %v9824_v14, 16 }
 0x385   : > { %8224 = vmatmul.mubr.bf16.gmra.mrb[72].mxu1 %v7722_v7  ;;  %v9238_v22 = vpop.f32.mrb[21].mxu1 }
 0x386   : > { %v7663_v47 = vpop.permute.xlu0 %7662  ;;  %v9239_v57 = vadd.f32 %v9238_v22, %v9237_v48  ;;  %v9240_v0 = vpop.f32.mrb[22].mxu1  ;;  %v6925_v60 = vsel %vm10128_vm11, %v6920_v32, %v6924_v53 }
 0x387   : > { %v7806_v46 = vsel %vm5721_vm6, %v9008_v8, %v7663_v47  ;;  %v9241_v15 = vpop.f32.mrb[23].mxu1  ;;  %v9179_v2 = vpop.f32.mrb[24].mxu0  ;;  %v9021_v8 = vcombine.low %v13606_v18, %v7342_v19  ;;  %v6943_v18 = vor.u32 %v6942_v16, %v13615_v12  ;;  %v9825_v19 = vld [vmem:[#allocation3 + $0x98] sm:$0x1]  ;;  %v7354_v16 = vrot.slane %v7352_v58, 4 }
 0x388   : > { %8296 = vmatprep.mubr.bf16.mxu0 %v7806_v46  ;;  %v9242_v61 = vadd.f32 %v9241_v15, %v9240_v0  ;;  %v9180_v25 = vpop.f32.mrb[25].mxu0  ;;  %v13622_v31 = vadd.f32 %v9239_v57, %v6212_v28  ;;  %v7349_v28 = vsel %vm10108_vm7, %v7347_v37, %v7348_v9  ;;  %v7355_v57 = vrot.slane %v9825_v19, 5  ;;  %v9826_v15 = vld [vmem:[#allocation3 + $0xb0] sm:$0x1] }
 0x389   : > { %8297 = vmatmul.mubr.bf16.gmra.mrb[76].mxu0 %v7774_v33  ;;  %v9181_v52 = vadd.f32 %v9180_v25, %v9179_v2  ;;  %v9182_v13 = vpop.f32.mrb[26].mxu0  ;;  %v6933_v0 = vor.u32 %v13566_v41, %v13564_v38  ;;  %v6946_v40 = vshll.u32 %v9826_v15, 16  ;;  %v8993_v38 = vcombine.low %v6915_v26, %v6925_v60  ;;  %v9830_v15 = vld [vmem:[#allocation3 + $0xbc] sm:$0x1] }
 0x38a   : > { %v7535_v7 = vpop.permute.xlu0 %7534  ;;  %v9183_v4 = vpop.f32.mrb[27].mxu0  ;;  %v13636_v48 = vadd.f32 %v9242_v61, %v6215_v54  ;;  %v6944_v41 = vrot.slane %v6943_v18, 4  ;;  %v13662_v2 = vrot.slane %v6960_v35, 5  ;;  %v6966_v61 = vrot.slane %v6964_v6, 4  ;;  %v9827_v35 = vld [vmem:[#allocation3 + $0xc0] sm:$0xf] }
 0x38b   : > { %v7758_v49 = vsel %vm5721_vm6, %v8980_v55, %v7535_v7  ;;  %v9184_v22 = vadd.f32 %v9183_v4, %v9182_v13  ;;  %v6220_v39 = vadd.f32 %v9181_v52, %v13537_v42  ;;  %v7356_v26 = vsel %vm10108_vm7, %v7354_v16, %v7355_v57  ;;  %v7307_v57 = vld [vmem:[#allocation3 + $0x9c] sm:$0xe] }
 0x38c   : > { %8231 = vmatprep.mubr.bf16.mxu1 %v7758_v49  ;;  %v9243_v43 = vpop.f32.mrb[24].mxu1  ;;  %v6934_v4 = vrot.slane %v6933_v0, 4  ;;  %v6948_v49 = vrot.slane %v6946_v40, 5  ;;  %v7346_v60 = vsel %vm10108_vm7, %v8950_v51, %v7345_v5  ;;  %v6978_v0 = vshll.u32 %v9827_v35, 16  ;;  %v7308_v51 = vld [vmem:[#allocation3 + $0xa8] sm:$0xe] }
 0x38d   : > { %v7463_v47 = vpop.permute.xlu1 %7462  ;;  %v9244_v46 = vpop.f32.mrb[25].mxu1  ;;  %v6223_v25 = vadd.f32 %v9184_v22, %v13537_v42  ;;  %v6975_v22 = vshrl.u32 %v9827_v35, 16  ;;  %v7361_v5 = vrot.slane %v7359_v44, 4  ;;  %v6957_v16 = vor.u32 %v13572_v30, %v13568_v62 }
 0x38e   : > { %v7726_v55 = vsel %vm5721_vm6, %v8964_v17, %v7463_v47  ;;  %v9245_v17 = vadd.f32 %v9244_v46, %v9243_v43  ;;  %v9246_v56 = vpop.f32.mrb[26].mxu1  ;;  %v9022_v43 = vcombine.low %v7346_v60, %v7349_v28  ;;  %v6949_v19 = vsel %vm10128_vm11, %v6944_v41, %v6948_v49  ;;  %v9832_v41 = vld [vmem:[#allocation3 + $0xb0] sm:$0x1] }
 0x38f   : > { %8232 = vmatmul.mubr.bf16.gmra.mrb[76].mxu1 %v7726_v55  ;;  %v7665_v32 = vpop.permute.xlu0 %7664  ;;  %v9247_v33 = vpop.f32.mrb[27].mxu1  ;;  %v7353_v55 = vsel %vm10108_vm7, %v8951_v59, %v7352_v58  ;;  %v6939_v45 = vsel %vm10128_vm11, %v6934_v4, %v13615_v12  ;;  %v9828_v58 = vld [vmem:[#allocation3 + $0xc0] sm:$0xf]  ;;  %v13698_v59 = vld [vmem:[#allocation3 + $0xc4] sm:$0xf]  ;;  %v6970_v40 = vshll.u32 %v9830_v15, 16 }
 0x390   : > { %9507 = vmatprep.mubr.msk.bf16.mxu1 %vm5721_vm6, %v9021_v8  ;;  %v7810_v9 = vsel %vm5721_vm6, %v9009_v29, %v7665_v32  ;;  %v9185_v54 = vpop.f32.mrb[28].mxu0  ;;  %v9248_v53 = vadd.f32 %v9247_v33, %v9246_v56  ;;  %v13665_v11 = vadd.f32 %v9245_v17, %v6220_v39  ;;  %v7366_v29 = vrot.slane %v13600_v27, 5  ;;  %v7309_v4 = vld [vmem:[#allocation3 + $0xb4] sm:$0xe] }
 0x391   : > { %v7593_v34 = vpop.permute.xlu1 %7592  ;;  %8304 = vmatprep.mubr.bf16.mxu0 %v7810_v9  ;;  %v9186_v37 = vpop.f32.mrb[29].mxu0  ;;  %v9023_v20 = vcombine.low %v7353_v55, %v7356_v26  ;;  %v9011_v32 = vcombine.low %v9828_v58, %v13698_v59  ;;  %v8994_v17 = vcombine.low %v6939_v45, %v6949_v19  ;;  %v8952_v56 = vrot.slane %v7307_v57, 9  ;;  %v9831_v9 = vld [vmem:[#allocation3 + $0xa4] sm:$0x1]  ;;  %v9835_v58 = vld [vmem:[#allocation3 + $0xbc] sm:$0x1] }
 0x392   : > { %v7778_v8 = vsel %vm5721_vm6, %v8993_v38, %v7593_v34  ;;  %v13670_v52 = vadd.f32 %v9186_v37, %v9185_v54  ;;  %v9188_v13 = vpop.f32.mrb[30].mxu0  ;;  %v13674_v14 = vadd.f32 %v9248_v53, %v6223_v25  ;;  %v7368_v28 = vrot.slane %v7366_v29, 4  ;;  %v9833_v34 = vld [vmem:[#allocation3 + $0xc4] sm:$0xf]  ;;  %v9834_v37 = vld [vmem:[#allocation3 + $0xb8] sm:$0xf] }
 0x393   : > { %8305 = vmatmul.mubr.bf16.gmra.mrb[80].mxu0 %v7778_v8  ;;  %v7667_v7 = vpop.permute.xlu0 %7666  ;;  %v9189_v18 = vpop.f32.mrb[31].mxu0  ;;  %v7362_v38 = vrot.slane %v9831_v9, 5  ;;  %v7369_v33 = vrot.slane %v9832_v41, 5  ;;  %v8953_v12 = vrot.slane %v7308_v51, 9  ;;  %v6988_v25 = vshrl.u32 %v9833_v34, 16 }
 0x394   : > { %v7814_v47 = vsel %vm5721_vm6, %v9010_v10, %v7667_v7  ;;  %v13681_v6 = vadd.f32 %v9189_v18, %v9188_v13  ;;  %v6967_v10 = vor.u32 %v6966_v61, %v13662_v2  ;;  %v6984_v61 = vshll.u32 %v9833_v34, 16 }
 0x395   : > { %8312 = vmatprep.mubr.bf16.mxu0 %v7814_v47  ;;  %v7595_v46 = vpop.permute.xlu1 %7594  ;;  %v7363_v62 = vsel %vm10108_vm7, %v7361_v5, %v7362_v38  ;;  %v7370_v30 = vsel %vm10108_vm7, %v7368_v28, %v7369_v33  ;;  %v7373_v8 = vrot.slane %v9834_v37, 5  ;;  %v6958_v7 = vrot.slane %v6957_v16, 4 }
 0x396   : > { %v6968_v54 = vrot.slane %v6967_v10, 4  ;;  %v7782_v53 = vsel %vm5721_vm6, %v8994_v17, %v7595_v46  ;;  %v6972_v26 = vrot.slane %v6970_v40, 5  ;;  %v7380_v49 = vrot.slane %v13698_v59, 5 }
 0x397   : > { %9508 = vmatmul.mubr.msk.bf16.vlgmr.msra.gmra.mrb[80].mxu1 %vm5721_vm6, %v9022_v43  ;;  %v7669_v39 = vpop.permute.xlu0 %7668  ;;  %v6977_v18 = vrot.slane %v6975_v22, 4  ;;  %v7360_v35 = vsel %vm10108_vm7, %v8952_v56, %v7359_v44  ;;  %v7367_v47 = vsel %vm10108_vm7, %v8953_v12, %v7366_v29  ;;  %v13721_v55 = vrot.slane %v6984_v61, 5  ;;  %v7310_v44 = vld [vmem:[#allocation3 + $0xc0] sm:$0xe]  ;;  %v9837_v61 = vld [vmem:[#allocation3 + $0xc8] sm:$0x1] }
 0x398   : > { %9511 = vmatprep.mubr.msk.bf16.mxu1 %vm5721_vm6, %v9023_v20  ;;  %v7818_v13 = vsel %vm5721_vm6, %v9011_v32, %v7669_v39  ;;  %v9024_v60 = vcombine.low %v7360_v35, %v7363_v62  ;;  %v6973_v43 = vsel %vm10128_vm11, %v6968_v54, %v6972_v26  ;;  %v6990_v19 = vrot.slane %v6988_v25, 4  ;;  %v9836_v32 = vld [vmem:[#allocation3 + $0xc8] sm:$0x1] }
 0x399   : > { %v6980_v22 = vrot.slane %v6978_v0, 5  ;;  %v9025_v10 = vcombine.low %v7367_v47, %v7370_v30  ;;  %v8954_v20 = vrot.slane %v7309_v4, 9  ;;  %v7375_v3 = vrot.slane %v7373_v8, 4  ;;  %v7597_v51 = vpop.permute.xlu1 %7596 }
 0x39a   : > { %v6963_v27 = vsel %vm10128_vm11, %v6958_v7, %v13662_v2  ;;  %v7382_v29 = vrot.slane %v7380_v49, 4  ;;  %v6228_v28 = vadd.f32 %v13670_v52, %v13537_v42  ;;  %v7376_v59 = vrot.slane %v9835_v58, 5  ;;  %v7311_v2 = vld [vmem:[#allocation3 + $0xcc] sm:$0xe] }
 0x39b   : > { %8313 = vmatmul.mubr.bf16.gmra.mrb[84].mxu0 %v7782_v53  ;;  %v8995_v0 = vcombine.low %v6963_v27, %v6973_v43  ;;  %v7383_v16 = vrot.slane %v9836_v32, 5  ;;  %v7387_v15 = vrot.slane %v13372_v50, 5  ;;  %v6991_v39 = vor.u32 %v6990_v19, %v13721_v55 }
 0x39c   : > { %8320 = vmatprep.mubr.bf16.mxu0 %v7818_v13  ;;  %v6231_v17 = vadd.f32 %v13681_v6, %v13537_v42  ;;  %v7377_v41 = vsel %vm10108_vm7, %v7375_v3, %v7376_v59  ;;  %v8955_v33 = vrot.slane %v7310_v44, 9  ;;  %v6981_v12 = vor.u32 %v6980_v22, %v6977_v18 }
 0x39d   : > { %v9249_v57 = vpop.f32.mrb[28].mxu1  ;;  %v7786_v38 = vsel %vm5721_vm6, %v8995_v0, %v7597_v51  ;;  %v7384_v34 = vsel %vm10108_vm7, %v7382_v29, %v7383_v16  ;;  %v6994_v25 = vshll.u32 %v9837_v61, 16  ;;  %v7374_v30 = vsel %vm10108_vm7, %v8954_v20, %v7373_v8  ;;  %v7599_v22 = vpop.permute.xlu1 %7598 }
 0x39e   : > { %v9250_v5 = vpop.f32.mrb[29].mxu1  ;;  %v8956_v37 = vrot.slane %v7311_v2, 9  ;;  %v7389_v13 = vrot.slane %v7387_v15, 4  ;;  %v7390_v7 = vrot.slane %v13389_v23, 5  ;;  %v9026_v4 = vcombine.low %v7374_v30, %v7377_v41 }
 0x39f   : > { %9512 = vmatmul.mubr.msk.bf16.gmra.mrb[84].mxu1 %vm5721_vm6, %v9024_v60  ;;  %v9251_v46 = vadd.f32 %v9250_v5, %v9249_v57  ;;  %v9252_v45 = vpop.f32.mrb[30].mxu1  ;;  %v9191_v52 = vpop.f32.mrb[32].mxu0  ;;  %v7381_v18 = vsel %vm10108_vm7, %v8955_v33, %v7380_v49  ;;  %v6992_v35 = vrot.slane %v6991_v39, 4  ;;  %v6982_v43 = vrot.slane %v6981_v12, 4 }
 0x3a0   : > { %9515 = vmatprep.mubr.msk.bf16.mxu1 %vm5721_vm6, %v9025_v10  ;;  %v9253_v40 = vpop.f32.mrb[31].mxu1  ;;  %v9192_v54 = vpop.f32.mrb[33].mxu0  ;;  %v9027_v60 = vcombine.low %v7381_v18, %v7384_v34  ;;  %v6996_v19 = vrot.slane %v6994_v25, 5  ;;  %v7388_v8 = vsel %vm10108_vm7, %v8956_v37, %v7387_v15  ;;  %v7391_v23 = vsel %vm10108_vm7, %v7389_v13, %v7390_v7 }
 0x3a1   : > { %v9254_v56 = vadd.f32 %v9253_v40, %v9252_v45  ;;  %v13734_v9 = vadd.f32 %v9251_v46, %v6228_v28  ;;  %v9193_v53 = vadd.f32 %v9192_v54, %v9191_v52  ;;  %v9194_v6 = vpop.f32.mrb[34].mxu0  ;;  %v9012_v57 = vcombine.low %v13364_v24, %v13372_v50 }
 0x3a2   : > { %v9195_v26 = vpop.f32.mrb[35].mxu0  ;;  %v6997_v49 = vsel %vm10128_vm11, %v6992_v35, %v6996_v19  ;;  %v6987_v10 = vsel %vm10128_vm11, %v6982_v43, %v13721_v55  ;;  %v9028_v20 = vcombine.low %v7388_v8, %v7391_v23 }
 0x3a3   : > { %8321 = vmatmul.mubr.bf16.gmra.mrb[88].mxu0 %v7786_v38  ;;  %v13741_v62 = vadd.f32 %v9254_v56, %v6231_v17  ;;  %v9196_v47 = vadd.f32 %v9195_v26, %v9194_v6  ;;  %v8996_v5 = vcombine.low %v6987_v10, %v6997_v49  ;;  %v6236_v24 = vadd.f32 %v9193_v53, %v13537_v42 }
 0x3a5   : > { %v7790_v1 = vsel %vm5721_vm6, %v8996_v5, %v7599_v22  ;;  %v6239_v36 = vadd.f32 %v9196_v47, %v13537_v42 }
 0x3a7   : > { %9516 = vmatmul.mubr.msk.bf16.gmra.mrb[88].mxu1 %vm5721_vm6, %v9026_v4 }
 0x3a8   : > { %9519 = vmatprep.mubr.msk.bf16.mxu1 %vm5721_vm6, %v9027_v60 }
 0x3ab   : > { %v9255_v51 = vpop.f32.mrb[32].mxu1 }
 0x3ac   : > { %v7671_v3 = vpop.permute.xlu0 %7670  ;;  %v9256_v44 = vpop.f32.mrb[33].mxu1 }
 0x3ad   : > { %v7822_v27 = vsel %vm5721_vm6, %v9012_v57, %v7671_v3  ;;  %v9257_v50 = vadd.f32 %v9256_v44, %v9255_v51  ;;  %v9258_v29 = vpop.f32.mrb[34].mxu1 }
 0x3ae   : > { %8328 = vmatprep.mubr.bf16.mxu0 %v7822_v27  ;;  %v9259_v28 = vpop.f32.mrb[35].mxu1 }
 0x3af   : > { %8329 = vmatmul.mubr.bf16.gmra.mrb[92].mxu0 %v7790_v1  ;;  %9520 = vmatmul.mubr.msk.bf16.gmra.mrb[92].mxu1 %vm5721_vm6, %v9028_v20  ;;  %v9260_v55 = vadd.f32 %v9259_v28, %v9258_v29  ;;  %v13766_v45 = vadd.f32 %v9257_v50, %v6236_v24 }
 0x3b1   : > { %v13768_v32 = vadd.f32 %v9260_v55, %v6239_v36 }
 0x3b2   : > { %v9197_v46 = vpop.f32.mrb[36].mxu0 }
 0x3b3   : > { %v9198_v0 = vpop.f32.mrb[37].mxu0 }
 0x3b4   : > { %v9199_v58 = vadd.f32 %v9198_v0, %v9197_v46  ;;  %v9200_v59 = vpop.f32.mrb[38].mxu0 }
 0x3b5   : > { %v9201_v16 = vpop.f32.mrb[39].mxu0 }
 0x3b6   : > { %v9202_v15 = vadd.f32 %v9201_v16, %v9200_v59  ;;  %v6244_v2 = vadd.f32 %v9199_v58, %v13537_v42 }
 0x3b8   : > { %v6247_v38 = vadd.f32 %v9202_v15, %v13537_v42 }
 0x3cc   : > { %v9261_v40 = vpop.f32.mrb[36].mxu1 }
 0x3cd   : > { %v9262_v39 = vpop.f32.mrb[37].mxu1 }
 0x3ce   : > { %v9263_v17 = vadd.f32 %v9262_v39, %v9261_v40  ;;  %v9264_v56 = vpop.f32.mrb[38].mxu1 }
 0x3cf   : > { %v9265_v52 = vpop.f32.mrb[39].mxu1 }
 0x3d0   : > { %v9266_v41 = vadd.f32 %v9265_v52, %v9264_v56  ;;  %v6341_v12 = vadd.f32 %v9263_v17, %v6244_v2 }
 0x3d1   : > { %v9203_v33 = vpop.f32.mrb[40].mxu0 }
 0x3d2   : > { %v9204_v54 = vpop.f32.mrb[41].mxu0  ;;  %v6344_v25 = vadd.f32 %v9266_v41, %v6247_v38 }
 0x3d3   : > { %v9205_v34 = vadd.f32 %v9204_v54, %v9203_v33  ;;  %v9206_v61 = vpop.f32.mrb[42].mxu0 }
 0x3d4   : > { %v9207_v53 = vpop.f32.mrb[43].mxu0 }
 0x3d5   : > { %v9208_v6 = vadd.f32 %v9207_v53, %v9206_v61  ;;  %v6252_v13 = vadd.f32 %v9205_v34, %v13537_v42 }
 0x3d7   : > { %v6255_v18 = vadd.f32 %v9208_v6, %v13537_v42 }
 0x3e3   : > { %v9267_v30 = vpop.f32.mrb[40].mxu1 }
 0x3e4   : > { %v9268_v37 = vpop.f32.mrb[41].mxu1 }
 0x3e5   : > { %v9269_v7 = vadd.f32 %v9268_v37, %v9267_v30  ;;  %v9270_v26 = vpop.f32.mrb[42].mxu1 }
 0x3e6   : > { %v9271_v4 = vpop.f32.mrb[43].mxu1  ;;  %v9209_v47 = vpop.f32.mrb[44].mxu0 }
 0x3e7   : > { %v9272_v35 = vadd.f32 %v9271_v4, %v9270_v26  ;;  %v13774_v60 = vadd.f32 %v9269_v7, %v6252_v13  ;;  %v9210_v43 = vpop.f32.mrb[45].mxu0 }
 0x3e8   : > { %v9211_v19 = vadd.f32 %v9210_v43, %v9209_v47  ;;  %v9212_v8 = vpop.f32.mrb[46].mxu0 }
 0x3e9   : > { %v13777_v23 = vadd.f32 %v9272_v35, %v6255_v18  ;;  %v9213_v57 = vpop.f32.mrb[47].mxu0 }
 0x3ea   : > { %v9214_v49 = vadd.f32 %v9213_v57, %v9212_v8 }
 0x3ec   : > { %v6263_v39 = vadd.f32 %v9214_v49, %v13537_v42 }
 0x3ee   : > { %v9485_v22 = vpop.f32.mrb[48].mxu0 }
 0x3ef   : > { %v6406_v10 = vadd.f32 %v9485_v22, %v13622_v31  ;;  %v6397_v20 = vpop.f32.mrb[49].mxu0 }
 0x3f0   : > { %v6398_v3 = vadd.f32 %v6397_v20, %v13547_v21  ;;  %v9486_v5 = vpop.f32.mrb[50].mxu0 }
 0x3f1   : > { %6462 = vst [vmem:[%s13783_s16 + $0x10] sm:$0xff] %v6406_v10  ;;  %v6409_v51 = vadd.f32 %v9486_v5, %v13636_v48  ;;  %v6400_v27 = vpop.f32.mrb[51].mxu0 }
 0x3f2   : > { %6460 = vst [vmem:[%s13783_s16] sm:$0xff] %v6398_v3  ;;  %v6401_v31 = vadd.f32 %v6400_v27, %v13549_v63 }
 0x3f3   : > { %6463 = vst [vmem:[%s13783_s16 + $0x18] sm:$0xff] %v6409_v51 }
 0x3f4   : > { %6461 = vst [vmem:[%s13783_s16 + $0x8] sm:$0xff] %v6401_v31 }
 0x3f9   : > { %v9489_v21 = vpop.f32.mrb[52].mxu0 }
 0x3fa   : > { %v6422_v44 = vadd.f32 %v9489_v21, %v13734_v9  ;;  %v6413_v1 = vpop.f32.mrb[53].mxu0 }
 0x3fb   : > { %v6414_v24 = vadd.f32 %v6413_v1, %v13665_v11  ;;  %v9490_v50 = vpop.f32.mrb[54].mxu0 }
 0x3fc   : > { %6466 = vst [vmem:[%s13783_s16 + $0x30] sm:$0xff] %v6422_v44  ;;  %v6425_v29 = vadd.f32 %v9490_v50, %v13741_v62  ;;  %v6416_v48 = vpop.f32.mrb[55].mxu0  ;;  %v6260_v62 = vadd.f32 %v9211_v19, %v13537_v42 }
 0x3fd   : > { %6464 = vst [vmem:[%s13783_s16 + $0x20] sm:$0xff] %v6414_v24  ;;  %v6417_v28 = vadd.f32 %v6416_v48, %v13674_v14 }
 0x3fe   : > { %6467 = vst [vmem:[%s13783_s16 + $0x38] sm:$0xff] %v6425_v29 }
 0x3ff   : > { %6465 = vst [vmem:[%s13783_s16 + $0x28] sm:$0xff] %v6417_v28 }
 0x403   : > { %v9493_v63 = vpop.f32.mrb[56].mxu0 }
 0x404   : > { %v9273_v36 = vpop.f32.mrb[44].mxu1  ;;  %v6438_v55 = vadd.f32 %v9493_v63, %v6341_v12  ;;  %v6429_v9 = vpop.f32.mrb[57].mxu0 }
 0x405   : > { %v9274_v46 = vpop.f32.mrb[45].mxu1  ;;  %v6430_v11 = vadd.f32 %v6429_v9, %v13766_v45  ;;  %v9494_v0 = vpop.f32.mrb[58].mxu0 }
 0x406   : > { %v9275_v58 = vadd.f32 %v9274_v46, %v9273_v36  ;;  %v9276_v59 = vpop.f32.mrb[46].mxu1  ;;  %6470 = vst [vmem:[%s13783_s16 + $0x50] sm:$0xff] %v6438_v55  ;;  %v6441_v16 = vadd.f32 %v9494_v0, %v6344_v25  ;;  %v6432_v14 = vpop.f32.mrb[59].mxu0 }
 0x407   : > { %v9277_v15 = vpop.f32.mrb[47].mxu1  ;;  %6468 = vst [vmem:[%s13783_s16 + $0x40] sm:$0xff] %v6430_v11  ;;  %v6433_v40 = vadd.f32 %v6432_v14, %v13768_v32 }
 0x408   : > { %v9278_v2 = vadd.f32 %v9277_v15, %v9276_v59  ;;  %6471 = vst [vmem:[%s13783_s16 + $0x58] sm:$0xff] %v6441_v16  ;;  %v6357_v17 = vadd.f32 %v9275_v58, %v6260_v62 }
 0x409   : > { %6469 = vst [vmem:[%s13783_s16 + $0x48] sm:$0xff] %v6433_v40 }
 0x40a   : > { %v6360_v45 = vadd.f32 %v9278_v2, %v6263_v39 }
 0x40c   : > { %v9307_v56 = vpop.f32.mrb[48].mxu1  ;;  %v9497_v52 = vpop.f32.mrb[60].mxu0 }
 0x40d   : > { %v9308_v38 = vpop.f32.mrb[49].mxu1  ;;  %v6454_v41 = vadd.f32 %v9497_v52, %v6357_v17  ;;  %v6445_v33 = vpop.f32.mrb[61].mxu0 }
 0x40e   : > { %v9309_v12 = vadd.f32 %v9308_v38, %v9307_v56  ;;  %v9310_v54 = vpop.f32.mrb[50].mxu1  ;;  %v6446_v32 = vadd.f32 %v6445_v33, %v13774_v60  ;;  %v9498_v34 = vpop.f32.mrb[62].mxu0 }
 0x40f   : > { %v9311_v61 = vpop.f32.mrb[51].mxu1  ;;  %6474 = vst [vmem:[%s13783_s16 + $0x70] sm:$0xff] %v6454_v41  ;;  %v6457_v25 = vadd.f32 %v9498_v34, %v6360_v45  ;;  %v6448_v53 = vpop.f32.mrb[63].mxu0 }
 0x410   : > { %v9312_v6 = vadd.f32 %v9311_v61, %v9310_v54  ;;  %6472 = vst [vmem:[%s13783_s16 + $0x60] sm:$0xff] %v6446_v32  ;;  %v6449_v30 = vadd.f32 %v6448_v53, %v13777_v23  ;;  %v8178_v60 = vadd.f32 %v9309_v12, %v13537_v42 }
 0x411   : > { %6475 = vst [vmem:[%s13783_s16 + $0x78] sm:$0xff] %v6457_v25 }
 0x412   : > { %6473 = vst [vmem:[%s13783_s16 + $0x68] sm:$0xff] %v6449_v30  ;;  %v8181_v49 = vadd.f32 %v9312_v6, %v13537_v42 }
 0x414   : > { %v9313_v37 = vpop.f32.mrb[52].mxu1 }
 0x415   : > { %v9314_v13 = vpop.f32.mrb[53].mxu1 }
 0x416   : > { %v9315_v7 = vadd.f32 %v9314_v13, %v9313_v37  ;;  %v9316_v26 = vpop.f32.mrb[54].mxu1 }
 0x417   : > { %v9317_v4 = vpop.f32.mrb[55].mxu1 }
 0x418   : > { %v9318_v18 = vadd.f32 %v9317_v4, %v9316_v26  ;;  %v9371_v35 = vpop.f32.mrb[64].mxu0  ;;  %v8186_v11 = vadd.f32 %v9315_v7, %v13537_v42 }
 0x419   : > { %v9372_v47 = vpop.f32.mrb[65].mxu0 }
 0x41a   : > { %v9373_v43 = vadd.f32 %v9372_v47, %v9371_v35  ;;  %v9374_v19 = vpop.f32.mrb[66].mxu0  ;;  %v8189_v59 = vadd.f32 %v9318_v18, %v13537_v42 }
 0x41b   : > { %v9375_v57 = vpop.f32.mrb[67].mxu0 }
 0x41c   : > { %v9319_v8 = vpop.f32.mrb[56].mxu1  ;;  %v9376_v23 = vadd.f32 %v9375_v57, %v9374_v19  ;;  %v13815_v10 = vadd.f32 %v9373_v43, %v8178_v60 }
 0x41d   : > { %v9320_v22 = vpop.f32.mrb[57].mxu1 }
 0x41e   : > { %v9321_v20 = vadd.f32 %v9320_v22, %v9319_v8  ;;  %v9322_v3 = vpop.f32.mrb[58].mxu1  ;;  %v13817_v51 = vadd.f32 %v9376_v23, %v8181_v49 }
 0x41f   : > { %v9323_v5 = vpop.f32.mrb[59].mxu1 }
 0x420   : > { %v9324_v27 = vadd.f32 %v9323_v5, %v9322_v3  ;;  %v8194_v41 = vadd.f32 %v9321_v20, %v13537_v42 }
 0x422   : > { %v8197_v32 = vadd.f32 %v9324_v27, %v13537_v42 }
 0x424   : > { %v9325_v31 = vpop.f32.mrb[60].mxu1 }
 0x425   : > { %v9326_v21 = vpop.f32.mrb[61].mxu1 }
 0x426   : > { %v9327_v44 = vadd.f32 %v9326_v21, %v9325_v31  ;;  %v9328_v1 = vpop.f32.mrb[62].mxu1 }
 0x427   : > { %v9329_v24 = vpop.f32.mrb[63].mxu1 }
 0x428   : > { %v9330_v50 = vadd.f32 %v9329_v24, %v9328_v1  ;;  %v8202_v18 = vadd.f32 %v9327_v44, %v13537_v42 }
 0x42a   : > { %v8205_v43 = vadd.f32 %v9330_v50, %v13537_v42 }
 0x42c   : > { %v9331_v29 = vpop.f32.mrb[64].mxu1 }
 0x42d   : > { %v9332_v48 = vpop.f32.mrb[65].mxu1 }
 0x42e   : > { %v9333_v28 = vadd.f32 %v9332_v48, %v9331_v29  ;;  %v9334_v63 = vpop.f32.mrb[66].mxu1 }
 0x42f   : > { %v9335_v36 = vpop.f32.mrb[67].mxu1 }
 0x430   : > { %v9336_v55 = vadd.f32 %v9335_v36, %v9334_v63  ;;  %v9377_v9 = vpop.f32.mrb[68].mxu0  ;;  %v8210_v21 = vadd.f32 %v9333_v28, %v13537_v42 }
 0x431   : > { %v9378_v46 = vpop.f32.mrb[69].mxu0 }
 0x432   : > { %v9379_v0 = vadd.f32 %v9378_v46, %v9377_v9  ;;  %v9380_v62 = vpop.f32.mrb[70].mxu0  ;;  %v8213_v50 = vadd.f32 %v9336_v55, %v13537_v42 }
 0x433   : > { %v9381_v58 = vpop.f32.mrb[71].mxu0 }
 0x434   : > { %v9382_v16 = vadd.f32 %v9381_v58, %v9380_v62  ;;  %v8283_v14 = vadd.f32 %v9379_v0, %v8186_v11 }
 0x435   : > { %v9337_v15 = vpop.f32.mrb[68].mxu1 }
 0x436   : > { %v9338_v40 = vpop.f32.mrb[69].mxu1  ;;  %v8286_v39 = vadd.f32 %v9382_v16, %v8189_v59 }
 0x437   : > { %v9339_v2 = vadd.f32 %v9338_v40, %v9337_v15  ;;  %v9340_v17 = vpop.f32.mrb[70].mxu1 }
 0x438   : > { %v9341_v45 = vpop.f32.mrb[71].mxu1 }
 0x439   : > { %v9342_v56 = vadd.f32 %v9341_v45, %v9340_v17  ;;  %v9383_v52 = vpop.f32.mrb[72].mxu0  ;;  %v8218_v55 = vadd.f32 %v9339_v2, %v13537_v42 }
 0x43a   : > { %v9384_v38 = vpop.f32.mrb[73].mxu0 }
 0x43b   : > { %v9385_v33 = vadd.f32 %v9384_v38, %v9383_v52  ;;  %v9386_v12 = vpop.f32.mrb[74].mxu0 }
 0x43c   : > { %v9387_v54 = vpop.f32.mrb[75].mxu0 }
 0x43d   : > { %v9388_v34 = vadd.f32 %v9387_v54, %v9386_v12  ;;  %v8291_v61 = vadd.f32 %v9385_v33, %v8194_v41 }
 0x43f   : > { %v13823_v25 = vadd.f32 %v9388_v34, %v8197_v32 }
 0x458   : > { %v9343_v53 = vpop.f32.mrb[72].mxu1 }
 0x459   : > { %v9344_v6 = vpop.f32.mrb[73].mxu1 }
 0x45a   : > { %v13825_v30 = vadd.f32 %v9344_v6, %v9343_v53  ;;  %v9346_v37 = vpop.f32.mrb[74].mxu1 }
 0x45b   : > { %v9347_v13 = vpop.f32.mrb[75].mxu1 }
 0x45c   : > { %v13827_v7 = vadd.f32 %v9347_v13, %v9346_v37  ;;  %v9389_v26 = vpop.f32.mrb[76].mxu0 }
 0x45d   : > { %v9390_v4 = vpop.f32.mrb[77].mxu0 }
 0x45e   : > { %v9391_v35 = vadd.f32 %v9390_v4, %v9389_v26  ;;  %v9392_v47 = vpop.f32.mrb[78].mxu0 }
 0x45f   : > { %v9393_v60 = vpop.f32.mrb[79].mxu0 }
 0x460   : > { %v9394_v19 = vadd.f32 %v9393_v60, %v9392_v47  ;;  %v8299_v8 = vadd.f32 %v9391_v35, %v8202_v18 }
 0x462   : > { %v9349_v57 = vpop.f32.mrb[76].mxu1  ;;  %v8302_v22 = vadd.f32 %v9394_v19, %v8205_v43 }
 0x463   : > { %v9350_v49 = vpop.f32.mrb[77].mxu1 }
 0x464   : > { %v13831_v23 = vadd.f32 %v9350_v49, %v9349_v57  ;;  %v9352_v20 = vpop.f32.mrb[78].mxu1 }
 0x465   : > { %v9353_v3 = vpop.f32.mrb[79].mxu1 }
 0x466   : > { %v13833_v5 = vadd.f32 %v9353_v3, %v9352_v20  ;;  %v9395_v27 = vpop.f32.mrb[80].mxu0 }
 0x467   : > { %v9396_v31 = vpop.f32.mrb[81].mxu0 }
 0x468   : > { %v9397_v44 = vadd.f32 %v9396_v31, %v9395_v27  ;;  %v9398_v1 = vpop.f32.mrb[82].mxu0 }
 0x469   : > { %v9399_v24 = vpop.f32.mrb[83].mxu0 }
 0x46a   : > { %v9400_v29 = vadd.f32 %v9399_v24, %v9398_v1  ;;  %v9509_v48 = vpop.f32.mrb[80].mxu1  ;;  %v8307_v63 = vadd.f32 %v9397_v44, %v8210_v21 }
 0x46b   : > { %v8380_v36 = vadd.f32 %v9509_v48, %v8283_v14  ;;  %v8371_v9 = vpop.f32.mrb[81].mxu1 }
 0x46c   : > { %v8372_v46 = vadd.f32 %v8371_v9, %v13815_v10  ;;  %v9510_v11 = vpop.f32.mrb[82].mxu1  ;;  %v8310_v0 = vadd.f32 %v9400_v29, %v8213_v50  ;;  %v9838_v10 = vld [vmem:[%s13921_s4] ss:$0 sm:$0xff] }
 0x46d   : > { %9076 = vst [vmem:[%s13783_s16 + $0x90] sm:$0xff] %v8380_v36  ;;  %v8383_v62 = vadd.f32 %v9510_v11, %v8286_v39  ;;  %v8374_v28 = vpop.f32.mrb[83].mxu1  ;;  %v8221_v39 = vadd.f32 %v9838_v10, %v9342_v56  ;;  %v8226_v56 = vadd.f32 %v9838_v10, %v13825_v30  ;;  %v8229_v37 = vadd.f32 %v9838_v10, %v13827_v7 }
 0x46e   : > { %9074 = vst [vmem:[%s13783_s16 + $0x80] sm:$0xff] %v8372_v46  ;;  %v8375_v58 = vadd.f32 %v8374_v28, %v13817_v51  ;;  %v9401_v59 = vpop.f32.mrb[84].mxu0  ;;  %v8237_v1 = vadd.f32 %v9838_v10, %v13833_v5 }
 0x46f   : > { %9077 = vst [vmem:[%s13783_s16 + $0x98] sm:$0xff] %v8383_v62  ;;  %v9402_v16 = vpop.f32.mrb[85].mxu0 }
 0x470   : > { %9075 = vst [vmem:[%s13783_s16 + $0x88] sm:$0xff] %v8375_v58  ;;  %v9403_v15 = vadd.f32 %v9402_v16, %v9401_v59  ;;  %v9404_v14 = vpop.f32.mrb[86].mxu0 }
 0x471   : > { %v9405_v40 = vpop.f32.mrb[87].mxu0 }
 0x472   : > { %v9406_v17 = vadd.f32 %v9405_v40, %v9404_v14  ;;  %v9513_v45 = vpop.f32.mrb[84].mxu1  ;;  %v8315_v51 = vadd.f32 %v9403_v15, %v8218_v55 }
 0x473   : > { %v8396_v52 = vadd.f32 %v9513_v45, %v8299_v8  ;;  %v8387_v38 = vpop.f32.mrb[85].mxu1 }
 0x474   : > { %v8388_v41 = vadd.f32 %v8387_v38, %v8291_v61  ;;  %v9514_v33 = vpop.f32.mrb[86].mxu1  ;;  %v8318_v42 = vadd.f32 %v9406_v17, %v8221_v39 }
 0x475   : > { %9080 = vst [vmem:[%s13783_s16 + $0xb0] sm:$0xff] %v8396_v52  ;;  %v8399_v2 = vadd.f32 %v9514_v33, %v8302_v22  ;;  %v8390_v12 = vpop.f32.mrb[87].mxu1  ;;  %v8234_v22 = vadd.f32 %v9838_v10, %v13831_v23 }
 0x476   : > { %9078 = vst [vmem:[%s13783_s16 + $0xa0] sm:$0xff] %v8388_v41  ;;  %v8391_v54 = vadd.f32 %v8390_v12, %v13823_v25  ;;  %v9407_v32 = vpop.f32.mrb[88].mxu0 }
 0x477   : > { %9081 = vst [vmem:[%s13783_s16 + $0xb8] sm:$0xff] %v8399_v2  ;;  %v9408_v34 = vpop.f32.mrb[89].mxu0 }
 0x478   : > { %9079 = vst [vmem:[%s13783_s16 + $0xa8] sm:$0xff] %v8391_v54  ;;  %v9409_v53 = vadd.f32 %v9408_v34, %v9407_v32  ;;  %v9410_v6 = vpop.f32.mrb[90].mxu0 }
 0x479   : > { %v9411_v61 = vpop.f32.mrb[91].mxu0 }
 0x47a   : > { %v9412_v13 = vadd.f32 %v9411_v61, %v9410_v6  ;;  %v9517_v26 = vpop.f32.mrb[88].mxu1  ;;  %v8323_v4 = vadd.f32 %v9409_v53, %v8226_v56 }
 0x47b   : > { %v8412_v18 = vadd.f32 %v9517_v26, %v8315_v51  ;;  %v8403_v25 = vpop.f32.mrb[89].mxu1 }
 0x47c   : > { %v8404_v35 = vadd.f32 %v8403_v25, %v8307_v63  ;;  %v9518_v47 = vpop.f32.mrb[90].mxu1  ;;  %v8326_v60 = vadd.f32 %v9412_v13, %v8229_v37 }
 0x47d   : > { %9084 = vst [vmem:[%s13783_s16 + $0xd0] sm:$0xff] %v8412_v18  ;;  %v8415_v43 = vadd.f32 %v9518_v47, %v8318_v42  ;;  %v8406_v30 = vpop.f32.mrb[91].mxu1 }
 0x47e   : > { %9082 = vst [vmem:[%s13783_s16 + $0xc0] sm:$0xff] %v8404_v35  ;;  %v8407_v19 = vadd.f32 %v8406_v30, %v8310_v0 }
 0x47f   : > { %9085 = vst [vmem:[%s13783_s16 + $0xd8] sm:$0xff] %v8415_v43 }
 0x480   : > { %9083 = vst [vmem:[%s13783_s16 + $0xc8] sm:$0xff] %v8407_v19 }
 0x482   : > { %v9413_v8 = vpop.f32.mrb[92].mxu0  ;;  %v9521_v57 = vpop.f32.mrb[92].mxu1 }
 0x483   : > { %v9414_v7 = vpop.f32.mrb[93].mxu0  ;;  %v8419_v49 = vpop.f32.mrb[93].mxu1 }
 0x484   : > { %v9415_v20 = vadd.f32 %v9414_v7, %v9413_v8  ;;  %v9416_v3 = vpop.f32.mrb[94].mxu0  ;;  %v8420_v27 = vadd.f32 %v8419_v49, %v8323_v4  ;;  %v9522_v31 = vpop.f32.mrb[94].mxu1 }
 0x485   : > { %v9417_v21 = vpop.f32.mrb[95].mxu0  ;;  %v8422_v44 = vpop.f32.mrb[95].mxu1 }
 0x486   : > { %v9418_v24 = vadd.f32 %v9417_v21, %v9416_v3  ;;  %v8331_v50 = vadd.f32 %v9415_v20, %v8234_v22  ;;  %9086 = vst [vmem:[%s13783_s16 + $0xe0] sm:$0xff] %v8420_v27  ;;  %v8423_v29 = vadd.f32 %v8422_v44, %v8326_v60 }
 0x488   : > { %v8428_v23 = vadd.f32 %v9521_v57, %v8331_v50  ;;  %v8334_v48 = vadd.f32 %v9418_v24, %v8237_v1  ;;  %9087 = vst [vmem:[%s13783_s16 + $0xe8] sm:$0xff] %v8423_v29 }
 0x48a   : > { %9088 = vst [vmem:[%s13783_s16 + $0xf0] sm:$0xff] %v8428_v23  ;;  %v8431_v63 = vadd.f32 %v9522_v31, %v8334_v48 }
 0x48c   : > { %9089 = vst [vmem:[%s13783_s16 + $0xf8] sm:$0xff] %v8431_v63 }
 0x48d   : > { %9852 = shalt.err (!%p9849_p3)
}
 0x48e   : > { %s9853_s13 = scalar_lea.hbm %s13867_s12, 4096  ;;  %s9857_s16 = scalar_lea.hbm %s13922_s5, 8192 }
 0x48f   : > { %p9854_p4 = scmp.ne.s32.totalorder %s13867_s12, %s9853_s13  ;;  %p9858_p9 = scmp.lt.u32.totalorder %s13867_s12, %s13922_s5 }
 0x490   : > { %p9859_p10 = scmp.lt.u32.totalorder %s9857_s16, %s9853_s13  ;;  %p9861_p12 = scmp.lt.u32.totalorder %s9853_s13, %s13867_s12 }
 0x491   : > { %p9855_p7 = pnand %p9854_p4, %p9983_p5 }
 0x492   : > { %p9860_p11 = por %p9859_p10, %p9858_p9 }
 0x493   : > { %p9856_p8 = pneg %p9855_p7 }
 0x494   : > { %p9862_p13 = por %p9861_p12, %p9860_p11 }
 0x496   : > { %p9863_p0 = pnand %p9862_p13, %p9856_p8 }
 0x498   : > { %9866 = shalt.err (!%p9863_p0)
}
 0x499   : > { %s9914_s8 = smov 128  }
 0x49a   : > { %9525 = dma.vmem_to_hbm [thread:$0]  (%p9983_p5), %s13870_s23, 4096, %s13867_s12, %s13875_s30, %s9914_s8, %s9914_s8, %s9904_s10  }
 0x49b PF: > { %p9531_p1 = scmp.ge.s32.totalorder %s9901_s21, 2  ;;  %s8480_s25 = sand.u32 1, %s9889_s18  }
 0x49c   : > { %s8481_s26 = scalar_lea.sflag [#allocation5], %s8480_s25 }
 0x49d   : > { %p9528_p2 = pnand %p9531_p1, %p9987_p6 }
 0x49f   : > { %9884 = dma.done.wait (!%p9528_p2), %s8481_s26, 4096  }
 0x4a0   : > { %9886 = vsyncadd (!%p9528_p2), %s8481_s26, 4294963200  ;;  %p15_p3 = scmp.ge.s32.totalorder %s9970_s24, 4   ;;  %s14017_s18 = smov %s9893_s19 }
 0x4a1   : > { %s14018_s19 = smov %s9897_s20  ;;  %s14019_s20 = smov %s9981_s27 }
 0x4a2   : > { %s14020_s21 = smov %s9970_s24  ;;  %17 = sbr.rel (!%p15_p3) target bundleno = 3 (0x3), region = 89 }
 0x4a9   :  { %8486 = vsyncpa [#allocation5], 1 }
 0x4aa   :  { %8488 = vsyncpa [#allocation5 + $0x1], 1 }

</bundles_post_ra>
